<compile_context>
chip_gen: v5e
topology: v5e:2x2
jax: 0.10.0
libtpu: 0.0.40
codegen_flags: <defaults>
</compile_context>

<pallas_src>
import numpy as np
import jax
import jax.numpy as jnp
from jax import lax
from jax.experimental import pallas as pl
from jax.experimental.pallas import tpu as pltpu

EPS = 1e-5
NOUT_PAD = 128   # final Linear padded to a full lane group -> lane-dense store


def resnet_kernel(x_ref,
                  w_in_ref,
                  w1_t0_ref, w1_t1p_ref, w1_t2_ref,
                  w1_v0_ref, w1_v1_ref, w1_v2_ref,
                  w2_t0_ref, w2_t1p_ref, w2_t2_ref,
                  w2_v0_ref, w2_v1_ref, w2_v2_ref,
                  w_l1_ref, b_l1_ref, w_l2_ref, b_l2_ref,
                  o_ref):
    x = x_ref[...].astype(jnp.float32)                    # (Bt, L, S)
    bt, L, _ = x.shape
    M = bt * L

    def mm(a, w_ref):
        # (Bt, L, Cin) @ (Cin, Cout) -> (Bt, L, Cout) as ONE 2-D MXU matmul.
        # Leading-dim merge/split reshapes are layout no-ops because L % 8 == 0.
        w = w_ref[...]
        y = jnp.dot(a.reshape(M, a.shape[-1]).astype(w.dtype), w,
                    preferred_element_type=jnp.float32)
        return y.reshape(bt, L, w.shape[1])

    def shift_down(a):
        # out[:, l] = a[:, l-1] (zero at l == 0): pure sublane shift.
        z = jnp.zeros((bt, 1, a.shape[-1]), jnp.float32)
        return jnp.concatenate([z, a[:, :L - 1, :]], axis=1)

    def shift_up(a):
        # out[:, l] = a[:, l+1] (zero at l == L-1).
        z = jnp.zeros((bt, 1, a.shape[-1]), jnp.float32)
        return jnp.concatenate([a[:, 1:, :], z], axis=1)

    def bn(h):
        # BatchNorm1d, training mode, gamma=1 / beta=0, per-sequence stats over L.
        mu = jnp.mean(h, axis=1, keepdims=True)
        c = h - mu                                   # centered, reused twice
        var = jnp.mean(c * c, axis=1, keepdims=True)
        return c * lax.rsqrt(var + EPS)

    relu = lambda h: jnp.maximum(h, 0.0)

    def block(h, t0_ref, t1p_ref, t2_ref, v0_ref, v1_ref, v2_ref, c_out):
        # Conv1 (K=3, 'same') as three per-tap matmuls on sublane-shifted
        # inputs (no lane-axis concat).  The 1x1 residual projection is merged
        # into the centre-tap weight (extra N columns).
        wide = mm(h, t1p_ref)                             # (Bt, L, 2*c_out)
        y = wide[:, :, :c_out] \
            + mm(shift_down(h), t0_ref) + mm(shift_up(h), t2_ref)
        proj = wide[:, :, c_out:]
        z = relu(bn(y))
        # Conv2 (K=3, 'same'), same per-tap structure.
        z = mm(z, v1_ref) + mm(shift_down(z), v0_ref) + mm(shift_up(z), v2_ref)
        z = bn(z)
        return relu(z + proj)

    # input_net: Conv1d(k=1) -> BN -> ReLU
    h = relu(bn(mm(x, w_in_ref)))                         # (Bt, L, 16)

    # ResNetBlock 1: 16 -> 32
    h = block(h, w1_t0_ref, w1_t1p_ref, w1_t2_ref,
              w1_v0_ref, w1_v1_ref, w1_v2_ref, w1_t0_ref.shape[1])

    # ResNetBlock 2: 32 -> 64
    h = block(h, w2_t0_ref, w2_t1p_ref, w2_t2_ref,
              w2_v0_ref, w2_v1_ref, w2_v2_ref, w2_t0_ref.shape[1])

    # output_net: Linear(64,64) -> ReLU -> Linear(64, NOUT_PAD)  (lane-dense store)
    h = relu(mm(h, w_l1_ref) + b_l1_ref[...])
    o_ref[...] = mm(h, w_l2_ref) + b_l2_ref[...]


def _pack_weights(params, mm_dtype):
    """Host-side packing (done once): per-tap 2-D conv weights, residual proj
    merged into the centre tap, final Linear padded to 128 output columns."""
    cw = lambda w: w.astype(mm_dtype)

    def block_weights(c1, c2, proj):
        t1p = jnp.concatenate([c1[1], proj], axis=1)      # (Cin, 2*Cout)
        return [cw(c1[0]), cw(t1p), cw(c1[2]), cw(c2[0]), cw(c2[1]), cw(c2[2])]

    nman = params['w_l2'].shape[1]
    w_l2 = jnp.pad(params['w_l2'], ((0, 0), (0, NOUT_PAD - nman)))
    b_l2 = jnp.pad(params['b_l2'], ((0, 0), (0, NOUT_PAD - nman)))
    weights = ([cw(params['w_in'])]
               + block_weights(params['w1_c1'], params['w1_c2'], params['w1_proj'])
               + block_weights(params['w2_c1'], params['w2_c2'], params['w2_proj'])
               + [cw(params['w_l1']), params['b_l1'].astype(jnp.float32),
                  cw(w_l2), b_l2.astype(jnp.float32)])
    assert all(w.ndim == 2 for w in weights)   # constant (0, 0) index_map relies on 2-D
    return weights


def resnet_forward(x, params, *, b_tile=None, use_bf16=False):
    """x: (B, L, state_dim) batch of independent sequences -> (B, L, num_maneuvers).

    use_bf16: cast matmul operands to bf16 (BN / elementwise stays f32).
    Recommended on v6e/v7x (native bf16 MXU); keep False on v5e and loosen the
    comparison tolerance if enabled.
    """
    B, L, S = x.shape
    nman = params['w_l2'].shape[1]
    # TODO(synk): support L % 8 != 0 (needs padding + in-kernel masked BN stats).
    assert L % 8 == 0, "L must be a multiple of 8 (sublane-aligned reshapes)"

    mm_dtype = jnp.bfloat16 if use_bf16 else jnp.float32
    weights = _pack_weights(params, mm_dtype)

    # Batch tiling: target >= ~1024 rows (Bt*L) per grid step so the matmul M
    # dimension fills the MXU and the ~0.35us per-step overhead is amortized.
    if b_tile is None:
        b_tile = max(1, 1024 // max(L, 1))
        b_tile = min(b_tile, max(1, B))
    n_tiles = pl.cdiv(B, b_tile)
    if n_tiles > 1 and n_tiles % 2 == 1:
        n_tiles += 1             # even grid: keep both v7x TensorCores busy
    bp = n_tiles * b_tile
    if bp != B:                  # padded rows give finite values, sliced off below
        x = jnp.pad(x, ((0, bp - B), (0, 0), (0, 0)))

    x_spec = pl.BlockSpec((b_tile, L, S), lambda b: (b, 0, 0))
    # Constant index_map -> weights stay resident in VMEM across grid steps.
    w_specs = [pl.BlockSpec(w.shape, lambda b: (0, 0)) for w in weights]
    out_spec = pl.BlockSpec((b_tile, L, NOUT_PAD), lambda b: (b, 0, 0))

    out = pl.pallas_call(
        resnet_kernel,
        out_shape=jax.ShapeDtypeStruct((bp, L, NOUT_PAD), jnp.float32),
        grid=(n_tiles,),
        in_specs=[x_spec] + w_specs,
        out_specs=out_spec,
        compiler_params=pltpu.CompilerParams(
            dimension_semantics=("parallel",),       # shard batch tiles over TCs (v7x)
            vmem_limit_bytes=32 * 1024 * 1024),      # covers v5e's 16 MiB default
    )(x, *weights)
    return out[:B, :, :nman]


def init_params(key):
    """Deterministic PyTorch-default-style (kaiming-uniform-ish) init."""
    ks = jax.random.split(key, 11)

    def conv_w(k, c_out, c_in, ksize):
        bound = 1.0 / float(c_in * ksize) ** 0.5
        w = jax.random.uniform(k, (c_out, c_in, ksize), jnp.float32, -bound, bound)
        return jnp.transpose(w, (2, 1, 0))          # (K, Cin, Cout)

    def linear(kw, kb, fan_in, fan_out):
        bound = 1.0 / float(fan_in) ** 0.5
        w = jax.random.uniform(kw, (fan_out, fan_in), jnp.float32, -bound, bound)
        b = jax.random.uniform(kb, (fan_out,), jnp.float32, -bound, bound)
        return jnp.transpose(w), b.reshape(1, -1)   # (in, out), (1, out)

    w_l1, b_l1 = linear(ks[7], ks[8], 64, 64)
    w_l2, b_l2 = linear(ks[9], ks[10], 64, 5)
    return dict(
        w_in=conv_w(ks[0], 16, 10, 1)[0],           # (10, 16)
        w1_proj=conv_w(ks[1], 32, 16, 1)[0],        # (16, 32)
        w1_c1=conv_w(ks[2], 32, 16, 3),             # (3, 16, 32)
        w1_c2=conv_w(ks[3], 32, 32, 3),             # (3, 32, 32)
        w2_proj=conv_w(ks[4], 64, 32, 1)[0],        # (32, 64)
        w2_c1=conv_w(ks[5], 64, 32, 3),             # (3, 32, 64)
        w2_c2=conv_w(ks[6], 64, 64, 3),             # (3, 64, 64)
        w_l1=w_l1, b_l1=b_l1, w_l2=w_l2, b_l2=b_l2,
    )


def ref_forward(x, p):
    """Pure-JAX reference with identical per-sequence semantics, vmapped over batch."""
    def conv_same(h, w):
        K = w.shape[0]
        half = K // 2
        L = h.shape[0]
        hp = jnp.pad(h, ((half, half), (0, 0)))
        return sum(hp[t:t + L] @ w[t] for t in range(K))

    def bn(h):
        mu = h.mean(0, keepdims=True)
        var = ((h - mu) ** 2).mean(0, keepdims=True)
        return (h - mu) / jnp.sqrt(var + EPS)

    relu = lambda h: jnp.maximum(h, 0.0)

    def single(xs):
        h = relu(bn(xs @ p['w_in']))
        for proj, c1, c2 in (('w1_proj', 'w1_c1', 'w1_c2'),
                             ('w2_proj', 'w2_c1', 'w2_c2')):
            z = relu(bn(conv_same(h, p[c1])))
            z = bn(conv_same(z, p[c2]))
            h = relu(z + h @ p[proj])
        h = relu(h @ p['w_l1'] + p['b_l1'])
        return h @ p['w_l2'] + p['b_l2']

    return jax.vmap(single)(x)


if __name__ == "__main__":
    key = jax.random.PRNGKey(0)
    kx, kp = jax.random.split(key)
    B, L, state_dim = 64, 16, 10       # batch of sequences, each (L, state_dim=10)
    x = jax.random.normal(kx, (B, L, state_dim), jnp.float32)
    params = init_params(kp)

    # b_tile=16 -> grid of 4 even batch tiles, M = Bt*L = 256 rows per step.
    out = resnet_forward(x, params, b_tile=16, use_bf16=False)
    out = jax.block_until_ready(out)

    ref = ref_forward(x, params)
    assert out.shape == (B, L, 5)
    np.testing.assert_allclose(np.asarray(out), np.asarray(ref),
                               rtol=1e-4, atol=1e-4)
    print("KERNEL_OK")
</pallas_src>

<mosaic_0001>
module attributes {stable_mosaic.version = 11 : i64} {
  func.func @resnet_kernel(%arg0: i32, %arg1: memref<16x16x10xf32, #tpu.memory_space<vmem>>, %arg2: memref<10x16xf32, #tpu.memory_space<vmem>>, %arg3: memref<16x32xf32, #tpu.memory_space<vmem>>, %arg4: memref<16x64xf32, #tpu.memory_space<vmem>>, %arg5: memref<16x32xf32, #tpu.memory_space<vmem>>, %arg6: memref<32x32xf32, #tpu.memory_space<vmem>>, %arg7: memref<32x32xf32, #tpu.memory_space<vmem>>, %arg8: memref<32x32xf32, #tpu.memory_space<vmem>>, %arg9: memref<32x64xf32, #tpu.memory_space<vmem>>, %arg10: memref<32x128xf32, #tpu.memory_space<vmem>>, %arg11: memref<32x64xf32, #tpu.memory_space<vmem>>, %arg12: memref<64x64xf32, #tpu.memory_space<vmem>>, %arg13: memref<64x64xf32, #tpu.memory_space<vmem>>, %arg14: memref<64x64xf32, #tpu.memory_space<vmem>>, %arg15: memref<64x64xf32, #tpu.memory_space<vmem>>, %arg16: memref<1x64xf32, #tpu.memory_space<vmem>>, %arg17: memref<64x128xf32, #tpu.memory_space<vmem>>, %arg18: memref<1x128xf32, #tpu.memory_space<vmem>>, %arg19: memref<16x16x128xf32, #tpu.memory_space<vmem>>) attributes {dimension_semantics = [#tpu.dimension_semantics<parallel>], iteration_bounds = array<i64: 4>, scalar_prefetch = 0 : i64, scratch_operands = 0 : i64, tpu.core_type = #tpu.core_type<tc>, window_params = [{transform_indices = @transform_0, window_bounds = array<i64: 16, 16, 10>}, {pipeline_mode = #tpu.pipeline_mode<synchronous>, transform_indices = @transform_1, window_bounds = array<i64: 10, 16>}, {pipeline_mode = #tpu.pipeline_mode<synchronous>, transform_indices = @transform_2, window_bounds = array<i64: 16, 32>}, {pipeline_mode = #tpu.pipeline_mode<synchronous>, transform_indices = @transform_3, window_bounds = array<i64: 16, 64>}, {pipeline_mode = #tpu.pipeline_mode<synchronous>, transform_indices = @transform_4, window_bounds = array<i64: 16, 32>}, {pipeline_mode = #tpu.pipeline_mode<synchronous>, transform_indices = @transform_5, window_bounds = array<i64: 32, 32>}, {pipeline_mode = #tpu.pipeline_mode<synchronous>, transform_indices = @transform_6, window_bounds = array<i64: 32, 32>}, {pipeline_mode = #tpu.pipeline_mode<synchronous>, transform_indices = @transform_7, window_bounds = array<i64: 32, 32>}, {pipeline_mode = #tpu.pipeline_mode<synchronous>, transform_indices = @transform_8, window_bounds = array<i64: 32, 64>}, {pipeline_mode = #tpu.pipeline_mode<synchronous>, transform_indices = @transform_9, window_bounds = array<i64: 32, 128>}, {pipeline_mode = #tpu.pipeline_mode<synchronous>, transform_indices = @transform_10, window_bounds = array<i64: 32, 64>}, {pipeline_mode = #tpu.pipeline_mode<synchronous>, transform_indices = @transform_11, window_bounds = array<i64: 64, 64>}, {pipeline_mode = #tpu.pipeline_mode<synchronous>, transform_indices = @transform_12, window_bounds = array<i64: 64, 64>}, {pipeline_mode = #tpu.pipeline_mode<synchronous>, transform_indices = @transform_13, window_bounds = array<i64: 64, 64>}, {pipeline_mode = #tpu.pipeline_mode<synchronous>, transform_indices = @transform_14, window_bounds = array<i64: 64, 64>}, {pipeline_mode = #tpu.pipeline_mode<synchronous>, transform_indices = @transform_15, window_bounds = array<i64: 1, 64>}, {pipeline_mode = #tpu.pipeline_mode<synchronous>, transform_indices = @transform_16, window_bounds = array<i64: 64, 128>}, {pipeline_mode = #tpu.pipeline_mode<synchronous>, transform_indices = @transform_17, window_bounds = array<i64: 1, 128>}, {transform_indices = @transform_18, window_bounds = array<i64: 16, 16, 128>}]} {
    %c0 = arith.constant 0 : index
    %c0_0 = arith.constant 0 : index
    %c0_1 = arith.constant 0 : index
    %0 = vector.load %arg1[%c0, %c0_0, %c0_1] : memref<16x16x10xf32, #tpu.memory_space<vmem>>, vector<16x16x10xf32>
    %c0_2 = arith.constant 0 : index
    %c0_3 = arith.constant 0 : index
    %1 = vector.load %arg2[%c0_2, %c0_3] : memref<10x16xf32, #tpu.memory_space<vmem>>, vector<10x16xf32>
    %2 = vector.shape_cast %0 : vector<16x16x10xf32> to vector<256x10xf32>
    %cst = arith.constant dense<0.000000e+00> : vector<256x16xf32>
    %3 = tpu.matmul %2, %1, %cst {dimension_numbers = #tpu.dot_dimension_numbers<[1], [0], [0], [1], [0, 0, 1, 1], [], []>} : vector<256x10xf32>, vector<10x16xf32>, vector<256x16xf32> -> vector<256x16xf32>
    %4 = vector.shape_cast %3 : vector<256x16xf32> to vector<16x16x16xf32>
    %cst_4 = arith.constant dense<0.000000e+00> : vector<16x16xf32>
    %5 = vector.multi_reduction <add>, %4, %cst_4 [1] : vector<16x16x16xf32> to vector<16x16xf32>
    %6 = vector.shape_cast %5 : vector<16x16xf32> to vector<16x1x16xf32>
    %cst_5 = arith.constant 1.600000e+01 : f32
    %7 = vector.broadcast %cst_5 : f32 to vector<16x1x16xf32>
    %8 = arith.divf %6, %7 : vector<16x1x16xf32>
    %9 = vector.broadcast %8 : vector<16x1x16xf32> to vector<16x16x16xf32>
    %10 = arith.subf %4, %9 : vector<16x16x16xf32>
    %11 = arith.mulf %10, %10 : vector<16x16x16xf32>
    %cst_6 = arith.constant dense<0.000000e+00> : vector<16x16xf32>
    %12 = vector.multi_reduction <add>, %11, %cst_6 [1] : vector<16x16x16xf32> to vector<16x16xf32>
    %13 = vector.shape_cast %12 : vector<16x16xf32> to vector<16x1x16xf32>
    %cst_7 = arith.constant 1.600000e+01 : f32
    %14 = vector.broadcast %cst_7 : f32 to vector<16x1x16xf32>
    %15 = arith.divf %13, %14 : vector<16x1x16xf32>
    %cst_8 = arith.constant 9.99999974E-6 : f32
    %16 = vector.broadcast %cst_8 : f32 to vector<16x1x16xf32>
    %17 = arith.addf %15, %16 : vector<16x1x16xf32>
    %18 = math.rsqrt %17 : vector<16x1x16xf32>
    %19 = vector.broadcast %18 : vector<16x1x16xf32> to vector<16x16x16xf32>
    %20 = arith.mulf %10, %19 : vector<16x16x16xf32>
    %cst_9 = arith.constant 0.000000e+00 : f32
    %21 = vector.broadcast %cst_9 : f32 to vector<16x16x16xf32>
    %22 = arith.maximumf %20, %21 : vector<16x16x16xf32>
    %c0_10 = arith.constant 0 : index
    %c0_11 = arith.constant 0 : index
    %23 = vector.load %arg4[%c0_10, %c0_11] : memref<16x64xf32, #tpu.memory_space<vmem>>, vector<16x64xf32>
    %24 = vector.shape_cast %22 : vector<16x16x16xf32> to vector<256x16xf32>
    %cst_12 = arith.constant dense<0.000000e+00> : vector<256x64xf32>
    %25 = tpu.matmul %24, %23, %cst_12 {dimension_numbers = #tpu.dot_dimension_numbers<[1], [0], [0], [1], [0, 0, 1, 1], [], []>} : vector<256x16xf32>, vector<16x64xf32>, vector<256x64xf32> -> vector<256x64xf32>
    %26 = vector.shape_cast %25 : vector<256x64xf32> to vector<16x16x64xf32>
    %27 = vector.extract_strided_slice %26 {offsets = [0, 0, 0], sizes = [16, 16, 32], strides = [1, 1, 1]} : vector<16x16x64xf32> to vector<16x16x32xf32>
    %cst_13 = arith.constant 0.000000e+00 : f32
    %28 = vector.broadcast %cst_13 : f32 to vector<16x1x16xf32>
    %29 = vector.extract_strided_slice %22 {offsets = [0, 0, 0], sizes = [16, 15, 16], strides = [1, 1, 1]} : vector<16x16x16xf32> to vector<16x15x16xf32>
    %30 = tpu.concatenate %28, %29 in 1 : vector<16x1x16xf32>, vector<16x15x16xf32> -> vector<16x16x16xf32>
    %c0_14 = arith.constant 0 : index
    %c0_15 = arith.constant 0 : index
    %31 = vector.load %arg3[%c0_14, %c0_15] : memref<16x32xf32, #tpu.memory_space<vmem>>, vector<16x32xf32>
    %32 = vector.shape_cast %30 : vector<16x16x16xf32> to vector<256x16xf32>
    %cst_16 = arith.constant dense<0.000000e+00> : vector<256x32xf32>
    %33 = tpu.matmul %32, %31, %cst_16 {dimension_numbers = #tpu.dot_dimension_numbers<[1], [0], [0], [1], [0, 0, 1, 1], [], []>} : vector<256x16xf32>, vector<16x32xf32>, vector<256x32xf32> -> vector<256x32xf32>
    %34 = vector.shape_cast %33 : vector<256x32xf32> to vector<16x16x32xf32>
    %35 = arith.addf %27, %34 : vector<16x16x32xf32>
    %cst_17 = arith.constant 0.000000e+00 : f32
    %36 = vector.broadcast %cst_17 : f32 to vector<16x1x16xf32>
    %37 = vector.extract_strided_slice %22 {offsets = [0, 1, 0], sizes = [16, 15, 16], strides = [1, 1, 1]} : vector<16x16x16xf32> to vector<16x15x16xf32>
    %38 = tpu.concatenate %37, %36 in 1 : vector<16x15x16xf32>, vector<16x1x16xf32> -> vector<16x16x16xf32>
    %c0_18 = arith.constant 0 : index
    %c0_19 = arith.constant 0 : index
    %39 = vector.load %arg5[%c0_18, %c0_19] : memref<16x32xf32, #tpu.memory_space<vmem>>, vector<16x32xf32>
    %40 = vector.shape_cast %38 : vector<16x16x16xf32> to vector<256x16xf32>
    %cst_20 = arith.constant dense<0.000000e+00> : vector<256x32xf32>
    %41 = tpu.matmul %40, %39, %cst_20 {dimension_numbers = #tpu.dot_dimension_numbers<[1], [0], [0], [1], [0, 0, 1, 1], [], []>} : vector<256x16xf32>, vector<16x32xf32>, vector<256x32xf32> -> vector<256x32xf32>
    %42 = vector.shape_cast %41 : vector<256x32xf32> to vector<16x16x32xf32>
    %43 = arith.addf %35, %42 : vector<16x16x32xf32>
    %44 = vector.extract_strided_slice %26 {offsets = [0, 0, 32], sizes = [16, 16, 32], strides = [1, 1, 1]} : vector<16x16x64xf32> to vector<16x16x32xf32>
    %cst_21 = arith.constant dense<0.000000e+00> : vector<16x32xf32>
    %45 = vector.multi_reduction <add>, %43, %cst_21 [1] : vector<16x16x32xf32> to vector<16x32xf32>
    %46 = vector.shape_cast %45 : vector<16x32xf32> to vector<16x1x32xf32>
    %cst_22 = arith.constant 1.600000e+01 : f32
    %47 = vector.broadcast %cst_22 : f32 to vector<16x1x32xf32>
    %48 = arith.divf %46, %47 : vector<16x1x32xf32>
    %49 = vector.broadcast %48 : vector<16x1x32xf32> to vector<16x16x32xf32>
    %50 = arith.subf %43, %49 : vector<16x16x32xf32>
    %51 = arith.mulf %50, %50 : vector<16x16x32xf32>
    %cst_23 = arith.constant dense<0.000000e+00> : vector<16x32xf32>
    %52 = vector.multi_reduction <add>, %51, %cst_23 [1] : vector<16x16x32xf32> to vector<16x32xf32>
    %53 = vector.shape_cast %52 : vector<16x32xf32> to vector<16x1x32xf32>
    %cst_24 = arith.constant 1.600000e+01 : f32
    %54 = vector.broadcast %cst_24 : f32 to vector<16x1x32xf32>
    %55 = arith.divf %53, %54 : vector<16x1x32xf32>
    %cst_25 = arith.constant 9.99999974E-6 : f32
    %56 = vector.broadcast %cst_25 : f32 to vector<16x1x32xf32>
    %57 = arith.addf %55, %56 : vector<16x1x32xf32>
    %58 = math.rsqrt %57 : vector<16x1x32xf32>
    %59 = vector.broadcast %58 : vector<16x1x32xf32> to vector<16x16x32xf32>
    %60 = arith.mulf %50, %59 : vector<16x16x32xf32>
    %cst_26 = arith.constant 0.000000e+00 : f32
    %61 = vector.broadcast %cst_26 : f32 to vector<16x16x32xf32>
    %62 = arith.maximumf %60, %61 : vector<16x16x32xf32>
    %c0_27 = arith.constant 0 : index
    %c0_28 = arith.constant 0 : index
    %63 = vector.load %arg7[%c0_27, %c0_28] : memref<32x32xf32, #tpu.memory_space<vmem>>, vector<32x32xf32>
    %64 = vector.shape_cast %62 : vector<16x16x32xf32> to vector<256x32xf32>
    %cst_29 = arith.constant dense<0.000000e+00> : vector<256x32xf32>
    %65 = tpu.matmul %64, %63, %cst_29 {dimension_numbers = #tpu.dot_dimension_numbers<[1], [0], [0], [1], [0, 0, 1, 1], [], []>} : vector<256x32xf32>, vector<32x32xf32>, vector<256x32xf32> -> vector<256x32xf32>
    %66 = vector.shape_cast %65 : vector<256x32xf32> to vector<16x16x32xf32>
    %cst_30 = arith.constant 0.000000e+00 : f32
    %67 = vector.broadcast %cst_30 : f32 to vector<16x1x32xf32>
    %68 = vector.extract_strided_slice %62 {offsets = [0, 0, 0], sizes = [16, 15, 32], strides = [1, 1, 1]} : vector<16x16x32xf32> to vector<16x15x32xf32>
    %69 = tpu.concatenate %67, %68 in 1 : vector<16x1x32xf32>, vector<16x15x32xf32> -> vector<16x16x32xf32>
    %c0_31 = arith.constant 0 : index
    %c0_32 = arith.constant 0 : index
    %70 = vector.load %arg6[%c0_31, %c0_32] : memref<32x32xf32, #tpu.memory_space<vmem>>, vector<32x32xf32>
    %71 = vector.shape_cast %69 : vector<16x16x32xf32> to vector<256x32xf32>
    %cst_33 = arith.constant dense<0.000000e+00> : vector<256x32xf32>
    %72 = tpu.matmul %71, %70, %cst_33 {dimension_numbers = #tpu.dot_dimension_numbers<[1], [0], [0], [1], [0, 0, 1, 1], [], []>} : vector<256x32xf32>, vector<32x32xf32>, vector<256x32xf32> -> vector<256x32xf32>
    %73 = vector.shape_cast %72 : vector<256x32xf32> to vector<16x16x32xf32>
    %74 = arith.addf %66, %73 : vector<16x16x32xf32>
    %cst_34 = arith.constant 0.000000e+00 : f32
    %75 = vector.broadcast %cst_34 : f32 to vector<16x1x32xf32>
    %76 = vector.extract_strided_slice %62 {offsets = [0, 1, 0], sizes = [16, 15, 32], strides = [1, 1, 1]} : vector<16x16x32xf32> to vector<16x15x32xf32>
    %77 = tpu.concatenate %76, %75 in 1 : vector<16x15x32xf32>, vector<16x1x32xf32> -> vector<16x16x32xf32>
    %c0_35 = arith.constant 0 : index
    %c0_36 = arith.constant 0 : index
    %78 = vector.load %arg8[%c0_35, %c0_36] : memref<32x32xf32, #tpu.memory_space<vmem>>, vector<32x32xf32>
    %79 = vector.shape_cast %77 : vector<16x16x32xf32> to vector<256x32xf32>
    %cst_37 = arith.constant dense<0.000000e+00> : vector<256x32xf32>
    %80 = tpu.matmul %79, %78, %cst_37 {dimension_numbers = #tpu.dot_dimension_numbers<[1], [0], [0], [1], [0, 0, 1, 1], [], []>} : vector<256x32xf32>, vector<32x32xf32>, vector<256x32xf32> -> vector<256x32xf32>
    %81 = vector.shape_cast %80 : vector<256x32xf32> to vector<16x16x32xf32>
    %82 = arith.addf %74, %81 : vector<16x16x32xf32>
    %cst_38 = arith.constant dense<0.000000e+00> : vector<16x32xf32>
    %83 = vector.multi_reduction <add>, %82, %cst_38 [1] : vector<16x16x32xf32> to vector<16x32xf32>
    %84 = vector.shape_cast %83 : vector<16x32xf32> to vector<16x1x32xf32>
    %cst_39 = arith.constant 1.600000e+01 : f32
    %85 = vector.broadcast %cst_39 : f32 to vector<16x1x32xf32>
    %86 = arith.divf %84, %85 : vector<16x1x32xf32>
    %87 = vector.broadcast %86 : vector<16x1x32xf32> to vector<16x16x32xf32>
    %88 = arith.subf %82, %87 : vector<16x16x32xf32>
    %89 = arith.mulf %88, %88 : vector<16x16x32xf32>
    %cst_40 = arith.constant dense<0.000000e+00> : vector<16x32xf32>
    %90 = vector.multi_reduction <add>, %89, %cst_40 [1] : vector<16x16x32xf32> to vector<16x32xf32>
    %91 = vector.shape_cast %90 : vector<16x32xf32> to vector<16x1x32xf32>
    %cst_41 = arith.constant 1.600000e+01 : f32
    %92 = vector.broadcast %cst_41 : f32 to vector<16x1x32xf32>
    %93 = arith.divf %91, %92 : vector<16x1x32xf32>
    %cst_42 = arith.constant 9.99999974E-6 : f32
    %94 = vector.broadcast %cst_42 : f32 to vector<16x1x32xf32>
    %95 = arith.addf %93, %94 : vector<16x1x32xf32>
    %96 = math.rsqrt %95 : vector<16x1x32xf32>
    %97 = vector.broadcast %96 : vector<16x1x32xf32> to vector<16x16x32xf32>
    %98 = arith.mulf %88, %97 : vector<16x16x32xf32>
    %99 = arith.addf %98, %44 : vector<16x16x32xf32>
    %cst_43 = arith.constant 0.000000e+00 : f32
    %100 = vector.broadcast %cst_43 : f32 to vector<16x16x32xf32>
    %101 = arith.maximumf %99, %100 : vector<16x16x32xf32>
    %c0_44 = arith.constant 0 : index
    %c0_45 = arith.constant 0 : index
    %102 = vector.load %arg10[%c0_44, %c0_45] : memref<32x128xf32, #tpu.memory_space<vmem>>, vector<32x128xf32>
    %103 = vector.shape_cast %101 : vector<16x16x32xf32> to vector<256x32xf32>
    %cst_46 = arith.constant dense<0.000000e+00> : vector<256x128xf32>
    %104 = tpu.matmul %103, %102, %cst_46 {dimension_numbers = #tpu.dot_dimension_numbers<[1], [0], [0], [1], [0, 0, 1, 1], [], []>} : vector<256x32xf32>, vector<32x128xf32>, vector<256x128xf32> -> vector<256x128xf32>
    %105 = vector.shape_cast %104 : vector<256x128xf32> to vector<16x16x128xf32>
    %106 = vector.extract_strided_slice %105 {offsets = [0, 0, 0], sizes = [16, 16, 64], strides = [1, 1, 1]} : vector<16x16x128xf32> to vector<16x16x64xf32>
    %cst_47 = arith.constant 0.000000e+00 : f32
    %107 = vector.broadcast %cst_47 : f32 to vector<16x1x32xf32>
    %108 = vector.extract_strided_slice %101 {offsets = [0, 0, 0], sizes = [16, 15, 32], strides = [1, 1, 1]} : vector<16x16x32xf32> to vector<16x15x32xf32>
    %109 = tpu.concatenate %107, %108 in 1 : vector<16x1x32xf32>, vector<16x15x32xf32> -> vector<16x16x32xf32>
    %c0_48 = arith.constant 0 : index
    %c0_49 = arith.constant 0 : index
    %110 = vector.load %arg9[%c0_48, %c0_49] : memref<32x64xf32, #tpu.memory_space<vmem>>, vector<32x64xf32>
    %111 = vector.shape_cast %109 : vector<16x16x32xf32> to vector<256x32xf32>
    %cst_50 = arith.constant dense<0.000000e+00> : vector<256x64xf32>
    %112 = tpu.matmul %111, %110, %cst_50 {dimension_numbers = #tpu.dot_dimension_numbers<[1], [0], [0], [1], [0, 0, 1, 1], [], []>} : vector<256x32xf32>, vector<32x64xf32>, vector<256x64xf32> -> vector<256x64xf32>
    %113 = vector.shape_cast %112 : vector<256x64xf32> to vector<16x16x64xf32>
    %114 = arith.addf %106, %113 : vector<16x16x64xf32>
    %cst_51 = arith.constant 0.000000e+00 : f32
    %115 = vector.broadcast %cst_51 : f32 to vector<16x1x32xf32>
    %116 = vector.extract_strided_slice %101 {offsets = [0, 1, 0], sizes = [16, 15, 32], strides = [1, 1, 1]} : vector<16x16x32xf32> to vector<16x15x32xf32>
    %117 = tpu.concatenate %116, %115 in 1 : vector<16x15x32xf32>, vector<16x1x32xf32> -> vector<16x16x32xf32>
    %c0_52 = arith.constant 0 : index
    %c0_53 = arith.constant 0 : index
    %118 = vector.load %arg11[%c0_52, %c0_53] : memref<32x64xf32, #tpu.memory_space<vmem>>, vector<32x64xf32>
    %119 = vector.shape_cast %117 : vector<16x16x32xf32> to vector<256x32xf32>
    %cst_54 = arith.constant dense<0.000000e+00> : vector<256x64xf32>
    %120 = tpu.matmul %119, %118, %cst_54 {dimension_numbers = #tpu.dot_dimension_numbers<[1], [0], [0], [1], [0, 0, 1, 1], [], []>} : vector<256x32xf32>, vector<32x64xf32>, vector<256x64xf32> -> vector<256x64xf32>
    %121 = vector.shape_cast %120 : vector<256x64xf32> to vector<16x16x64xf32>
    %122 = arith.addf %114, %121 : vector<16x16x64xf32>
    %123 = vector.extract_strided_slice %105 {offsets = [0, 0, 64], sizes = [16, 16, 64], strides = [1, 1, 1]} : vector<16x16x128xf32> to vector<16x16x64xf32>
    %cst_55 = arith.constant dense<0.000000e+00> : vector<16x64xf32>
    %124 = vector.multi_reduction <add>, %122, %cst_55 [1] : vector<16x16x64xf32> to vector<16x64xf32>
    %125 = vector.shape_cast %124 : vector<16x64xf32> to vector<16x1x64xf32>
    %cst_56 = arith.constant 1.600000e+01 : f32
    %126 = vector.broadcast %cst_56 : f32 to vector<16x1x64xf32>
    %127 = arith.divf %125, %126 : vector<16x1x64xf32>
    %128 = vector.broadcast %127 : vector<16x1x64xf32> to vector<16x16x64xf32>
    %129 = arith.subf %122, %128 : vector<16x16x64xf32>
    %130 = arith.mulf %129, %129 : vector<16x16x64xf32>
    %cst_57 = arith.constant dense<0.000000e+00> : vector<16x64xf32>
    %131 = vector.multi_reduction <add>, %130, %cst_57 [1] : vector<16x16x64xf32> to vector<16x64xf32>
    %132 = vector.shape_cast %131 : vector<16x64xf32> to vector<16x1x64xf32>
    %cst_58 = arith.constant 1.600000e+01 : f32
    %133 = vector.broadcast %cst_58 : f32 to vector<16x1x64xf32>
    %134 = arith.divf %132, %133 : vector<16x1x64xf32>
    %cst_59 = arith.constant 9.99999974E-6 : f32
    %135 = vector.broadcast %cst_59 : f32 to vector<16x1x64xf32>
    %136 = arith.addf %134, %135 : vector<16x1x64xf32>
    %137 = math.rsqrt %136 : vector<16x1x64xf32>
    %138 = vector.broadcast %137 : vector<16x1x64xf32> to vector<16x16x64xf32>
    %139 = arith.mulf %129, %138 : vector<16x16x64xf32>
    %cst_60 = arith.constant 0.000000e+00 : f32
    %140 = vector.broadcast %cst_60 : f32 to vector<16x16x64xf32>
    %141 = arith.maximumf %139, %140 : vector<16x16x64xf32>
    %c0_61 = arith.constant 0 : index
    %c0_62 = arith.constant 0 : index
    %142 = vector.load %arg13[%c0_61, %c0_62] : memref<64x64xf32, #tpu.memory_space<vmem>>, vector<64x64xf32>
    %143 = vector.shape_cast %141 : vector<16x16x64xf32> to vector<256x64xf32>
    %cst_63 = arith.constant dense<0.000000e+00> : vector<256x64xf32>
    %144 = tpu.matmul %143, %142, %cst_63 {dimension_numbers = #tpu.dot_dimension_numbers<[1], [0], [0], [1], [0, 0, 1, 1], [], []>} : vector<256x64xf32>, vector<64x64xf32>, vector<256x64xf32> -> vector<256x64xf32>
    %145 = vector.shape_cast %144 : vector<256x64xf32> to vector<16x16x64xf32>
    %cst_64 = arith.constant 0.000000e+00 : f32
    %146 = vector.broadcast %cst_64 : f32 to vector<16x1x64xf32>
    %147 = vector.extract_strided_slice %141 {offsets = [0, 0, 0], sizes = [16, 15, 64], strides = [1, 1, 1]} : vector<16x16x64xf32> to vector<16x15x64xf32>
    %148 = tpu.concatenate %146, %147 in 1 : vector<16x1x64xf32>, vector<16x15x64xf32> -> vector<16x16x64xf32>
    %c0_65 = arith.constant 0 : index
    %c0_66 = arith.constant 0 : index
    %149 = vector.load %arg12[%c0_65, %c0_66] : memref<64x64xf32, #tpu.memory_space<vmem>>, vector<64x64xf32>
    %150 = vector.shape_cast %148 : vector<16x16x64xf32> to vector<256x64xf32>
    %cst_67 = arith.constant dense<0.000000e+00> : vector<256x64xf32>
    %151 = tpu.matmul %150, %149, %cst_67 {dimension_numbers = #tpu.dot_dimension_numbers<[1], [0], [0], [1], [0, 0, 1, 1], [], []>} : vector<256x64xf32>, vector<64x64xf32>, vector<256x64xf32> -> vector<256x64xf32>
    %152 = vector.shape_cast %151 : vector<256x64xf32> to vector<16x16x64xf32>
    %153 = arith.addf %145, %152 : vector<16x16x64xf32>
    %cst_68 = arith.constant 0.000000e+00 : f32
    %154 = vector.broadcast %cst_68 : f32 to vector<16x1x64xf32>
    %155 = vector.extract_strided_slice %141 {offsets = [0, 1, 0], sizes = [16, 15, 64], strides = [1, 1, 1]} : vector<16x16x64xf32> to vector<16x15x64xf32>
    %156 = tpu.concatenate %155, %154 in 1 : vector<16x15x64xf32>, vector<16x1x64xf32> -> vector<16x16x64xf32>
    %c0_69 = arith.constant 0 : index
    %c0_70 = arith.constant 0 : index
    %157 = vector.load %arg14[%c0_69, %c0_70] : memref<64x64xf32, #tpu.memory_space<vmem>>, vector<64x64xf32>
    %158 = vector.shape_cast %156 : vector<16x16x64xf32> to vector<256x64xf32>
    %cst_71 = arith.constant dense<0.000000e+00> : vector<256x64xf32>
    %159 = tpu.matmul %158, %157, %cst_71 {dimension_numbers = #tpu.dot_dimension_numbers<[1], [0], [0], [1], [0, 0, 1, 1], [], []>} : vector<256x64xf32>, vector<64x64xf32>, vector<256x64xf32> -> vector<256x64xf32>
    %160 = vector.shape_cast %159 : vector<256x64xf32> to vector<16x16x64xf32>
    %161 = arith.addf %153, %160 : vector<16x16x64xf32>
    %cst_72 = arith.constant dense<0.000000e+00> : vector<16x64xf32>
    %162 = vector.multi_reduction <add>, %161, %cst_72 [1] : vector<16x16x64xf32> to vector<16x64xf32>
    %163 = vector.shape_cast %162 : vector<16x64xf32> to vector<16x1x64xf32>
    %cst_73 = arith.constant 1.600000e+01 : f32
    %164 = vector.broadcast %cst_73 : f32 to vector<16x1x64xf32>
    %165 = arith.divf %163, %164 : vector<16x1x64xf32>
    %166 = vector.broadcast %165 : vector<16x1x64xf32> to vector<16x16x64xf32>
    %167 = arith.subf %161, %166 : vector<16x16x64xf32>
    %168 = arith.mulf %167, %167 : vector<16x16x64xf32>
    %cst_74 = arith.constant dense<0.000000e+00> : vector<16x64xf32>
    %169 = vector.multi_reduction <add>, %168, %cst_74 [1] : vector<16x16x64xf32> to vector<16x64xf32>
    %170 = vector.shape_cast %169 : vector<16x64xf32> to vector<16x1x64xf32>
    %cst_75 = arith.constant 1.600000e+01 : f32
    %171 = vector.broadcast %cst_75 : f32 to vector<16x1x64xf32>
    %172 = arith.divf %170, %171 : vector<16x1x64xf32>
    %cst_76 = arith.constant 9.99999974E-6 : f32
    %173 = vector.broadcast %cst_76 : f32 to vector<16x1x64xf32>
    %174 = arith.addf %172, %173 : vector<16x1x64xf32>
    %175 = math.rsqrt %174 : vector<16x1x64xf32>
    %176 = vector.broadcast %175 : vector<16x1x64xf32> to vector<16x16x64xf32>
    %177 = arith.mulf %167, %176 : vector<16x16x64xf32>
    %178 = arith.addf %177, %123 : vector<16x16x64xf32>
    %cst_77 = arith.constant 0.000000e+00 : f32
    %179 = vector.broadcast %cst_77 : f32 to vector<16x16x64xf32>
    %180 = arith.maximumf %178, %179 : vector<16x16x64xf32>
    %c0_78 = arith.constant 0 : index
    %c0_79 = arith.constant 0 : index
    %181 = vector.load %arg15[%c0_78, %c0_79] : memref<64x64xf32, #tpu.memory_space<vmem>>, vector<64x64xf32>
    %182 = vector.shape_cast %180 : vector<16x16x64xf32> to vector<256x64xf32>
    %cst_80 = arith.constant dense<0.000000e+00> : vector<256x64xf32>
    %183 = tpu.matmul %182, %181, %cst_80 {dimension_numbers = #tpu.dot_dimension_numbers<[1], [0], [0], [1], [0, 0, 1, 1], [], []>} : vector<256x64xf32>, vector<64x64xf32>, vector<256x64xf32> -> vector<256x64xf32>
    %184 = vector.shape_cast %183 : vector<256x64xf32> to vector<16x16x64xf32>
    %c0_81 = arith.constant 0 : index
    %c0_82 = arith.constant 0 : index
    %185 = vector.load %arg16[%c0_81, %c0_82] : memref<1x64xf32, #tpu.memory_space<vmem>>, vector<1x64xf32>
    %186 = vector.shape_cast %185 : vector<1x64xf32> to vector<1x1x64xf32>
    %187 = vector.broadcast %186 : vector<1x1x64xf32> to vector<16x16x64xf32>
    %188 = arith.addf %184, %187 : vector<16x16x64xf32>
    %cst_83 = arith.constant 0.000000e+00 : f32
    %189 = vector.broadcast %cst_83 : f32 to vector<16x16x64xf32>
    %190 = arith.maximumf %188, %189 : vector<16x16x64xf32>
    %c0_84 = arith.constant 0 : index
    %c0_85 = arith.constant 0 : index
    %191 = vector.load %arg17[%c0_84, %c0_85] : memref<64x128xf32, #tpu.memory_space<vmem>>, vector<64x128xf32>
    %192 = vector.shape_cast %190 : vector<16x16x64xf32> to vector<256x64xf32>
    %cst_86 = arith.constant dense<0.000000e+00> : vector<256x128xf32>
    %193 = tpu.matmul %192, %191, %cst_86 {dimension_numbers = #tpu.dot_dimension_numbers<[1], [0], [0], [1], [0, 0, 1, 1], [], []>} : vector<256x64xf32>, vector<64x128xf32>, vector<256x128xf32> -> vector<256x128xf32>
    %194 = vector.shape_cast %193 : vector<256x128xf32> to vector<16x16x128xf32>
    %c0_87 = arith.constant 0 : index
    %c0_88 = arith.constant 0 : index
    %195 = vector.load %arg18[%c0_87, %c0_88] : memref<1x128xf32, #tpu.memory_space<vmem>>, vector<1x128xf32>
    %196 = vector.shape_cast %195 : vector<1x128xf32> to vector<1x1x128xf32>
    %197 = vector.broadcast %196 : vector<1x1x128xf32> to vector<16x16x128xf32>
    %198 = arith.addf %194, %197 : vector<16x16x128xf32>
    %c0_89 = arith.constant 0 : index
    %c0_90 = arith.constant 0 : index
    %c0_91 = arith.constant 0 : index
    %199 = vector.load %arg19[%c0_89, %c0_90, %c0_91] : memref<16x16x128xf32, #tpu.memory_space<vmem>>, vector<16x16x128xf32>
    tpu.vector_store %arg19[%c0_89, %c0_90, %c0_91], %198 {strides = array<i32>} : memref<16x16x128xf32, #tpu.memory_space<vmem>>, vector<16x16x128xf32>,
    return
  }
  func.func @transform_0(%arg0: i32) -> (i32, i32, i32) {
    %c0_i32 = arith.constant 0 : i32
    %c0_i32_0 = arith.constant 0 : i32
    %c0_i32_1 = arith.constant 0 : i32
    return %arg0, %c0_i32, %c0_i32_0 : i32, i32, i32
  }
  func.func @transform_1(%arg0: i32) -> (i32, i32) {
    %c0_i32 = arith.constant 0 : i32
    %c0_i32_0 = arith.constant 0 : i32
    %c0_i32_1 = arith.constant 0 : i32
    return %c0_i32, %c0_i32_0 : i32, i32
  }
  func.func @transform_2(%arg0: i32) -> (i32, i32) {
    %c0_i32 = arith.constant 0 : i32
    %c0_i32_0 = arith.constant 0 : i32
    %c0_i32_1 = arith.constant 0 : i32
    return %c0_i32, %c0_i32_0 : i32, i32
  }
  func.func @transform_3(%arg0: i32) -> (i32, i32) {
    %c0_i32 = arith.constant 0 : i32
    %c0_i32_0 = arith.constant 0 : i32
    %c0_i32_1 = arith.constant 0 : i32
    return %c0_i32, %c0_i32_0 : i32, i32
  }
  func.func @transform_4(%arg0: i32) -> (i32, i32) {
    %c0_i32 = arith.constant 0 : i32
    %c0_i32_0 = arith.constant 0 : i32
    %c0_i32_1 = arith.constant 0 : i32
    return %c0_i32, %c0_i32_0 : i32, i32
  }
  func.func @transform_5(%arg0: i32) -> (i32, i32) {
    %c0_i32 = arith.constant 0 : i32
    %c0_i32_0 = arith.constant 0 : i32
    %c0_i32_1 = arith.constant 0 : i32
    return %c0_i32, %c0_i32_0 : i32, i32
  }
  func.func @transform_6(%arg0: i32) -> (i32, i32) {
    %c0_i32 = arith.constant 0 : i32
    %c0_i32_0 = arith.constant 0 : i32
    %c0_i32_1 = arith.constant 0 : i32
    return %c0_i32, %c0_i32_0 : i32, i32
  }
  func.func @transform_7(%arg0: i32) -> (i32, i32) {
    %c0_i32 = arith.constant 0 : i32
    %c0_i32_0 = arith.constant 0 : i32
    %c0_i32_1 = arith.constant 0 : i32
    return %c0_i32, %c0_i32_0 : i32, i32
  }
  func.func @transform_8(%arg0: i32) -> (i32, i32) {
    %c0_i32 = arith.constant 0 : i32
    %c0_i32_0 = arith.constant 0 : i32
    %c0_i32_1 = arith.constant 0 : i32
    return %c0_i32, %c0_i32_0 : i32, i32
  }
  func.func @transform_9(%arg0: i32) -> (i32, i32) {
    %c0_i32 = arith.constant 0 : i32
    %c0_i32_0 = arith.constant 0 : i32
    %c0_i32_1 = arith.constant 0 : i32
    return %c0_i32, %c0_i32_0 : i32, i32
  }
  func.func @transform_10(%arg0: i32) -> (i32, i32) {
    %c0_i32 = arith.constant 0 : i32
    %c0_i32_0 = arith.constant 0 : i32
    %c0_i32_1 = arith.constant 0 : i32
    return %c0_i32, %c0_i32_0 : i32, i32
  }
  func.func @transform_11(%arg0: i32) -> (i32, i32) {
    %c0_i32 = arith.constant 0 : i32
    %c0_i32_0 = arith.constant 0 : i32
    %c0_i32_1 = arith.constant 0 : i32
    return %c0_i32, %c0_i32_0 : i32, i32
  }
  func.func @transform_12(%arg0: i32) -> (i32, i32) {
    %c0_i32 = arith.constant 0 : i32
    %c0_i32_0 = arith.constant 0 : i32
    %c0_i32_1 = arith.constant 0 : i32
    return %c0_i32, %c0_i32_0 : i32, i32
  }
  func.func @transform_13(%arg0: i32) -> (i32, i32) {
    %c0_i32 = arith.constant 0 : i32
    %c0_i32_0 = arith.constant 0 : i32
    %c0_i32_1 = arith.constant 0 : i32
    return %c0_i32, %c0_i32_0 : i32, i32
  }
  func.func @transform_14(%arg0: i32) -> (i32, i32) {
    %c0_i32 = arith.constant 0 : i32
    %c0_i32_0 = arith.constant 0 : i32
    %c0_i32_1 = arith.constant 0 : i32
    return %c0_i32, %c0_i32_0 : i32, i32
  }
  func.func @transform_15(%arg0: i32) -> (i32, i32) {
    %c0_i32 = arith.constant 0 : i32
    %c0_i32_0 = arith.constant 0 : i32
    %c0_i32_1 = arith.constant 0 : i32
    return %c0_i32, %c0_i32_0 : i32, i32
  }
  func.func @transform_16(%arg0: i32) -> (i32, i32) {
    %c0_i32 = arith.constant 0 : i32
    %c0_i32_0 = arith.constant 0 : i32
    %c0_i32_1 = arith.constant 0 : i32
    return %c0_i32, %c0_i32_0 : i32, i32
  }
  func.func @transform_17(%arg0: i32) -> (i32, i32) {
    %c0_i32 = arith.constant 0 : i32
    %c0_i32_0 = arith.constant 0 : i32
    %c0_i32_1 = arith.constant 0 : i32
    return %c0_i32, %c0_i32_0 : i32, i32
  }
  func.func @transform_18(%arg0: i32) -> (i32, i32, i32) {
    %c0_i32 = arith.constant 0 : i32
    %c0_i32_0 = arith.constant 0 : i32
    %c0_i32_1 = arith.constant 0 : i32
    return %arg0, %c0_i32, %c0_i32_0 : i32, i32, i32
  }
}

</mosaic_0001>

<bundles_post_ra>
// kernel: tpu_custom_call.1
= control target key start
LH: loop header
LB: loop body
LE: loop exit
PB: predicated region body
PF: predicated region fallthrough
CT: control target
= control target key end

     0   :  { %s13995_s0 = inlined_call_operand.vmem [shape: f32[64,16,10], index: 0, kind: input, shape index: {}]   ;;  %s13996_s1 = inlined_call_operand.vmem [shape: f32[10,16], index: 1, kind: input, shape index: {}]   ;;  %s13997_s2 = inlined_call_operand.vmem [shape: f32[16,32], index: 2, kind: input, shape index: {}]   ;;  %s13998_s3 = inlined_call_operand.vmem [shape: f32[16,64], index: 3, kind: input, shape index: {}]   ;;  %s13999_s4 = inlined_call_operand.vmem [shape: f32[16,32], index: 4, kind: input, shape index: {}]   ;;  %s14000_s5 = inlined_call_operand.vmem [shape: f32[32,32], index: 5, kind: input, shape index: {}]   ;;  %s14001_s6 = inlined_call_operand.vmem [shape: f32[32,32], index: 6, kind: input, shape index: {}]   ;;  %s14002_s7 = inlined_call_operand.vmem [shape: f32[32,32], index: 7, kind: input, shape index: {}]   ;;  %s14003_s8 = inlined_call_operand.vmem [shape: f32[32,64], index: 8, kind: input, shape index: {}]   ;;  %s14004_s9 = inlined_call_operand.vmem [shape: f32[32,128], index: 9, kind: input, shape index: {}]   ;;  %s14005_s10 = inlined_call_operand.vmem [shape: f32[32,64], index: 10, kind: input, shape index: {}]   ;;  %s14006_s11 = inlined_call_operand.vmem [shape: f32[64,64], index: 11, kind: input, shape index: {}]   ;;  %s14007_s12 = inlined_call_operand.vmem [shape: f32[64,64], index: 12, kind: input, shape index: {}]   ;;  %s14008_s13 = inlined_call_operand.vmem [shape: f32[64,64], index: 13, kind: input, shape index: {}]   ;;  %s14009_s14 = inlined_call_operand.vmem [shape: f32[64,64], index: 14, kind: input, shape index: {}]   ;;  %s14010_s15 = inlined_call_operand.vmem [shape: f32[1,64], index: 15, kind: input, shape index: {}]   ;;  %s14011_s16 = inlined_call_operand.vmem [shape: f32[64,128], index: 16, kind: input, shape index: {}]   ;;  %s14012_s17 = inlined_call_operand.vmem [shape: f32[1,128], index: 17, kind: input, shape index: {}]   ;;  %s14013_s18 = inlined_call_operand.hbm [shape: f32[64,16,128], index: 18, kind: output, shape index: {}]  }
   0x1   :  { %14027 = sst [smem:[#allocation17_spill]] %s13995_s0 }
   0x2   :  { %14028 = sst [smem:[#allocation18_spill]] %s13996_s1 }
   0x3   :  { %14029 = sst [smem:[#allocation19_spill]] %s13997_s2 }
   0x4   :  { %14030 = sst [smem:[#allocation20_spill]] %s13998_s3 }
   0x5   :  { %14031 = sst [smem:[#allocation21_spill]] %s13999_s4 }
   0x6   :  { %14032 = sst [smem:[#allocation22_spill]] %s14000_s5 }
   0x7   :  { %14033 = sst [smem:[#allocation23_spill]] %s14001_s6 }
   0x8   :  { %23 = vsyncpa [#allocation3], 0 }
   0x9   :  { %25 = vsyncpa [#allocation3 + $0x1], 0  ;;  %s9135_s27 = smov 0   ;;  %s9137_s28 = smov 0  }
   0xa   :  { %s9139_s29 = smov 0   ;;  %s9141_s30 = smov 0  }
   0xb LB: > { %14034 = sst [smem:[#allocation5_spill]] %s9029_s29  ;;  %s9156_s0 = sadd.s32 4294967295, %s9033_s30   ;;  %s9033_s30 = sphi %s9141_s30, %s14071_s30   ;;  %s9029_s29 = sphi %s9139_s29, %s14073_s29   ;;  %s9025_s28 = sphi %s9137_s28, %s14075_s28   ;;  %s9021_s27 = sphi %s9135_s27, %s14074_s27  }
   0xc   : > { %s8259_s19 = sadd.s32 4294967294, %s9033_s30   ;;  %s9160_s1 = sadd.s32 1, %s9033_s30  }
   0xd   : > { %14035 = sst [smem:[#allocation6_spill]] %s9160_s1  ;;  %s421_s20 = sadd.s32 1, %s9029_s29 }
   0xe   : > { %s418_s21 = ssub.s32 %s9033_s30, %s9160_s1  ;;  %p431_p0 = scmp.ne.s32.totalorder %s9029_s29, %s9025_s28 }
   0xf   : > { %p419_p1 = scmp.eq.s32.totalorder %s418_s21, 0  ;;  %p432_p2 = scmp.eq.s32.totalorder %s9156_s0, 3 }
  0x10   : > { %p437_p3 = scmp.ne.s32.totalorder %s9025_s28, %s9021_s27  ;;  %p438_p4 = scmp.eq.s32.totalorder %s8259_s19, 3 }
  0x11   : > { %s9171_s22 = scalar_select %p419_p1, %s9029_s29, %s421_s20  }
  0x12   : > { %p9173_p5 = por %p432_p2, %p431_p0  ;;  %p9177_p6 = por %p438_p4, %p437_p3 }
  0x13   : > { %14036 = sst [smem:[#allocation7_spill]] %s9171_s22  ;;  %p8262_p7 = scmp.ge.s32.totalorder %s9033_s30, 1 }
  0x14   : > { %s14038_s23 = scalar_select %p9177_p6, 1, 0 }
  0x15   : > { %p517_p8 = scmp.lt.s32.totalorder %s9033_s30, 5 }
  0x16   : > { %14039 = sst [smem:[#allocation8_spill]] %s14038_s23 }
  0x17   : > { %p518_p9 = pnand %p8262_p7, %p517_p8 }
  0x19   : > { %521 = sbr.rel (%p518_p9) target bundleno = 1833 (0x729), region = 92 }
  0x1e   : > { %s14040_s26 = sld [smem:[#allocation18_spill]]  ;;  %vm711_vm0 = vcmask 1041408   ;;  %s8264_s21 = sshll.u32 %s9156_s0, 4  ;;  %vm614_vm1 = vcmask 80896   ;;  %v9035_v26 = vmov 16.0   ;;  %vm828_vm2 = vcmask 130048  }
  0x1f   : > { %p573_p10 = scmp.lt.s32.totalorder %s8264_s21, 63  ;;  %s14041_s23 = sld [smem:[#allocation17_spill]]  ;;  %8809 = vrcp.f32 %v9035_v26  ;;  %vm1671_vm15 = vcmask 1040384  }
  0x20   : > { %s14042_s3 = sld [smem:[#allocation20_spill]]  ;;  %s569_s19 = sand.u32 1, %s9025_s28  }
  0x21   : > { %s14077_s21 = smov (!%p573_p10, %s8264_s21), 63  ;;  %s14043_s20 = sld [smem:[#allocation19_spill]] }
  0x22   : > { %s8754_s22 = sshll.u32 %s14077_s21, 4  ;;  %s14044_s4 = sld [smem:[#allocation21_spill]] }
  0x23   : > { %s14045_s6 = sld [smem:[#allocation23_spill]]  ;;  %s9036_s21 = smov 96  }
  0x24   : > { %v613_v0 = vld [vmem:[%s14040_s26 + $0x8] sm:$0x3]  ;;  %v612_v1 = vld [vmem:[%s14040_s26] sm:$0xff]  ;;  %s14046_s5 = sld [smem:[#allocation22_spill]]  ;;  %s8263_s29 = sshll.u32 %s569_s19, 8 }
  0x25   : > { %8267 = vmatpush.msk.msra.mxu0 %vm711_vm0, %v613_v0  ;;  %8757 = vmatpush.msk.msra.mxu3 %vm711_vm0, %v613_v0  ;;  %s9193_s24 = scalar_lea.vmem %s14041_s23, %s8754_s22  ;;  %v8810_v30 = vpop.eup %8809  ;;  %s13867_s23 = scalar_lea.vmem [#allocation2], %s8263_s29 }
  0x26   : > { %v580_v2 = vld [vmem:[%s9193_s24] sm:$0xff]  ;;  %v581_v4 = vld [vmem:[%s9193_s24 + $0x8] sm:$0xff]  ;;  %v582_v6 = vld [vmem:[%s9193_s24 + $0x10] sm:$0xff]  ;;  %v974_v31 = vmul.f32 16.0, %v8810_v30  ;;  %vm978_vm3 = vweird.f32 %v8810_v30  ;;  %s8756_s25 = sshll.u32 %s9156_s0, 8  ;;  %s8194_s1 = sshll.u32 %s13867_s23, 4  ;;  %s8195_s1 = int_to_ptr.vmem [resolvable:$true] %s8194_s1 }
  0x27   : > { %730 = vmatpush.msra.mxu0 %v612_v1  ;;  %8758 = vmatpush.msra.mxu3 %v612_v1  ;;  %v604_v3 = vld [vmem:[%s9193_s24 + $0xc0] sm:$0xff]  ;;  %v605_v5 = vld [vmem:[%s9193_s24 + $0xc8] sm:$0xff]  ;;  %v606_v7 = vld [vmem:[%s9193_s24 + $0xd0] sm:$0xff]  ;;  %s8193_s29 = scalar_lea.hbm %s14013_s18, %s8756_s25 }
  0x28   : > { %8268 = vmatmul.msk.f32.vlgmr.msra.gmra.mxu0 %vm614_vm1, %v580_v2  ;;  %8292 = vmatmul.msk.f32.vlgmr.msra.gmra.mxu3 %vm614_vm1, %v604_v3  ;;  %v583_v8 = vld [vmem:[%s9193_s24 + $0x18] sm:$0xff]  ;;  %v584_v10 = vld [vmem:[%s9193_s24 + $0x20] sm:$0xff]  ;;  %v585_v12 = vld [vmem:[%s9193_s24 + $0x28] sm:$0xff]  ;;  %v975_v37 = vsub.f32 1.0, %v974_v31  ;;  %s8196_s22 = sshll.u32 %s8193_s29, 4  ;;  %s8197_s22 = int_to_ptr.hbm [resolvable:$true] %s8196_s22 }
  0x29   : > { %v607_v9 = vld [vmem:[%s9193_s24 + $0xd8] sm:$0xff]  ;;  %v608_v11 = vld [vmem:[%s9193_s24 + $0xe0] sm:$0xff]  ;;  %v609_v13 = vld [vmem:[%s9193_s24 + $0xe8] sm:$0xff]  ;;  %s8985_s0 = sshra.s32 %s8197_s22, 4  ;;  %s8986_s0 = int_to_ptr.hbm [resolvable:$true] %s8985_s0 }
  0x2a   : > { %v586_v14 = vld [vmem:[%s9193_s24 + $0x30] sm:$0xff]  ;;  %v587_v16 = vld [vmem:[%s9193_s24 + $0x38] sm:$0xff]  ;;  %v588_v18 = vld [vmem:[%s9193_s24 + $0x40] sm:$0xff]  ;;  %v976_v40 = vmul.f32 %v8810_v30, %v975_v37  ;;  %p8992_p0 = scmp.lt.s32.totalorder %s8986_s0, %s14013_s18 }
  0x2b   : > { %v610_v15 = vld [vmem:[%s9193_s24 + $0xf0] sm:$0xff]  ;;  %v611_v17 = vld [vmem:[%s9193_s24 + $0xf8] sm:$0xff]  ;;  %v589_v19 = vld [vmem:[%s9193_s24 + $0x48] sm:$0xff] }
  0x2c   : > { %v590_v20 = vld [vmem:[%s9193_s24 + $0x50] sm:$0xff]  ;;  %v591_v21 = vld [vmem:[%s9193_s24 + $0x58] sm:$0xff]  ;;  %v592_v22 = vld [vmem:[%s9193_s24 + $0x60] sm:$0xff]  ;;  %v977_v49 = vadd.f32 %v8810_v30, %v976_v40 }
  0x2d   : > { %v593_v23 = vld [vmem:[%s9193_s24 + $0x68] sm:$0xff]  ;;  %v594_v24 = vld [vmem:[%s9193_s24 + $0x70] sm:$0xff]  ;;  %v595_v25 = vld [vmem:[%s9193_s24 + $0x78] sm:$0xff] }
  0x2e   : > { %v1461_v27 = vld [vmem:[%s14042_s3 + $0x8] sm:$0xff]  ;;  %v596_v29 = vld [vmem:[%s9193_s24 + $0x80] sm:$0xff]  ;;  %v598_v48 = vld [vmem:[%s9193_s24 + $0x90] sm:$0xff]  ;;  %v9258_v54 = vsel %vm978_vm3, %v8810_v30, %v977_v49  ;;  %vm1979_vm3 = vcmask 1046528  }
  0x2f   : > { %8759 = vmatpush.msrb.mxu3 %v1461_v27  ;;  %1572 = vmatpush.msra.mxu1 %v1461_v27  ;;  %v597_v35 = vld [vmem:[%s9193_s24 + $0x88] sm:$0xff]  ;;  %v599_v62 = vld [vmem:[%s9193_s24 + $0x98] sm:$0xff] }
  0x30   : > { %8269 = vmatmul.msk.f32.gmra.mxu0 %vm614_vm1, %v581_v4  ;;  %8293 = vmatmul.msk.f32.gmra.mxu3 %vm614_vm1, %v605_v5 }
  0x38   : > { %8270 = vmatmul.msk.f32.gmra.mxu0 %vm614_vm1, %v582_v6  ;;  %8294 = vmatmul.msk.f32.gmra.mxu3 %vm614_vm1, %v606_v7 }
  0x40   : > { %8271 = vmatmul.msk.f32.gmra.mxu0 %vm614_vm1, %v583_v8  ;;  %8295 = vmatmul.msk.f32.gmra.mxu3 %vm614_vm1, %v607_v9 }
  0x48   : > { %8272 = vmatmul.msk.f32.gmra.mxu0 %vm614_vm1, %v584_v10  ;;  %8296 = vmatmul.msk.f32.gmra.mxu3 %vm614_vm1, %v608_v11 }
  0x50   : > { %8273 = vmatmul.msk.f32.gmra.mxu0 %vm614_vm1, %v585_v12  ;;  %8297 = vmatmul.msk.f32.gmra.mxu3 %vm614_vm1, %v609_v13  ;;  %v1460_v12 = vld [vmem:[%s14042_s3] sm:$0xff]  ;;  %s8181_s3 = scalar_lea.sflag [#allocation3], %s569_s19 }
  0x51   : > { %8760 = vmatpush.msrb.mxu3 %v1460_v12  ;;  %1573 = vmatpush.msra.mxu1 %v1460_v12 }
  0x58   : > { %8274 = vmatmul.msk.f32.gmra.mxu0 %vm614_vm1, %v586_v14  ;;  %8298 = vmatmul.msk.f32.gmra.mxu3 %vm614_vm1, %v610_v15 }
  0x60   : > { %8275 = vmatmul.msk.f32.gmra.mxu0 %vm614_vm1, %v587_v16  ;;  %8299 = vmatmul.msk.f32.gmra.mxu3 %vm614_vm1, %v611_v17 }
  0x68   : > { %8276 = vmatmul.msk.f32.gmra.mxu0 %vm614_vm1, %v588_v18 }
  0x70   : > { %8277 = vmatmul.msk.f32.gmra.mxu0 %vm614_vm1, %v589_v19 }
  0x78   : > { %8278 = vmatmul.msk.f32.gmra.mxu0 %vm614_vm1, %v590_v20 }
  0x80   : > { %8279 = vmatmul.msk.f32.gmra.mxu0 %vm614_vm1, %v591_v21 }
  0x88   : > { %8280 = vmatmul.msk.f32.gmra.mxu0 %vm614_vm1, %v592_v22  ;;  %v600_v22 = vld [vmem:[%s9193_s24 + $0xa0] sm:$0xff] }
  0x90   : > { %8281 = vmatmul.msk.f32.gmra.mxu0 %vm614_vm1, %v593_v23 }
  0x98   : > { %8282 = vmatmul.msk.f32.gmra.mxu0 %vm614_vm1, %v594_v24 }
  0xa0   : > { %8283 = vmatmul.msk.f32.gmra.mxu0 %vm614_vm1, %v595_v25 }
  0xa5   : > { %v732_v28 = vpop.f32.mrf.mxu0 }
  0xa6   : > { %v829_v33 = vsel %vm828_vm2, %v732_v28, 0.0 }
  0xa8   : > { %8284 = vmatmul.msk.f32.gmra.mxu0 %vm614_vm1, %v596_v29 }
  0xab   : > { %v804_v32 = vpop.f32.mrf.mxu3 }
  0xac   : > { %v937_v43 = vsel %vm828_vm2, %v804_v32, 0.0 }
  0xad   : > { %v735_v34 = vpop.f32.mrf.mxu0 }
  0xae   : > { %v830_v36 = vsel %vm828_vm2, %v735_v34, 0.0 }
  0xaf   : > { %v831_v38 = vadd.f32 %v830_v36, %v829_v33 }
  0xb0   : > { %8285 = vmatmul.msk.f32.gmra.mxu0 %vm614_vm1, %v597_v35 }
  0xb1   : > { %v832_v39 = vrot.slane %v831_v38, 4 }
  0xb3   : > { %v833_v41 = vadd.f32 %v832_v39, %v831_v38  ;;  %v807_v42 = vpop.f32.mrf.mxu3 }
  0xb4   : > { %v938_v44 = vsel %vm828_vm2, %v807_v42, 0.0 }
  0xb5   : > { %v834_v45 = vrot.slane %v833_v41, 2  ;;  %v939_v46 = vadd.f32 %v938_v44, %v937_v43  ;;  %v9254_v47 = vpop.f32.mrf.mxu0  ;;  %v601_v44 = vld [vmem:[%s9193_s24 + $0xa8] sm:$0xff] }
  0xb6   : > { %v838_v58 = vsel %vm828_vm2, %v9254_v47, 0.0 }
  0xb7   : > { %v835_v50 = vadd.f32 %v834_v45, %v833_v41  ;;  %v940_v51 = vrot.slane %v939_v46, 4 }
  0xb8   : > { %8286 = vmatmul.msk.f32.gmra.mxu0 %vm614_vm1, %v598_v48 }
  0xb9   : > { %v836_v52 = vrot.slane %v835_v50, 1  ;;  %v941_v53 = vadd.f32 %v940_v51, %v939_v46 }
  0xbb   : > { %v837_v55 = vadd.f32 %v836_v52, %v835_v50  ;;  %v942_v56 = vrot.slane %v941_v53, 2  ;;  %v9260_v57 = vpop.f32.mrf.mxu3 }
  0xbc   : > { %v946_v14 = vsel %vm828_vm2, %v9260_v57, 0.0 }
  0xbd   : > { %v980_v59 = vmul.f32 %v9258_v54, %v837_v55  ;;  %v943_v60 = vadd.f32 %v942_v56, %v941_v53  ;;  %v741_v61 = vpop.f32.mrf.mxu0 }
  0xbe   : > { %v839_v63 = vsel %vm828_vm2, %v741_v61, 0.0 }
  0xbf   : > { %v9267_v0 = vsub.f32 %v735_v34, %v980_v59  ;;  %v944_v1 = vrot.slane %v943_v60, 1  ;;  %v840_v2 = vadd.f32 %v839_v63, %v838_v58  ;;  %v9269_v3 = vsub.f32 %v732_v28, %v980_v59 }
  0xc0   : > { %8287 = vmatmul.msk.f32.gmra.mxu0 %vm614_vm1, %v599_v62 }
  0xc1   : > { %v1029_v4 = vmul.f32 %v9267_v0, %v9267_v0  ;;  %v945_v5 = vadd.f32 %v944_v1, %v943_v60  ;;  %v841_v6 = vrot.slane %v840_v2, 4  ;;  %v1028_v7 = vmul.f32 %v9269_v3, %v9269_v3 }
  0xc3   : > { %v1061_v8 = vsel %vm828_vm2, %v1029_v4, 0.0  ;;  %v992_v9 = vmul.f32 %v9258_v54, %v945_v5  ;;  %v842_v10 = vadd.f32 %v841_v6, %v840_v2  ;;  %v9278_v11 = vpop.f32.mrf.mxu3  ;;  %v1060_v13 = vsel %vm828_vm2, %v1028_v7, 0.0 }
  0xc4   : > { %v947_v15 = vsel %vm828_vm2, %v9278_v11, 0.0  ;;  %v1062_v16 = vadd.f32 %v1061_v8, %v1060_v13 }
  0xc5   : > { %v9288_v17 = vsub.f32 %v804_v32, %v992_v9  ;;  %v9290_v18 = vsub.f32 %v807_v42, %v992_v9  ;;  %v843_v19 = vrot.slane %v842_v10, 2  ;;  %v948_v20 = vadd.f32 %v947_v15, %v946_v14  ;;  %v9292_v21 = vpop.f32.mrf.mxu0  ;;  %v602_v15 = vld [vmem:[%s9193_s24 + $0xb0] sm:$0xff] }
  0xc6   : > { %v1063_v23 = vrot.slane %v1062_v16, 4  ;;  %v847_v39 = vsel %vm828_vm2, %v9292_v21, 0.0 }
  0xc7   : > { %v1052_v24 = vmul.f32 %v9288_v17, %v9288_v17  ;;  %v1053_v25 = vmul.f32 %v9290_v18, %v9290_v18  ;;  %v844_v26 = vadd.f32 %v843_v19, %v842_v10  ;;  %v949_v27 = vrot.slane %v948_v20, 4 }
  0xc8   : > { %8288 = vmatmul.msk.f32.gmra.mxu0 %vm614_vm1, %v600_v22  ;;  %v1064_v28 = vadd.f32 %v1063_v23, %v1062_v16 }
  0xc9   : > { %v1168_v29 = vsel %vm828_vm2, %v1052_v24, 0.0  ;;  %v1169_v30 = vsel %vm828_vm2, %v1053_v25, 0.0  ;;  %v845_v31 = vrot.slane %v844_v26, 1  ;;  %v950_v32 = vadd.f32 %v949_v27, %v948_v20 }
  0xca   : > { %v1170_v33 = vadd.f32 %v1169_v30, %v1168_v29  ;;  %v1065_v34 = vrot.slane %v1064_v28, 2 }
  0xcb   : > { %v846_v35 = vadd.f32 %v845_v31, %v844_v26  ;;  %v951_v36 = vrot.slane %v950_v32, 2  ;;  %v9302_v37 = vpop.f32.mrf.mxu3 }
  0xcc   : > { %v1171_v38 = vrot.slane %v1170_v33, 4  ;;  %v1066_v40 = vadd.f32 %v1065_v34, %v1064_v28 }
  0xcd   : > { %v981_v41 = vmul.f32 %v9258_v54, %v846_v35  ;;  %v952_v42 = vadd.f32 %v951_v36, %v950_v32  ;;  %v9307_v43 = vpop.f32.mrf.mxu0 }
  0xce   : > { %v1172_v45 = vadd.f32 %v1171_v38, %v1170_v33  ;;  %v848_v46 = vsel %vm828_vm2, %v9307_v43, 0.0  ;;  %v1067_v48 = vrot.slane %v1066_v40, 1 }
  0xcf   : > { %v9312_v49 = vsub.f32 %v741_v61, %v981_v41  ;;  %v953_v50 = vrot.slane %v952_v42, 1  ;;  %v849_v51 = vadd.f32 %v848_v46, %v847_v39  ;;  %v9315_v52 = vsub.f32 %v9254_v47, %v981_v41 }
  0xd0   : > { %v1173_v53 = vrot.slane %v1172_v45, 2  ;;  %8289 = vmatmul.msk.f32.gmra.mxu0 %vm614_vm1, %v601_v44  ;;  %v1068_v55 = vadd.f32 %v1067_v48, %v1066_v40  ;;  %v955_v61 = vsel %vm828_vm2, %v9302_v37, 0.0 }
  0xd1   : > { %v1031_v56 = vmul.f32 %v9312_v49, %v9312_v49  ;;  %v954_v58 = vadd.f32 %v953_v50, %v952_v42  ;;  %v850_v59 = vrot.slane %v849_v51, 4  ;;  %v1030_v60 = vmul.f32 %v9315_v52, %v9315_v52  ;;  %v603_v42 = vld [vmem:[%s9193_s24 + $0xb8] sm:$0xff]  ;;  %s9037_s24 = smov 64  }
  0xd2   : > { %v1174_v62 = vadd.f32 %v1173_v53, %v1172_v45  ;;  %v1204_v47 = vmul.f32 %v1068_v55, %v9258_v54 }
  0xd3   : > { %v1070_v63 = vsel %vm828_vm2, %v1031_v56, 0.0  ;;  %v993_v1 = vmul.f32 %v9258_v54, %v954_v58  ;;  %v851_v2 = vadd.f32 %v850_v59, %v849_v51  ;;  %v9327_v4 = vpop.f32.mrf.mxu3  ;;  %v1069_v5 = vsel %vm828_vm2, %v1030_v60, 0.0 }
  0xd4   : > { %v1175_v6 = vrot.slane %v1174_v62, 1  ;;  %v956_v7 = vsel %vm828_vm2, %v9327_v4, 0.0  ;;  %v1220_v8 = vadd.f32 1e-05, %v1204_v47  ;;  %v1071_v9 = vadd.f32 %v1070_v63, %v1069_v5 }
  0xd5   : > { %v9333_v10 = vsub.f32 %v9278_v11, %v993_v1  ;;  %v852_v12 = vrot.slane %v851_v2, 2  ;;  %v957_v13 = vadd.f32 %v956_v7, %v955_v61  ;;  %v9335_v14 = vpop.f32.mrf.mxu0  ;;  %v9339_v16 = vsub.f32 %v9260_v57, %v993_v1 }
  0xd6   : > { %v1176_v19 = vadd.f32 %v1175_v6, %v1174_v62  ;;  %8811 = vrsqrt.f32 %v1220_v8  ;;  %v1072_v24 = vrot.slane %v1071_v9, 4  ;;  %v856_v38 = vsel %vm828_vm2, %v9335_v14, 0.0  ;;  %v1753_v6 = vld [vmem:[%s14043_s20 + $0x8] sm:$0xff] }
  0xd7   : > { %v1055_v20 = vmul.f32 %v9333_v10, %v9333_v10  ;;  %v853_v22 = vadd.f32 %v852_v12, %v851_v2  ;;  %v958_v23 = vrot.slane %v957_v13, 4  ;;  %v1054_v11 = vmul.f32 %v9339_v16, %v9339_v16  ;;  %8761 = vmatpush.msra.mxu3 %v1753_v6  ;;  %1848 = vmatpush.msra.mxu2 %v1753_v6 }
  0xd8   : > { %v1216_v25 = vmul.f32 %v1176_v19, %v9258_v54  ;;  %8290 = vmatmul.msk.f32.gmra.mxu0 %vm614_vm1, %v602_v15  ;;  %v1073_v28 = vadd.f32 %v1072_v24, %v1071_v9  ;;  %vm1242_vm4 = vweird.f32 %v1220_v8 }
  0xd9   : > { %v1178_v26 = vsel %vm828_vm2, %v1055_v20, 0.0  ;;  %v854_v27 = vrot.slane %v853_v22, 1  ;;  %v959_v57 = vadd.f32 %v958_v23, %v957_v13  ;;  %v1177_v30 = vsel %vm828_vm2, %v1054_v11, 0.0 }
  0xda   : > { %v9348_v29 = vadd.f32 1e-05, %v1216_v25  ;;  %v1074_v34 = vrot.slane %v1073_v28, 2  ;;  %v1179_v35 = vadd.f32 %v1178_v26, %v1177_v30 }
  0xdb   : > { %v855_v31 = vadd.f32 %v854_v27, %v853_v22  ;;  %v960_v32 = vrot.slane %v959_v57, 2  ;;  %v9351_v33 = vpop.f32.mrf.mxu3 }
  0xdc   : > { %v8812_v36 = vpop.eup %8811  ;;  %8813 = vrsqrt.f32 %v9348_v29  ;;  %v1075_v46 = vadd.f32 %v1074_v34, %v1073_v28  ;;  %v1180_v48 = vrot.slane %v1179_v35, 4  ;;  %v964_v1 = vsel %vm828_vm2, %v9351_v33, 0.0 }
  0xdd   : > { %v982_v39 = vmul.f32 %v9258_v54, %v855_v31  ;;  %v961_v40 = vadd.f32 %v960_v32, %v959_v57  ;;  %v9357_v41 = vpop.f32.mrf.mxu0  ;;  %v1237_v44 = vmul.f32 %v8812_v36, %v1220_v8  ;;  %vm1243_vm5 = vweird.f32 %v8812_v36 }
  0xde   : > { %v857_v45 = vsel %vm828_vm2, %v9357_v41, 0.0  ;;  %v1076_v56 = vrot.slane %v1075_v46, 1  ;;  %v1181_v58 = vadd.f32 %v1180_v48, %v1179_v35  ;;  %vm1244_vm6 = vmor %vm1242_vm4, %vm1243_vm5  ;;  %vm1362_vm7 = vweird.f32 %v9348_v29 }
  0xdf   : > { %v962_v50 = vrot.slane %v961_v40, 1  ;;  %v858_v51 = vadd.f32 %v857_v45, %v856_v38  ;;  %v1238_v53 = vmul.f32 %v8812_v36, %v1237_v44  ;;  %v9363_v55 = vsub.f32 %v9307_v43, %v982_v39 }
  0xe0   : > { %8291 = vmatmul.msk.f32.gmra.mxu0 %vm614_vm1, %v603_v42  ;;  %v1077_v47 = vadd.f32 %v1076_v56, %v1075_v46  ;;  %v1182_v63 = vrot.slane %v1181_v58, 2  ;;  %v9374_v7 = vsub.f32 %v9292_v21, %v982_v39 }
  0xe1   : > { %v963_v59 = vadd.f32 %v962_v50, %v961_v40  ;;  %v859_v60 = vrot.slane %v858_v51, 4  ;;  %v1239_v62 = vmul.f32 0.5, %v1238_v53  ;;  %v1033_v9 = vmul.f32 %v9363_v55, %v9363_v55 }
  0xe2   : > { %v8814_v61 = vpop.eup %8813  ;;  %v1205_v15 = vmul.f32 %v1077_v47, %v9258_v54  ;;  %v1183_v11 = vadd.f32 %v1182_v63, %v1181_v58  ;;  %v1032_v57 = vmul.f32 %v9374_v7, %v9374_v7 }
  0xe3   : > { %v860_v2 = vadd.f32 %v859_v60, %v858_v51  ;;  %v9368_v5 = vpop.f32.mrf.mxu3  ;;  %v1240_v43 = vsub.f32 1.5, %v1239_v62  ;;  %v1357_v13 = vmul.f32 %v8814_v61, %v9348_v29  ;;  %v994_v19 = vmul.f32 %v9258_v54, %v963_v59 }
  0xe4   : > { %v965_v12 = vsel %vm828_vm2, %v9368_v5, 0.0  ;;  %v9386_v25 = vadd.f32 1e-05, %v1205_v15  ;;  %v1079_v31 = vsel %vm828_vm2, %v1033_v9, 0.0  ;;  %vm1363_vm8 = vweird.f32 %v8814_v61 }
  0xe5   : > { %v861_v20 = vrot.slane %v860_v2, 2  ;;  %v966_v22 = vadd.f32 %v965_v12, %v964_v1  ;;  %v9384_v21 = vpop.f32.mrf.mxu0  ;;  %v1241_v23 = vmul.f32 %v8812_v36, %v1240_v43  ;;  %v1358_v24 = vmul.f32 %v8814_v61, %v1357_v13  ;;  %vm1364_vm9 = vmor %vm1362_vm7, %vm1363_vm8 }
  0xe6   : > { %8815 = vrsqrt.f32 %v9386_v25  ;;  %v9395_v32 = vsub.f32 %v9327_v4, %v994_v19  ;;  %v1184_v39 = vrot.slane %v1183_v11, 1  ;;  %v1078_v44 = vsel %vm828_vm2, %v1032_v57, 0.0 }
  0xe7   : > { %v862_v26 = vadd.f32 %v861_v20, %v860_v2  ;;  %v967_v8 = vrot.slane %v966_v22, 4  ;;  %v1245_v27 = vsel %vm1244_vm6, %v8812_v36, %v1241_v23  ;;  %v1359_v30 = vmul.f32 0.5, %v1358_v24 }
  0xe8   : > { %v1396_v28 = vmul.f32 %v1245_v27, %v9269_v3  ;;  %v865_v3 = vsel %vm828_vm2, %v9384_v21, 0.0  ;;  %v1397_v4 = vmul.f32 %v1245_v27, %v9267_v0  ;;  %v1185_v46 = vadd.f32 %v1184_v39, %v1183_v11 }
  0xe9   : > { %v863_v34 = vrot.slane %v862_v26, 1  ;;  %v968_v35 = vadd.f32 %v967_v8, %v966_v22  ;;  %v1360_v36 = vsub.f32 1.5, %v1359_v30  ;;  %v9406_v48 = vsub.f32 %v9302_v37, %v994_v19 }
  0xea   : > { %v9397_v38 = vmax.f32 %v1396_v28, 0.0  ;;  %v1057_v50 = vmul.f32 %v9395_v32, %v9395_v32  ;;  %v1217_v37 = vmul.f32 %v1185_v46, %v9258_v54  ;;  %v1080_v60 = vadd.f32 %v1079_v31, %v1078_v44 }
  0xeb   : > { %v864_v40 = vadd.f32 %v863_v34, %v862_v26  ;;  %v969_v42 = vrot.slane %v968_v35, 2  ;;  %v1361_v45 = vmul.f32 %v8814_v61, %v1360_v36  ;;  %v9423_v2 = vmax.f32 %v1397_v4, 0.0 }
  0xec   : > { %8300 = vmatmul.msk.f32.vlgmr.msra.gmra.mxu1 %vm828_vm2, %v9397_v38  ;;  %v8816_v58 = vpop.eup %8815  ;;  %v9426_v43 = vadd.f32 1e-05, %v1217_v37  ;;  %v1056_v6 = vmul.f32 %v9406_v48, %v9406_v48  ;;  %vm1252_vm10 = vweird.f32 %v9386_v25  ;;  %v1081_v22 = vrot.slane %v1080_v60, 4 }
  0xed   : > { %v983_v51 = vmul.f32 %v9258_v54, %v864_v40  ;;  %v970_v53 = vadd.f32 %v969_v42, %v968_v35  ;;  %v9411_v56 = vpop.f32.mrf.mxu0  ;;  %v1365_v59 = vsel %vm1364_vm9, %v8814_v61, %v1361_v45  ;;  %v1247_v29 = vmul.f32 %v8816_v58, %v9386_v25 }
  0xee   : > { %v866_v0 = vsel %vm828_vm2, %v9411_v56, 0.0  ;;  %v1420_v1 = vmul.f32 %v1365_v59, %v9288_v17  ;;  %v1187_v61 = vsel %vm828_vm2, %v1057_v50, 0.0  ;;  %8817 = vrsqrt.f32 %v9426_v43 }
  0xef   : > { %v9420_v62 = vsub.f32 %v9357_v41, %v983_v51  ;;  %v971_v47 = vrot.slane %v970_v53, 1  ;;  %v867_v63 = vadd.f32 %v866_v0, %v865_v3  ;;  %v1248_v15 = vmul.f32 %v8816_v58, %v1247_v29 }
  0xf0   : > { %v9431_v13 = vmax.f32 %v1420_v1, 0.0  ;;  %v1421_v20 = vmul.f32 %v1365_v59, %v9290_v18  ;;  %vm1253_vm11 = vweird.f32 %v8816_v58  ;;  %v1186_v24 = vsel %vm828_vm2, %v1056_v6, 0.0 }
  0xf1   : > { %v972_v9 = vadd.f32 %v971_v47, %v970_v53  ;;  %v868_v12 = vrot.slane %v867_v63, 4  ;;  %v1035_v41 = vmul.f32 %v9420_v62, %v9420_v62  ;;  %v1249_v23 = vmul.f32 0.5, %v1248_v15  ;;  %vm1254_vm12 = vmor %vm1252_vm10, %vm1253_vm11 }
  0xf2   : > { %8324 = vmatmul.msk.f32.vlgmr.msrb.gmra.mxu3 %vm828_vm2, %v9431_v13  ;;  %v9445_v11 = vsub.f32 %v9335_v14, %v983_v51  ;;  %v1082_v57 = vadd.f32 %v1081_v22, %v1080_v60  ;;  %v1188_v28 = vadd.f32 %v1187_v61, %v1186_v24  ;;  %v9462_v40 = vmax.f32 %v1421_v20, 0.0 }
  0xf3   : > { %v995_v17 = vmul.f32 %v9258_v54, %v972_v9  ;;  %v869_v19 = vadd.f32 %v868_v12, %v867_v63  ;;  %v1088_v18 = vsel %vm828_vm2, %v1035_v41, 0.0  ;;  %v1250_v30 = vsub.f32 1.5, %v1249_v23 }
  0xf4   : > { %8301 = vmatmul.msk.f32.gmra.mxu1 %vm828_vm2, %v9423_v2  ;;  %v1034_v31 = vmul.f32 %v9445_v11, %v9445_v11  ;;  %v1189_v36 = vrot.slane %v1188_v28, 4  ;;  %v8818_v39 = vpop.eup %8817  ;;  %vm1372_vm13 = vweird.f32 %v9426_v43 }
  0xf5   : > { %v9448_v26 = vsub.f32 %v9368_v5, %v995_v17  ;;  %v870_v8 = vrot.slane %v869_v19, 2  ;;  %v9450_v27 = vpop.f32.mrf.mxu0  ;;  %v9456_v34 = vsub.f32 %v9351_v33, %v995_v17  ;;  %v1083_v5 = vrot.slane %v1082_v57, 2 }
  0xf6   : > { %v1251_v42 = vmul.f32 %v8816_v58, %v1250_v30  ;;  %v1087_v3 = vsel %vm828_vm2, %v1034_v31, 0.0  ;;  %v874_v4 = vsel %vm828_vm2, %v9450_v27, 0.0  ;;  %v1367_v25 = vmul.f32 %v8818_v39, %v9426_v43 }
  0xf7   : > { %v1059_v14 = vmul.f32 %v9448_v26, %v9448_v26  ;;  %v871_v35 = vadd.f32 %v870_v8, %v869_v19  ;;  %v1058_v44 = vmul.f32 %v9456_v34, %v9456_v34  ;;  %v1084_v50 = vadd.f32 %v1083_v5, %v1082_v57 }
  0xf8   : > { %v1255_v46 = vsel %vm1254_vm12, %v8816_v58, %v1251_v42  ;;  %v1190_v51 = vadd.f32 %v1189_v36, %v1188_v28  ;;  %v1089_v53 = vadd.f32 %v1088_v18, %v1087_v3  ;;  %v1368_v37 = vmul.f32 %v8818_v39, %v1367_v25  ;;  %v1752_v42 = vld [vmem:[%s14043_s20] sm:$0xff] }
  0xf9   : > { %v1196_v33 = vsel %vm828_vm2, %v1059_v14, 0.0  ;;  %v872_v45 = vrot.slane %v871_v35, 1  ;;  %v1398_v59 = vmul.f32 %v1255_v46, %v9315_v52  ;;  %vm1373_vm14 = vweird.f32 %v8818_v39  ;;  %8762 = vmatpush.msra.mxu3 %v1752_v42  ;;  %1849 = vmatpush.msra.mxu2 %v1752_v42 }
  0xfa   : > { %8325 = vmatmul.msk.f32.gmra.mxu3 %vm828_vm2, %v9462_v40  ;;  %v1085_v60 = vrot.slane %v1084_v50, 1  ;;  %v1191_v47 = vrot.slane %v1190_v51, 2  ;;  %v1090_v63 = vrot.slane %v1089_v53, 4  ;;  %v1195_v1 = vsel %vm828_vm2, %v1058_v44, 0.0  ;;  %vm1374_vm0 = vmor %vm1372_vm13, %vm1373_vm14 }
  0xfb   : > { %v873_v0 = vadd.f32 %v872_v45, %v871_v35  ;;  %v9477_v6 = vmax.f32 %v1398_v59, 0.0  ;;  %v1369_v61 = vmul.f32 0.5, %v1368_v37  ;;  %v1399_v9 = vmul.f32 %v1255_v46, %v9312_v49 }
  0xfc   : > { %v1086_v52 = vadd.f32 %v1085_v60, %v1084_v50  ;;  %v1192_v41 = vadd.f32 %v1191_v47, %v1190_v51  ;;  %v1091_v15 = vadd.f32 %v1090_v63, %v1089_v53  ;;  %v1197_v22 = vadd.f32 %v1196_v33, %v1195_v1 }
  0xfd   : > { %v984_v29 = vmul.f32 %v9258_v54, %v873_v0  ;;  %v9479_v58 = vpop.f32.mrf.mxu0  ;;  %8302 = vmatmul.msk.f32.gmra.mxu1 %vm828_vm2, %v9477_v6  ;;  %v1370_v20 = vsub.f32 1.5, %v1369_v61  ;;  %v9502_v36 = vmax.f32 %v1399_v9, 0.0  ;;  %v1709_v47 = vrot.slane %v9462_v40, 7 }
  0xfe   : > { %v875_v12 = vsel %vm828_vm2, %v9479_v58, 0.0  ;;  %v1206_v23 = vmul.f32 %v1086_v52, %v9258_v54  ;;  %v1193_v24 = vrot.slane %v1192_v41, 1  ;;  %v1092_v49 = vrot.slane %v1091_v15, 2 }
  0xff   : > { %v9485_v17 = vsub.f32 %v9411_v56, %v984_v29  ;;  %v876_v19 = vadd.f32 %v875_v12, %v874_v4  ;;  %v9491_v8 = vsub.f32 %v9384_v21, %v984_v29  ;;  %v1371_v56 = vmul.f32 %v8818_v39, %v1370_v20 }
 0x100   : > { %v1198_v18 = vrot.slane %v1197_v22, 4  ;;  %v9498_v30 = vadd.f32 1e-05, %v1206_v23  ;;  %v1194_v31 = vadd.f32 %v1193_v24, %v1192_v41  ;;  %v1093_v14 = vadd.f32 %v1092_v49, %v1091_v15 }
 0x101   : > { %v1037_v57 = vmul.f32 %v9485_v17, %v9485_v17  ;;  %v877_v28 = vrot.slane %v876_v19, 4  ;;  %v1036_v35 = vmul.f32 %v9491_v8, %v9491_v8  ;;  %v1375_v21 = vsel %vm1374_vm0, %v8818_v39, %v1371_v56 }
 0x102   : > { %v1199_v3 = vadd.f32 %v1198_v18, %v1197_v22  ;;  %v1422_v43 = vmul.f32 %v1375_v21, %v9339_v16  ;;  %v1423_v33 = vmul.f32 %v1375_v21, %v9333_v10  ;;  %8819 = vrsqrt.f32 %v9498_v30 }
 0x103   : > { %v878_v5 = vadd.f32 %v877_v28, %v876_v19  ;;  %v1097_v44 = vsel %vm828_vm2, %v1037_v57, 0.0  ;;  %v1218_v39 = vmul.f32 %v1194_v31, %v9258_v54  ;;  %v1094_v25 = vrot.slane %v1093_v14, 1 }
 0x104   : > { %v1200_v46 = vrot.slane %v1199_v3, 2  ;;  %v9514_v50 = vmax.f32 %v1422_v43, 0.0  ;;  %v9516_v51 = vmax.f32 %v1423_v33, 0.0  ;;  %v1096_v53 = vsel %vm828_vm2, %v1036_v35, 0.0 }
 0x105   : > { %v879_v45 = vrot.slane %v878_v5, 2  ;;  %v9511_v4 = vpop.f32.mrf.mxu0  ;;  %v1708_v16 = vrot.slane %v9431_v13, 7  ;;  %8303 = vmatmul.msk.f32.gmra.mxu1 %vm828_vm2, %v9502_v36  ;;  %v9522_v0 = vadd.f32 1e-05, %v1218_v39  ;;  %v1095_v59 = vadd.f32 %v1094_v25, %v1093_v14 }
 0x106   : > { %v1201_v37 = vadd.f32 %v1200_v46, %v1199_v3  ;;  %8326 = vmatmul.msk.f32.gmra.mxu3 %vm828_vm2, %v9514_v50  ;;  %v1098_v60 = vadd.f32 %v1097_v44, %v1096_v53  ;;  %v1711_v63 = vrot.slane %v9514_v50, 7  ;;  %v1712_v1 = vrot.slane %v9516_v51, 7 }
 0x107   : > { %v880_v10 = vadd.f32 %v879_v45, %v878_v5  ;;  %8821 = vrsqrt.f32 %v9522_v0  ;;  %v1207_v61 = vmul.f32 %v1095_v59, %v9258_v54  ;;  %v9534_v41 = vsel %vm1671_vm15, %v1708_v16, %v1709_v47 }
 0x108   : > { %v8820_v9 = vpop.eup %8819  ;;  %v1202_v12 = vrot.slane %v1201_v37, 1  ;;  %v1099_v52 = vrot.slane %v1098_v60, 4  ;;  %v883_v22 = vsel %vm828_vm2, %v9511_v4, 0.0  ;;  %v9544_v49 = vsel %vm1671_vm15, %v1711_v63, %v1712_v1 }
 0x109   : > { %v881_v29 = vrot.slane %v880_v10, 1  ;;  %v1257_v19 = vmul.f32 %v8820_v9, %v9498_v30  ;;  %v9537_v20 = vadd.f32 1e-05, %v1207_v61  ;;  %vm1262_vm1 = vweird.f32 %v9498_v30 }
 0x10a   : > { %v1203_v23 = vadd.f32 %v1202_v12, %v1201_v37  ;;  %v1100_v24 = vadd.f32 %v1099_v52, %v1098_v60  ;;  %vm1263_vm4 = vweird.f32 %v8820_v9  ;;  %vm1382_vm5 = vweird.f32 %v9522_v0 }
 0x10b   : > { %v882_v15 = vadd.f32 %v881_v29, %v880_v10  ;;  %v1258_v28 = vmul.f32 %v8820_v9, %v1257_v19  ;;  %8823 = vrsqrt.f32 %v9537_v20  ;;  %vm1264_vm6 = vmor %vm1262_vm1, %vm1263_vm4  ;;  %v1672_v46 = vrot.slane %v9397_v38, 7 }
 0x10c   : > { %v1219_v31 = vmul.f32 %v1203_v23, %v9258_v54  ;;  %v1101_v14 = vrot.slane %v1100_v24, 2  ;;  %v2016_v53 = vrot.slane %v9431_v13, 1  ;;  %v14023_v47 = vrot.slane %v9462_v40, 1 }
 0x10d   : > { %v985_v57 = vmul.f32 %v9258_v54, %v882_v15  ;;  %v9548_v56 = vpop.f32.mrf.mxu0  ;;  %v8822_v35 = vpop.eup %8821  ;;  %v1259_v21 = vmul.f32 0.5, %v1258_v28  ;;  %v1736_v30 = vsel %vm1671_vm15, 0.0, %v1672_v46  ;;  %vm1272_vm8 = vweird.f32 %v9537_v20 }
 0x10e   : > { %v884_v18 = vsel %vm828_vm2, %v9548_v56, 0.0  ;;  %8327 = vmatmul.msk.f32.gmra.mxu3 %vm828_vm2, %v9516_v51  ;;  %v1377_v44 = vmul.f32 %v8822_v35, %v9522_v0  ;;  %v9564_v43 = vadd.f32 1e-05, %v1219_v31  ;;  %v1102_v33 = vadd.f32 %v1101_v14, %v1100_v24  ;;  %8332 = vmatmul.msk.f32.vlgmr.msra.gmra.mxu2 %vm828_vm2, %v1736_v30 }
 0x10f   : > { %v9555_v5 = vsub.f32 %v9479_v58, %v985_v57  ;;  %v885_v42 = vadd.f32 %v884_v18, %v883_v22  ;;  %v9558_v3 = vsub.f32 %v9450_v27, %v985_v57  ;;  %v1260_v58 = vsub.f32 1.5, %v1259_v21 }
 0x110   : > { %v1378_v27 = vmul.f32 %v8822_v35, %v1377_v44  ;;  %8825 = vrsqrt.f32 %v9564_v43  ;;  %v1103_v60 = vrot.slane %v1102_v33, 1  ;;  %vm1383_vm7 = vweird.f32 %v8822_v35 }
 0x111   : > { %v1039_v45 = vmul.f32 %v9555_v5, %v9555_v5  ;;  %v886_v39 = vrot.slane %v885_v42, 4  ;;  %v1038_v25 = vmul.f32 %v9558_v3, %v9558_v3  ;;  %v8824_v10 = vpop.eup %8823  ;;  %v1261_v59 = vmul.f32 %v8820_v9, %v1260_v58  ;;  %vm1384_vm10 = vmor %vm1382_vm5, %vm1383_vm7 }
 0x112   : > { %v1379_v29 = vmul.f32 0.5, %v1378_v27  ;;  %v1267_v61 = vmul.f32 %v8824_v10, %v9537_v20  ;;  %v1104_v19 = vadd.f32 %v1103_v60, %v1102_v33  ;;  %vm1273_vm9 = vweird.f32 %v8824_v10 }
 0x113   : > { %v887_v37 = vadd.f32 %v886_v39, %v885_v42  ;;  %v1106_v1 = vsel %vm828_vm2, %v1039_v45, 0.0  ;;  %v1265_v12 = vsel %vm1264_vm6, %v8820_v9, %v1261_v59  ;;  %v1105_v22 = vsel %vm828_vm2, %v1038_v25, 0.0  ;;  %vm1274_vm11 = vmor %vm1272_vm8, %vm1273_vm9 }
 0x114   : > { %v1400_v23 = vmul.f32 %v1265_v12, %v9374_v7  ;;  %v1380_v24 = vsub.f32 1.5, %v1379_v29  ;;  %v1268_v28 = vmul.f32 %v8824_v10, %v1267_v61  ;;  %v1208_v18 = vmul.f32 %v1104_v19, %v9258_v54 }
 0x115   : > { %v888_v52 = vrot.slane %v887_v37, 2  ;;  %v9580_v15 = vpop.f32.mrf.mxu0  ;;  %v1107_v31 = vadd.f32 %v1106_v1, %v1105_v22  ;;  %v9592_v42 = vsel %vm1979_vm3, %v2016_v53, %v14023_v47  ;;  %v1401_v44 = vmul.f32 %v1265_v12, %v9363_v55 }
 0x116   : > { %v8826_v9 = vpop.eup %8825  ;;  %v9587_v14 = vmax.f32 %v1400_v23, 0.0  ;;  %v1381_v21 = vmul.f32 %v8822_v35, %v1380_v24  ;;  %v1269_v33 = vmul.f32 0.5, %v1268_v28  ;;  %v9600_v39 = vadd.f32 1e-05, %v1208_v18 }
 0x117   : > { %v889_v57 = vadd.f32 %v888_v52, %v887_v37  ;;  %v1387_v45 = vmul.f32 %v8826_v9, %v9564_v43  ;;  %v1673_v25 = vrot.slane %v9423_v2, 7  ;;  %v1108_v27 = vrot.slane %v1107_v31, 4 }
 0x118   : > { %8304 = vmatmul.msk.f32.gmra.mxu1 %vm828_vm2, %v9587_v14  ;;  %v1385_v58 = vsel %vm1384_vm10, %v8822_v35, %v1381_v21  ;;  %v1270_v37 = vsub.f32 1.5, %v1269_v33  ;;  %v892_v0 = vsel %vm828_vm2, %v9580_v15, 0.0  ;;  %8827 = vrsqrt.f32 %v9600_v39 }
 0x119   : > { %v890_v7 = vrot.slane %v889_v57, 1  ;;  %v1424_v59 = vmul.f32 %v1385_v58, %v9406_v48  ;;  %v1388_v55 = vmul.f32 %v8826_v9, %v1387_v45  ;;  %v1674_v35 = vsel %vm1671_vm15, %v1672_v46, %v1673_v25  ;;  %v2061_v45 = vld [vmem:[%s14044_s4 + $0x8] sm:$0xff] }
 0x11a   : > { %v1271_v29 = vmul.f32 %v8824_v10, %v1270_v37  ;;  %8333 = vmatmul.msk.f32.gmra.mxu2 %vm828_vm2, %v1674_v35  ;;  %v9617_v48 = vmax.f32 %v1401_v44, 0.0  ;;  %v1109_v12 = vadd.f32 %v1108_v27, %v1107_v31  ;;  %v1980_v23 = vrot.slane %v9397_v38, 1  ;;  %2156 = vmatpush.msrb.mxu3 %v2061_v45 }
 0x11b   : > { %v891_v53 = vadd.f32 %v890_v7, %v889_v57  ;;  %v9612_v1 = vmax.f32 %v1424_v59, 0.0  ;;  %v1389_v30 = vmul.f32 0.5, %v1388_v55  ;;  %vm1393_vm12 = vweird.f32 %v8826_v9 }
 0x11c   : > { %v1275_v46 = vsel %vm1274_vm11, %v8824_v10, %v1271_v29  ;;  %v1110_v57 = vrot.slane %v1109_v12, 2  ;;  %v1425_v18 = vmul.f32 %v1385_v58, %v9395_v32  ;;  %vm1392_vm13 = vweird.f32 %v9564_v43 }
 0x11d   : > { %v986_v60 = vmul.f32 %v9258_v54, %v891_v53  ;;  %v9614_v61 = vpop.f32.mrf.mxu0  ;;  %8328 = vmatmul.msk.f32.gmra.mxu3 %vm828_vm2, %v9612_v1  ;;  %v1390_v24 = vsub.f32 1.5, %v1389_v30  ;;  %v1675_v38 = vrot.slane %v9477_v6, 7  ;;  %v1981_v7 = vrot.slane %v9423_v2, 1  ;;  %vm1394_vm14 = vmor %vm1392_vm13, %vm1393_vm12 }
 0x11e   : > { %v893_v20 = vsel %vm828_vm2, %v9614_v61, 0.0  ;;  %v8828_v21 = vpop.eup %8827  ;;  %v1111_v43 = vadd.f32 %v1110_v57, %v1109_v12  ;;  %v9651_v27 = vmax.f32 %v1425_v18, 0.0  ;;  %vm1282_vm0 = vweird.f32 %v9600_v39 }
 0x11f   : > { %v9622_v52 = vsub.f32 %v9548_v56, %v986_v60  ;;  %v894_v19 = vadd.f32 %v893_v20, %v892_v0  ;;  %v9627_v22 = vsub.f32 %v9511_v4, %v986_v60  ;;  %v1402_v4 = vmul.f32 %v1275_v46, %v9445_v11 }
 0x120   : > { %8305 = vmatmul.msk.f32.gmra.mxu1 %vm828_vm2, %v9617_v48  ;;  %v1391_v10 = vmul.f32 %v8826_v9, %v1390_v24  ;;  %v1277_v33 = vmul.f32 %v8828_v21, %v9600_v39  ;;  %v1737_v11 = vsel %vm1671_vm15, 0.0, %v1675_v38  ;;  %v1112_v55 = vrot.slane %v1111_v43, 1 }
 0x121   : > { %v1041_v28 = vmul.f32 %v9622_v52, %v9622_v52  ;;  %v895_v56 = vrot.slane %v894_v19, 4  ;;  %v1040_v31 = vmul.f32 %v9627_v22, %v9627_v22  ;;  %v9656_v0 = vmax.f32 %v1402_v4, 0.0 }
 0x122   : > { %v1395_v58 = vsel %vm1394_vm14, %v8826_v9, %v1391_v10  ;;  %v1278_v37 = vmul.f32 %v8828_v21, %v1277_v33  ;;  %8334 = vmatmul.msk.f32.gmra.mxu2 %vm828_vm2, %v1737_v11  ;;  %vm1283_vm1 = vweird.f32 %v8828_v21  ;;  %v1113_v20 = vadd.f32 %v1112_v55, %v1111_v43 }
 0x123   : > { %v1115_v44 = vsel %vm828_vm2, %v1041_v28, 0.0  ;;  %v896_v32 = vadd.f32 %v895_v56, %v894_v19  ;;  %v1114_v25 = vsel %vm828_vm2, %v1040_v31, 0.0  ;;  %v1426_v60 = vmul.f32 %v1395_v58, %v9456_v34  ;;  %vm1284_vm4 = vmor %vm1282_vm0, %vm1283_vm1 }
 0x124   : > { %v1116_v9 = vadd.f32 %v1115_v44, %v1114_v25  ;;  %v1279_v29 = vmul.f32 0.5, %v1278_v37  ;;  %v9665_v12 = vsel %vm1979_vm3, %v1980_v23, %v1981_v7  ;;  %v1403_v24 = vmul.f32 %v1275_v46, %v9420_v62 }
 0x125   : > { %v897_v53 = vrot.slane %v896_v32, 2  ;;  %v9653_v59 = vpop.f32.mrf.mxu0  ;;  %8329 = vmatmul.msk.f32.gmra.mxu3 %vm828_vm2, %v9651_v27  ;;  %v1209_v34 = vmul.f32 %v1113_v20, %v9258_v54  ;;  %v9671_v56 = vmax.f32 %v1426_v60, 0.0  ;;  %v2019_v46 = vrot.slane %v9514_v50, 1 }
 0x126   : > { %v1117_v30 = vrot.slane %v1116_v9, 4  ;;  %v1280_v57 = vsub.f32 1.5, %v1279_v29  ;;  %v901_v31 = vsel %vm828_vm2, %v9653_v59, 0.0  ;;  %v14022_v10 = vrot.slane %v9516_v51, 1 }
 0x127   : > { %v898_v35 = vadd.f32 %v897_v53, %v896_v32  ;;  %v9677_v23 = vadd.f32 1e-05, %v1209_v34  ;;  %v9682_v32 = vmax.f32 %v1403_v24, 0.0  ;;  %v2022_v45 = vrot.slane %v9612_v1, 1 }
 0x128   : > { %8306 = vmatmul.msk.f32.gmra.mxu1 %vm828_vm2, %v9656_v0  ;;  %v1118_v28 = vadd.f32 %v1117_v30, %v1116_v9  ;;  %v1281_v4 = vmul.f32 %v8828_v21, %v1280_v57  ;;  %v14021_v43 = vrot.slane %v9651_v27, 1  ;;  %v1427_v53 = vmul.f32 %v1395_v58, %v9448_v26 }
 0x129   : > { %v899_v19 = vrot.slane %v898_v35, 1  ;;  %8829 = vrsqrt.f32 %v9677_v23  ;;  %v1676_v26 = vrot.slane %v9502_v36, 7  ;;  %vm1292_vm5 = vweird.f32 %v9677_v23 }
 0x12a   : > { %v1119_v62 = vrot.slane %v1118_v28, 2  ;;  %v1285_v11 = vsel %vm1284_vm4, %v8828_v21, %v1281_v4  ;;  %v9703_v21 = vsel %vm1979_vm3, %v2019_v46, %v14022_v10  ;;  %v9716_v58 = vsel %vm1979_vm3, %v2022_v45, %v14021_v43 }
 0x12b   : > { %v900_v18 = vadd.f32 %v899_v19, %v898_v35  ;;  %v9719_v30 = vmax.f32 %v1427_v53, 0.0  ;;  %v1677_v57 = vsel %vm1671_vm15, %v1675_v38, %v1676_v26 }
 0x12c   : > { %v1120_v55 = vadd.f32 %v1119_v62, %v1118_v28  ;;  %v1983_v28 = vrot.slane %v9477_v6, 1  ;;  %8335 = vmatmul.msk.f32.gmra.mxu2 %vm828_vm2, %v1677_v57 }
 0x12d   : > { %v987_v44 = vmul.f32 %v9258_v54, %v900_v18  ;;  %v9684_v33 = vpop.f32.mrf.mxu0  ;;  %8330 = vmatmul.msk.f32.gmra.mxu3 %vm828_vm2, %v9671_v56  ;;  %v1984_v18 = vrot.slane %v9502_v36, 1 }
 0x12e   : > { %v902_v39 = vsel %vm828_vm2, %v9684_v33, 0.0  ;;  %v1121_v29 = vrot.slane %v1120_v55, 1 }
 0x12f   : > { %v9692_v25 = vsub.f32 %v9614_v61, %v987_v44  ;;  %v903_v37 = vadd.f32 %v902_v39, %v901_v31  ;;  %v9698_v9 = vsub.f32 %v9580_v15, %v987_v44  ;;  %v1404_v61 = vmul.f32 %v1285_v11, %v9491_v8  ;;  %v8830_v24 = vpop.eup %8829 }
 0x130   : > { %8307 = vmatmul.msk.f32.gmra.mxu1 %vm828_vm2, %v9682_v32  ;;  %v1122_v19 = vadd.f32 %v1121_v29, %v1120_v55  ;;  %v1287_v46 = vmul.f32 %v8830_v24, %v9677_v23  ;;  %v1678_v44 = vrot.slane %v9587_v14, 7  ;;  %v9738_v6 = vsel %vm1979_vm3, %v1983_v28, %v1984_v18 }
 0x131   : > { %v1043_v35 = vmul.f32 %v9692_v25, %v9692_v25  ;;  %v904_v60 = vrot.slane %v903_v37, 4  ;;  %v1042_v15 = vmul.f32 %v9698_v9, %v9698_v9  ;;  %v9727_v31 = vmax.f32 %v1404_v61, 0.0 }
 0x132   : > { %v1210_v45 = vmul.f32 %v1122_v19, %v9258_v54  ;;  %v1288_v53 = vmul.f32 %v8830_v24, %v1287_v46  ;;  %v14020_v55 = vrot.slane %v9719_v30, 1  ;;  %vm1293_vm6 = vweird.f32 %v8830_v24 }
 0x133   : > { %v1124_v20 = vsel %vm828_vm2, %v1043_v35, 0.0  ;;  %v905_v8 = vadd.f32 %v904_v60, %v903_v37  ;;  %v1123_v34 = vsel %vm828_vm2, %v1042_v15, 0.0  ;;  %v2025_v37 = vrot.slane %v9671_v56, 1  ;;  %vm1294_vm7 = vmor %vm1292_vm5, %vm1293_vm6 }
 0x134   : > { %v1125_v38 = vadd.f32 %v1124_v20, %v1123_v34  ;;  %v9745_v35 = vadd.f32 1e-05, %v1210_v45  ;;  %v1289_v29 = vmul.f32 0.5, %v1288_v53  ;;  %v1405_v15 = vmul.f32 %v1285_v11, %v9485_v17 }
 0x135   : > { %v906_v4 = vrot.slane %v905_v8, 2  ;;  %v9729_v62 = vpop.f32.mrf.mxu0  ;;  %8331 = vmatmul.msk.f32.gmra.mxu3 %vm828_vm2, %v9719_v30  ;;  %v9750_v26 = vsel %vm1979_vm3, %v2025_v37, %v14020_v55  ;;  %v1738_v20 = vsel %vm1671_vm15, 0.0, %v1678_v44  ;;  %v1748_v17 = vsel %vm1671_vm15, 0.0, %v1708_v16 }
 0x136   : > { %v1126_v61 = vrot.slane %v1125_v38, 4  ;;  %8831 = vrsqrt.f32 %v9745_v35  ;;  %v1290_v57 = vsub.f32 1.5, %v1289_v29  ;;  %v910_v34 = vsel %vm828_vm2, %v9729_v62, 0.0  ;;  %8336 = vmatmul.msk.f32.gmra.mxu2 %vm828_vm2, %v1738_v20 }
 0x137   : > { %v907_v39 = vadd.f32 %v906_v4, %v905_v8  ;;  %v9768_v11 = vmax.f32 %v1405_v15, 0.0  ;;  %v1679_v20 = vrot.slane %v9617_v48, 7  ;;  %vm1302_vm8 = vweird.f32 %v9745_v35 }
 0x138   : > { %8308 = vmatmul.msk.f32.gmra.mxu1 %vm828_vm2, %v9727_v31  ;;  %v1127_v8 = vadd.f32 %v1126_v61, %v1125_v38  ;;  %v1291_v46 = vmul.f32 %v8830_v24, %v1290_v57 }
 0x139   : > { %v908_v60 = vrot.slane %v907_v39, 1  ;;  %v1993_v43 = vrot.slane %v9768_v11, 1 }
 0x13a   : > { %v1128_v28 = vrot.slane %v1127_v8, 2  ;;  %v1295_v53 = vsel %vm1294_vm7, %v8830_v24, %v1291_v46 }
 0x13b   : > { %v909_v19 = vadd.f32 %v908_v60, %v907_v39 }
 0x13c   : > { %v1129_v39 = vadd.f32 %v1128_v28, %v1127_v8  ;;  %v8832_v61 = vpop.eup %8831 }
 0x13d   : > { %v988_v4 = vmul.f32 %v9258_v54, %v909_v19  ;;  %v9762_v45 = vpop.f32.mrf.mxu0  ;;  %8356 = vmatmul.msk.f32.vlgmr.msra.gmra.mxu3 %vm828_vm2, %v1748_v17  ;;  %v1297_v15 = vmul.f32 %v8832_v61, %v9745_v35  ;;  %vm1303_vm9 = vweird.f32 %v8832_v61 }
 0x13e   : > { %v911_v38 = vsel %vm828_vm2, %v9762_v45, 0.0  ;;  %v1130_v60 = vrot.slane %v1129_v39, 1  ;;  %vm1304_vm10 = vmor %vm1302_vm8, %vm1303_vm9 }
 0x13f   : > { %v9773_v23 = vsub.f32 %v9684_v33, %v988_v4  ;;  %v912_v37 = vadd.f32 %v911_v38, %v910_v34  ;;  %v9777_v29 = vsub.f32 %v9653_v59, %v988_v4  ;;  %v1406_v33 = vmul.f32 %v1295_v53, %v9558_v3  ;;  %v2060_v59 = vld [vmem:[%s14044_s4] sm:$0xff]  ;;  %s8987_s4 = scalar_lea.hbm %s8986_s0, 256 }
 0x140   : > { %8309 = vmatmul.msk.f32.gmra.mxu1 %vm828_vm2, %v9768_v11  ;;  %v1131_v24 = vadd.f32 %v1130_v60, %v1129_v39  ;;  %v1298_v57 = vmul.f32 %v8832_v61, %v1297_v15  ;;  %v1680_v34 = vsel %vm1671_vm15, %v1678_v44, %v1679_v20  ;;  %2157 = vmatpush.msrb.mxu3 %v2060_v59  ;;  %v1986_v3 = vrot.slane %v9587_v14, 1  ;;  %p8988_p11 = scmp.ne.s32.totalorder %s8986_s0, %s8987_s4 }
 0x141   : > { %v1045_v13 = vmul.f32 %v9773_v23, %v9773_v23  ;;  %v913_v16 = vrot.slane %v912_v37, 4  ;;  %v1044_v4 = vmul.f32 %v9777_v29, %v9777_v29  ;;  %8337 = vmatmul.msk.f32.gmra.mxu2 %vm828_vm2, %v1680_v34  ;;  %v1987_v39 = vrot.slane %v9617_v48, 1 }
 0x142   : > { %v1211_v28 = vmul.f32 %v1131_v24, %v9258_v54  ;;  %v1299_v38 = vmul.f32 0.5, %v1298_v57  ;;  %v1681_v44 = vrot.slane %v9656_v0, 7  ;;  %p8989_p12 = pnand %p8988_p11, %p9173_p5 }
 0x143   : > { %v1133_v8 = vsel %vm828_vm2, %v1045_v13, 0.0  ;;  %v914_v19 = vadd.f32 %v913_v16, %v912_v37  ;;  %v9799_v37 = vmax.f32 %v1406_v33, 0.0  ;;  %v1132_v13 = vsel %vm828_vm2, %v1044_v4, 0.0 }
 0x144   : > { %v9802_v60 = vadd.f32 1e-05, %v1211_v28  ;;  %v1300_v16 = vsub.f32 1.5, %v1299_v38  ;;  %v1134_v15 = vadd.f32 %v1133_v8, %v1132_v13  ;;  %v9810_v20 = vsel %vm1979_vm3, %v1986_v3, %v1987_v39  ;;  %p8990_p13 = pneg %p8989_p12 }
 0x145   : > { %v915_v46 = vrot.slane %v914_v19, 2  ;;  %v9795_v17 = vpop.f32.mrf.mxu0  ;;  %8357 = vmatmul.msk.f32.gmra.mxu3 %vm828_vm2, %v9534_v41  ;;  %v1407_v41 = vmul.f32 %v1295_v53, %v9555_v5  ;;  %v1739_v8 = vsel %vm1671_vm15, 0.0, %v1681_v44  ;;  %v1749_v5 = vsel %vm1671_vm15, 0.0, %v1711_v63 }
 0x146   : > { %8833 = vrsqrt.f32 %v9802_v60  ;;  %v1135_v24 = vrot.slane %v1134_v15, 4  ;;  %v919_v34 = vsel %vm828_vm2, %v9795_v17, 0.0  ;;  %vm1312_vm11 = vweird.f32 %v9802_v60 }
 0x147   : > { %v916_v14 = vadd.f32 %v915_v46, %v914_v19  ;;  %v1301_v19 = vmul.f32 %v8832_v61, %v1300_v16  ;;  %v9827_v53 = vmax.f32 %v1407_v41, 0.0 }
 0x148   : > { %8310 = vmatmul.msk.f32.gmra.mxu1 %vm828_vm2, %v9799_v37  ;;  %v1136_v59 = vadd.f32 %v1135_v24, %v1134_v15 }
 0x149   : > { %v917_v33 = vrot.slane %v916_v14, 1  ;;  %8338 = vmatmul.msk.f32.gmra.mxu2 %vm828_vm2, %v1739_v8  ;;  %v1305_v46 = vsel %vm1304_vm10, %v8832_v61, %v1301_v19 }
 0x14a   : > { %v1137_v4 = vrot.slane %v1136_v59, 2  ;;  %v1408_v63 = vmul.f32 %v1305_v46, %v9627_v22 }
 0x14b   : > { %v918_v57 = vadd.f32 %v917_v33, %v916_v14 }
 0x14c   : > { %v8834_v3 = vpop.eup %8833  ;;  %v1138_v15 = vadd.f32 %v1137_v4, %v1136_v59  ;;  %v9851_v4 = vmax.f32 %v1408_v63, 0.0 }
 0x14d   : > { %v989_v35 = vmul.f32 %v9258_v54, %v918_v57  ;;  %v9821_v28 = vpop.f32.mrf.mxu0  ;;  %8358 = vmatmul.msk.f32.gmra.mxu3 %vm828_vm2, %v1749_v5  ;;  %v1307_v16 = vmul.f32 %v8834_v3, %v9802_v60  ;;  %vm1313_vm12 = vweird.f32 %v8834_v3 }
 0x14e   : > { %v920_v38 = vsel %vm828_vm2, %v9821_v28, 0.0  ;;  %v1139_v41 = vrot.slane %v1138_v15, 1  ;;  %vm1314_vm13 = vmor %vm1312_vm11, %vm1313_vm12 }
 0x14f   : > { %v9832_v13 = vsub.f32 %v9762_v45, %v989_v35  ;;  %v921_v14 = vadd.f32 %v920_v38, %v919_v34  ;;  %v9837_v33 = vsub.f32 %v9729_v62, %v989_v35  ;;  %v1308_v24 = vmul.f32 %v8834_v3, %v1307_v16 }
 0x150   : > { %8311 = vmatmul.msk.f32.gmra.mxu1 %vm828_vm2, %v9827_v53  ;;  %v1682_v45 = vrot.slane %v9682_v32, 7  ;;  %v1140_v34 = vadd.f32 %v1139_v41, %v1138_v15  ;;  %v1989_v35 = vrot.slane %v9656_v0, 1 }
 0x151   : > { %v1047_v50 = vmul.f32 %v9832_v13, %v9832_v13  ;;  %v922_v61 = vrot.slane %v921_v14, 4  ;;  %v1046_v19 = vmul.f32 %v9837_v33, %v9837_v33  ;;  %v1309_v57 = vmul.f32 0.5, %v1308_v24 }
 0x152   : > { %v1683_v59 = vsel %vm1671_vm15, %v1681_v44, %v1682_v45  ;;  %v1990_v44 = vrot.slane %v9682_v32, 1  ;;  %v1714_v45 = vrot.slane %v9612_v1, 7 }
 0x153   : > { %v1142_v8 = vsel %vm828_vm2, %v1047_v50, 0.0  ;;  %v923_v62 = vadd.f32 %v922_v61, %v921_v14  ;;  %v1141_v22 = vsel %vm828_vm2, %v1046_v19, 0.0  ;;  %8339 = vmatmul.msk.f32.gmra.mxu2 %vm828_vm2, %v1683_v59  ;;  %v1310_v55 = vsub.f32 1.5, %v1309_v57 }
 0x154   : > { %v1143_v16 = vadd.f32 %v1142_v8, %v1141_v22  ;;  %v1684_v50 = vrot.slane %v9727_v31, 7  ;;  %v1212_v14 = vmul.f32 %v1140_v34, %v9258_v54  ;;  %v9867_v61 = vsel %vm1979_vm3, %v1989_v35, %v1990_v44 }
 0x155   : > { %v924_v5 = vrot.slane %v923_v62, 2  ;;  %v9853_v38 = vpop.f32.mrf.mxu0  ;;  %8359 = vmatmul.msk.f32.gmra.mxu3 %vm828_vm2, %v9544_v49  ;;  %v1409_v49 = vmul.f32 %v1305_v46, %v9622_v52  ;;  %v1311_v19 = vmul.f32 %v8834_v3, %v1310_v55  ;;  %v1750_v1 = vsel %vm1671_vm15, 0.0, %v1714_v45 }
 0x156   : > { %v1144_v0 = vrot.slane %v1143_v16, 4  ;;  %v9862_v63 = vadd.f32 1e-05, %v1212_v14  ;;  %v1740_v60 = vsel %vm1671_vm15, 0.0, %v1684_v50  ;;  %v928_v57 = vsel %vm828_vm2, %v9853_v38, 0.0 }
 0x157   : > { %v925_v15 = vadd.f32 %v924_v5, %v923_v62  ;;  %v9882_v55 = vmax.f32 %v1409_v49, 0.0  ;;  %v1315_v46 = vsel %vm1314_vm13, %v8834_v3, %v1311_v19  ;;  %v1685_v35 = vrot.slane %v9768_v11, 7 }
 0x158   : > { %v1145_v41 = vadd.f32 %v1144_v0, %v1143_v16  ;;  %8312 = vmatmul.msk.f32.gmra.mxu1 %vm828_vm2, %v9851_v4  ;;  %8835 = vrsqrt.f32 %v9862_v63  ;;  %v1715_v3 = vrot.slane %v9651_v27, 7  ;;  %vm1322_vm14 = vweird.f32 %v9862_v63 }
 0x159   : > { %v926_v24 = vrot.slane %v925_v15, 1  ;;  %v1686_v19 = vsel %vm1671_vm15, %v1684_v50, %v1685_v35  ;;  %vm2287_vm13 = vcmask 261120  }
 0x15a   : > { %v1146_v62 = vrot.slane %v1145_v41, 2 }
 0x15b   : > { %v927_v8 = vadd.f32 %v926_v24, %v925_v15  ;;  %8340 = vmatmul.msk.f32.gmra.mxu2 %vm828_vm2, %v1740_v60 }
 0x15c   : > { %v1147_v52 = vadd.f32 %v1146_v62, %v1145_v41 }
 0x15d   : > { %v990_v59 = vmul.f32 %v9258_v54, %v927_v8  ;;  %v9879_v34 = vpop.f32.mrf.mxu0  ;;  %8360 = vmatmul.msk.f32.gmra.mxu3 %vm828_vm2, %v1750_v1 }
 0x15e   : > { %v929_v22 = vsel %vm828_vm2, %v9879_v34, 0.0  ;;  %v1148_v14 = vrot.slane %v1147_v52, 1  ;;  %v8836_v0 = vpop.eup %8835 }
 0x15f   : > { %v9888_v5 = vsub.f32 %v9821_v28, %v990_v59  ;;  %v930_v16 = vadd.f32 %v929_v22, %v928_v57  ;;  %v9892_v15 = vsub.f32 %v9795_v17, %v990_v59  ;;  %v1317_v49 = vmul.f32 %v8836_v0, %v9862_v63 }
 0x160   : > { %8313 = vmatmul.msk.f32.gmra.mxu1 %vm828_vm2, %v9882_v55  ;;  %v1410_v28 = vmul.f32 %v1315_v46, %v9698_v9  ;;  %v1149_v60 = vadd.f32 %v1148_v14, %v1147_v52  ;;  %v1992_v59 = vrot.slane %v9727_v31, 1  ;;  %v1716_v9 = vsel %vm1671_vm15, %v1714_v45, %v1715_v3 }
 0x161   : > { %v1049_v24 = vmul.f32 %v9888_v5, %v9888_v5  ;;  %v931_v41 = vrot.slane %v930_v16, 4  ;;  %v1048_v17 = vmul.f32 %v9892_v15, %v9892_v15  ;;  %v1318_v57 = vmul.f32 %v8836_v0, %v1317_v49 }
 0x162   : > { %v1213_v1 = vmul.f32 %v1149_v60, %v9258_v54  ;;  %v9911_v35 = vmax.f32 %v1410_v28, 0.0  ;;  %v9919_v31 = vsel %vm1979_vm3, %v1992_v59, %v1993_v43  ;;  %vm1323_vm0 = vweird.f32 %v8836_v0 }
 0x163   : > { %v1151_v8 = vsel %vm828_vm2, %v1049_v24, 0.0  ;;  %v932_v62 = vadd.f32 %v931_v41, %v930_v16  ;;  %v1150_v22 = vsel %vm828_vm2, %v1048_v17, 0.0  ;;  %v1319_v50 = vmul.f32 0.5, %v1318_v57  ;;  %8341 = vmatmul.msk.f32.gmra.mxu2 %vm828_vm2, %v1686_v19  ;;  %v2915_v17 = vld [vmem:[%s14045_s6 + $0x18] sm:$0xff]  ;;  %vm1324_vm1 = vmor %vm1322_vm14, %vm1323_vm0 }
 0x164   : > { %v1152_v52 = vadd.f32 %v1151_v8, %v1150_v22  ;;  %v1687_v16 = vrot.slane %v9799_v37, 7  ;;  %v9914_v14 = vadd.f32 1e-05, %v1213_v1  ;;  %v1717_v19 = vrot.slane %v9671_v56, 7  ;;  %3024 = vmatpush.msrb.mxu0 %v2915_v17 }
 0x165   : > { %v933_v10 = vrot.slane %v932_v62, 2  ;;  %8361 = vmatmul.msk.f32.gmra.mxu3 %vm828_vm2, %v1716_v9  ;;  %v1320_v45 = vsub.f32 1.5, %v1319_v50  ;;  %v1411_v60 = vmul.f32 %v1315_v46, %v9692_v25  ;;  %v1688_v1 = vrot.slane %v9827_v53, 7 }
 0x166   : > { %v1153_v3 = vrot.slane %v1152_v52, 4  ;;  %8837 = vrsqrt.f32 %v9914_v14  ;;  %v1751_v46 = vsel %vm1671_vm15, 0.0, %v1717_v19  ;;  %vm1332_vm4 = vweird.f32 %v9914_v14 }
 0x167   : > { %v934_v24 = vadd.f32 %v933_v10, %v932_v62  ;;  %v1741_v10 = vsel %vm1671_vm15, 0.0, %v1687_v16  ;;  %v1321_v8 = vmul.f32 %v8836_v0, %v1320_v45  ;;  %v9939_v59 = vmax.f32 %v1411_v60, 0.0 }
 0x168   : > { %v1154_v28 = vadd.f32 %v1153_v3, %v1152_v52  ;;  %8314 = vmatmul.msk.f32.gmra.mxu1 %vm828_vm2, %v9911_v35  ;;  %v1689_v60 = vsel %vm1671_vm15, %v1687_v16, %v1688_v1  ;;  %v1690_v1 = vrot.slane %v9851_v4, 7 }
 0x169   : > { %v935_v41 = vrot.slane %v934_v24, 1  ;;  %v9923_v49 = vpop.f32.mrf.mxu1  ;;  %v1325_v9 = vsel %vm1324_vm1, %v8836_v0, %v1321_v8  ;;  %v1995_v8 = vrot.slane %v9799_v37, 1 }
 0x16a   : > { %4367 = vrot.lane.b32.xlu0 %v9923_v49, %s9036_s21  ;;  %v1155_v62 = vrot.slane %v1154_v28, 2  ;;  %v1412_v0 = vmul.f32 %v1325_v9, %v9777_v29 }
 0x16b   : > { %v936_v63 = vadd.f32 %v935_v41, %v934_v24  ;;  %8342 = vmatmul.msk.f32.gmra.mxu2 %vm828_vm2, %v1741_v10 }
 0x16c   : > { %v1156_v56 = vadd.f32 %v1155_v62, %v1154_v28  ;;  %v8838_v25 = vpop.eup %8837 }
 0x16d   : > { %v991_v57 = vmul.f32 %v9258_v54, %v936_v63  ;;  %8362 = vmatmul.msk.f32.gmra.mxu3 %vm828_vm2, %v1751_v46  ;;  %v1327_v50 = vmul.f32 %v8838_v25, %v9914_v14  ;;  %v9970_v46 = vmax.f32 %v1412_v0, 0.0  ;;  %vm1333_vm5 = vweird.f32 %v8838_v25 }
 0x16e   : > { %v1157_v52 = vrot.slane %v1156_v56, 1  ;;  %vm1334_vm6 = vmor %vm1332_vm4, %vm1333_vm5 }
 0x16f   : > { %v9943_v22 = vsub.f32 %v9879_v34, %v991_v57  ;;  %v9948_v24 = vsub.f32 %v9853_v38, %v991_v57  ;;  %v1328_v41 = vmul.f32 %v8838_v25, %v1327_v50  ;;  %v1718_v34 = vrot.slane %v9719_v30, 7 }
 0x170   : > { %v1158_v28 = vadd.f32 %v1157_v52, %v1156_v56  ;;  %8315 = vmatmul.msk.f32.gmra.mxu1 %vm828_vm2, %v9939_v59  ;;  %v1996_v57 = vrot.slane %v9827_v53, 1 }
 0x171   : > { %v1051_v45 = vmul.f32 %v9943_v22, %v9943_v22  ;;  %v9952_v3 = vpop.f32.mrf.mxu1  ;;  %v1050_v38 = vmul.f32 %v9948_v24, %v9948_v24  ;;  %v1329_v17 = vmul.f32 0.5, %v1328_v41  ;;  %v1719_v56 = vsel %vm1671_vm15, %v1717_v19, %v1718_v34 }
 0x172   : > { %4369 = vrot.lane.b32.xlu0 %v9952_v3, %s9036_s21  ;;  %v1214_v63 = vmul.f32 %v1158_v28, %v9258_v54  ;;  %v9976_v50 = vsel %vm1979_vm3, %v1995_v8, %v1996_v57  ;;  %v1413_v19 = vmul.f32 %v1325_v9, %v9773_v23  ;;  %v1742_v28 = vsel %vm1671_vm15, 0.0, %v1690_v1 }
 0x173   : > { %v1160_v10 = vsel %vm828_vm2, %v1051_v45, 0.0  ;;  %v1159_v62 = vsel %vm828_vm2, %v1050_v38, 0.0  ;;  %8343 = vmatmul.msk.f32.gmra.mxu2 %vm828_vm2, %v1689_v60  ;;  %v1330_v37 = vsub.f32 1.5, %v1329_v17  ;;  %v1691_v23 = vrot.slane %v9882_v55, 7 }
 0x174   : > { %v1230_v29 = vadd.f32 1e-05, %v1214_v63  ;;  %v1161_v16 = vadd.f32 %v1160_v10, %v1159_v62  ;;  %v9991_v10 = vmax.f32 %v1413_v19, 0.0  ;;  %v1999_v19 = vrot.slane %v9882_v55, 1 }
 0x175   : > { %8363 = vmatmul.msk.f32.gmra.mxu3 %vm828_vm2, %v1719_v56  ;;  %v9983_v41 = vpop.f32.mrf.mxu3  ;;  %v1331_v34 = vmul.f32 %v8838_v25, %v1330_v37  ;;  %v1692_v56 = vsel %vm1671_vm15, %v1690_v1, %v1691_v23 }
 0x176   : > { %8839 = vrsqrt.f32 %v1230_v29  ;;  %v1162_v52 = vrot.slane %v1161_v16, 4  ;;  %vm1342_vm7 = vweird.f32 %v1230_v29 }
 0x177   : > { %v1335_v9 = vsel %vm1334_vm6, %v8838_v25, %v1331_v34  ;;  %v1693_v34 = vrot.slane %v9911_v35, 7 }
 0x178   : > { %v1163_v45 = vadd.f32 %v1162_v52, %v1161_v16  ;;  %8316 = vmatmul.msk.f32.gmra.mxu1 %vm828_vm2, %v9970_v46  ;;  %v1414_v16 = vmul.f32 %v1335_v9, %v9837_v33 }
 0x17a   : > { %v1164_v0 = vrot.slane %v1163_v45, 2  ;;  %v9986_v60 = vpop.f32.mrf.mxu1  ;;  %v10018_v1 = vmax.f32 %v1414_v16, 0.0 }
 0x17b   : > { %8344 = vmatmul.msk.f32.gmra.mxu2 %vm828_vm2, %v1742_v28  ;;  %4371 = vrot.lane.b32.xlu1 %v9986_v60, %s9036_s21 }
 0x17c   : > { %v8840_v38 = vpop.eup %8839  ;;  %v1165_v14 = vadd.f32 %v1164_v0, %v1163_v45  ;;  %v1998_v45 = vrot.slane %v9851_v4, 1  ;;  %v2044_v4 = vsel %vm1979_vm3, %v1981_v7, 0.0 }
 0x17d   : > { %v1337_v17 = vmul.f32 %v8840_v38, %v1230_v29  ;;  %8364 = vmatmul.msk.f32.vlgmr.msrb.gmra.mxu3 %vm828_vm2, %v9665_v12  ;;  %v10003_v28 = vpop.f32.mrf.mxu3  ;;  %vm1343_vm8 = vweird.f32 %v8840_v38  ;;  %v1694_v29 = vrot.slane %v9939_v59, 7 }
 0x17e   : > { %v1166_v63 = vrot.slane %v1165_v14, 1  ;;  %v10013_v33 = vsel %vm1979_vm3, %v1998_v45, %v1999_v19  ;;  %vm1344_vm9 = vmor %vm1342_vm7, %vm1343_vm8  ;;  %v2002_v45 = vrot.slane %v9939_v59, 1 }
 0x17f   : > { %v1338_v8 = vmul.f32 %v8840_v38, %v1337_v17  ;;  %v1743_v17 = vsel %vm1671_vm15, 0.0, %v1693_v34 }
 0x180   : > { %v1167_v62 = vadd.f32 %v1166_v63, %v1165_v14  ;;  %8317 = vmatmul.msk.f32.gmra.mxu1 %vm828_vm2, %v9991_v10  ;;  %v1415_v14 = vmul.f32 %v1335_v9, %v9832_v13  ;;  %v1695_v9 = vsel %vm1671_vm15, %v1693_v34, %v1694_v29 }
 0x181   : > { %v1339_v37 = vmul.f32 0.5, %v1338_v8 }
 0x182   : > { %v1215_v52 = vmul.f32 %v1167_v62, %v9258_v54  ;;  %v10005_v12 = vpop.f32.mrf.mxu1  ;;  %v10027_v23 = vmax.f32 %v1415_v14, 0.0 }
 0x183   : > { %8345 = vmatmul.msk.f32.gmra.mxu2 %vm828_vm2, %v1692_v56  ;;  %4373 = vrot.lane.b32.xlu1 %v10005_v12, %s9036_s21  ;;  %v1340_v0 = vsub.f32 1.5, %v1339_v37  ;;  %v3517_v56 = vld [vmem:[%s14002_s7 + $0x18] sm:$0xff] }
 0x184   : > { %v1231_v25 = vadd.f32 1e-05, %v1215_v52  ;;  %3610 = vmatpush.msrb.mxu2 %v3517_v56  ;;  %v2001_v52 = vrot.slane %v9911_v35, 1  ;;  %v2005_v56 = vrot.slane %v9991_v10, 1 }
 0x185   : > { %8365 = vmatmul.msk.f32.gmra.mxu3 %vm828_vm2, %v2044_v4  ;;  %v1341_v2 = vmul.f32 %v8840_v38, %v1340_v0  ;;  %v1696_v4 = vrot.slane %v9970_v46, 7  ;;  %v3208_v0 = vld [vmem:[%s14046_s5 + $0x18] sm:$0xff] }
 0x186   : > { %8841 = vrsqrt.f32 %v1231_v25  ;;  %3301 = vmatpush.msrb.mxu1 %v3208_v0  ;;  %vm1352_vm10 = vweird.f32 %v1231_v25 }
 0x187   : > { %v1345_v62 = vsel %vm1344_vm9, %v8840_v38, %v1341_v2 }
 0x188   : > { %8318 = vmatmul.msk.f32.gmra.mxu1 %vm828_vm2, %v10018_v1  ;;  %v1416_v13 = vmul.f32 %v1345_v62, %v9892_v15  ;;  %v2045_v15 = vsel %vm1979_vm3, %v1984_v18, 0.0  ;;  %v1417_v36 = vmul.f32 %v1345_v62, %v9888_v5  ;;  %v1744_v18 = vsel %vm1671_vm15, 0.0, %v1696_v4 }
 0x189   : > { %v10029_v63 = vpop.f32.mrf.mxu3 }
 0x18a   : > { %v10052_v38 = vmax.f32 %v1416_v13, 0.0 }
 0x18b   : > { %8346 = vmatmul.msk.f32.gmra.mxu2 %vm828_vm2, %v1743_v17  ;;  %v2914_v17 = vld [vmem:[%s14045_s6 + $0x10] sm:$0xff] }
 0x18c   : > { %v8842_v7 = vpop.eup %8841  ;;  %3025 = vmatpush.msrb.mxu0 %v2914_v17  ;;  %v2047_v17 = vsel %vm1979_vm3, %v1990_v44, 0.0 }
 0x18d   : > { %v1347_v8 = vmul.f32 %v8842_v7, %v1231_v25  ;;  %8366 = vmatmul.msk.f32.gmra.mxu3 %vm828_vm2, %v9738_v6  ;;  %v10047_v6 = vsel %vm1979_vm3, %v2001_v52, %v2002_v45  ;;  %vm1353_vm11 = vweird.f32 %v8842_v7  ;;  %v1697_v25 = vrot.slane %v9991_v10, 7 }
 0x18e   : > { %vm1354_vm12 = vmor %vm1352_vm10, %vm1353_vm11 }
 0x18f   : > { %v1348_v16 = vmul.f32 %v8842_v7, %v1347_v8  ;;  %v10073_v8 = vmax.f32 %v1417_v36, 0.0  ;;  %v1698_v13 = vsel %vm1671_vm15, %v1696_v4, %v1697_v25  ;;  %v1700_v4 = vrot.slane %v10027_v23, 7 }
 0x190   : > { %8319 = vmatmul.msk.f32.gmra.mxu1 %vm828_vm2, %v10027_v23  ;;  %v2007_v36 = vrot.slane %v10018_v1, 1 }
 0x191   : > { %v1349_v37 = vmul.f32 0.5, %v1348_v16  ;;  %v10061_v14 = vpop.f32.mrf.mxu3 }
 0x193   : > { %8347 = vmatmul.msk.f32.gmra.mxu2 %vm828_vm2, %v1695_v9  ;;  %v1350_v35 = vsub.f32 1.5, %v1349_v37  ;;  %v2004_v9 = vrot.slane %v9970_v46, 1 }
 0x195   : > { %v10055_v34 = vpop.f32.mrf.mxu1  ;;  %8367 = vmatmul.msk.f32.gmra.mxu3 %vm828_vm2, %v2045_v15  ;;  %v1351_v2 = vmul.f32 %v8842_v7, %v1350_v35 }
 0x196   : > { %4375 = vrot.lane.b32.xlu2 %v10055_v34, %s9036_s21 }
 0x197   : > { %v1355_v5 = vsel %vm1354_vm12, %v8842_v7, %v1351_v2  ;;  %v2046_v7 = vsel %vm1979_vm3, %v1987_v39, 0.0  ;;  %v1702_v2 = vrot.slane %v10052_v38, 7 }
 0x198   : > { %8320 = vmatmul.msk.f32.gmra.mxu1 %vm828_vm2, %v10052_v38  ;;  %v1418_v16 = vmul.f32 %v1355_v5, %v9948_v24  ;;  %v1699_v24 = vrot.slane %v10018_v1, 7  ;;  %v1419_v48 = vmul.f32 %v1355_v5, %v9943_v22 }
 0x199   : > { %v1746_v5 = vsel %vm1671_vm15, 0.0, %v1702_v2 }
 0x19a   : > { %v10099_v37 = vmax.f32 %v1418_v16, 0.0  ;;  %v1745_v39 = vsel %vm1671_vm15, 0.0, %v1699_v24  ;;  %v10114_v15 = vmax.f32 %v1419_v48, 0.0  ;;  %v1701_v0 = vsel %vm1671_vm15, %v1699_v24, %v1700_v4 }
 0x19b   : > { %8348 = vmatmul.msk.f32.gmra.mxu2 %vm828_vm2, %v1744_v18  ;;  %v14026_v18 = vrot.slane %v10027_v23, 1  ;;  %v1703_v16 = vrot.slane %v10073_v8, 7  ;;  %v14025_v24 = vrot.slane %v10073_v8, 1  ;;  %v2048_v48 = vsel %vm1979_vm3, %v1993_v43, 0.0  ;;  %v2913_v43 = vld [vmem:[%s14045_s6 + $0x8] sm:$0xff] }
 0x19c   : > { %3026 = vmatpush.msrb.mxu0 %v2913_v43 }
 0x19d   : > { %v10076_v29 = vpop.f32.mrf.mxu1  ;;  %8368 = vmatmul.msk.f32.gmra.mxu3 %vm828_vm2, %v9810_v20  ;;  %v10094_v20 = vsel %vm1979_vm3, %v2004_v9, %v2005_v56  ;;  %v3516_v9 = vld [vmem:[%s14002_s7 + $0x10] sm:$0xff] }
 0x19e   : > { %4377 = vrot.lane.b32.xlu2 %v10076_v29, %s9036_s21  ;;  %3611 = vmatpush.msrb.mxu2 %v3516_v9  ;;  %v14024_v9 = vrot.slane %v10114_v15, 1 }
 0x1a0   : > { %8321 = vmatmul.msk.f32.gmra.mxu1 %vm828_vm2, %v10073_v8  ;;  %v10084_v62 = vpop.f32.mrf.mxu3 }
 0x1a3   : > { %8349 = vmatmul.msk.f32.gmra.mxu2 %vm828_vm2, %v1698_v13  ;;  %v1704_v13 = vsel %vm1671_vm15, %v1702_v2, %v1703_v16  ;;  %v1851_v2 = vpop.f32.mrf.mxu2 }
 0x1a4   : > { %v1947_v47 = vadd.f32 %v1851_v2, %v9923_v49 }
 0x1a5   : > { %v10102_v52 = vpop.f32.mrf.mxu1  ;;  %8369 = vmatmul.msk.f32.gmra.mxu3 %vm828_vm2, %v2046_v7  ;;  %v2010_v7 = vrot.slane %v10052_v38, 1  ;;  %v3207_v38 = vld [vmem:[%s14046_s5 + $0x10] sm:$0xff] }
 0x1a6   : > { %4379 = vrot.lane.b32.xlu0 %v10102_v52, %s9036_s21  ;;  %3302 = vmatpush.msrb.mxu1 %v3207_v38 }
 0x1a8   : > { %8322 = vmatmul.msk.f32.gmra.mxu1 %vm828_vm2, %v10099_v37  ;;  %v10109_v46 = vpop.f32.mrf.mxu3 }
 0x1ab   : > { %8350 = vmatmul.msk.f32.gmra.mxu2 %vm828_vm2, %v1745_v39  ;;  %v1705_v39 = vrot.slane %v10099_v37, 7 }
 0x1ad   : > { %v10117_v35 = vpop.f32.mrf.mxu1  ;;  %8370 = vmatmul.msk.f32.gmra.mxu3 %vm828_vm2, %v9867_v61  ;;  %v10134_v61 = vsel %vm1979_vm3, %v2007_v36, %v14026_v18  ;;  %v1747_v11 = vsel %vm1671_vm15, 0.0, %v1705_v39  ;;  %v1706_v36 = vrot.slane %v10114_v15, 7 }
 0x1ae   : > { %4381 = vrot.lane.b32.xlu1 %v10117_v35, %s9036_s21 }
 0x1af   : > { %v1707_v16 = vsel %vm1671_vm15, %v1705_v39, %v1706_v36  ;;  %v1854_v39 = vpop.f32.mrf.mxu2 }
 0x1b0   : > { %8323 = vmatmul.msk.f32.gmra.mxu1 %vm828_vm2, %v10114_v15  ;;  %v10125_v22 = vpop.f32.mrf.mxu3 }
 0x1b3   : > { %8351 = vmatmul.msk.f32.gmra.mxu2 %vm828_vm2, %v1701_v0 }
 0x1b5   : > { %v10140_v25 = vpop.f32.mrf.mxu1  ;;  %8371 = vmatmul.msk.f32.gmra.mxu3 %vm828_vm2, %v2047_v17 }
 0x1b6   : > { %4383 = vrot.lane.b32.xlu2 %v10140_v25, %s9036_s21 }
 0x1b8   : > { %v10145_v1 = vpop.f32.mrf.mxu3 }
 0x1bb   : > { %8352 = vmatmul.msk.f32.gmra.mxu2 %vm828_vm2, %v1746_v5 }
 0x1bd   : > { %v10150_v32 = vpop.f32.mrf.mxu1  ;;  %8372 = vmatmul.msk.f32.gmra.mxu3 %vm828_vm2, %v9919_v31  ;;  %v10168_v31 = vsel %vm1979_vm3, %v2010_v7, %v14025_v24 }
 0x1be   : > { %4385 = vrot.lane.b32.xlu0 %v10150_v32, %s9036_s21 }
 0x1c0   : > { %v10156_v44 = vpop.f32.mrf.mxu3 }
 0x1c1   : > { %14047 = vst [vmem:[#allocation9_spill] sm:$0xff] %v10156_v44 }
 0x1c3   : > { %8353 = vmatmul.msk.f32.gmra.mxu2 %vm828_vm2, %v1704_v13  ;;  %v2013_v13 = vrot.slane %v10099_v37, 1 }
 0x1c5   : > { %v10174_v4 = vpop.f32.mrf.mxu1  ;;  %8373 = vmatmul.msk.f32.gmra.mxu3 %vm828_vm2, %v2048_v48  ;;  %v10205_v7 = vsel %vm1979_vm3, %v2013_v13, %v14024_v9 }
 0x1c6   : > { %4387 = vrot.lane.b32.xlu1 %v10174_v4, %s9036_s21 }
 0x1c8   : > { %v10182_v0 = vpop.f32.mrf.mxu3 }
 0x1c9   : > { %14048 = vst [vmem:[#allocation10_spill] sm:$0xff] %v10182_v0 }
 0x1cb   : > { %8354 = vmatmul.msk.f32.gmra.mxu2 %vm828_vm2, %v1747_v11  ;;  %v2050_v11 = vsel %vm1979_vm3, %v1999_v19, 0.0  ;;  %v2051_v19 = vsel %vm1979_vm3, %v2002_v45, 0.0 }
 0x1cd   : > { %v10190_v17 = vpop.f32.mrf.mxu1  ;;  %8374 = vmatmul.msk.f32.gmra.mxu3 %vm828_vm2, %v9976_v50  ;;  %v2049_v50 = vsel %vm1979_vm3, %v1996_v57, 0.0  ;;  %v1857_v57 = vpop.f32.mrf.mxu2 }
 0x1ce   : > { %4389 = vrot.lane.b32.xlu2 %v10190_v17, %s9036_s21 }
 0x1d0   : > { %v10196_v5 = vpop.f32.mrf.mxu3 }
 0x1d1   : > { %14049 = vst [vmem:[#allocation11_spill] sm:$0xff] %v10196_v5 }
 0x1d3   : > { %8355 = vmatmul.msk.f32.gmra.mxu2 %vm828_vm2, %v1707_v16 }
 0x1d5   : > { %v10210_v48 = vpop.f32.mrf.mxu1  ;;  %8375 = vmatmul.msk.f32.gmra.mxu3 %vm828_vm2, %v2049_v50 }
 0x1d6   : > { %4391 = vrot.lane.b32.xlu0 %v10210_v48, %s9036_s21 }
 0x1d8   : > { %v10215_v37 = vpop.f32.mrf.mxu3 }
 0x1d9   : > { %14050 = vst [vmem:[#allocation12_spill] sm:$0xff] %v10215_v37 }
 0x1dd   : > { %v10217_v38 = vpop.f32.mrf.mxu1  ;;  %8376 = vmatmul.msk.f32.gmra.mxu3 %vm828_vm2, %v10013_v33  ;;  %v1860_v33 = vpop.f32.mrf.mxu2 }
 0x1de   : > { %4393 = vrot.lane.b32.xlu1 %v10217_v38, %s9036_s21 }
 0x1e0   : > { %v10223_v53 = vpop.f32.mrf.mxu3 }
 0x1e1   : > { %14051 = vst [vmem:[#allocation13_spill] sm:$0xff] %v10223_v53 }
 0x1e5   : > { %v10228_v43 = vpop.f32.mrf.mxu1  ;;  %8377 = vmatmul.msk.f32.gmra.mxu3 %vm828_vm2, %v2050_v11  ;;  %v10251_v50 = vpop.f32.mrf.mxu2 }
 0x1e6   : > { %4395 = vrot.lane.b32.xlu2 %v10228_v43, %s9036_s21 }
 0x1e8   : > { %v10233_v36 = vpop.f32.mrf.mxu3 }
 0x1e9   : > { %14052 = vst [vmem:[#allocation14_spill] sm:$0xff] %v10233_v36  ;;  %v1949_v36 = vadd.f32 %v1857_v57, %v9986_v60 }
 0x1ed   : > { %v10235_v16 = vpop.f32.mrf.mxu1  ;;  %8378 = vmatmul.msk.f32.gmra.mxu3 %vm828_vm2, %v10047_v6  ;;  %v10261_v45 = vpop.f32.mrf.mxu2 }
 0x1ee   : > { %4397 = vrot.lane.b32.xlu0 %v10235_v16, %s9036_s21 }
 0x1f0   : > { %v10241_v55 = vpop.f32.mrf.mxu3 }
 0x1f1   : > { %14053 = vst [vmem:[#allocation15_spill] sm:$0xff] %v10241_v55 }
 0x1f5   : > { %v10246_v13 = vpop.f32.mrf.mxu1  ;;  %8379 = vmatmul.msk.f32.gmra.mxu3 %vm828_vm2, %v2051_v19  ;;  %v2052_v19 = vsel %vm1979_vm3, %v2005_v56, 0.0  ;;  %v10273_v55 = vpop.f32.mrf.mxu2 }
 0x1f6   : > { %4399 = vrot.lane.b32.xlu1 %v10246_v13, %s9036_s21 }
 0x1f8   : > { %v10253_v11 = vpop.f32.mrf.mxu3 }
 0x1f9   : > { %14054 = vst [vmem:[#allocation16_spill] sm:$0xff] %v10253_v11 }
 0x1fd   : > { %v10255_v6 = vpop.f32.mrf.mxu1  ;;  %8380 = vmatmul.msk.f32.gmra.mxu3 %vm828_vm2, %v10094_v20  ;;  %v1948_v20 = vadd.f32 %v1854_v39, %v9952_v3 }
 0x1fe   : > { %4401 = vrot.lane.b32.xlu2 %v10255_v6, %s9036_s21 }
 0x200   : > { %v2159_v59 = vpop.f32.mrf.mxu3 }
 0x201   : > { %v2255_v24 = vadd.f32 %v2159_v59, %v1947_v47  ;;  %v14055_v59 = vrot.slane %v10027_v23, 1 }
 0x203   : > { %v2288_v10 = vsel %vm2287_vm13, %v2255_v24, 0.0 }
 0x205   : > { %v10267_v9 = vpop.f32.mrf.mxu1  ;;  %8381 = vmatmul.msk.f32.gmra.mxu3 %vm828_vm2, %v2052_v19 }
 0x206   : > { %4403 = vrot.lane.b32.xlu0 %v10267_v9, %s9036_s21 }
 0x208   : > { %v2162_v18 = vpop.f32.mrf.mxu3 }
 0x209   : > { %v2256_v11 = vadd.f32 %v2162_v18, %v1948_v20  ;;  %v2053_v20 = vsel %vm1979_vm3, %v14055_v59, 0.0 }
 0x20b   : > { %v2289_v56 = vsel %vm2287_vm13, %v2256_v11, 0.0 }
 0x20c   : > { %v2290_v49 = vadd.f32 %v2289_v56, %v2288_v10  ;;  %v10287_v10 = vpop.f32.mrf.mxu2 }
 0x20d   : > { %v10277_v2 = vpop.f32.mrf.mxu1  ;;  %8382 = vmatmul.msk.f32.gmra.mxu3 %vm828_vm2, %v10134_v61 }
 0x20e   : > { %v2291_v19 = vrot.slane %v2290_v49, 4  ;;  %4405 = vrot.lane.b32.xlu1 %v10277_v2, %s9036_s21 }
 0x210   : > { %v2292_v47 = vadd.f32 %v2291_v19, %v2290_v49  ;;  %v2165_v3 = vpop.f32.mrf.mxu3  ;;  %v1950_v49 = vadd.f32 %v1860_v33, %v10005_v12 }
 0x211   : > { %v2257_v19 = vadd.f32 %v2165_v3, %v1949_v36 }
 0x212   : > { %v2293_v39 = vrot.slane %v2292_v47, 2 }
 0x213   : > { %v2297_v60 = vsel %vm2287_vm13, %v2257_v19, 0.0 }
 0x214   : > { %v2294_v18 = vadd.f32 %v2293_v39, %v2292_v47 }
 0x215   : > { %v10289_v56 = vpop.f32.mrf.mxu1  ;;  %8383 = vmatmul.msk.f32.gmra.mxu3 %vm828_vm2, %v2053_v20 }
 0x216   : > { %v2295_v61 = vrot.slane %v2294_v18, 1  ;;  %4407 = vrot.lane.b32.xlu2 %v10289_v56, %s9036_s21 }
 0x218   : > { %v2296_v47 = vadd.f32 %v2295_v61, %v2294_v18  ;;  %v2168_v39 = vpop.f32.mrf.mxu3 }
 0x219   : > { %v2258_v23 = vadd.f32 %v2168_v39, %v1950_v49 }
 0x21a   : > { %v2432_v59 = vmul.f32 %v2296_v47, %v9258_v54 }
 0x21b   : > { %v2298_v57 = vsel %vm2287_vm13, %v2258_v23, 0.0 }
 0x21c   : > { %v10298_v53 = vsub.f32 %v2255_v24, %v2432_v59  ;;  %v10300_v37 = vsub.f32 %v2256_v11, %v2432_v59  ;;  %v2299_v20 = vadd.f32 %v2298_v57, %v2297_v60  ;;  %v10312_v24 = vpop.f32.mrf.mxu2  ;;  %v14056_v59 = vrot.slane %v10073_v8, 1 }
 0x21d   : > { %v10302_v5 = vpop.f32.mrf.mxu1  ;;  %8384 = vmatmul.msk.f32.gmra.mxu3 %vm828_vm2, %v10168_v31  ;;  %v1951_v57 = vadd.f32 %v10251_v50, %v10055_v34  ;;  %v1952_v8 = vadd.f32 %v10261_v45, %v10076_v29  ;;  %v3515_v34 = vld [vmem:[%s14002_s7 + $0x8] sm:$0xff] }
 0x21e   : > { %v2480_v12 = vmul.f32 %v10298_v53, %v10298_v53  ;;  %v2481_v36 = vmul.f32 %v10300_v37, %v10300_v37  ;;  %v2300_v33 = vrot.slane %v2299_v20, 4  ;;  %4409 = vrot.lane.b32.xlu0 %v10302_v5, %s9036_s21  ;;  %v2054_v60 = vsel %vm1979_vm3, %v14056_v59, 0.0  ;;  %v3206_v50 = vld [vmem:[%s14046_s5 + $0x8] sm:$0xff]  ;;  %3612 = vmatpush.msrb.mxu2 %v3515_v34 }
 0x21f   : > { %3303 = vmatpush.msrb.mxu1 %v3206_v50 }
 0x220   : > { %v2512_v11 = vsel %vm2287_vm13, %v2480_v12, 0.0  ;;  %v2513_v3 = vsel %vm2287_vm13, %v2481_v36, 0.0  ;;  %v2301_v18 = vadd.f32 %v2300_v33, %v2299_v20  ;;  %v2171_v61 = vpop.f32.mrf.mxu3 }
 0x221   : > { %v2514_v49 = vadd.f32 %v2513_v3, %v2512_v11  ;;  %v2259_v36 = vadd.f32 %v2171_v61, %v1951_v57 }
 0x222   : > { %v2302_v31 = vrot.slane %v2301_v18, 2 }
 0x223   : > { %v2515_v47 = vrot.slane %v2514_v49, 4 }
 0x224   : > { %v2303_v39 = vadd.f32 %v2302_v31, %v2301_v18  ;;  %v10336_v3 = vpop.f32.mrf.mxu2  ;;  %v2306_v31 = vsel %vm2287_vm13, %v2259_v36, 0.0 }
 0x225   : > { %v2516_v0 = vadd.f32 %v2515_v47, %v2514_v49  ;;  %v10321_v44 = vpop.f32.mrf.mxu1  ;;  %8385 = vmatmul.msk.f32.gmra.mxu3 %vm828_vm2, %v2054_v60 }
 0x226   : > { %v2304_v12 = vrot.slane %v2303_v39, 1  ;;  %4415 = vrot.lane.b32.xlu0 %v9983_v41, %s9036_s21  ;;  %4411 = vrot.lane.b32.xlu1 %v10321_v44, %s9036_s21 }
 0x227   : > { %v2517_v20 = vrot.slane %v2516_v0, 2 }
 0x228   : > { %v2305_v33 = vadd.f32 %v2304_v12, %v2303_v39  ;;  %v2174_v11 = vpop.f32.mrf.mxu3 }
 0x229   : > { %v2518_v18 = vadd.f32 %v2517_v20, %v2516_v0  ;;  %v2260_v49 = vadd.f32 %v2174_v11, %v1952_v8  ;;  %v2912_v8 = vld [vmem:[%s14045_s6] sm:$0xff] }
 0x22a   : > { %v2433_v29 = vmul.f32 %v2305_v33, %v9258_v54  ;;  %3027 = vmatpush.msrb.mxu0 %v2912_v8 }
 0x22b   : > { %v2519_v45 = vrot.slane %v2518_v18, 1  ;;  %v2307_v47 = vsel %vm2287_vm13, %v2260_v49, 0.0 }
 0x22c   : > { %v10341_v59 = vsub.f32 %v2257_v19, %v2433_v29  ;;  %v10343_v60 = vsub.f32 %v2258_v23, %v2433_v29  ;;  %v2308_v61 = vadd.f32 %v2307_v47, %v2306_v31  ;;  %v10365_v29 = vpop.f32.mrf.mxu2  ;;  %v14057_v47 = vrot.slane %v10114_v15, 1 }
 0x22d   : > { %v2520_v57 = vadd.f32 %v2519_v45, %v2518_v18  ;;  %v10345_v34 = vpop.f32.mrf.mxu1  ;;  %8386 = vmatmul.msk.f32.gmra.mxu3 %vm828_vm2, %v10205_v7 }
 0x22e   : > { %v2482_v0 = vmul.f32 %v10341_v59, %v10341_v59  ;;  %v2483_v39 = vmul.f32 %v10343_v60, %v10343_v60  ;;  %v2309_v12 = vrot.slane %v2308_v61, 4  ;;  %4421 = vrot.lane.b32.xlu0 %v10061_v14, %s9036_s21  ;;  %4417 = vrot.lane.b32.xlu1 %v10003_v28, %s9036_s21 }
 0x22f   : > { %v2656_v19 = vmul.f32 %v2520_v57, %v9258_v54  ;;  %4413 = vrot.lane.b32.xlu2 %v10345_v34, %s9036_s21  ;;  %v2055_v57 = vsel %vm1979_vm3, %v14057_v47, 0.0 }
 0x230   : > { %v2521_v7 = vsel %vm2287_vm13, %v2482_v0, 0.0  ;;  %v2522_v23 = vsel %vm2287_vm13, %v2483_v39, 0.0  ;;  %v2310_v20 = vadd.f32 %v2309_v12, %v2308_v61  ;;  %v2177_v50 = vpop.f32.mrf.mxu3  ;;  %v1953_v0 = vadd.f32 %v10273_v55, %v10102_v52 }
 0x231   : > { %v2672_v33 = vadd.f32 1e-05, %v2656_v19  ;;  %v2523_v11 = vadd.f32 %v2522_v23, %v2521_v7  ;;  %v1954_v12 = vadd.f32 %v10287_v10, %v10117_v35 }
 0x232   : > { %v2311_v18 = vrot.slane %v2310_v20, 2  ;;  %v10379_v15 = vadd.f32 %v2177_v50, %v1953_v0 }
 0x233   : > { %8843 = vrsqrt.f32 %v2672_v33  ;;  %v2524_v45 = vrot.slane %v2523_v11, 4  ;;  %vm2694_vm0 = vweird.f32 %v2672_v33 }
 0x234   : > { %v2312_v31 = vadd.f32 %v2311_v18, %v2310_v20 }
 0x235   : > { %v2525_v39 = vadd.f32 %v2524_v45, %v2523_v11  ;;  %8387 = vmatmul.msk.f32.gmra.mxu3 %vm828_vm2, %v2055_v57  ;;  %v2315_v45 = vsel %vm2287_vm13, %v10379_v15, 0.0  ;;  %v10394_v57 = vpop.f32.mrf.mxu2 }
 0x236   : > { %v2313_v61 = vrot.slane %v2312_v31, 1  ;;  %4427 = vrot.lane.b32.xlu0 %v10125_v22, %s9036_s21  ;;  %4423 = vrot.lane.b32.xlu1 %v10084_v62, %s9036_s21 }
 0x237   : > { %v2526_v19 = vrot.slane %v2525_v39, 2  ;;  %4419 = vrot.lane.b32.xlu2 %v10029_v63, %s9036_s21 }
 0x238   : > { %v2314_v52 = vadd.f32 %v2313_v61, %v2312_v31  ;;  %v2180_v55 = vpop.f32.mrf.mxu3 }
 0x239   : > { %v8844_v7 = vpop.eup %8843  ;;  %v2527_v23 = vadd.f32 %v2526_v19, %v2525_v39  ;;  %v10383_v8 = vadd.f32 %v2180_v55, %v1954_v12 }
 0x23a   : > { %v2689_v20 = vmul.f32 %v8844_v7, %v2672_v33  ;;  %v2434_v11 = vmul.f32 %v2314_v52, %v9258_v54  ;;  %vm2695_vm14 = vweird.f32 %v8844_v7 }
 0x23b   : > { %v2528_v18 = vrot.slane %v2527_v23, 1  ;;  %v2316_v35 = vsel %vm2287_vm13, %v10383_v8, 0.0  ;;  %vm2696_vm1 = vmor %vm2694_vm0, %vm2695_vm14 }
 0x23c   : > { %v2690_v10 = vmul.f32 %v8844_v7, %v2689_v20  ;;  %v10390_v50 = vsub.f32 %v2259_v36, %v2434_v11  ;;  %v10392_v47 = vsub.f32 %v2260_v49, %v2434_v11  ;;  %v2317_v31 = vadd.f32 %v2316_v35, %v2315_v45 }
 0x23d   : > { %v2529_v0 = vadd.f32 %v2528_v18, %v2527_v23  ;;  %8388 = vmatmul.msk.f32.gmra.mxu3 %vm828_vm2, %v9592_v42  ;;  %v3514_v18 = vld [vmem:[%s14002_s7] sm:$0xff] }
 0x23e   : > { %v2691_v39 = vmul.f32 0.5, %v2690_v10  ;;  %v2484_v61 = vmul.f32 %v10390_v50, %v10390_v50  ;;  %v2485_v12 = vmul.f32 %v10392_v47, %v10392_v47  ;;  %v2318_v19 = vrot.slane %v2317_v31, 4  ;;  %4429 = vrot.lane.b32.xlu1 %v10145_v1, %s9036_s21  ;;  %3613 = vmatpush.msrb.mxu2 %v3514_v18 }
 0x23f   : > { %v2657_v36 = vmul.f32 %v2529_v0, %v9258_v54  ;;  %4425 = vrot.lane.b32.xlu2 %v10109_v46, %s9036_s21  ;;  %s8991_s21 = scalar_lea.hbm %s14013_s18, 1024 }
 0x240   : > { %v2692_v49 = vsub.f32 1.5, %v2691_v39  ;;  %v2530_v42 = vsel %vm2287_vm13, %v2484_v61, 0.0  ;;  %v2531_v52 = vsel %vm2287_vm13, %v2485_v12, 0.0  ;;  %v2319_v55 = vadd.f32 %v2318_v19, %v2317_v31  ;;  %v2183_v23 = vpop.f32.mrf.mxu3  ;;  %p8993_p1 = scmp.lt.s32.totalorder %s8991_s21, %s8987_s4 }
 0x241   : > { %v10409_v20 = vadd.f32 1e-05, %v2657_v36  ;;  %v2532_v11 = vadd.f32 %v2531_v52, %v2530_v42  ;;  %v14058_v31 = vrot.slane %v9462_v40, 1  ;;  %v1955_v12 = vadd.f32 %v10312_v24, %v10140_v25  ;;  %v3205_v25 = vld [vmem:[%s14046_s5] sm:$0xff] }
 0x242   : > { %v2693_v45 = vmul.f32 %v8844_v7, %v2692_v49  ;;  %v2320_v35 = vrot.slane %v2319_v55, 2  ;;  %v1956_v49 = vadd.f32 %v10336_v3, %v10150_v32  ;;  %3304 = vmatpush.msrb.mxu1 %v3205_v25  ;;  %p8994_p2 = por %p8993_p1, %p8992_p0 }
 0x243   : > { %8845 = vrsqrt.f32 %v10409_v20  ;;  %v2533_v10 = vrot.slane %v2532_v11, 4  ;;  %v2056_v61 = vsel %vm1979_vm3, %v14058_v31, 0.0  ;;  %v10428_v18 = vadd.f32 %v2183_v23, %v1955_v12 }
 0x244   : > { %v2697_v0 = vsel %vm2696_vm1, %v8844_v7, %v2693_v45  ;;  %v2321_v39 = vadd.f32 %v2320_v35, %v2319_v55  ;;  %v10426_v55 = vpop.f32.mrf.mxu2  ;;  %vm2704_vm5 = vweird.f32 %v10409_v20  ;;  %p8995_p3 = pnand %p8994_p2, %p8990_p13 }
 0x245   : > { %v2848_v19 = vmul.f32 %v2697_v0, %v10298_v53  ;;  %v2849_v33 = vmul.f32 %v2697_v0, %v10300_v37  ;;  %v2534_v36 = vadd.f32 %v2533_v10, %v2532_v11  ;;  %8389 = vmatmul.msk.f32.gmra.mxu3 %vm828_vm2, %v2056_v61  ;;  %v2324_v31 = vsel %vm2287_vm13, %v10428_v18, 0.0 }
 0x246   : > { %v2322_v42 = vrot.slane %v2321_v39, 1 }
 0x247   : > { %v2880_v7 = vmax.f32 %v2848_v19, 0.0  ;;  %v2881_v52 = vmax.f32 %v2849_v33, 0.0  ;;  %v2535_v40 = vrot.slane %v2534_v36, 2 }
 0x248   : > { %v2323_v53 = vadd.f32 %v2322_v42, %v2321_v39  ;;  %v2186_v37 = vpop.f32.mrf.mxu3 }
 0x249   : > { %v8846_v24 = vpop.eup %8845  ;;  %v2536_v11 = vadd.f32 %v2535_v40, %v2534_v36  ;;  %v10433_v45 = vadd.f32 %v2186_v37, %v1956_v49  ;;  %8396 = vmatmul.msk.f32.vlgmr.msrb.gmra.mxu0 %vm2287_vm13, %v2880_v7  ;;  %v3125_v32 = vrot.slane %v2880_v7, 7  ;;  %v3434_v3 = vrot.slane %v2880_v7, 1 }
 0x24a   : > { %v2699_v35 = vmul.f32 %v8846_v24, %v10409_v20  ;;  %v2435_v23 = vmul.f32 %v2323_v53, %v9258_v54  ;;  %v3435_v10 = vrot.slane %v2881_v52, 1  ;;  %vm2705_vm4 = vweird.f32 %v8846_v24 }
 0x24b   : > { %v2537_v0 = vrot.slane %v2536_v11, 1  ;;  %v2325_v39 = vsel %vm2287_vm13, %v10433_v45, 0.0  ;;  %v3189_v61 = vsel %vm1671_vm15, 0.0, %v3125_v32  ;;  %v3126_v53 = vrot.slane %v2881_v52, 7  ;;  %vm2706_vm6 = vmor %vm2704_vm5, %vm2705_vm4 }
 0x24c   : > { %v2700_v12 = vmul.f32 %v8846_v24, %v2699_v35  ;;  %v10444_v19 = vsub.f32 %v10379_v15, %v2435_v23  ;;  %v10447_v33 = vsub.f32 %v10383_v8, %v2435_v23  ;;  %v2326_v36 = vadd.f32 %v2325_v39, %v2324_v31  ;;  %8428 = vmatmul.msk.f32.vlgmr.msrb.gmra.mxu1 %vm2287_vm13, %v3189_v61  ;;  %v10461_v23 = vpop.f32.mrf.mxu2 }
 0x24d   : > { %v2538_v49 = vadd.f32 %v2537_v0, %v2536_v11  ;;  %v3436_v42 = vsel %vm1979_vm3, %v3434_v3, %v3435_v10  ;;  %8390 = vmatmul.msk.f32.gmra.mxu3 %vm828_vm2, %v9703_v21 }
 0x24e   : > { %v2701_v7 = vmul.f32 0.5, %v2700_v12  ;;  %v2486_v40 = vmul.f32 %v10444_v19, %v10444_v19  ;;  %v2487_v15 = vmul.f32 %v10447_v33, %v10447_v33  ;;  %v2327_v25 = vrot.slane %v2326_v36, 4  ;;  %8460 = vmatmul.msk.f32.vlgmr.msrb.gmra.mxu2 %vm2287_vm13, %v3436_v42 }
 0x24f   : > { %v2658_v8 = vmul.f32 %v2538_v49, %v9258_v54  ;;  %v3127_v49 = vsel %vm1671_vm15, %v3125_v32, %v3126_v53 }
 0x250   : > { %v2702_v37 = vsub.f32 1.5, %v2701_v7  ;;  %v2539_v11 = vsel %vm2287_vm13, %v2486_v40, 0.0  ;;  %v2540_v3 = vsel %vm2287_vm13, %v2487_v15, 0.0  ;;  %v2328_v21 = vadd.f32 %v2327_v25, %v2326_v36  ;;  %v2189_v35 = vpop.f32.mrf.mxu3 }
 0x251   : > { %v10463_v0 = vadd.f32 1e-05, %v2658_v8  ;;  %v2541_v31 = vadd.f32 %v2540_v3, %v2539_v11  ;;  %8397 = vmatmul.msk.f32.gmra.mxu0 %vm2287_vm13, %v2881_v52  ;;  %v1957_v36 = vadd.f32 %v10365_v29, %v10174_v4  ;;  %v14059_v52 = vrot.slane %v9516_v51, 1 }
 0x252   : > { %v2703_v39 = vmul.f32 %v8846_v24, %v2702_v37  ;;  %v2329_v61 = vrot.slane %v2328_v21, 2  ;;  %v3498_v8 = vsel %vm1979_vm3, %v3435_v10, 0.0  ;;  %v1958_v4 = vadd.f32 %v10394_v57, %v10190_v17 }
 0x253   : > { %8847 = vrsqrt.f32 %v10463_v0  ;;  %v2542_v12 = vrot.slane %v2541_v31, 4  ;;  %v2057_v40 = vsel %vm1979_vm3, %v14059_v52, 0.0  ;;  %v10488_v32 = vadd.f32 %v2189_v35, %v1957_v36 }
 0x254   : > { %v2707_v42 = vsel %vm2706_vm6, %v8846_v24, %v2703_v39  ;;  %v2330_v7 = vadd.f32 %v2329_v61, %v2328_v21  ;;  %8429 = vmatmul.msk.f32.gmra.mxu1 %vm2287_vm13, %v3127_v49  ;;  %v10496_v35 = vpop.f32.mrf.mxu2  ;;  %vm2714_vm8 = vweird.f32 %v10463_v0 }
 0x255   : > { %v2850_v20 = vmul.f32 %v2707_v42, %v10341_v59  ;;  %v2851_v15 = vmul.f32 %v2707_v42, %v10343_v60  ;;  %v2543_v25 = vadd.f32 %v2542_v12, %v2541_v31  ;;  %8391 = vmatmul.msk.f32.gmra.mxu3 %vm828_vm2, %v2057_v40  ;;  %v4530_v59 = vld [vmem:[%s14004_s9 + $0x18] sm:$0xff]  ;;  %v2333_v12 = vsel %vm2287_vm13, %v10488_v32, 0.0 }
 0x256   : > { %v2331_v29 = vrot.slane %v2330_v7, 1  ;;  %8461 = vmatmul.msk.f32.gmra.mxu2 %vm2287_vm13, %v3498_v8  ;;  %4639 = vmatpush.msra.mxu3 %v4530_v59 }
 0x257   : > { %v10483_v24 = vmax.f32 %v2851_v15, 0.0  ;;  %v2544_v51 = vrot.slane %v2543_v25, 2  ;;  %v2882_v60 = vmax.f32 %v2850_v20, 0.0 }
 0x258   : > { %v2332_v10 = vadd.f32 %v2331_v29, %v2330_v7  ;;  %v2192_v53 = vpop.f32.mrf.mxu3 }
 0x259   : > { %v8848_v37 = vpop.eup %8847  ;;  %v2545_v11 = vadd.f32 %v2544_v51, %v2543_v25  ;;  %v10490_v3 = vadd.f32 %v2192_v53, %v1958_v4  ;;  %8398 = vmatmul.msk.f32.gmra.mxu0 %vm2287_vm13, %v2882_v60  ;;  %v3128_v17 = vrot.slane %v2882_v60, 7  ;;  %v3437_v57 = vrot.slane %v2882_v60, 1 }
 0x25a   : > { %v2709_v21 = vmul.f32 %v8848_v37, %v10463_v0  ;;  %v2436_v31 = vmul.f32 %v2332_v10, %v9258_v54  ;;  %v3438_v39 = vrot.slane %v10483_v24, 1  ;;  %vm2715_vm7 = vweird.f32 %v8848_v37 }
 0x25b   : > { %v2546_v61 = vrot.slane %v2545_v11, 1  ;;  %v2334_v49 = vsel %vm2287_vm13, %v10490_v3, 0.0  ;;  %v3190_v36 = vsel %vm1671_vm15, 0.0, %v3128_v17  ;;  %v3129_v29 = vrot.slane %v10483_v24, 7  ;;  %vm2716_vm9 = vmor %vm2714_vm8, %vm2715_vm7 }
 0x25c   : > { %v2710_v42 = vmul.f32 %v8848_v37, %v2709_v21  ;;  %v10504_v7 = vsub.f32 %v10428_v18, %v2436_v31  ;;  %v10507_v52 = vsub.f32 %v10433_v45, %v2436_v31  ;;  %v2335_v40 = vadd.f32 %v2334_v49, %v2333_v12  ;;  %8430 = vmatmul.msk.f32.gmra.mxu1 %vm2287_vm13, %v3190_v36 }
 0x25d   : > { %v2547_v20 = vadd.f32 %v2546_v61, %v2545_v11  ;;  %v3439_v15 = vsel %vm1979_vm3, %v3437_v57, %v3438_v39  ;;  %8392 = vmatmul.msk.f32.gmra.mxu3 %vm828_vm2, %v9716_v58  ;;  %v3130_v61 = vsel %vm1671_vm15, %v3128_v17, %v3129_v29  ;;  %v1959_v12 = vadd.f32 %v10426_v55, %v10210_v48 }
 0x25e   : > { %v2711_v25 = vmul.f32 0.5, %v2710_v42  ;;  %v2488_v8 = vmul.f32 %v10504_v7, %v10504_v7  ;;  %v2489_v18 = vmul.f32 %v10507_v52, %v10507_v52  ;;  %v2336_v4 = vrot.slane %v2335_v40, 4  ;;  %8462 = vmatmul.msk.f32.gmra.mxu2 %vm2287_vm13, %v3439_v15 }
 0x25f   : > { %v2659_v45 = vmul.f32 %v2547_v20, %v9258_v54  ;;  %v14060_v42 = vrot.slane %v9651_v27, 1  ;;  %v10537_v20 = vpop.f32.mrf.mxu2  ;;  %v3499_v17 = vsel %vm1979_vm3, %v3438_v39, 0.0  ;;  %v1960_v48 = vadd.f32 %v10461_v23, %v10217_v38 }
 0x260   : > { %v2712_v51 = vsub.f32 1.5, %v2711_v25  ;;  %v2548_v59 = vsel %vm2287_vm13, %v2488_v8, 0.0  ;;  %v2549_v58 = vsel %vm2287_vm13, %v2489_v18, 0.0  ;;  %v2337_v60 = vadd.f32 %v2336_v4, %v2335_v40  ;;  %v2195_v10 = vpop.f32.mrf.mxu3 }
 0x261   : > { %v10522_v53 = vadd.f32 1e-05, %v2659_v45  ;;  %v2550_v11 = vadd.f32 %v2549_v58, %v2548_v59  ;;  %8399 = vmatmul.msk.f32.gmra.mxu0 %vm2287_vm13, %v10483_v24  ;;  %v2058_v24 = vsel %vm1979_vm3, %v14060_v42, 0.0 }
 0x262   : > { %v2713_v57 = vmul.f32 %v8848_v37, %v2712_v51  ;;  %v2338_v21 = vrot.slane %v2337_v60, 2 }
 0x263   : > { %8849 = vrsqrt.f32 %v10522_v53  ;;  %v2551_v31 = vrot.slane %v2550_v11, 4  ;;  %vm2724_vm11 = vweird.f32 %v10522_v53 }
 0x264   : > { %v2717_v49 = vsel %vm2716_vm9, %v8848_v37, %v2713_v57  ;;  %v2339_v36 = vadd.f32 %v2338_v21, %v2337_v60  ;;  %8431 = vmatmul.msk.f32.gmra.mxu1 %vm2287_vm13, %v3130_v61 }
 0x265   : > { %v2852_v0 = vmul.f32 %v2717_v49, %v10390_v50  ;;  %v2853_v40 = vmul.f32 %v2717_v49, %v10392_v47  ;;  %v2552_v15 = vadd.f32 %v2551_v31, %v2550_v11  ;;  %8393 = vmatmul.msk.f32.gmra.mxu3 %vm828_vm2, %v2058_v24  ;;  %v4823_v50 = vld [vmem:[%s14003_s8 + $0x18] sm:$0xff]  ;;  %v10547_v47 = vadd.f32 %v2195_v10, %v1959_v12 }
 0x266   : > { %v2340_v55 = vrot.slane %v2339_v36, 1  ;;  %8463 = vmatmul.msk.f32.gmra.mxu2 %vm2287_vm13, %v3499_v17  ;;  %4916 = vmatpush.msra.mxu0 %v4823_v50 }
 0x267   : > { %v2885_v27 = vmax.f32 %v2853_v40, 0.0  ;;  %v2553_v37 = vrot.slane %v2552_v15, 2  ;;  %v2884_v25 = vmax.f32 %v2852_v0, 0.0  ;;  %v2342_v60 = vsel %vm2287_vm13, %v10547_v47, 0.0 }
 0x268   : > { %v2341_v8 = vadd.f32 %v2340_v55, %v2339_v36  ;;  %v2198_v39 = vpop.f32.mrf.mxu3 }
 0x269   : > { %v8850_v18 = vpop.eup %8849  ;;  %v2554_v4 = vadd.f32 %v2553_v37, %v2552_v15  ;;  %v10549_v45 = vadd.f32 %v2198_v39, %v1960_v48  ;;  %8400 = vmatmul.msk.f32.gmra.mxu0 %vm2287_vm13, %v2884_v25  ;;  %v3131_v38 = vrot.slane %v2884_v25, 7  ;;  %v3440_v23 = vrot.slane %v2884_v25, 1 }
 0x26a   : > { %v2719_v29 = vmul.f32 %v8850_v18, %v10522_v53  ;;  %v2437_v51 = vmul.f32 %v2341_v8, %v9258_v54  ;;  %v3441_v59 = vrot.slane %v2885_v27, 1  ;;  %vm2725_vm10 = vweird.f32 %v8850_v18 }
 0x26b   : > { %v2555_v58 = vrot.slane %v2554_v4, 1  ;;  %v2343_v10 = vsel %vm2287_vm13, %v10549_v45, 0.0  ;;  %v3191_v11 = vsel %vm1671_vm15, 0.0, %v3131_v38  ;;  %v3132_v40 = vrot.slane %v2885_v27, 7  ;;  %vm2726_vm12 = vmor %vm2724_vm11, %vm2725_vm10 }
 0x26c   : > { %v2720_v57 = vmul.f32 %v8850_v18, %v2719_v29  ;;  %v10560_v21 = vsub.f32 %v10488_v32, %v2437_v51  ;;  %v10563_v31 = vsub.f32 %v10490_v3, %v2437_v51  ;;  %v2344_v61 = vadd.f32 %v2343_v10, %v2342_v60  ;;  %8432 = vmatmul.msk.f32.gmra.mxu1 %vm2287_vm13, %v3191_v11  ;;  %v10574_v3 = vpop.f32.mrf.mxu2 }
 0x26d   : > { %v2556_v12 = vadd.f32 %v2555_v58, %v2554_v4  ;;  %v3442_v49 = vsel %vm1979_vm3, %v3440_v23, %v3441_v59  ;;  %8394 = vmatmul.msk.f32.gmra.mxu3 %vm828_vm2, %v9750_v26  ;;  %v3133_v4 = vsel %vm1671_vm15, %v3131_v38, %v3132_v40  ;;  %v1961_v23 = vadd.f32 %v10496_v35, %v10228_v43 }
 0x26e   : > { %v2721_v36 = vmul.f32 0.5, %v2720_v57  ;;  %v2490_v42 = vmul.f32 %v10560_v21, %v10560_v21  ;;  %v2491_v32 = vmul.f32 %v10563_v31, %v10563_v31  ;;  %v2345_v24 = vrot.slane %v2344_v61, 4  ;;  %8464 = vmatmul.msk.f32.gmra.mxu2 %vm2287_vm13, %v3442_v49 }
 0x26f   : > { %v2660_v0 = vmul.f32 %v2556_v12, %v9258_v54  ;;  %v14061_v58 = vrot.slane %v9719_v30, 1  ;;  %v3500_v11 = vsel %vm1979_vm3, %v3441_v59, 0.0  ;;  %v1962_v43 = vadd.f32 %v10537_v20, %v10235_v16 }
 0x270   : > { %v2722_v15 = vsub.f32 1.5, %v2721_v36  ;;  %v2557_v17 = vsel %vm2287_vm13, %v2490_v42, 0.0  ;;  %v2558_v26 = vsel %vm2287_vm13, %v2491_v32, 0.0  ;;  %v2346_v48 = vadd.f32 %v2345_v24, %v2344_v61  ;;  %v2201_v55 = vpop.f32.mrf.mxu3 }
 0x271   : > { %v10579_v37 = vadd.f32 1e-05, %v2660_v0  ;;  %v2559_v50 = vadd.f32 %v2558_v26, %v2557_v17  ;;  %8401 = vmatmul.msk.f32.gmra.mxu0 %vm2287_vm13, %v2885_v27  ;;  %v2059_v27 = vsel %vm1979_vm3, %v14061_v58, 0.0  ;;  %v10598_v30 = vadd.f32 %v2201_v55, %v1961_v23 }
 0x272   : > { %v2723_v25 = vmul.f32 %v8850_v18, %v2722_v15  ;;  %v2347_v8 = vrot.slane %v2346_v48, 2 }
 0x273   : > { %8851 = vrsqrt.f32 %v10579_v37  ;;  %v2560_v39 = vrot.slane %v2559_v50, 4  ;;  %v2351_v0 = vsel %vm2287_vm13, %v10598_v30, 0.0  ;;  %vm2734_vm14 = vweird.f32 %v10579_v37 }
 0x274   : > { %v2727_v29 = vsel %vm2726_vm12, %v8850_v18, %v2723_v25  ;;  %v2348_v51 = vadd.f32 %v2347_v8, %v2346_v48  ;;  %8433 = vmatmul.msk.f32.gmra.mxu1 %vm2287_vm13, %v3133_v4 }
 0x275   : > { %v2854_v53 = vmul.f32 %v2727_v29, %v10444_v19  ;;  %v2855_v60 = vmul.f32 %v2727_v29, %v10447_v33  ;;  %v2561_v10 = vadd.f32 %v2560_v39, %v2559_v50  ;;  %8395 = vmatmul.msk.f32.gmra.mxu3 %vm828_vm2, %v2059_v27  ;;  %v1902_v33 = vpop.f32.mrf.mxu2 }
 0x276   : > { %v2349_v35 = vrot.slane %v2348_v51, 1  ;;  %8465 = vmatmul.msk.f32.gmra.mxu2 %vm2287_vm13, %v3500_v11 }
 0x277   : > { %v2887_v18 = vmax.f32 %v2855_v60, 0.0  ;;  %v2562_v38 = vrot.slane %v2561_v10, 2  ;;  %v2886_v57 = vmax.f32 %v2854_v53, 0.0 }
 0x278   : > { %v2350_v61 = vadd.f32 %v2349_v35, %v2348_v51  ;;  %v2204_v19 = vpop.f32.mrf.mxu3 }
 0x279   : > { %v8852_v12 = vpop.eup %8851  ;;  %v2563_v49 = vadd.f32 %v2562_v38, %v2561_v10  ;;  %v10600_v36 = vadd.f32 %v2204_v19, %v1962_v43  ;;  %8402 = vmatmul.msk.f32.gmra.mxu0 %vm2287_vm13, %v2886_v57  ;;  %v3134_v59 = vrot.slane %v2886_v57, 7  ;;  %v3443_v42 = vrot.slane %v2886_v57, 1 }
 0x27a   : > { %v2729_v16 = vmul.f32 %v8852_v12, %v10579_v37  ;;  %v2438_v20 = vmul.f32 %v2350_v61, %v9258_v54  ;;  %v3444_v32 = vrot.slane %v2887_v18, 1  ;;  %vm2735_vm2 = vweird.f32 %v8852_v12 }
 0x27b   : > { %v2564_v24 = vrot.slane %v2563_v49, 1  ;;  %v2352_v40 = vsel %vm2287_vm13, %v10600_v36, 0.0  ;;  %v3192_v15 = vsel %vm1671_vm15, 0.0, %v3134_v59  ;;  %vm2736_vm0 = vmor %vm2734_vm14, %vm2735_vm2  ;;  %v1963_v61 = vadd.f32 %v10574_v3, %v10246_v13 }
 0x27c   : > { %v2730_v17 = vmul.f32 %v8852_v12, %v2729_v16  ;;  %v10611_v26 = vsub.f32 %v10547_v47, %v2438_v20  ;;  %v10614_v48 = vsub.f32 %v10549_v45, %v2438_v20  ;;  %v2353_v55 = vadd.f32 %v2352_v40, %v2351_v0  ;;  %8434 = vmatmul.msk.f32.gmra.mxu1 %vm2287_vm13, %v3192_v15 }
 0x27d   : > { %v2565_v50 = vadd.f32 %v2564_v24, %v2563_v49  ;;  %v3445_v25 = vsel %vm1979_vm3, %v3443_v42, %v3444_v32  ;;  %v3135_v45 = vrot.slane %v2887_v18, 7  ;;  %v10630_v35 = vpop.f32.mrf.mxu2  ;;  %v3501_v16 = vsel %vm1979_vm3, %v3444_v32, 0.0 }
 0x27e   : > { %v2731_v8 = vmul.f32 0.5, %v2730_v17  ;;  %v2492_v39 = vmul.f32 %v10611_v26, %v10611_v26  ;;  %v2493_v4 = vmul.f32 %v10614_v48, %v10614_v48  ;;  %v2354_v23 = vrot.slane %v2353_v55, 4  ;;  %8466 = vmatmul.msk.f32.gmra.mxu2 %vm2287_vm13, %v3445_v25 }
 0x27f   : > { %v2661_v47 = vmul.f32 %v2565_v50, %v9258_v54  ;;  %v3136_v57 = vsel %vm1671_vm15, %v3134_v59, %v3135_v45  ;;  %v1964_v20 = vadd.f32 %v1902_v33, %v10255_v6 }
 0x280   : > { %v2732_v29 = vsub.f32 1.5, %v2731_v8  ;;  %v2566_v51 = vsel %vm2287_vm13, %v2492_v39, 0.0  ;;  %v2567_v58 = vsel %vm2287_vm13, %v2493_v4, 0.0  ;;  %v2355_v27 = vadd.f32 %v2354_v23, %v2353_v55  ;;  %v2207_v53 = vpop.f32.mrf.mxu3 }
 0x281   : > { %v10626_v60 = vadd.f32 1e-05, %v2661_v47  ;;  %v2568_v10 = vadd.f32 %v2567_v58, %v2566_v51  ;;  %8403 = vmatmul.msk.f32.gmra.mxu0 %vm2287_vm13, %v2887_v18  ;;  %v10643_v40 = vadd.f32 %v2207_v53, %v1963_v61 }
 0x282   : > { %v2733_v11 = vmul.f32 %v8852_v12, %v2732_v29  ;;  %v2356_v43 = vrot.slane %v2355_v27, 2 }
 0x283   : > { %8853 = vrsqrt.f32 %v10626_v60  ;;  %v2569_v38 = vrot.slane %v2568_v10, 4  ;;  %v2360_v25 = vsel %vm2287_vm13, %v10643_v40, 0.0  ;;  %vm2744_vm4 = vweird.f32 %v10626_v60 }
 0x284   : > { %v2737_v19 = vsel %vm2736_vm0, %v8852_v12, %v2733_v11  ;;  %v2357_v49 = vadd.f32 %v2356_v43, %v2355_v27  ;;  %8435 = vmatmul.msk.f32.gmra.mxu1 %vm2287_vm13, %v3136_v57 }
 0x285   : > { %v2856_v18 = vmul.f32 %v2737_v19, %v10504_v7  ;;  %v2857_v37 = vmul.f32 %v2737_v19, %v10507_v52  ;;  %v2570_v42 = vadd.f32 %v2569_v38, %v2568_v10  ;;  %v1908_v29 = vpop.f32.mrf.mxu2 }
 0x286   : > { %v2358_v24 = vrot.slane %v2357_v49, 1  ;;  %8467 = vmatmul.msk.f32.gmra.mxu2 %vm2287_vm13, %v3501_v16 }
 0x287   : > { %v2889_v59 = vmax.f32 %v2857_v37, 0.0  ;;  %v2571_v0 = vrot.slane %v2570_v42, 2  ;;  %v2888_v13 = vmax.f32 %v2856_v18, 0.0 }
 0x288   : > { %v2359_v3 = vadd.f32 %v2358_v24, %v2357_v49  ;;  %v2210_v12 = vpop.f32.mrf.mxu3  ;;  %v1965_v24 = vadd.f32 %v10630_v35, %v10267_v9  ;;  %v5132_v9 = vld [vmem:[%s14005_s10 + $0x18] sm:$0xff] }
 0x289   : > { %v8854_v15 = vpop.eup %8853  ;;  %v2572_v17 = vadd.f32 %v2571_v0, %v2570_v42  ;;  %v10645_v7 = vadd.f32 %v2210_v12, %v1964_v20  ;;  %8404 = vmatmul.msk.f32.gmra.mxu0 %vm2287_vm13, %v2888_v13  ;;  %v3137_v52 = vrot.slane %v2888_v13, 7  ;;  %v3446_v32 = vrot.slane %v2888_v13, 1  ;;  %5225 = vmatpush.msra.mxu1 %v5132_v9 }
 0x28a   : > { %v2739_v6 = vmul.f32 %v8854_v15, %v10626_v60  ;;  %v2439_v33 = vmul.f32 %v2359_v3, %v9258_v54  ;;  %v3447_v55 = vrot.slane %v2889_v59, 1  ;;  %vm2745_vm1 = vweird.f32 %v8854_v15 }
 0x28b   : > { %v2573_v50 = vrot.slane %v2572_v17, 1  ;;  %v2361_v8 = vsel %vm2287_vm13, %v10645_v7, 0.0  ;;  %v3193_v39 = vsel %vm1671_vm15, 0.0, %v3137_v52  ;;  %vm2746_vm5 = vmor %vm2744_vm4, %vm2745_vm1 }
 0x28c   : > { %v2740_v4 = vmul.f32 %v8854_v15, %v2739_v6  ;;  %v10656_v23 = vsub.f32 %v10598_v30, %v2439_v33  ;;  %v10659_v47 = vsub.f32 %v10600_v36, %v2439_v33  ;;  %v2362_v45 = vadd.f32 %v2361_v8, %v2360_v25  ;;  %8436 = vmatmul.msk.f32.gmra.mxu1 %vm2287_vm13, %v3193_v39 }
 0x28d   : > { %v2574_v51 = vadd.f32 %v2573_v50, %v2572_v17  ;;  %v3448_v58 = vsel %vm1979_vm3, %v3446_v32, %v3447_v55  ;;  %v3138_v36 = vrot.slane %v2889_v59, 7  ;;  %v3502_v60 = vsel %vm1979_vm3, %v3447_v55, 0.0  ;;  %v10684_v32 = vpop.f32.mrf.mxu2 }
 0x28e   : > { %v2741_v27 = vmul.f32 0.5, %v2740_v4  ;;  %v2494_v53 = vmul.f32 %v10656_v23, %v10656_v23  ;;  %v2495_v10 = vmul.f32 %v10659_v47, %v10659_v47  ;;  %v2363_v11 = vrot.slane %v2362_v45, 4  ;;  %8468 = vmatmul.msk.f32.gmra.mxu2 %vm2287_vm13, %v3448_v58 }
 0x28f   : > { %v2662_v30 = vmul.f32 %v2574_v51, %v9258_v54  ;;  %v3139_v20 = vsel %vm1671_vm15, %v3137_v52, %v3138_v36 }
 0x290   : > { %v2742_v43 = vsub.f32 1.5, %v2741_v27  ;;  %v2575_v38 = vsel %vm2287_vm13, %v2494_v53, 0.0  ;;  %v2576_v57 = vsel %vm2287_vm13, %v2495_v10, 0.0  ;;  %v2364_v61 = vadd.f32 %v2363_v11, %v2362_v45  ;;  %v2213_v19 = vpop.f32.mrf.mxu3 }
 0x291   : > { %v10671_v49 = vadd.f32 1e-05, %v2662_v30  ;;  %v2577_v18 = vadd.f32 %v2576_v57, %v2575_v38  ;;  %8405 = vmatmul.msk.f32.gmra.mxu0 %vm2287_vm13, %v2889_v59  ;;  %v10692_v35 = vadd.f32 %v2213_v19, %v1965_v24 }
 0x292   : > { %v2743_v37 = vmul.f32 %v8854_v15, %v2742_v43  ;;  %v2365_v42 = vrot.slane %v2364_v61, 2 }
 0x293   : > { %8855 = vrsqrt.f32 %v10671_v49  ;;  %v2578_v16 = vrot.slane %v2577_v18, 4  ;;  %vm2754_vm7 = vweird.f32 %v10671_v49 }
 0x294   : > { %v2747_v0 = vsel %vm2746_vm5, %v8854_v15, %v2743_v37  ;;  %v2366_v13 = vadd.f32 %v2365_v42, %v2364_v61  ;;  %8437 = vmatmul.msk.f32.gmra.mxu1 %vm2287_vm13, %v3139_v20  ;;  %v1966_v15 = vadd.f32 %v1908_v29, %v10277_v2  ;;  %v2369_v2 = vsel %vm2287_vm13, %v10692_v35, 0.0 }
 0x295   : > { %v2858_v3 = vmul.f32 %v2747_v0, %v10560_v21  ;;  %v2859_v59 = vmul.f32 %v2747_v0, %v10563_v31  ;;  %v2579_v12 = vadd.f32 %v2578_v16, %v2577_v18  ;;  %v4529_v21 = vld [vmem:[%s14004_s9 + $0x10] sm:$0xff]  ;;  %v1914_v20 = vpop.f32.mrf.mxu2 }
 0x296   : > { %v2367_v17 = vrot.slane %v2366_v13, 1  ;;  %8469 = vmatmul.msk.f32.gmra.mxu2 %vm2287_vm13, %v3502_v60  ;;  %4640 = vmatpush.msra.mxu3 %v4529_v21 }
 0x297   : > { %v2891_v52 = vmax.f32 %v2859_v59, 0.0  ;;  %v2580_v6 = vrot.slane %v2579_v12, 2  ;;  %v2890_v31 = vmax.f32 %v2858_v3, 0.0 }
 0x298   : > { %v2368_v33 = vadd.f32 %v2367_v17, %v2366_v13  ;;  %v2216_v25 = vpop.f32.mrf.mxu3 }
 0x299   : > { %v8856_v55 = vpop.eup %8855  ;;  %v2581_v50 = vadd.f32 %v2580_v6, %v2579_v12  ;;  %8406 = vmatmul.msk.f32.gmra.mxu0 %vm2287_vm13, %v2890_v31  ;;  %v3140_v8 = vrot.slane %v2890_v31, 7  ;;  %v3449_v39 = vrot.slane %v2890_v31, 1  ;;  %v3450_v4 = vrot.slane %v2891_v52, 1 }
 0x29a   : > { %v2749_v45 = vmul.f32 %v8856_v55, %v10671_v49  ;;  %v2440_v51 = vmul.f32 %v2368_v33, %v9258_v54  ;;  %v10698_v58 = vadd.f32 %v2216_v25, %v1966_v15  ;;  %v3141_v18 = vrot.slane %v2891_v52, 7 }
 0x29b   : > { %v2582_v27 = vrot.slane %v2581_v50, 1  ;;  %v3194_v29 = vsel %vm1671_vm15, 0.0, %v3140_v8  ;;  %v3451_v53 = vsel %vm1979_vm3, %v3449_v39, %v3450_v4  ;;  %vm2755_vm6 = vweird.f32 %v8856_v55 }
 0x29c   : > { %v2750_v10 = vmul.f32 %v8856_v55, %v2749_v45  ;;  %v10705_v11 = vsub.f32 %v10643_v40, %v2440_v51  ;;  %v10708_v30 = vsub.f32 %v10645_v7, %v2440_v51  ;;  %v2370_v36 = vsel %vm2287_vm13, %v10698_v58, 0.0  ;;  %8438 = vmatmul.msk.f32.gmra.mxu1 %vm2287_vm13, %v3194_v29  ;;  %vm2756_vm8 = vmor %vm2754_vm7, %vm2755_vm6 }
 0x29d   : > { %v2583_v43 = vadd.f32 %v2582_v27, %v2581_v50  ;;  %v2371_v38 = vadd.f32 %v2370_v36, %v2369_v2  ;;  %v3142_v17 = vsel %vm1671_vm15, %v3140_v8, %v3141_v18  ;;  %v3503_v9 = vsel %vm1979_vm3, %v3450_v4, 0.0 }
 0x29e   : > { %v2751_v57 = vmul.f32 0.5, %v2750_v10  ;;  %v2496_v61 = vmul.f32 %v10705_v11, %v10705_v11  ;;  %v2497_v19 = vmul.f32 %v10708_v30, %v10708_v30  ;;  %8470 = vmatmul.msk.f32.gmra.mxu2 %vm2287_vm13, %v3451_v53  ;;  %v1967_v49 = vadd.f32 %v10684_v32, %v10289_v56  ;;  %v1917_v53 = vpop.f32.mrf.mxu2 }
 0x29f   : > { %v2663_v40 = vmul.f32 %v2583_v43, %v9258_v54  ;;  %v2372_v7 = vrot.slane %v2371_v38, 4  ;;  %v1968_v39 = vadd.f32 %v1914_v20, %v10302_v5 }
 0x2a0   : > { %v2752_v37 = vsub.f32 1.5, %v2751_v57  ;;  %v2584_v42 = vsel %vm2287_vm13, %v2496_v61, 0.0  ;;  %v2585_v16 = vsel %vm2287_vm13, %v2497_v19, 0.0  ;;  %v2219_v3 = vpop.f32.mrf.mxu3 }
 0x2a1   : > { %v10721_v24 = vadd.f32 1e-05, %v2663_v40  ;;  %v2586_v0 = vadd.f32 %v2585_v16, %v2584_v42  ;;  %v2373_v13 = vadd.f32 %v2372_v7, %v2371_v38  ;;  %8407 = vmatmul.msk.f32.gmra.mxu0 %vm2287_vm13, %v2891_v52 }
 0x2a2   : > { %v2753_v59 = vmul.f32 %v8856_v55, %v2752_v37 }
 0x2a3   : > { %8857 = vrsqrt.f32 %v10721_v24  ;;  %v2587_v12 = vrot.slane %v2586_v0, 4  ;;  %v2374_v60 = vrot.slane %v2373_v13, 2  ;;  %vm2764_vm10 = vweird.f32 %v10721_v24 }
 0x2a4   : > { %v2757_v6 = vsel %vm2756_vm8, %v8856_v55, %v2753_v59  ;;  %8439 = vmatmul.msk.f32.gmra.mxu1 %vm2287_vm13, %v3142_v17  ;;  %v4822_v55 = vld [vmem:[%s14003_s8 + $0x10] sm:$0xff] }
 0x2a5   : > { %v2860_v21 = vmul.f32 %v2757_v6, %v10611_v26  ;;  %v2861_v31 = vmul.f32 %v2757_v6, %v10614_v48  ;;  %v2588_v52 = vadd.f32 %v2587_v12, %v2586_v0  ;;  %v2375_v15 = vadd.f32 %v2374_v60, %v2373_v13  ;;  %4917 = vmatpush.msra.mxu0 %v4822_v55 }
 0x2a6   : > { %8471 = vmatmul.msk.f32.gmra.mxu2 %vm2287_vm13, %v3503_v9  ;;  %v10738_v26 = vadd.f32 %v2219_v3, %v1967_v49 }
 0x2a7   : > { %v2893_v33 = vmax.f32 %v2861_v31, 0.0  ;;  %v2589_v50 = vrot.slane %v2588_v52, 2  ;;  %v2376_v25 = vrot.slane %v2375_v15, 1  ;;  %v2892_v8 = vmax.f32 %v2860_v21, 0.0 }
 0x2a8   : > { %v2222_v51 = vpop.f32.mrf.mxu3  ;;  %v2378_v38 = vsel %vm2287_vm13, %v10738_v26, 0.0 }
 0x2a9   : > { %v8858_v48 = vpop.eup %8857  ;;  %v2590_v4 = vadd.f32 %v2589_v50, %v2588_v52  ;;  %v2377_v45 = vadd.f32 %v2376_v25, %v2375_v15  ;;  %8408 = vmatmul.msk.f32.gmra.mxu0 %vm2287_vm13, %v2892_v8  ;;  %v3143_v56 = vrot.slane %v2892_v8, 7  ;;  %v3452_v32 = vrot.slane %v2892_v8, 1  ;;  %v1920_v15 = vpop.f32.mrf.mxu2 }
 0x2aa   : > { %v2759_v27 = vmul.f32 %v8858_v48, %v10721_v24  ;;  %v10742_v2 = vadd.f32 %v2222_v51, %v1968_v39  ;;  %v3453_v29 = vrot.slane %v2893_v33, 1  ;;  %v3144_v42 = vrot.slane %v2893_v33, 7 }
 0x2ab   : > { %v2591_v10 = vrot.slane %v2590_v4, 1  ;;  %v2441_v5 = vmul.f32 %v2377_v45, %v9258_v54  ;;  %v3195_v36 = vsel %vm1671_vm15, 0.0, %v3143_v56  ;;  %vm2765_vm9 = vweird.f32 %v8858_v48 }
 0x2ac   : > { %v2760_v43 = vmul.f32 %v8858_v48, %v2759_v27  ;;  %v2379_v57 = vsel %vm2287_vm13, %v10742_v2, 0.0  ;;  %8440 = vmatmul.msk.f32.gmra.mxu1 %vm2287_vm13, %v3195_v36  ;;  %v3454_v61 = vsel %vm1979_vm3, %v3452_v32, %v3453_v29  ;;  %vm2766_vm11 = vmor %vm2764_vm10, %vm2765_vm9  ;;  %v3145_v21 = vsel %vm1671_vm15, %v3143_v56, %v3144_v42 }
 0x2ad   : > { %v2592_v19 = vadd.f32 %v2591_v10, %v2590_v4  ;;  %v10753_v40 = vsub.f32 %v10692_v35, %v2441_v5  ;;  %v10756_v7 = vsub.f32 %v10698_v58, %v2441_v5  ;;  %v2380_v18 = vadd.f32 %v2379_v57, %v2378_v38 }
 0x2ae   : > { %v2761_v37 = vmul.f32 0.5, %v2760_v43  ;;  %8472 = vmatmul.msk.f32.gmra.mxu2 %vm2287_vm13, %v3454_v61  ;;  %v3504_v55 = vsel %vm1979_vm3, %v3453_v29, 0.0  ;;  %v1969_v24 = vadd.f32 %v1917_v53, %v10321_v44 }
 0x2af   : > { %v2664_v16 = vmul.f32 %v2592_v19, %v9258_v54  ;;  %v2498_v20 = vmul.f32 %v10753_v40, %v10753_v40  ;;  %v2499_v0 = vmul.f32 %v10756_v7, %v10756_v7  ;;  %v2381_v13 = vrot.slane %v2380_v18, 4 }
 0x2b0   : > { %v2762_v3 = vsub.f32 1.5, %v2761_v37  ;;  %v2225_v60 = vpop.f32.mrf.mxu3 }
 0x2b1   : > { %v10764_v35 = vadd.f32 1e-05, %v2664_v16  ;;  %v2593_v58 = vsel %vm2287_vm13, %v2498_v20, 0.0  ;;  %v2594_v59 = vsel %vm2287_vm13, %v2499_v0, 0.0  ;;  %v2382_v12 = vadd.f32 %v2381_v13, %v2380_v18  ;;  %8409 = vmatmul.msk.f32.gmra.mxu0 %vm2287_vm13, %v2893_v33 }
 0x2b2   : > { %v2763_v17 = vmul.f32 %v8858_v48, %v2762_v3  ;;  %v2595_v6 = vadd.f32 %v2594_v59, %v2593_v58  ;;  %v10779_v51 = vadd.f32 %v2225_v60, %v1969_v24 }
 0x2b3   : > { %8859 = vrsqrt.f32 %v10764_v35  ;;  %v2383_v9 = vrot.slane %v2382_v12, 2  ;;  %vm2774_vm2 = vweird.f32 %v10764_v35 }
 0x2b4   : > { %v2767_v31 = vsel %vm2766_vm11, %v8858_v48, %v2763_v17  ;;  %v2596_v52 = vrot.slane %v2595_v6, 4  ;;  %8441 = vmatmul.msk.f32.gmra.mxu1 %vm2287_vm13, %v3145_v21  ;;  %v1970_v48 = vadd.f32 %v1920_v15, %v10345_v34  ;;  %v2387_v57 = vsel %vm2287_vm13, %v10779_v51, 0.0 }
 0x2b5   : > { %v2862_v49 = vmul.f32 %v2767_v31, %v10656_v23  ;;  %v2863_v50 = vmul.f32 %v2767_v31, %v10659_v47  ;;  %v2384_v33 = vadd.f32 %v2383_v9, %v2382_v12 }
 0x2b6   : > { %v2597_v25 = vadd.f32 %v2596_v52, %v2595_v6  ;;  %8473 = vmatmul.msk.f32.gmra.mxu2 %vm2287_vm13, %v3504_v55  ;;  %v14062_v55 = vld [vmem:[#allocation9_spill] sm:$0xff] }
 0x2b7   : > { %v2895_v8 = vmax.f32 %v2863_v50, 0.0  ;;  %v2385_v39 = vrot.slane %v2384_v33, 1  ;;  %v2894_v4 = vmax.f32 %v2862_v49, 0.0  ;;  %v1971_v24 = vadd.f32 %v14062_v55, %v9983_v41 }
 0x2b8   : > { %v2598_v45 = vrot.slane %v2597_v25, 2  ;;  %v2228_v32 = vpop.f32.mrf.mxu3 }
 0x2b9   : > { %v8860_v56 = vpop.eup %8859  ;;  %v2386_v23 = vadd.f32 %v2385_v39, %v2384_v33  ;;  %8410 = vmatmul.msk.f32.gmra.mxu0 %vm2287_vm13, %v2894_v4  ;;  %v3146_v47 = vrot.slane %v2894_v4, 7  ;;  %v3455_v27 = vrot.slane %v2894_v4, 1  ;;  %v3456_v29 = vrot.slane %v2895_v8, 1 }
 0x2ba   : > { %v2769_v44 = vmul.f32 %v8860_v56, %v10764_v35  ;;  %v2599_v53 = vadd.f32 %v2598_v45, %v2597_v25  ;;  %v10783_v10 = vadd.f32 %v2228_v32, %v1970_v48  ;;  %v3147_v3 = vrot.slane %v2895_v8, 7  ;;  %v14063_v45 = vld [vmem:[#allocation10_spill] sm:$0xff] }
 0x2bb   : > { %v2442_v5 = vmul.f32 %v2386_v23, %v9258_v54  ;;  %v3196_v34 = vsel %vm1671_vm15, 0.0, %v3146_v47  ;;  %v3457_v36 = vsel %vm1979_vm3, %v3455_v27, %v3456_v29  ;;  %vm2775_vm12 = vweird.f32 %v8860_v56 }
 0x2bc   : > { %v2770_v43 = vmul.f32 %v8860_v56, %v2769_v44  ;;  %v2600_v38 = vrot.slane %v2599_v53, 1  ;;  %v2388_v61 = vsel %vm2287_vm13, %v10783_v10, 0.0  ;;  %8442 = vmatmul.msk.f32.gmra.mxu1 %vm2287_vm13, %v3196_v34  ;;  %vm2776_vm14 = vmor %vm2774_vm2, %vm2775_vm12  ;;  %v3148_v31 = vsel %vm1671_vm15, %v3146_v47, %v3147_v3 }
 0x2bd   : > { %v10794_v19 = vsub.f32 %v10738_v26, %v2442_v5  ;;  %v10797_v18 = vsub.f32 %v10742_v2, %v2442_v5  ;;  %v2389_v37 = vadd.f32 %v2388_v61, %v2387_v57  ;;  %v3505_v35 = vsel %vm1979_vm3, %v3456_v29, 0.0 }
 0x2be   : > { %v2771_v42 = vmul.f32 0.5, %v2770_v43  ;;  %v2601_v16 = vadd.f32 %v2600_v38, %v2599_v53  ;;  %8474 = vmatmul.msk.f32.gmra.mxu2 %vm2287_vm13, %v3457_v36 }
 0x2bf   : > { %v2500_v20 = vmul.f32 %v10794_v19, %v10794_v19  ;;  %v2501_v0 = vmul.f32 %v10797_v18, %v10797_v18  ;;  %v2390_v13 = vrot.slane %v2389_v37, 4 }
 0x2c0   : > { %v2772_v58 = vsub.f32 1.5, %v2771_v42  ;;  %v2665_v26 = vmul.f32 %v2601_v16, %v9258_v54  ;;  %v2231_v60 = vpop.f32.mrf.mxu3 }
 0x2c1   : > { %v2602_v2 = vsel %vm2287_vm13, %v2500_v20, 0.0  ;;  %v2603_v59 = vsel %vm2287_vm13, %v2501_v0, 0.0  ;;  %v2391_v12 = vadd.f32 %v2390_v13, %v2389_v37  ;;  %8411 = vmatmul.msk.f32.gmra.mxu0 %vm2287_vm13, %v2895_v8 }
 0x2c2   : > { %v2773_v17 = vmul.f32 %v8860_v56, %v2772_v58  ;;  %v10809_v6 = vadd.f32 1e-05, %v2665_v26  ;;  %v2604_v9 = vadd.f32 %v2603_v59, %v2602_v2 }
 0x2c3   : > { %v2392_v21 = vrot.slane %v2391_v12, 2 }
 0x2c4   : > { %v2777_v52 = vsel %vm2776_vm14, %v8860_v56, %v2773_v17  ;;  %8861 = vrsqrt.f32 %v10809_v6  ;;  %v2605_v15 = vrot.slane %v2604_v9, 4  ;;  %8443 = vmatmul.msk.f32.gmra.mxu1 %vm2287_vm13, %v3148_v31  ;;  %v1972_v56 = vadd.f32 %v14063_v45, %v10003_v28 }
 0x2c5   : > { %v2864_v49 = vmul.f32 %v2777_v52, %v10705_v11  ;;  %v2865_v50 = vmul.f32 %v2777_v52, %v10708_v30  ;;  %v2393_v33 = vadd.f32 %v2392_v21, %v2391_v12  ;;  %v10822_v11 = vadd.f32 %v2231_v60, %v1971_v24 }
 0x2c6   : > { %v2606_v25 = vadd.f32 %v2605_v15, %v2604_v9  ;;  %8475 = vmatmul.msk.f32.gmra.mxu2 %vm2287_vm13, %v3505_v35  ;;  %v3029_v8 = vpop.f32.mrf.mxu0  ;;  %vm2784_vm1 = vweird.f32 %v10809_v6  ;;  %v14064_v35 = vld [vmem:[#allocation11_spill] sm:$0xff] }
 0x2c7   : > { %v2897_v39 = vmax.f32 %v2865_v50, 0.0  ;;  %v2394_v4 = vrot.slane %v2393_v33, 1  ;;  %v2896_v48 = vmax.f32 %v2864_v49, 0.0  ;;  %v2396_v38 = vsel %vm2287_vm13, %v10822_v11, 0.0 }
 0x2c8   : > { %v2607_v23 = vrot.slane %v2606_v25, 2  ;;  %v2234_v32 = vpop.f32.mrf.mxu3  ;;  %v1973_v55 = vadd.f32 %v14064_v35, %v10029_v63 }
 0x2c9   : > { %v2395_v30 = vadd.f32 %v2394_v4, %v2393_v33  ;;  %8412 = vmatmul.msk.f32.gmra.mxu0 %vm2287_vm13, %v2896_v48  ;;  %v3306_v47 = vpop.f32.mrf.mxu1  ;;  %v3149_v27 = vrot.slane %v2896_v48, 7  ;;  %v3458_v41 = vrot.slane %v2896_v48, 1  ;;  %v3459_v29 = vrot.slane %v2897_v39, 1 }
 0x2ca   : > { %v8862_v44 = vpop.eup %8861  ;;  %v2608_v53 = vadd.f32 %v2607_v23, %v2606_v25  ;;  %v10825_v5 = vadd.f32 %v2234_v32, %v1972_v56  ;;  %v3150_v3 = vrot.slane %v2897_v39, 7  ;;  %v3402_v4 = vadd.f32 %v3306_v47, %v3029_v8 }
 0x2cb   : > { %v2779_v34 = vmul.f32 %v8862_v44, %v10809_v6  ;;  %v2443_v36 = vmul.f32 %v2395_v30, %v9258_v54  ;;  %v3197_v28 = vsel %vm1671_vm15, 0.0, %v3149_v27  ;;  %v3460_v61 = vsel %vm1979_vm3, %v3458_v41, %v3459_v29 }
 0x2cc   : > { %v2609_v43 = vrot.slane %v2608_v53, 1  ;;  %v2397_v57 = vsel %vm2287_vm13, %v10825_v5, 0.0  ;;  %8444 = vmatmul.msk.f32.gmra.mxu1 %vm2287_vm13, %v3197_v28  ;;  %vm2785_vm0 = vweird.f32 %v8862_v44  ;;  %v3151_v33 = vsel %vm1671_vm15, %v3149_v27, %v3150_v3  ;;  %v14065_v27 = vld [vmem:[#allocation12_spill] sm:$0xff] }
 0x2cd   : > { %v2780_v37 = vmul.f32 %v8862_v44, %v2779_v34  ;;  %v10837_v42 = vsub.f32 %v10779_v51, %v2443_v36  ;;  %v10840_v16 = vsub.f32 %v10783_v10, %v2443_v36  ;;  %v2398_v20 = vadd.f32 %v2397_v57, %v2396_v38  ;;  %vm2786_vm4 = vmor %vm2784_vm1, %vm2785_vm0 }
 0x2ce   : > { %v2610_v0 = vadd.f32 %v2609_v43, %v2608_v53  ;;  %8476 = vmatmul.msk.f32.gmra.mxu2 %vm2287_vm13, %v3460_v61  ;;  %v3032_v13 = vpop.f32.mrf.mxu0  ;;  %v3506_v48 = vsel %vm1979_vm3, %v3459_v29, 0.0  ;;  %v1974_v41 = vadd.f32 %v14065_v27, %v10061_v14 }
 0x2cf   : > { %v2781_v58 = vmul.f32 0.5, %v2780_v37  ;;  %v2502_v26 = vmul.f32 %v10837_v42, %v10837_v42  ;;  %v2503_v2 = vmul.f32 %v10840_v16, %v10840_v16  ;;  %v2399_v59 = vrot.slane %v2398_v20, 4 }
 0x2d0   : > { %v2666_v51 = vmul.f32 %v2610_v0, %v9258_v54  ;;  %v2237_v21 = vpop.f32.mrf.mxu3 }
 0x2d1   : > { %v2782_v12 = vsub.f32 1.5, %v2781_v58  ;;  %v2611_v10 = vsel %vm2287_vm13, %v2502_v26, 0.0  ;;  %v2612_v60 = vsel %vm2287_vm13, %v2503_v2, 0.0  ;;  %v2400_v17 = vadd.f32 %v2399_v59, %v2398_v20  ;;  %v3615_v9 = vpop.f32.mrf.mxu2  ;;  %8413 = vmatmul.msk.f32.gmra.mxu0 %vm2287_vm13, %v2897_v39  ;;  %v3309_v15 = vpop.f32.mrf.mxu1 }
 0x2d2   : > { %v10851_v31 = vadd.f32 1e-05, %v2666_v51  ;;  %v2613_v52 = vadd.f32 %v2612_v60, %v2611_v10  ;;  %v10866_v30 = vadd.f32 %v3615_v9, %v3402_v4  ;;  %v10868_v32 = vadd.f32 %v2237_v21, %v1973_v55 }
 0x2d3   : > { %v2783_v49 = vmul.f32 %v8862_v44, %v2782_v12  ;;  %v2401_v50 = vrot.slane %v2400_v17, 2  ;;  %v3403_v47 = vadd.f32 %v3309_v15, %v3032_v13 }
 0x2d4   : > { %8863 = vrsqrt.f32 %v10851_v31  ;;  %v2614_v24 = vrot.slane %v2613_v52, 4  ;;  %8445 = vmatmul.msk.f32.gmra.mxu1 %vm2287_vm13, %v3151_v33  ;;  %v3743_v13 = vsel %vm2287_vm13, %v10866_v30, 0.0  ;;  %v2405_v3 = vsel %vm2287_vm13, %v10868_v32, 0.0 }
 0x2d5   : > { %v2787_v25 = vsel %vm2786_vm4, %v8862_v44, %v2783_v49  ;;  %v2402_v39 = vadd.f32 %v2401_v50, %v2400_v17  ;;  %v14066_v44 = vld [vmem:[#allocation13_spill] sm:$0xff]  ;;  %vm2794_vm6 = vweird.f32 %v10851_v31 }
 0x2d6   : > { %v2866_v6 = vmul.f32 %v2787_v25, %v10753_v40  ;;  %v2867_v45 = vmul.f32 %v2787_v25, %v10756_v7  ;;  %v2615_v56 = vadd.f32 %v2614_v24, %v2613_v52  ;;  %8477 = vmatmul.msk.f32.gmra.mxu2 %vm2287_vm13, %v3506_v48  ;;  %v10864_v63 = vpop.f32.mrf.mxu0  ;;  %v5131_v40 = vld [vmem:[%s14005_s10 + $0x10] sm:$0xff]  ;;  %v4528_v7 = vld [vmem:[%s14004_s9 + $0x8] sm:$0xff]  ;;  %v10882_v53 = vadd.f32 %v14066_v44, %v10084_v62 }
 0x2d7   : > { %v2403_v23 = vrot.slane %v2402_v39, 1  ;;  %5226 = vmatpush.msra.mxu1 %v5131_v40  ;;  %4641 = vmatpush.msra.mxu3 %v4528_v7 }
 0x2d8   : > { %v2616_v8 = vrot.slane %v2615_v56, 2  ;;  %v10878_v29 = vmax.f32 %v2866_v6, 0.0  ;;  %v10884_v34 = vmax.f32 %v2867_v45, 0.0  ;;  %v2240_v28 = vpop.f32.mrf.mxu3 }
 0x2d9   : > { %v2404_v14 = vadd.f32 %v2403_v23, %v2402_v39  ;;  %v3618_v36 = vpop.f32.mrf.mxu2  ;;  %v10888_v61 = vadd.f32 %v2240_v28, %v1974_v41  ;;  %v3312_v37 = vpop.f32.mrf.mxu1  ;;  %v14067_v28 = vld [vmem:[#allocation14_spill] sm:$0xff] }
 0x2da   : > { %v8864_v43 = vpop.eup %8863  ;;  %v2617_v38 = vadd.f32 %v2616_v8, %v2615_v56  ;;  %v10886_v57 = vadd.f32 %v3618_v36, %v3403_v47  ;;  %8414 = vmatmul.msk.f32.gmra.mxu0 %vm2287_vm13, %v10878_v29  ;;  %v3152_v62 = vrot.slane %v10878_v29, 7  ;;  %v3461_v21 = vrot.slane %v10878_v29, 1 }
 0x2db   : > { %v2789_v20 = vmul.f32 %v8864_v43, %v10851_v31  ;;  %v2444_v0 = vmul.f32 %v2404_v14, %v9258_v54  ;;  %v2406_v2 = vsel %vm2287_vm13, %v10888_v61, 0.0  ;;  %v3462_v52 = vrot.slane %v10884_v34, 1 }
 0x2dc   : > { %v2618_v58 = vrot.slane %v2617_v38, 1  ;;  %v3744_v26 = vsel %vm2287_vm13, %v10886_v57, 0.0  ;;  %v3198_v59 = vsel %vm1671_vm15, 0.0, %v3152_v62  ;;  %v2407_v9 = vadd.f32 %v2406_v2, %v2405_v3 }
 0x2dd   : > { %v2790_v51 = vmul.f32 %v8864_v43, %v2789_v20  ;;  %v10905_v12 = vsub.f32 %v10822_v11, %v2444_v0  ;;  %v10908_v10 = vsub.f32 %v10825_v5, %v2444_v0  ;;  %v3745_v60 = vadd.f32 %v3744_v26, %v3743_v13  ;;  %8446 = vmatmul.msk.f32.gmra.mxu1 %vm2287_vm13, %v3198_v59 }
 0x2de   : > { %v2619_v17 = vadd.f32 %v2618_v58, %v2617_v38  ;;  %v3038_v15 = vpop.f32.mrf.mxu0  ;;  %vm2795_vm5 = vweird.f32 %v8864_v43  ;;  %v2408_v35 = vrot.slane %v2407_v9, 4  ;;  %v3463_v55 = vsel %vm1979_vm3, %v3461_v21, %v3462_v52 }
 0x2df   : > { %v2791_v49 = vmul.f32 0.5, %v2790_v51  ;;  %v2504_v50 = vmul.f32 %v10905_v12, %v10905_v12  ;;  %v2505_v11 = vmul.f32 %v10908_v10, %v10908_v10  ;;  %v3746_v33 = vrot.slane %v3745_v60, 4  ;;  %8478 = vmatmul.msk.f32.gmra.mxu2 %vm2287_vm13, %v3463_v55  ;;  %vm2796_vm7 = vmor %vm2794_vm6, %vm2795_vm5 }
 0x2e0   : > { %v2667_v5 = vmul.f32 %v2619_v17, %v9258_v54  ;;  %v2243_v6 = vpop.f32.mrf.mxu3  ;;  %v2409_v23 = vadd.f32 %v2408_v35, %v2407_v9  ;;  %v3404_v40 = vadd.f32 %v3312_v37, %v10864_v63  ;;  %v3153_v7 = vrot.slane %v10884_v34, 7 }
 0x2e1   : > { %v2792_v24 = vsub.f32 1.5, %v2791_v49  ;;  %v2620_v25 = vsel %vm2287_vm13, %v2504_v50, 0.0  ;;  %v2621_v39 = vsel %vm2287_vm13, %v2505_v11, 0.0  ;;  %v3747_v4 = vadd.f32 %v3746_v33, %v3745_v60  ;;  %v3621_v48 = vpop.f32.mrf.mxu2  ;;  %v3315_v27 = vpop.f32.mrf.mxu1 }
 0x2e2   : > { %v10923_v45 = vadd.f32 1e-05, %v2667_v5  ;;  %v2622_v56 = vadd.f32 %v2621_v39, %v2620_v25  ;;  %8415 = vmatmul.msk.f32.gmra.mxu0 %vm2287_vm13, %v10884_v34  ;;  %v2410_v31 = vrot.slane %v2409_v23, 2  ;;  %v10931_v14 = vadd.f32 %v3621_v48, %v3404_v40 }
 0x2e3   : > { %v2793_v41 = vmul.f32 %v8864_v43, %v2792_v24  ;;  %v3748_v8 = vrot.slane %v3747_v4, 2  ;;  %v10934_v36 = vadd.f32 %v2243_v6, %v10882_v53  ;;  %v1976_v38 = vadd.f32 %v14067_v28, %v10109_v46  ;;  %v4821_v53 = vld [vmem:[%s14003_s8 + $0x8] sm:$0xff] }
 0x2e4   : > { %8865 = vrsqrt.f32 %v10923_v45  ;;  %v2623_v47 = vrot.slane %v2622_v56, 4  ;;  %v2411_v34 = vadd.f32 %v2410_v31, %v2409_v23  ;;  %v3405_v3 = vadd.f32 %v3315_v27, %v3038_v15  ;;  %4918 = vmatpush.msra.mxu0 %v4821_v53 }
 0x2e5   : > { %v2797_v29 = vsel %vm2796_vm7, %v8864_v43, %v2793_v41  ;;  %v3749_v44 = vadd.f32 %v3748_v8, %v3747_v4  ;;  %v3154_v43 = vsel %vm1671_vm15, %v3152_v62, %v3153_v7  ;;  %v3507_v46 = vsel %vm1979_vm3, %v3462_v52, 0.0 }
 0x2e6   : > { %v2868_v63 = vmul.f32 %v2797_v29, %v10794_v19  ;;  %v2624_v37 = vadd.f32 %v2623_v47, %v2622_v56  ;;  %v10939_v20 = vpop.f32.mrf.mxu0  ;;  %v2869_v0 = vmul.f32 %v2797_v29, %v10797_v18  ;;  %v2412_v26 = vrot.slane %v2411_v34, 1  ;;  %8447 = vmatmul.msk.f32.gmra.mxu1 %vm2287_vm13, %v3154_v43 }
 0x2e7   : > { %v3750_v13 = vrot.slane %v3749_v44, 1  ;;  %v3752_v18 = vsel %vm2287_vm13, %v10931_v14, 0.0  ;;  %v2414_v62 = vsel %vm2287_vm13, %v10934_v36, 0.0  ;;  %8479 = vmatmul.msk.f32.gmra.mxu2 %vm2287_vm13, %v3507_v46  ;;  %vm2804_vm8 = vweird.f32 %v10923_v45 }
 0x2e8   : > { %v2625_v58 = vrot.slane %v2624_v37, 2  ;;  %v10948_v19 = vmax.f32 %v2868_v63, 0.0  ;;  %v2246_v51 = vpop.f32.mrf.mxu3  ;;  %v2413_v9 = vadd.f32 %v2412_v26, %v2411_v34  ;;  %v10963_v49 = vmax.f32 %v2869_v0, 0.0 }
 0x2e9   : > { %v3751_v2 = vadd.f32 %v3750_v13, %v3749_v44  ;;  %v3624_v59 = vpop.f32.mrf.mxu2  ;;  %v10957_v52 = vadd.f32 %v2246_v51, %v1976_v38  ;;  %v10961_v15 = vpop.f32.mrf.mxu1 }
 0x2ea   : > { %v8866_v60 = vpop.eup %8865  ;;  %v2626_v17 = vadd.f32 %v2625_v58, %v2624_v37  ;;  %v10955_v21 = vadd.f32 %v3624_v59, %v3405_v3  ;;  %8416 = vmatmul.msk.f32.gmra.mxu0 %vm2287_vm13, %v10948_v19  ;;  %v2445_v5 = vmul.f32 %v2413_v9, %v9258_v54  ;;  %v3155_v26 = vrot.slane %v10948_v19, 7  ;;  %v14068_v59 = vld [vmem:[#allocation15_spill] sm:$0xff] }
 0x2eb   : > { %v2799_v50 = vmul.f32 %v8866_v60, %v10923_v45  ;;  %vm2805_vm9 = vweird.f32 %v8866_v60  ;;  %v3887_v11 = vmul.f32 %v3751_v2, %v9258_v54  ;;  %v2415_v55 = vsel %vm2287_vm13, %v10957_v52, 0.0 }
 0x2ec   : > { %v2627_v33 = vrot.slane %v2626_v17, 1  ;;  %v3753_v35 = vsel %vm2287_vm13, %v10955_v21, 0.0  ;;  %v10980_v6 = vsub.f32 %v10868_v32, %v2445_v5  ;;  %v10983_v56 = vsub.f32 %v10888_v61, %v2445_v5  ;;  %vm2806_vm10 = vmor %vm2804_vm8, %vm2805_vm9 }
 0x2ed   : > { %v2800_v24 = vmul.f32 %v8866_v60, %v2799_v50  ;;  %v10974_v25 = vsub.f32 %v10866_v30, %v3887_v11  ;;  %v10977_v39 = vsub.f32 %v10886_v57, %v3887_v11  ;;  %v3754_v4 = vadd.f32 %v3753_v35, %v3752_v18 }
 0x2ee   : > { %v2628_v48 = vadd.f32 %v2627_v33, %v2626_v17  ;;  %v2416_v23 = vadd.f32 %v2415_v55, %v2414_v62  ;;  %v10985_v27 = vpop.f32.mrf.mxu0  ;;  %v2506_v32 = vmul.f32 %v10980_v6, %v10980_v6  ;;  %v2507_v61 = vmul.f32 %v10983_v56, %v10983_v56  ;;  %v14069_v55 = vld [vmem:[#allocation16_spill] sm:$0xff] }
 0x2ef   : > { %v2801_v41 = vmul.f32 0.5, %v2800_v24  ;;  %v3935_v8 = vmul.f32 %v10974_v25, %v10974_v25  ;;  %v3936_v30 = vmul.f32 %v10977_v39, %v10977_v39  ;;  %v3755_v57 = vrot.slane %v3754_v4, 4 }
 0x2f0   : > { %v2668_v40 = vmul.f32 %v2628_v48, %v9258_v54  ;;  %v2417_v7 = vrot.slane %v2416_v23, 4  ;;  %v2629_v37 = vsel %vm2287_vm13, %v2506_v32, 0.0  ;;  %v2630_v34 = vsel %vm2287_vm13, %v2507_v61, 0.0  ;;  %v11015_v45 = vpop.f32.mrf.mxu3 }
 0x2f1   : > { %v2802_v47 = vsub.f32 1.5, %v2801_v41  ;;  %v3967_v31 = vsel %vm2287_vm13, %v3935_v8, 0.0  ;;  %v3968_v29 = vsel %vm2287_vm13, %v3936_v30, 0.0  ;;  %v3756_v44 = vadd.f32 %v3755_v57, %v3754_v4  ;;  %v3627_v28 = vpop.f32.mrf.mxu2  ;;  %v3321_v0 = vpop.f32.mrf.mxu1 }
 0x2f2   : > { %v10998_v38 = vadd.f32 1e-05, %v2668_v40  ;;  %v3969_v63 = vadd.f32 %v3968_v29, %v3967_v31  ;;  %8417 = vmatmul.msk.f32.gmra.mxu0 %vm2287_vm13, %v10963_v49  ;;  %v2631_v3 = vadd.f32 %v2630_v34, %v2629_v37  ;;  %v2418_v58 = vadd.f32 %v2417_v7, %v2416_v23 }
 0x2f3   : > { %v2803_v13 = vmul.f32 %v8866_v60, %v2802_v47  ;;  %v3757_v43 = vrot.slane %v3756_v44, 2  ;;  %v11011_v51 = vadd.f32 %v14068_v59, %v10125_v22  ;;  %v3199_v50 = vsel %vm1671_vm15, 0.0, %v3155_v26 }
 0x2f4   : > { %8867 = vrsqrt.f32 %v10998_v38  ;;  %v3970_v53 = vrot.slane %v3969_v63, 4  ;;  %v2632_v2 = vrot.slane %v2631_v3, 4  ;;  %v2419_v62 = vrot.slane %v2418_v58, 2  ;;  %8448 = vmatmul.msk.f32.gmra.mxu1 %vm2287_vm13, %v3199_v50 }
 0x2f5   : > { %v2807_v46 = vsel %vm2806_vm10, %v8866_v60, %v2803_v13  ;;  %v3758_v18 = vadd.f32 %v3757_v43, %v3756_v44  ;;  %v3464_v60 = vrot.slane %v10948_v19, 1  ;;  %v1978_v22 = vadd.f32 %v14069_v55, %v10145_v1 }
 0x2f6   : > { %v2871_v17 = vmul.f32 %v2807_v46, %v10840_v16  ;;  %v3971_v9 = vadd.f32 %v3970_v53, %v3969_v63  ;;  %v11017_v11 = vpop.f32.mrf.mxu0  ;;  %v2633_v33 = vadd.f32 %v2632_v2, %v2631_v3  ;;  %v2420_v35 = vadd.f32 %v2419_v62, %v2418_v58 }
 0x2f7   : > { %v3759_v5 = vrot.slane %v3758_v18, 1  ;;  %v3406_v16 = vadd.f32 %v10961_v15, %v10939_v20  ;;  %v3465_v4 = vrot.slane %v10963_v49, 1  ;;  %v11027_v48 = vmul.f32 %v2807_v46, %v10837_v42 }
 0x2f8   : > { %v3972_v24 = vrot.slane %v3971_v9, 2  ;;  %v2634_v23 = vrot.slane %v2633_v33, 2  ;;  %v2421_v8 = vrot.slane %v2420_v35, 1  ;;  %v11029_v40 = vmax.f32 %v2871_v17, 0.0  ;;  %v2252_v2 = vpop.f32.mrf.mxu3 }
 0x2f9   : > { %v3760_v41 = vadd.f32 %v3759_v5, %v3758_v18  ;;  %v3630_v30 = vpop.f32.mrf.mxu2  ;;  %v3466_v32 = vsel %vm1979_vm3, %v3464_v60, %v3465_v4  ;;  %v11032_v1 = vadd.f32 %v3627_v28, %v3406_v16  ;;  %v11034_v61 = vpop.f32.mrf.mxu1  ;;  %vm2814_vm11 = vweird.f32 %v10998_v38 }
 0x2fa   : > { %v8868_v57 = vpop.eup %8867  ;;  %v3973_v19 = vadd.f32 %v3972_v24, %v3971_v9  ;;  %v2635_v42 = vadd.f32 %v2634_v23, %v2633_v33  ;;  %8480 = vmatmul.msk.f32.gmra.mxu2 %vm2287_vm13, %v3466_v32  ;;  %v3407_v7 = vadd.f32 %v3321_v0, %v10985_v27  ;;  %v2422_v31 = vadd.f32 %v2421_v8, %v2420_v35 }
 0x2fb   : > { %v2809_v20 = vmul.f32 %v8868_v57, %v10998_v38  ;;  %v3888_v15 = vmul.f32 %v3760_v41, %v9258_v54  ;;  %vm2815_vm12 = vweird.f32 %v8868_v57  ;;  %v3156_v29 = vrot.slane %v10963_v49, 7 }
 0x2fc   : > { %v3974_v47 = vrot.slane %v3973_v19, 1  ;;  %v2636_v28 = vrot.slane %v2635_v42, 1  ;;  %v2446_v13 = vmul.f32 %v2422_v31, %v9258_v54  ;;  %v3508_v27 = vsel %vm1979_vm3, %v3465_v4, 0.0  ;;  %vm2816_vm2 = vmor %vm2814_vm11, %vm2815_vm12 }
 0x2fd   : > { %v2810_v44 = vmul.f32 %v8868_v57, %v2809_v20  ;;  %v11043_v63 = vsub.f32 %v10931_v14, %v3888_v15  ;;  %v11046_v37 = vsub.f32 %v10955_v21, %v3888_v15  ;;  %v3157_v3 = vsel %vm1671_vm15, %v3155_v26, %v3156_v29 }
 0x2fe   : > { %v3975_v34 = vadd.f32 %v3974_v47, %v3973_v19  ;;  %v11051_v0 = vpop.f32.mrf.mxu0  ;;  %v2637_v58 = vadd.f32 %v2636_v28, %v2635_v42  ;;  %8449 = vmatmul.msk.f32.gmra.mxu1 %vm2287_vm13, %v3157_v3  ;;  %v11060_v53 = vsub.f32 %v10934_v36, %v2446_v13  ;;  %v11063_v26 = vsub.f32 %v10957_v52, %v2446_v13 }
 0x2ff   : > { %v2811_v43 = vmul.f32 0.5, %v2810_v44  ;;  %v3937_v49 = vmul.f32 %v11043_v63, %v11043_v63  ;;  %v3938_v14 = vmul.f32 %v11046_v37, %v11046_v37  ;;  %v11065_v46 = vadd.f32 %v3630_v30, %v3407_v7 }
 0x300   : > { %v4111_v21 = vmul.f32 %v3975_v34, %v9258_v54  ;;  %v2669_v62 = vmul.f32 %v2637_v58, %v9258_v54  ;;  %v2508_v36 = vmul.f32 %v11060_v53, %v11060_v53  ;;  %v2509_v52 = vmul.f32 %v11063_v26, %v11063_v26 }
 0x301   : > { %v2812_v18 = vsub.f32 1.5, %v2811_v43  ;;  %v3976_v59 = vsel %vm2287_vm13, %v3937_v49, 0.0  ;;  %v3977_v17 = vsel %vm2287_vm13, %v3938_v14, 0.0  ;;  %v3633_v9 = vpop.f32.mrf.mxu2  ;;  %v11076_v5 = vpop.f32.mrf.mxu1  ;;  %v11082_v55 = vadd.f32 %v11015_v45, %v11011_v51 }
 0x302   : > { %v11070_v50 = vadd.f32 1e-05, %v4111_v21  ;;  %v3978_v33 = vadd.f32 %v3977_v17, %v3976_v59  ;;  %v11078_v60 = vadd.f32 1e-05, %v2669_v62  ;;  %8481 = vmatmul.msk.f32.gmra.mxu2 %vm2287_vm13, %v3508_v27  ;;  %v11085_v24 = vadd.f32 %v2252_v2, %v1978_v22 }
 0x303   : > { %v2813_v35 = vmul.f32 %v8868_v57, %v2812_v18  ;;  %v2638_v4 = vsel %vm2287_vm13, %v2508_v36, 0.0  ;;  %v3762_v23 = vsel %vm2287_vm13, %v11065_v46, 0.0  ;;  %v2639_v51 = vsel %vm2287_vm13, %v2509_v52, 0.0 }
 0x304   : > { %8869 = vrsqrt.f32 %v11070_v50  ;;  %v3979_v16 = vrot.slane %v3978_v33, 4  ;;  %v3761_v45 = vsel %vm2287_vm13, %v11032_v1, 0.0  ;;  %v2640_v30 = vadd.f32 %v2639_v51, %v2638_v4 }
 0x305   : > { %v2817_v41 = vsel %vm2816_vm2, %v8868_v57, %v2813_v35  ;;  %8871 = vrsqrt.f32 %v11078_v60  ;;  %v2423_v57 = vsel %vm2287_vm13, %v11082_v55, 0.0  ;;  %v3763_v32 = vadd.f32 %v3762_v23, %v3761_v45 }
 0x306   : > { %v11099_v22 = vmul.f32 %v2817_v41, %v10905_v12  ;;  %v11102_v38 = vmul.f32 %v2817_v41, %v10908_v10  ;;  %v3980_v8 = vadd.f32 %v3979_v16, %v3978_v33  ;;  %v11104_v19 = vpop.f32.mrf.mxu0  ;;  %v2424_v20 = vsel %vm2287_vm13, %v11085_v24, 0.0  ;;  %v4368_v41 = vpop.permute.xlu0 %4367 }
 0x307   : > { %v2902_v42 = vmax.f32 %v11027_v48, 0.0  ;;  %v2641_v7 = vrot.slane %v2640_v30, 4  ;;  %v2425_v12 = vadd.f32 %v2424_v20, %v2423_v57  ;;  %v3764_v47 = vrot.slane %v3763_v32, 4 }
 0x308   : > { %v3981_v15 = vrot.slane %v3980_v8, 2  ;;  %v3468_v29 = vrot.slane %v11029_v40, 1  ;;  %v3408_v27 = vadd.f32 %v11034_v61, %v11017_v11  ;;  %vm4149_vm14 = vweird.f32 %v11070_v50 }
 0x309   : > { %8418 = vmatmul.msk.f32.gmra.mxu0 %vm2287_vm13, %v2902_v42  ;;  %v3158_v10 = vrot.slane %v2902_v42, 7  ;;  %v3467_v31 = vrot.slane %v2902_v42, 1  ;;  %v3636_v44 = vpop.f32.mrf.mxu2  ;;  %v2642_v13 = vadd.f32 %v2641_v7, %v2640_v30  ;;  %v2426_v3 = vrot.slane %v2425_v12, 4  ;;  %v11115_v43 = vpop.f32.mrf.mxu1 }
 0x30a   : > { %v8870_v28 = vpop.eup %8869  ;;  %v3982_v34 = vadd.f32 %v3981_v15, %v3980_v8  ;;  %v3765_v49 = vadd.f32 %v3764_v47, %v3763_v32  ;;  %vm2824_vm0 = vweird.f32 %v11078_v60  ;;  %v11123_v62 = vadd.f32 %v3633_v9, %v3408_v27 }
 0x30b   : > { %v8872_v48 = vpop.eup %8871  ;;  %v4144_v58 = vmul.f32 %v8870_v28, %v11070_v50  ;;  %v3200_v14 = vsel %vm1671_vm15, 0.0, %v3158_v10  ;;  %v2643_v18 = vrot.slane %v2642_v13, 2  ;;  %v2427_v59 = vadd.f32 %v2426_v3, %v2425_v12 }
 0x30c   : > { %v2819_v21 = vmul.f32 %v8872_v48, %v11078_v60  ;;  %v3983_v2 = vrot.slane %v3982_v34, 1  ;;  %8450 = vmatmul.msk.f32.gmra.mxu1 %vm2287_vm13, %v3200_v14  ;;  %v3766_v61 = vrot.slane %v3765_v49, 2  ;;  %v3469_v17 = vsel %vm1979_vm3, %v3467_v31, %v3468_v29 }
 0x30d   : > { %v4145_v11 = vmul.f32 %v8870_v28, %v4144_v58  ;;  %vm4150_vm1 = vweird.f32 %v8870_v28  ;;  %v2644_v52 = vadd.f32 %v2643_v18, %v2642_v13  ;;  %8482 = vmatmul.msk.f32.gmra.mxu2 %vm2287_vm13, %v3469_v17  ;;  %vm2825_vm4 = vweird.f32 %v8872_v48 }
 0x30e   : > { %v2820_v33 = vmul.f32 %v8872_v48, %v2819_v21  ;;  %v3984_v36 = vadd.f32 %v3983_v2, %v3982_v34  ;;  %v11127_v35 = vpop.f32.mrf.mxu0  ;;  %v3767_v4 = vadd.f32 %v3766_v61, %v3765_v49  ;;  %v2428_v23 = vrot.slane %v2427_v59, 2  ;;  %vm4151_vm5 = vmor %vm4149_vm14, %vm4150_vm1 }
 0x30f   : > { %v4146_v16 = vmul.f32 0.5, %v4145_v11  ;;  %v2645_v45 = vrot.slane %v2644_v52, 1  ;;  %v3159_v8 = vrot.slane %v11029_v40, 7  ;;  %v3409_v20 = vadd.f32 %v11076_v5, %v11051_v0  ;;  %vm2826_vm6 = vmor %vm2824_vm0, %vm2825_vm4 }
 0x310   : > { %v2821_v9 = vmul.f32 0.5, %v2820_v33  ;;  %v4112_v51 = vmul.f32 %v3984_v36, %v9258_v54  ;;  %v3768_v57 = vrot.slane %v3767_v4, 1  ;;  %v2429_v32 = vadd.f32 %v2428_v23, %v2427_v59  ;;  %v4370_v59 = vpop.permute.xlu0 %4369 }
 0x311   : > { %v4147_v30 = vsub.f32 1.5, %v4146_v16  ;;  %8419 = vmatmul.msk.f32.gmra.mxu0 %vm2287_vm13, %v11029_v40  ;;  %v11135_v42 = vpop.f32.mrf.mxu2  ;;  %v2646_v12 = vadd.f32 %v2645_v45, %v2644_v52  ;;  %v3160_v47 = vsel %vm1671_vm15, %v3158_v10, %v3159_v8  ;;  %v11140_v31 = vpop.f32.mrf.mxu1  ;;  %v11142_v27 = vadd.f32 %v3636_v44, %v3409_v20 }
 0x312   : > { %v2822_v15 = vsub.f32 1.5, %v2821_v9  ;;  %v11137_v7 = vadd.f32 1e-05, %v4112_v51  ;;  %v3769_v13 = vadd.f32 %v3768_v57, %v3767_v4  ;;  %v2430_v3 = vrot.slane %v2429_v32, 1 }
 0x313   : > { %v4148_v34 = vmul.f32 %v8870_v28, %v4147_v30  ;;  %v2670_v0 = vmul.f32 %v2646_v12, %v9258_v54  ;;  %v3509_v5 = vsel %vm1979_vm3, %v3468_v29, 0.0  ;;  %v3771_v50 = vsel %vm2287_vm13, %v11142_v27, 0.0 }
 0x314   : > { %v2823_v40 = vmul.f32 %v8872_v48, %v2822_v15  ;;  %8873 = vrsqrt.f32 %v11137_v7  ;;  %8451 = vmatmul.msk.f32.gmra.mxu1 %vm2287_vm13, %v3160_v47  ;;  %v3889_v44 = vmul.f32 %v3769_v13, %v9258_v54  ;;  %v2431_v58 = vadd.f32 %v2430_v3, %v2429_v32 }
 0x315   : > { %v4152_v10 = vsel %vm4151_vm5, %v8870_v28, %v4148_v34  ;;  %v11159_v2 = vadd.f32 1e-05, %v2670_v0  ;;  %8483 = vmatmul.msk.f32.gmra.mxu2 %vm2287_vm13, %v3509_v5  ;;  %v2904_v36 = vmax.f32 %v11099_v22, 0.0  ;;  %vm4159_vm7 = vweird.f32 %v11137_v7 }
 0x316   : > { %v4303_v49 = vmul.f32 %v4152_v10, %v10974_v25  ;;  %v4304_v14 = vmul.f32 %v4152_v10, %v10977_v39  ;;  %v2827_v21 = vsel %vm2826_vm6, %v8872_v48, %v2823_v40  ;;  %v11162_v29 = vpop.f32.mrf.mxu0  ;;  %v11171_v18 = vsub.f32 %v11032_v1, %v3889_v44 }
 0x317   : > { %v11165_v60 = vmul.f32 %v2827_v21, %v10980_v6  ;;  %v11168_v28 = vmul.f32 %v2827_v21, %v10983_v56  ;;  %v11174_v25 = vsub.f32 %v11065_v46, %v3889_v44  ;;  %v11177_v39 = vmax.f32 %v11102_v38, 0.0  ;;  %v4527_v6 = vld [vmem:[%s14004_s9] sm:$0xff] }
 0x318   : > { %v4463_v48 = vadd.f32 %v4368_v41, %v4303_v49  ;;  %8875 = vrsqrt.f32 %v11159_v2  ;;  %v3939_v56 = vmul.f32 %v11171_v18, %v11171_v18  ;;  %v2447_v11 = vmul.f32 %v2431_v58, %v9258_v54  ;;  %4642 = vmatpush.msra.mxu3 %v4527_v6 }
 0x319   : > { %v3940_v1 = vmul.f32 %v11174_v25, %v11174_v25  ;;  %v3770_v46 = vsel %vm2287_vm13, %v11123_v62, 0.0  ;;  %v11190_v38 = vpop.f32.mrf.mxu2  ;;  %v11197_v52 = vpop.f32.mrf.mxu1  ;;  %v11199_v16 = vadd.f32 %v4370_v59, %v4304_v14  ;;  %8420 = vmatmul.msk.f32.gmra.mxu0 %vm2287_vm13, %v2904_v36  ;;  %v3161_v30 = vrot.slane %v2904_v36, 7 }
 0x31a   : > { %v11192_v61 = vpop.eup %8873  ;;  %v11194_v17 = vmax.f32 %v4463_v48, 0.0  ;;  %v3772_v33 = vadd.f32 %v3771_v50, %v3770_v46  ;;  %v3985_v23 = vsel %vm2287_vm13, %v3939_v56, 0.0  ;;  %v11206_v51 = vsub.f32 %v11082_v55, %v2447_v11 }
 0x31b   : > { %v4154_v4 = vmul.f32 %v11192_v61, %v11137_v7  ;;  %v3986_v41 = vsel %vm2287_vm13, %v3940_v1, 0.0  ;;  %v11209_v45 = vsub.f32 %v11085_v24, %v2447_v11  ;;  %v3470_v57 = vrot.slane %v2904_v36, 1 }
 0x31c   : > { %v3987_v9 = vadd.f32 %v3986_v41, %v3985_v23  ;;  %v3773_v8 = vrot.slane %v3772_v33, 4  ;;  %8492 = vmatmul.msk.f32.vlgmr.msra.gmra.mxu3 %vm2287_vm13, %v11194_v17  ;;  %v3471_v32 = vrot.slane %v11177_v39, 1  ;;  %v2510_v24 = vmul.f32 %v11206_v51, %v11206_v51 }
 0x31d   : > { %v4155_v22 = vmul.f32 %v11192_v61, %v4154_v4  ;;  %v2511_v15 = vmul.f32 %v11209_v45, %v11209_v45  ;;  %v3410_v13 = vadd.f32 %v11115_v43, %v11104_v19  ;;  %v3201_v3 = vsel %vm1671_vm15, 0.0, %v3161_v30 }
 0x31e   : > { %v8876_v20 = vpop.eup %8875  ;;  %v3988_v55 = vrot.slane %v3987_v9, 4  ;;  %v3774_v12 = vadd.f32 %v3773_v8, %v3772_v33  ;;  %v11225_v40 = vpop.f32.mrf.mxu0  ;;  %v2647_v5 = vsel %vm2287_vm13, %v2510_v24, 0.0  ;;  %8452 = vmatmul.msk.f32.gmra.mxu1 %vm2287_vm13, %v3201_v3  ;;  %v3472_v14 = vsel %vm1979_vm3, %v3470_v57, %v3471_v32 }
 0x31f   : > { %v4156_v47 = vmul.f32 0.5, %v4155_v22  ;;  %v2829_v34 = vmul.f32 %v8876_v20, %v11159_v2  ;;  %v2648_v10 = vsel %vm2287_vm13, %v2511_v15, 0.0  ;;  %vm2834_vm8 = vweird.f32 %v11159_v2  ;;  %8484 = vmatmul.msk.f32.gmra.mxu2 %vm2287_vm13, %v3472_v14  ;;  %v11253_v57 = vpop.permute.xlu1 %4371 }
 0x320   : > { %v3989_v0 = vadd.f32 %v3988_v55, %v3987_v9  ;;  %v3775_v44 = vrot.slane %v3774_v12, 2  ;;  %v2649_v49 = vadd.f32 %v2648_v10, %v2647_v5  ;;  %v11236_v48 = vadd.f32 %v11135_v42, %v3410_v13 }
 0x321   : > { %v4157_v58 = vsub.f32 1.5, %v4156_v47  ;;  %v2830_v50 = vmul.f32 %v8876_v20, %v2829_v34  ;;  %v11231_v21 = vpop.f32.mrf.mxu2  ;;  %v11238_v6 = vpop.f32.mrf.mxu1  ;;  %vm4160_vm9 = vweird.f32 %v11192_v61  ;;  %v3162_v11 = vrot.slane %v11177_v39, 7  ;;  %8421 = vmatmul.msk.f32.gmra.mxu0 %vm2287_vm13, %v11177_v39 }
 0x322   : > { %v3990_v19 = vrot.slane %v3989_v0, 2  ;;  %v3776_v43 = vadd.f32 %v3775_v44, %v3774_v12  ;;  %v2650_v1 = vrot.slane %v2649_v49, 4  ;;  %vm2835_vm10 = vweird.f32 %v8876_v20  ;;  %vm4161_vm11 = vmor %vm4159_vm7, %vm4160_vm9 }
 0x323   : > { %v2831_v56 = vmul.f32 0.5, %v2830_v50  ;;  %v4158_v46 = vmul.f32 %v11192_v61, %v4157_v58  ;;  %v3411_v42 = vadd.f32 %v11140_v31, %v11127_v35  ;;  %v3163_v23 = vsel %vm1671_vm15, %v3161_v30, %v3162_v11  ;;  %v5130_v35 = vld [vmem:[%s14005_s10 + $0x8] sm:$0xff]  ;;  %vm2836_vm12 = vmor %vm2834_vm8, %vm2835_vm10 }
 0x324   : > { %v3991_v59 = vadd.f32 %v3990_v19, %v3989_v0  ;;  %v3777_v33 = vrot.slane %v3776_v43, 1  ;;  %v2651_v4 = vadd.f32 %v2650_v1, %v2649_v49  ;;  %v11249_v41 = vmax.f32 %v11168_v28, 0.0  ;;  %5227 = vmatpush.msra.mxu1 %v5130_v35 }
 0x325   : > { %v2832_v36 = vsub.f32 1.5, %v2831_v56  ;;  %v3779_v22 = vsel %vm2287_vm13, %v11236_v48, 0.0  ;;  %v11263_v31 = vadd.f32 %v11190_v38, %v3411_v42  ;;  %v11266_v28 = vmax.f32 %v11165_v60, 0.0 }
 0x326   : > { %v3992_v9 = vrot.slane %v3991_v59, 1  ;;  %v3778_v8 = vadd.f32 %v3777_v33, %v3776_v43  ;;  %v2652_v55 = vrot.slane %v2651_v4, 2  ;;  %v4162_v30 = vsel %vm4161_vm11, %v11192_v61, %v4158_v46  ;;  %8453 = vmatmul.msk.f32.gmra.mxu1 %vm2287_vm13, %v3163_v23  ;;  %v11278_v61 = vpop.f32.mrf.mxu0 }
 0x327   : > { %v2833_v39 = vmul.f32 %v8876_v20, %v2832_v36  ;;  %v3510_v15 = vsel %vm1979_vm3, %v3471_v32, 0.0  ;;  %v3780_v60 = vsel %vm2287_vm13, %v11263_v31, 0.0  ;;  %v3164_v38 = vrot.slane %v11266_v28, 7 }
 0x328   : > { %v3993_v7 = vadd.f32 %v3992_v9, %v3991_v59  ;;  %v3890_v24 = vmul.f32 %v3778_v8, %v9258_v54  ;;  %v2653_v47 = vadd.f32 %v2652_v55, %v2651_v4  ;;  %8485 = vmatmul.msk.f32.gmra.mxu2 %vm2287_vm13, %v3510_v15  ;;  %v4305_v0 = vmul.f32 %v4162_v30, %v11043_v63 }
 0x329   : > { %v2837_v12 = vsel %vm2836_vm12, %v8876_v20, %v2833_v39  ;;  %v3648_v34 = vpop.f32.mrf.mxu2  ;;  %v11287_v20 = vpop.f32.mrf.mxu1  ;;  %v3781_v44 = vadd.f32 %v3780_v60, %v3779_v22  ;;  %8422 = vmatmul.msk.f32.gmra.mxu0 %vm2287_vm13, %v11266_v28  ;;  %v3412_v14 = vadd.f32 %v11197_v52, %v11162_v29  ;;  %v3202_v19 = vsel %vm1671_vm15, 0.0, %v3164_v38 }
 0x32a   : > { %v2876_v2 = vmul.f32 %v2837_v12, %v11060_v53  ;;  %v2877_v13 = vmul.f32 %v2837_v12, %v11063_v26  ;;  %v4113_v3 = vmul.f32 %v3993_v7, %v9258_v54  ;;  %v11284_v32 = vsub.f32 %v11123_v62, %v3890_v24  ;;  %v4374_v29 = vpop.permute.xlu1 %4373 }
 0x32b   : > { %v2654_v5 = vrot.slane %v2653_v47, 1  ;;  %v11291_v10 = vsub.f32 %v11142_v27, %v3890_v24  ;;  %v4306_v53 = vmul.f32 %v4162_v30, %v11046_v37  ;;  %v3473_v62 = vrot.slane %v11266_v28, 1 }
 0x32c   : > { %v11294_v58 = vadd.f32 1e-05, %v4113_v3  ;;  %v3941_v26 = vmul.f32 %v11284_v32, %v11284_v32  ;;  %v3782_v49 = vrot.slane %v3781_v44, 4  ;;  %v3474_v27 = vrot.slane %v11249_v41, 1 }
 0x32d   : > { %v2655_v50 = vadd.f32 %v2654_v5, %v2653_v47  ;;  %v3942_v63 = vmul.f32 %v11291_v10, %v11291_v10  ;;  %v11313_v59 = vadd.f32 %v11231_v21, %v3412_v14  ;;  %v3413_v33 = vadd.f32 %v11238_v6, %v11225_v40 }
 0x32e   : > { %8877 = vrsqrt.f32 %v11294_v58  ;;  %v3994_v37 = vsel %vm2287_vm13, %v3941_v26, 0.0  ;;  %v3783_v1 = vadd.f32 %v3782_v49, %v3781_v44  ;;  %v3475_v11 = vsel %vm1979_vm3, %v3473_v62, %v3474_v27  ;;  %8454 = vmatmul.msk.f32.gmra.mxu1 %vm2287_vm13, %v3202_v19  ;;  %v3068_v55 = vpop.f32.mrf.mxu0 }
 0x32f   : > { %v2671_v43 = vmul.f32 %v2655_v50, %v9258_v54  ;;  %v3995_v56 = vsel %vm2287_vm13, %v3942_v63, 0.0  ;;  %v11318_v36 = vmax.f32 %v11199_v16, 0.0  ;;  %v3165_v42 = vrot.slane %v11249_v41, 7 }
 0x330   : > { %v3996_v46 = vadd.f32 %v3995_v56, %v3994_v37  ;;  %v3784_v4 = vrot.slane %v3783_v1, 2  ;;  %v11324_v9 = vadd.f32 %v4374_v29, %v4306_v53  ;;  %8486 = vmatmul.msk.f32.gmra.mxu2 %vm2287_vm13, %v3475_v11  ;;  %v11329_v40 = vadd.f32 %v3648_v34, %v3413_v33 }
 0x331   : > { %v11320_v52 = vadd.f32 1e-05, %v2671_v43  ;;  %v3651_v23 = vpop.f32.mrf.mxu2  ;;  %8493 = vmatmul.msk.f32.gmra.mxu3 %vm2287_vm13, %v11318_v36  ;;  %v11331_v16 = vmax.f32 %v2876_v2, 0.0  ;;  %v3345_v21 = vpop.f32.mrf.mxu1  ;;  %v11333_v6 = vmax.f32 %v2877_v13, 0.0  ;;  %v3166_v39 = vsel %vm1671_vm15, %v3164_v38, %v3165_v42  ;;  %8423 = vmatmul.msk.f32.gmra.mxu0 %vm2287_vm13, %v11249_v41  ;;  %v4820_v38 = vld [vmem:[%s14003_s8] sm:$0xff] }
 0x332   : > { %v3997_v8 = vrot.slane %v3996_v46, 4  ;;  %v3785_v22 = vadd.f32 %v3784_v4, %v3783_v1  ;;  %v3788_v30 = vsel %vm2287_vm13, %v11313_v59, 0.0  ;;  %v3789_v7 = vsel %vm2287_vm13, %v11329_v40, 0.0  ;;  %4919 = vmatpush.msra.mxu0 %v4820_v38  ;;  %v4376_v42 = vpop.permute.xlu2 %4375 }
 0x333   : > { %8879 = vrsqrt.f32 %v11320_v52  ;;  %v4465_v24 = vadd.f32 %v11253_v57, %v4305_v0  ;;  %vm4169_vm2 = vweird.f32 %v11294_v58  ;;  %v3790_v47 = vadd.f32 %v3789_v7, %v3788_v30 }
 0x334   : > { %v8878_v35 = vpop.eup %8877  ;;  %v3998_v28 = vadd.f32 %v3997_v8, %v3996_v46  ;;  %v3786_v12 = vrot.slane %v3785_v22, 1  ;;  %v3167_v41 = vrot.slane %v11331_v16, 7  ;;  %v3476_v2 = vrot.slane %v11331_v16, 1 }
 0x335   : > { %v4164_v15 = vmul.f32 %v8878_v35, %v11294_v58  ;;  %v11349_v34 = vmax.f32 %v4465_v24, 0.0  ;;  %v3791_v3 = vrot.slane %v3790_v47, 4  ;;  %v3477_v0 = vrot.slane %v11333_v6, 1 }
 0x336   : > { %v3999_v60 = vrot.slane %v3998_v28, 2  ;;  %v3787_v57 = vadd.f32 %v3786_v12, %v3785_v22  ;;  %vm4170_vm14 = vweird.f32 %v8878_v35  ;;  %v3511_v44 = vsel %vm1979_vm3, %v3474_v27, 0.0  ;;  %8455 = vmatmul.msk.f32.gmra.mxu1 %vm2287_vm13, %v3166_v39  ;;  %v3071_v22 = vpop.f32.mrf.mxu0 }
 0x337   : > { %v4165_v13 = vmul.f32 %v8878_v35, %v4164_v15  ;;  %v3414_v53 = vadd.f32 %v11287_v20, %v11278_v61  ;;  %v3792_v63 = vadd.f32 %v3791_v3, %v3790_v47  ;;  %v3478_v49 = vsel %vm1979_vm3, %v3476_v2, %v3477_v0  ;;  %vm4171_vm0 = vmor %vm4169_vm2, %vm4170_vm14 }
 0x338   : > { %v4000_v5 = vadd.f32 %v3999_v60, %v3998_v28  ;;  %v3891_v50 = vmul.f32 %v3787_v57, %v9258_v54  ;;  %8487 = vmatmul.msk.f32.gmra.mxu2 %vm2287_vm13, %v3511_v44  ;;  %v3203_v61 = vsel %vm1671_vm15, 0.0, %v3167_v41  ;;  %v3415_v29 = vadd.f32 %v3345_v21, %v3068_v55 }
 0x339   : > { %v8880_v26 = vpop.eup %8879  ;;  %v4166_v62 = vmul.f32 0.5, %v4165_v13  ;;  %v3654_v37 = vpop.f32.mrf.mxu2  ;;  %8494 = vmatmul.msk.f32.gmra.mxu3 %vm2287_vm13, %v11349_v34  ;;  %v11367_v20 = vadd.f32 %v3651_v23, %v3414_v53  ;;  %v3793_v1 = vrot.slane %v3792_v63, 2  ;;  %8424 = vmatmul.msk.f32.gmra.mxu0 %vm2287_vm13, %v11331_v16  ;;  %v3168_v4 = vrot.slane %v11333_v6, 7 }
 0x33a   : > { %v2839_v14 = vmul.f32 %v8880_v26, %v11320_v52  ;;  %v4001_v19 = vrot.slane %v4000_v5, 1  ;;  %v11370_v43 = vsub.f32 %v11236_v48, %v3891_v50  ;;  %v11373_v56 = vsub.f32 %v11263_v31, %v3891_v50  ;;  %v3348_v11 = vpop.f32.mrf.mxu1 }
 0x33b   : > { %v4167_v27 = vsub.f32 1.5, %v4166_v62  ;;  %v3794_v31 = vadd.f32 %v3793_v1, %v3792_v63  ;;  %vm2845_vm1 = vweird.f32 %v8880_v26  ;;  %v3169_v21 = vsel %vm1671_vm15, %v3167_v41, %v3168_v4 }
 0x33c   : > { %v2840_v46 = vmul.f32 %v8880_v26, %v2839_v14  ;;  %v4002_v33 = vadd.f32 %v4001_v19, %v4000_v5  ;;  %v3943_v8 = vmul.f32 %v11370_v43, %v11370_v43  ;;  %v3944_v48 = vmul.f32 %v11373_v56, %v11373_v56 }
 0x33d   : > { %v4168_v23 = vmul.f32 %v8878_v35, %v4167_v27  ;;  %v3795_v7 = vrot.slane %v3794_v31, 1  ;;  %v11393_v58 = vmax.f32 %v11324_v9, 0.0  ;;  %vm2844_vm4 = vweird.f32 %v11320_v52 }
 0x33e   : > { %v2841_v39 = vmul.f32 0.5, %v2840_v46  ;;  %v4114_v16 = vmul.f32 %v4002_v33, %v9258_v54  ;;  %v4003_v28 = vsel %vm2287_vm13, %v3943_v8, 0.0  ;;  %v4004_v30 = vsel %vm2287_vm13, %v3944_v48, 0.0  ;;  %8456 = vmatmul.msk.f32.gmra.mxu1 %vm2287_vm13, %v3203_v61  ;;  %vm2846_vm5 = vmor %vm2844_vm4, %vm2845_vm1  ;;  %v4378_v61 = vpop.permute.xlu2 %4377  ;;  %v3074_v1 = vpop.f32.mrf.mxu0 }
 0x33f   : > { %v4172_v55 = vsel %vm4171_vm0, %v8878_v35, %v4168_v23  ;;  %v4005_v47 = vadd.f32 %v4004_v30, %v4003_v28  ;;  %v3796_v60 = vadd.f32 %v3795_v7, %v3794_v31  ;;  %v11397_v35 = vadd.f32 %v3654_v37, %v3415_v29  ;;  %v5129_v31 = vld [vmem:[%s14005_s10] sm:$0xff] }
 0x340   : > { %v4307_v24 = vmul.f32 %v4172_v55, %v11171_v18  ;;  %v2842_v15 = vsub.f32 1.5, %v2841_v39  ;;  %v11390_v12 = vadd.f32 1e-05, %v4114_v16  ;;  %8488 = vmatmul.msk.f32.gmra.mxu2 %vm2287_vm13, %v3478_v49  ;;  %v3797_v18 = vsel %vm2287_vm13, %v11367_v20, 0.0  ;;  %5228 = vmatpush.msra.mxu1 %v5129_v31 }
 0x341   : > { %v3657_v38 = vpop.f32.mrf.mxu2  ;;  %8495 = vmatmul.msk.f32.gmra.mxu3 %vm2287_vm13, %v11393_v58  ;;  %v3416_v9 = vadd.f32 %v3348_v11, %v3071_v22  ;;  %v4006_v52 = vrot.slane %v4005_v47, 4  ;;  %v3892_v2 = vmul.f32 %v3796_v60, %v9258_v54  ;;  %v3798_v13 = vsel %vm2287_vm13, %v11397_v35, 0.0  ;;  %8425 = vmatmul.msk.f32.gmra.mxu0 %vm2287_vm13, %v11333_v6 }
 0x342   : > { %v2843_v41 = vmul.f32 %v8880_v26, %v2842_v15  ;;  %8881 = vrsqrt.f32 %v11390_v12  ;;  %v4467_v57 = vadd.f32 %v4376_v42, %v4307_v24  ;;  %v4308_v3 = vmul.f32 %v4172_v55, %v11174_v25  ;;  %v3351_v37 = vpop.f32.mrf.mxu1 }
 0x343   : > { %v3799_v44 = vadd.f32 %v3798_v13, %v3797_v18  ;;  %v11412_v53 = vadd.f32 %v3657_v38, %v3416_v9  ;;  %v4007_v63 = vadd.f32 %v4006_v52, %v4005_v47  ;;  %v11417_v49 = vsub.f32 %v11313_v59, %v3892_v2 }
 0x344   : > { %v2847_v5 = vsel %vm2846_vm5, %v8880_v26, %v2843_v41  ;;  %v11420_v14 = vsub.f32 %v11329_v40, %v3892_v2  ;;  %v3512_v25 = vsel %vm1979_vm3, %v3477_v0, 0.0  ;;  %v11425_v19 = vmax.f32 %v4467_v57, 0.0 }
 0x345   : > { %v2878_v62 = vmul.f32 %v2847_v5, %v11206_v51  ;;  %v2879_v50 = vmul.f32 %v2847_v5, %v11209_v45  ;;  %v3800_v26 = vrot.slane %v3799_v44, 4  ;;  %v4008_v51 = vrot.slane %v4007_v63, 2 }
 0x346   : > { %v3945_v45 = vmul.f32 %v11417_v49, %v11417_v49  ;;  %v4468_v46 = vadd.f32 %v4378_v61, %v4308_v3  ;;  %v3946_v40 = vmul.f32 %v11420_v14, %v11420_v14  ;;  %v3417_v33 = vadd.f32 %v3351_v37, %v3074_v1  ;;  %8457 = vmatmul.msk.f32.gmra.mxu1 %vm2287_vm13, %v3169_v21 }
 0x347   : > { %v11427_v27 = vmax.f32 %v2879_v50, 0.0  ;;  %v2910_v59 = vmax.f32 %v2878_v62, 0.0  ;;  %v3801_v6 = vadd.f32 %v3800_v26, %v3799_v44  ;;  %v4009_v29 = vadd.f32 %v4008_v51, %v4007_v63 }
 0x348   : > { %v8882_v11 = vpop.eup %8881  ;;  %v4012_v4 = vsel %vm2287_vm13, %v3945_v45, 0.0  ;;  %v3806_v42 = vsel %vm2287_vm13, %v11412_v53, 0.0  ;;  %v4013_v8 = vsel %vm2287_vm13, %v3946_v40, 0.0  ;;  %8489 = vmatmul.msk.f32.gmra.mxu2 %vm2287_vm13, %v3512_v25  ;;  %vm4179_vm7 = vweird.f32 %v11390_v12 }
 0x349   : > { %v4174_v0 = vmul.f32 %v8882_v11, %v11390_v12  ;;  %v3660_v23 = vpop.f32.mrf.mxu2  ;;  %v3802_v48 = vrot.slane %v3801_v6, 2  ;;  %8496 = vmatmul.msk.f32.gmra.mxu3 %vm2287_vm13, %v11425_v19  ;;  %v3170_v22 = vrot.slane %v2910_v59, 7  ;;  %v3479_v39 = vrot.slane %v2910_v59, 1  ;;  %8426 = vmatmul.msk.f32.gmra.mxu0 %vm2287_vm13, %v2910_v59 }
 0x34a   : > { %v4010_v21 = vrot.slane %v4009_v29, 1  ;;  %v4014_v55 = vadd.f32 %v4013_v8, %v4012_v4  ;;  %v3480_v28 = vrot.slane %v11427_v27, 1  ;;  %vm4180_vm6 = vweird.f32 %v8882_v11 }
 0x34b   : > { %v4175_v16 = vmul.f32 %v8882_v11, %v4174_v0  ;;  %v3803_v30 = vadd.f32 %v3802_v48, %v3801_v6  ;;  %v3171_v7 = vrot.slane %v11427_v27, 7  ;;  %v11448_v24 = vadd.f32 %v3660_v23, %v3417_v33  ;;  %vm4181_vm8 = vmor %vm4179_vm7, %vm4180_vm6  ;;  %v3077_v48 = vpop.f32.mrf.mxu0 }
 0x34c   : > { %v4011_v47 = vadd.f32 %v4010_v21, %v4009_v29  ;;  %v4015_v60 = vrot.slane %v4014_v55, 4  ;;  %v3481_v38 = vsel %vm1979_vm3, %v3479_v39, %v3480_v28  ;;  %v3204_v18 = vsel %vm1671_vm15, 0.0, %v3170_v22 }
 0x34d   : > { %v4176_v15 = vmul.f32 0.5, %v4175_v16  ;;  %v3804_v41 = vrot.slane %v3803_v30, 1  ;;  %v3172_v9 = vsel %vm1671_vm15, %v3170_v22, %v3171_v7  ;;  %v3807_v52 = vsel %vm2287_vm13, %v11448_v24, 0.0 }
 0x34e   : > { %v4115_v13 = vmul.f32 %v4011_v47, %v9258_v54  ;;  %v4016_v57 = vadd.f32 %v4015_v60, %v4014_v55  ;;  %v3808_v3 = vadd.f32 %v3807_v52, %v3806_v42  ;;  %v11457_v44 = vmax.f32 %v4468_v46, 0.0  ;;  %8458 = vmatmul.msk.f32.gmra.mxu1 %vm2287_vm13, %v3204_v18 }
 0x34f   : > { %v4177_v2 = vsub.f32 1.5, %v4176_v15  ;;  %v3805_v5 = vadd.f32 %v3804_v41, %v3803_v30  ;;  %v3513_v4 = vsel %vm1979_vm3, %v3480_v28, 0.0  ;;  %v5050_v8 = vrot.slane %v11318_v36, 1  ;;  %v4382_v41 = vpop.permute.xlu1 %4381 }
 0x350   : > { %v11459_v50 = vadd.f32 1e-05, %v4115_v13  ;;  %v4017_v63 = vrot.slane %v4016_v57, 2  ;;  %v3809_v37 = vrot.slane %v3808_v3, 4  ;;  %8490 = vmatmul.msk.f32.gmra.mxu2 %vm2287_vm13, %v3481_v38  ;;  %v5049_v7 = vrot.slane %v11194_v17, 1  ;;  %v3354_v38 = vpop.f32.mrf.mxu1 }
 0x351   : > { %v4178_v62 = vmul.f32 %v8882_v11, %v4177_v2  ;;  %v3893_v25 = vmul.f32 %v3805_v5, %v9258_v54  ;;  %8497 = vmatmul.msk.f32.gmra.mxu3 %vm2287_vm13, %v11457_v44  ;;  %8427 = vmatmul.msk.f32.gmra.mxu0 %vm2287_vm13, %v11427_v27  ;;  %v4380_v27 = vpop.permute.xlu0 %4379  ;;  %v4741_v52 = vrot.slane %v11318_v36, 7 }
 0x352   : > { %8883 = vrsqrt.f32 %v11459_v50  ;;  %v4018_v26 = vadd.f32 %v4017_v63, %v4016_v57  ;;  %v3810_v59 = vadd.f32 %v3809_v37, %v3808_v3  ;;  %v5051_v57 = vsel %vm1979_vm3, %v5049_v7, %v5050_v8 }
 0x353   : > { %v4182_v12 = vsel %vm4181_vm8, %v8882_v11, %v4178_v62  ;;  %v11469_v61 = vsub.f32 %v11367_v20, %v3893_v25  ;;  %v11472_v51 = vsub.f32 %v11397_v35, %v3893_v25  ;;  %v4740_v20 = vrot.slane %v11194_v17, 7 }
 0x354   : > { %v4019_v45 = vrot.slane %v4018_v26, 1  ;;  %v4309_v1 = vmul.f32 %v4182_v12, %v11284_v32  ;;  %v3811_v6 = vrot.slane %v3810_v59, 2  ;;  %v4310_v55 = vmul.f32 %v4182_v12, %v11291_v10  ;;  %v5990_v10 = vld [vmem:[%s14007_s12 + $0x38] sm:$0xff] }
 0x355   : > { %v3947_v46 = vmul.f32 %v11469_v61, %v11469_v61  ;;  %v3948_v11 = vmul.f32 %v11472_v51, %v11472_v51  ;;  %v4804_v21 = vsel %vm1671_vm15, 0.0, %v4740_v20  ;;  %6095 = vmatpush.msra.mxu2 %v5990_v10  ;;  %v4742_v12 = vsel %vm1671_vm15, %v4740_v20, %v4741_v52 }
 0x356   : > { %v4020_v40 = vadd.f32 %v4019_v45, %v4018_v26  ;;  %8459 = vmatmul.msk.f32.gmra.mxu1 %vm2287_vm13, %v3172_v9  ;;  %v3812_v42 = vadd.f32 %v3811_v6, %v3810_v59  ;;  %v4469_v31 = vadd.f32 %v4380_v27, %v4309_v1  ;;  %v6287_v9 = vld [vmem:[%s14006_s11 + $0x38] sm:$0xff]  ;;  %v4470_v2 = vadd.f32 %v4382_v41, %v4310_v55 }
 0x357   : > { %v4021_v35 = vsel %vm2287_vm13, %v3947_v46, 0.0  ;;  %v4022_v33 = vsel %vm2287_vm13, %v3948_v11, 0.0  ;;  %6376 = vmatpush.msrb.mxu3 %v6287_v9  ;;  %v3663_v46 = vpop.f32.mrf.mxu2  ;;  %vm4189_vm10 = vweird.f32 %v11459_v50  ;;  %v4743_v20 = vrot.slane %v11349_v34, 7 }
 0x358   : > { %v11484_v0 = vpop.eup %8883  ;;  %v4116_v29 = vmul.f32 %v4020_v40, %v9258_v54  ;;  %v4023_v32 = vadd.f32 %v4022_v33, %v4021_v35  ;;  %8491 = vmatmul.msk.f32.gmra.mxu2 %vm2287_vm13, %v3513_v4  ;;  %v3813_v16 = vrot.slane %v3812_v42, 1  ;;  %v11499_v30 = vmax.f32 %v4469_v31, 0.0  ;;  %v3357_v27 = vpop.f32.mrf.mxu1 }
 0x359   : > { %v4184_v23 = vmul.f32 %v11484_v0, %v11459_v50  ;;  %8524 = vmatmul.msk.f32.vlgmr.msra.gmra.mxu0 %vm2287_vm13, %v4804_v21  ;;  %vm4190_vm9 = vweird.f32 %v11484_v0  ;;  %v11533_v45 = vmax.f32 %v4470_v2, 0.0  ;;  %v3418_v4 = vadd.f32 %v3354_v38, %v3077_v48 }
 0x35a   : > { %v11493_v22 = vadd.f32 1e-05, %v4116_v29  ;;  %v4024_v39 = vrot.slane %v4023_v32, 4  ;;  %v3814_v47 = vadd.f32 %v3813_v16, %v3812_v42  ;;  %8498 = vmatmul.msk.f32.gmra.mxu3 %vm2287_vm13, %v11499_v30  ;;  %vm4191_vm11 = vmor %vm4189_vm10, %vm4190_vm9  ;;  %v5113_v29 = vsel %vm1979_vm3, %v5050_v8, 0.0 }
 0x35b   : > { %v4185_v28 = vmul.f32 %v11484_v0, %v4184_v23  ;;  %v5052_v42 = vrot.slane %v11349_v34, 1  ;;  %v11552_v16 = vadd.f32 %v3663_v46, %v3418_v4  ;;  %v5053_v8 = vrot.slane %v11393_v58, 1  ;;  %v6600_v34 = vld [vmem:[%s14008_s13 + $0x38] sm:$0xff] }
 0x35c   : > { %8885 = vrsqrt.f32 %v11493_v22  ;;  %v4025_v15 = vadd.f32 %v4024_v39, %v4023_v32  ;;  %v3894_v17 = vmul.f32 %v3814_v47, %v9258_v54  ;;  %6689 = vmatpush.msrb.mxu0 %v6600_v34  ;;  %vm4199_vm2 = vweird.f32 %v11493_v22 }
 0x35d   : > { %v4186_v60 = vmul.f32 0.5, %v4185_v28  ;;  %v4384_v28 = vpop.permute.xlu2 %4383  ;;  %v3815_v41 = vsel %vm2287_vm13, %v11552_v16, 0.0  ;;  %v5054_v10 = vsel %vm1979_vm3, %v5052_v42, %v5053_v8  ;;  %v5055_v4 = vrot.slane %v11425_v19, 1 }
 0x35e   : > { %v4026_v18 = vrot.slane %v4025_v15, 2  ;;  %v11515_v5 = vsub.f32 %v11412_v53, %v3894_v17  ;;  %v11518_v62 = vsub.f32 %v11448_v24, %v3894_v17  ;;  %8556 = vmatmul.msk.f32.vlgmr.msra.gmra.mxu1 %vm2287_vm13, %v5051_v57  ;;  %v3080_v24 = vpop.f32.mrf.mxu0  ;;  %v5056_v42 = vrot.slane %v11457_v44, 1 }
 0x35f   : > { %v4187_v13 = vsub.f32 1.5, %v4186_v60  ;;  %v3419_v21 = vadd.f32 %v3357_v27, %v3080_v24  ;;  %v4744_v60 = vrot.slane %v11393_v58, 7 }
 0x360   : > { %v4027_v3 = vadd.f32 %v4026_v18, %v4025_v15  ;;  %v3949_v36 = vmul.f32 %v11515_v5, %v11515_v5  ;;  %v3950_v25 = vmul.f32 %v11518_v62, %v11518_v62  ;;  %v3360_v58 = vpop.f32.mrf.mxu1 }
 0x361   : > { %v4188_v26 = vmul.f32 %v11484_v0, %v4187_v13  ;;  %8525 = vmatmul.msk.f32.gmra.mxu0 %vm2287_vm13, %v4742_v12 }
 0x362   : > { %v11521_v63 = vpop.eup %8885  ;;  %v4028_v37 = vrot.slane %v4027_v3, 1  ;;  %v4030_v1 = vsel %vm2287_vm13, %v3949_v36, 0.0  ;;  %v4031_v11 = vsel %vm2287_vm13, %v3950_v25, 0.0  ;;  %8499 = vmatmul.msk.f32.gmra.mxu3 %vm2287_vm13, %v11533_v45  ;;  %v4386_v36 = vpop.permute.xlu0 %4385 }
 0x363   : > { %v4194_v53 = vmul.f32 %v11521_v63, %v11493_v22  ;;  %v4032_v6 = vadd.f32 %v4031_v11, %v4030_v1  ;;  %v4192_v35 = vsel %vm4191_vm11, %v11484_v0, %v4188_v26  ;;  %v4805_v0 = vsel %vm1671_vm15, 0.0, %v4743_v20 }
 0x364   : > { %v4029_v59 = vadd.f32 %v4028_v37, %v4027_v3  ;;  %v4311_v23 = vmul.f32 %v4192_v35, %v11370_v43  ;;  %v3666_v43 = vpop.f32.mrf.mxu2  ;;  %v4312_v17 = vmul.f32 %v4192_v35, %v11373_v56  ;;  %v4745_v37 = vsel %vm1671_vm15, %v4743_v20, %v4744_v60 }
 0x365   : > { %v4195_v33 = vmul.f32 %v11521_v63, %v4194_v53  ;;  %v4033_v50 = vrot.slane %v4032_v6, 4  ;;  %v11559_v7 = vadd.f32 %v3666_v43, %v3419_v21  ;;  %vm4200_vm12 = vweird.f32 %v11521_v63 }
 0x366   : > { %v4117_v40 = vmul.f32 %v4029_v59, %v9258_v54  ;;  %8557 = vmatmul.msk.f32.gmra.mxu1 %vm2287_vm13, %v5113_v29  ;;  %v3083_v48 = vpop.f32.mrf.mxu0  ;;  %v4471_v47 = vadd.f32 %v4384_v28, %v4311_v23  ;;  %v4472_v12 = vadd.f32 %v4386_v36, %v4312_v17  ;;  %vm4201_vm14 = vmor %vm4199_vm2, %vm4200_vm12  ;;  %v4746_v1 = vrot.slane %v11425_v19, 7  ;;  %v4390_v17 = vpop.permute.xlu2 %4389 }
 0x367   : > { %v4034_v31 = vadd.f32 %v4033_v50, %v4032_v6  ;;  %v4196_v39 = vmul.f32 0.5, %v4195_v33  ;;  %v3816_v18 = vsel %vm2287_vm13, %v11559_v7, 0.0  ;;  %v5114_v20 = vsel %vm1979_vm3, %v5053_v8, 0.0 }
 0x368   : > { %v11545_v32 = vadd.f32 1e-05, %v4117_v40  ;;  %v3817_v2 = vadd.f32 %v3816_v18, %v3815_v41  ;;  %v11570_v13 = vmax.f32 %v4471_v47, 0.0  ;;  %v11589_v33 = vmax.f32 %v4472_v12, 0.0  ;;  %v3363_v22 = vpop.f32.mrf.mxu1 }
 0x369   : > { %8526 = vmatmul.msk.f32.gmra.mxu0 %vm2287_vm13, %v4805_v0  ;;  %v4035_v55 = vrot.slane %v4034_v31, 2  ;;  %v4197_v38 = vsub.f32 1.5, %v4196_v39  ;;  %v4388_v0 = vpop.permute.xlu1 %4387  ;;  %v5057_v19 = vsel %vm1979_vm3, %v5055_v4, %v5056_v42  ;;  %v4749_v12 = vrot.slane %v11499_v30, 7 }
 0x36a   : > { %8887 = vrsqrt.f32 %v11545_v32  ;;  %v3818_v3 = vrot.slane %v3817_v2, 4  ;;  %8500 = vmatmul.msk.f32.gmra.mxu3 %vm2287_vm13, %v11570_v13  ;;  %vm4209_vm1 = vweird.f32 %v11545_v32 }
 0x36b   : > { %v4036_v15 = vadd.f32 %v4035_v55, %v4034_v31  ;;  %v4198_v25 = vmul.f32 %v11521_v63, %v4197_v38  ;;  %v3420_v31 = vadd.f32 %v3360_v58, %v3083_v48 }
 0x36c   : > { %v3819_v53 = vadd.f32 %v3818_v3, %v3817_v2  ;;  %v3669_v6 = vpop.f32.mrf.mxu2 }
 0x36d   : > { %v4037_v52 = vrot.slane %v4036_v15, 1  ;;  %v4202_v46 = vsel %vm4201_vm14, %v11521_v63, %v4198_v25  ;;  %v4806_v63 = vsel %vm1671_vm15, 0.0, %v4746_v1  ;;  %v11602_v21 = vadd.f32 %v3669_v6, %v3420_v31 }
 0x36e   : > { %8558 = vmatmul.msk.f32.gmra.mxu1 %vm2287_vm13, %v5054_v10  ;;  %v3820_v24 = vrot.slane %v3819_v53, 2  ;;  %v3086_v59 = vpop.f32.mrf.mxu0  ;;  %v4313_v27 = vmul.f32 %v4202_v46, %v11417_v49  ;;  %v4747_v49 = vrot.slane %v11457_v44, 7  ;;  %v4314_v43 = vmul.f32 %v4202_v46, %v11420_v14 }
 0x36f   : > { %v4038_v57 = vadd.f32 %v4037_v52, %v4036_v15  ;;  %v3421_v8 = vadd.f32 %v3363_v22, %v3086_v59 }
 0x370   : > { %v11567_v9 = vpop.eup %8887  ;;  %v3821_v35 = vadd.f32 %v3820_v24, %v3819_v53  ;;  %v4473_v34 = vadd.f32 %v4388_v0, %v4313_v27  ;;  %v4748_v14 = vsel %vm1671_vm15, %v4746_v1, %v4747_v49  ;;  %v4474_v58 = vadd.f32 %v4390_v17, %v4314_v43  ;;  %v5989_v27 = vld [vmem:[%s14007_s12 + $0x30] sm:$0xff] }
 0x371   : > { %v4204_v56 = vmul.f32 %v11567_v9, %v11545_v32  ;;  %8527 = vmatmul.msk.f32.gmra.mxu0 %vm2287_vm13, %v4745_v37  ;;  %v4118_v26 = vmul.f32 %v4038_v57, %v9258_v54  ;;  %v3366_v41 = vpop.f32.mrf.mxu1  ;;  %vm4210_vm0 = vweird.f32 %v11567_v9  ;;  %v5115_v1 = vsel %vm1979_vm3, %v5056_v42, 0.0  ;;  %6096 = vmatpush.msra.mxu2 %v5989_v27 }
 0x372   : > { %v3822_v29 = vrot.slane %v3821_v35, 1  ;;  %8501 = vmatmul.msk.f32.gmra.mxu3 %vm2287_vm13, %v11589_v33  ;;  %v11614_v60 = vmax.f32 %v4473_v34, 0.0  ;;  %vm4211_vm4 = vmor %vm4209_vm1, %vm4210_vm0  ;;  %v4750_v43 = vrot.slane %v11533_v45, 7 }
 0x373   : > { %v4205_v11 = vmul.f32 %v11567_v9, %v4204_v56  ;;  %v11586_v40 = vadd.f32 1e-05, %v4118_v26 }
 0x374   : > { %v3823_v23 = vadd.f32 %v3822_v29, %v3821_v35  ;;  %v3672_v15 = vpop.f32.mrf.mxu2  ;;  %v6286_v29 = vld [vmem:[%s14006_s11 + $0x30] sm:$0xff] }
 0x375   : > { %v4206_v50 = vmul.f32 0.5, %v4205_v11  ;;  %8889 = vrsqrt.f32 %v11586_v40  ;;  %v11612_v44 = vadd.f32 %v3672_v15, %v3421_v8  ;;  %v11642_v11 = vmax.f32 %v4474_v58, 0.0  ;;  %6377 = vmatpush.msrb.mxu3 %v6286_v29 }
 0x376   : > { %8559 = vmatmul.msk.f32.gmra.mxu1 %vm2287_vm13, %v5114_v20  ;;  %v3895_v39 = vmul.f32 %v3823_v23, %v9258_v54  ;;  %v3089_v55 = vpop.f32.mrf.mxu0  ;;  %v4392_v23 = vpop.permute.xlu0 %4391  ;;  %vm4219_vm6 = vweird.f32 %v11586_v40 }
 0x377   : > { %v4207_v28 = vsub.f32 1.5, %v4206_v50  ;;  %v3825_v10 = vsel %vm2287_vm13, %v11612_v44, 0.0  ;;  %v5058_v50 = vrot.slane %v11499_v30, 1  ;;  %v3422_v42 = vadd.f32 %v3366_v41, %v3089_v55 }
 0x378   : > { %v11607_v47 = vsub.f32 %v11552_v16, %v3895_v39  ;;  %v11610_v48 = vsub.f32 %v11559_v7, %v3895_v39  ;;  %v3824_v7 = vsel %vm2287_vm13, %v11602_v21, 0.0 }
 0x379   : > { %8528 = vmatmul.msk.f32.gmra.mxu0 %vm2287_vm13, %v4806_v63  ;;  %v4208_v52 = vmul.f32 %v11567_v9, %v4207_v28  ;;  %v3826_v2 = vadd.f32 %v3825_v10, %v3824_v7 }
 0x37a   : > { %v3951_v18 = vmul.f32 %v11607_v47, %v11607_v47  ;;  %v3952_v16 = vmul.f32 %v11610_v48, %v11610_v48  ;;  %8502 = vmatmul.msk.f32.gmra.mxu3 %vm2287_vm13, %v11614_v60 }
 0x37b   : > { %v11617_v38 = vpop.eup %8889  ;;  %v3827_v25 = vrot.slane %v3826_v2, 4  ;;  %v4212_v26 = vsel %vm4211_vm4, %v11567_v9, %v4208_v52  ;;  %v3369_v20 = vpop.f32.mrf.mxu1  ;;  %v4807_v9 = vsel %vm1671_vm15, 0.0, %v4749_v12 }
 0x37c   : > { %v4214_v57 = vmul.f32 %v11617_v38, %v11586_v40  ;;  %v4039_v3 = vsel %vm2287_vm13, %v3951_v18, 0.0  ;;  %v4040_v37 = vsel %vm2287_vm13, %v3952_v16, 0.0  ;;  %v4315_v35 = vmul.f32 %v4212_v26, %v11469_v61  ;;  %v4394_v52 = vpop.permute.xlu1 %4393 }
 0x37d   : > { %v4041_v36 = vadd.f32 %v4040_v37, %v4039_v3  ;;  %v3828_v24 = vadd.f32 %v3827_v25, %v3826_v2  ;;  %v3675_v59 = vpop.f32.mrf.mxu2  ;;  %v5059_v61 = vrot.slane %v11533_v45, 1  ;;  %vm4220_vm5 = vweird.f32 %v11617_v38 }
 0x37e   : > { %8560 = vmatmul.msk.f32.gmra.mxu1 %vm2287_vm13, %v5057_v19  ;;  %v3092_v56 = vpop.f32.mrf.mxu0  ;;  %v4215_v46 = vmul.f32 %v11617_v38, %v4214_v57  ;;  %v11658_v49 = vadd.f32 %v3675_v59, %v3422_v42  ;;  %v4475_v34 = vadd.f32 %v4392_v23, %v4315_v35  ;;  %vm4221_vm7 = vmor %vm4219_vm6, %vm4220_vm5  ;;  %v4753_v23 = vrot.slane %v11589_v33, 7 }
 0x37f   : > { %v4042_v53 = vrot.slane %v4041_v36, 4  ;;  %v3829_v6 = vrot.slane %v3828_v24, 2  ;;  %v3423_v39 = vadd.f32 %v3369_v20, %v3092_v56  ;;  %v5060_v30 = vsel %vm1979_vm3, %v5058_v50, %v5059_v61 }
 0x380   : > { %v4216_v4 = vmul.f32 0.5, %v4215_v46  ;;  %v11665_v55 = vmax.f32 %v4475_v34, 0.0  ;;  %v3833_v45 = vsel %vm2287_vm13, %v11658_v49, 0.0 }
 0x381   : > { %8529 = vmatmul.msk.f32.gmra.mxu0 %vm2287_vm13, %v4748_v14  ;;  %v4043_v32 = vadd.f32 %v4042_v53, %v4041_v36  ;;  %v3830_v63 = vadd.f32 %v3829_v6, %v3828_v24  ;;  %v4316_v14 = vmul.f32 %v4212_v26, %v11472_v51  ;;  %v4751_v51 = vsel %vm1671_vm15, %v4749_v12, %v4750_v43 }
 0x382   : > { %8503 = vmatmul.msk.f32.gmra.mxu3 %vm2287_vm13, %v11642_v11  ;;  %v4217_v18 = vsub.f32 1.5, %v4216_v4  ;;  %v4752_v26 = vrot.slane %v11570_v13, 7 }
 0x383   : > { %v4044_v22 = vrot.slane %v4043_v32, 2  ;;  %v3831_v0 = vrot.slane %v3830_v63, 1  ;;  %v4476_v37 = vadd.f32 %v4394_v52, %v4316_v14 }
 0x384   : > { %v4218_v36 = vmul.f32 %v11617_v38, %v4217_v18 }
 0x385   : > { %v4045_v31 = vadd.f32 %v4044_v22, %v4043_v32  ;;  %v3832_v15 = vadd.f32 %v3831_v0, %v3830_v63  ;;  %v3678_v19 = vpop.f32.mrf.mxu2  ;;  %v11699_v20 = vmax.f32 %v4476_v37, 0.0  ;;  %v4808_v22 = vsel %vm1671_vm15, 0.0, %v4752_v26 }
 0x386   : > { %8561 = vmatmul.msk.f32.gmra.mxu1 %vm2287_vm13, %v5115_v1  ;;  %v3095_v8 = vpop.f32.mrf.mxu0  ;;  %v11663_v16 = vadd.f32 %v3678_v19, %v3423_v39  ;;  %v5116_v1 = vsel %vm1979_vm3, %v5059_v61, 0.0  ;;  %v4222_v46 = vsel %vm4221_vm7, %v11617_v38, %v4218_v36  ;;  %v5061_v38 = vrot.slane %v11570_v13, 1 }
 0x387   : > { %v4046_v28 = vrot.slane %v4045_v31, 1  ;;  %v3896_v7 = vmul.f32 %v3832_v15, %v9258_v54  ;;  %v4317_v27 = vmul.f32 %v4222_v46, %v11515_v5  ;;  %v5062_v63 = vrot.slane %v11589_v33, 1  ;;  %v6599_v5 = vld [vmem:[%s14008_s13 + $0x30] sm:$0xff] }
 0x388   : > { %v3834_v17 = vsel %vm2287_vm13, %v11663_v16, 0.0  ;;  %6690 = vmatpush.msrb.mxu0 %v6599_v5  ;;  %v4318_v18 = vmul.f32 %v4222_v46, %v11518_v62  ;;  %v4398_v62 = vpop.permute.xlu0 %4397 }
 0x389   : > { %8530 = vmatmul.msk.f32.gmra.mxu0 %vm2287_vm13, %v4807_v9  ;;  %v4047_v41 = vadd.f32 %v4046_v28, %v4045_v31  ;;  %v3372_v10 = vpop.f32.mrf.mxu1  ;;  %v11678_v58 = vsub.f32 %v11602_v21, %v3896_v7  ;;  %v11681_v57 = vsub.f32 %v11612_v44, %v3896_v7  ;;  %v3835_v3 = vadd.f32 %v3834_v17, %v3833_v45  ;;  %v4396_v31 = vpop.permute.xlu2 %4395 }
 0x38a   : > { %8504 = vmatmul.msk.f32.gmra.mxu3 %vm2287_vm13, %v11665_v55  ;;  %v3424_v29 = vadd.f32 %v3372_v10, %v3095_v8  ;;  %v4477_v28 = vadd.f32 %v4396_v31, %v4317_v27  ;;  %v5063_v15 = vsel %vm1979_vm3, %v5061_v38, %v5062_v63  ;;  %v4754_v45 = vsel %vm1671_vm15, %v4752_v26, %v4753_v23 }
 0x38b   : > { %v4119_v2 = vmul.f32 %v4047_v41, %v9258_v54  ;;  %v3953_v56 = vmul.f32 %v11678_v58, %v11678_v58  ;;  %v3954_v21 = vmul.f32 %v11681_v57, %v11681_v57  ;;  %v3836_v12 = vrot.slane %v3835_v3, 4 }
 0x38c   : > { %v11723_v10 = vmax.f32 %v4477_v28, 0.0  ;;  %v4755_v26 = vrot.slane %v11614_v60, 7  ;;  %v5064_v23 = vrot.slane %v11614_v60, 1  ;;  %v5065_v31 = vrot.slane %v11642_v11, 1  ;;  %v6285_v60 = vld [vmem:[%s14006_s11 + $0x28] sm:$0xff] }
 0x38d   : > { %v11686_v25 = vadd.f32 1e-05, %v4119_v2  ;;  %v4048_v53 = vsel %vm2287_vm13, %v3953_v56, 0.0  ;;  %v4049_v24 = vsel %vm2287_vm13, %v3954_v21, 0.0  ;;  %v3837_v6 = vadd.f32 %v3836_v12, %v3835_v3  ;;  %6378 = vmatpush.msrb.mxu3 %v6285_v60 }
 0x38e   : > { %8562 = vmatmul.msk.f32.gmra.mxu1 %vm2287_vm13, %v5060_v30  ;;  %v3098_v44 = vpop.f32.mrf.mxu0  ;;  %v4050_v32 = vadd.f32 %v4049_v24, %v4048_v53  ;;  %v4478_v12 = vadd.f32 %v4398_v62, %v4318_v18  ;;  %v4756_v28 = vrot.slane %v11642_v11, 7  ;;  %v5066_v11 = vsel %vm1979_vm3, %v5064_v23, %v5065_v31 }
 0x38f   : > { %8891 = vrsqrt.f32 %v11686_v25  ;;  %v3838_v9 = vrot.slane %v3837_v6, 2  ;;  %vm4229_vm9 = vweird.f32 %v11686_v25 }
 0x390   : > { %v3681_v59 = vpop.f32.mrf.mxu2  ;;  %v4051_v35 = vrot.slane %v4050_v32, 4 }
 0x391   : > { %8531 = vmatmul.msk.f32.gmra.mxu0 %vm2287_vm13, %v4751_v51  ;;  %v3375_v40 = vpop.f32.mrf.mxu1  ;;  %v3839_v61 = vadd.f32 %v3838_v9, %v3837_v6  ;;  %v11709_v42 = vadd.f32 %v3681_v59, %v3424_v29  ;;  %v11752_v29 = vmax.f32 %v4478_v12, 0.0  ;;  %v4402_v62 = vpop.permute.xlu2 %4401 }
 0x392   : > { %8505 = vmatmul.msk.f32.gmra.mxu3 %vm2287_vm13, %v11699_v20  ;;  %v4052_v50 = vadd.f32 %v4051_v35, %v4050_v32  ;;  %v3425_v34 = vadd.f32 %v3375_v40, %v3098_v44  ;;  %v5117_v32 = vsel %vm1979_vm3, %v5062_v63, 0.0  ;;  %v4809_v63 = vsel %vm1671_vm15, 0.0, %v4755_v26 }
 0x393   : > { %v3840_v8 = vrot.slane %v3839_v61, 1  ;;  %v3842_v41 = vsel %vm2287_vm13, %v11709_v42, 0.0 }
 0x394   : > { %v4053_v39 = vrot.slane %v4052_v50, 2 }
 0x395   : > { %v8892_v4 = vpop.eup %8891  ;;  %v3841_v14 = vadd.f32 %v3840_v8, %v3839_v61 }
 0x396   : > { %8563 = vmatmul.msk.f32.gmra.mxu1 %vm2287_vm13, %v5116_v1  ;;  %v4224_v0 = vmul.f32 %v8892_v4, %v11686_v25  ;;  %v3101_v13 = vpop.f32.mrf.mxu0  ;;  %v4054_v30 = vadd.f32 %v4053_v39, %v4052_v50  ;;  %vm4230_vm8 = vweird.f32 %v8892_v4 }
 0x397   : > { %v3897_v52 = vmul.f32 %v3841_v14, %v9258_v54  ;;  %vm4231_vm10 = vmor %vm4229_vm9, %vm4230_vm8  ;;  %vm5358_vm9 = vcmask 523264  }
 0x398   : > { %v3684_v43 = vpop.f32.mrf.mxu2  ;;  %v4225_v19 = vmul.f32 %v8892_v4, %v4224_v0  ;;  %v4055_v51 = vrot.slane %v4054_v30, 1  ;;  %v4400_v0 = vpop.permute.xlu1 %4399 }
 0x399   : > { %8532 = vmatmul.msk.f32.gmra.mxu0 %vm2287_vm13, %v4808_v22  ;;  %v11717_v33 = vadd.f32 %v3684_v43, %v3425_v34  ;;  %v11733_v56 = vsub.f32 %v11658_v49, %v3897_v52  ;;  %v11736_v21 = vsub.f32 %v11663_v16, %v3897_v52 }
 0x39a   : > { %v4226_v17 = vmul.f32 0.5, %v4225_v19  ;;  %8506 = vmatmul.msk.f32.gmra.mxu3 %vm2287_vm13, %v11723_v10  ;;  %v4056_v36 = vadd.f32 %v4055_v51, %v4054_v30 }
 0x39b   : > { %v3378_v7 = vpop.f32.mrf.mxu1  ;;  %v3843_v2 = vsel %vm2287_vm13, %v11717_v33, 0.0  ;;  %v3955_v59 = vmul.f32 %v11733_v56, %v11733_v56  ;;  %v3956_v1 = vmul.f32 %v11736_v21, %v11736_v21 }
 0x39c   : > { %v3844_v3 = vadd.f32 %v3843_v2, %v3842_v41  ;;  %v4227_v37 = vsub.f32 1.5, %v4226_v17  ;;  %v4120_v24 = vmul.f32 %v4056_v36, %v9258_v54 }
 0x39d   : > { %v4057_v40 = vsel %vm2287_vm13, %v3955_v59, 0.0  ;;  %v4058_v35 = vsel %vm2287_vm13, %v3956_v1, 0.0 }
 0x39e   : > { %8564 = vmatmul.msk.f32.gmra.mxu1 %vm2287_vm13, %v5063_v15  ;;  %v3845_v44 = vrot.slane %v3844_v3, 4  ;;  %v4228_v53 = vmul.f32 %v8892_v4, %v4227_v37  ;;  %v3104_v49 = vpop.f32.mrf.mxu0  ;;  %v11747_v6 = vadd.f32 1e-05, %v4120_v24  ;;  %v4059_v9 = vadd.f32 %v4058_v35, %v4057_v40 }
 0x3a0   : > { %v3846_v16 = vadd.f32 %v3845_v44, %v3844_v3  ;;  %v4232_v25 = vsel %vm4231_vm10, %v8892_v4, %v4228_v53  ;;  %8893 = vrsqrt.f32 %v11747_v6  ;;  %v4060_v50 = vrot.slane %v4059_v9, 4 }
 0x3a1   : > { %8533 = vmatmul.msk.f32.gmra.mxu0 %vm2287_vm13, %v4754_v45  ;;  %v4319_v38 = vmul.f32 %v4232_v25, %v11607_v47  ;;  %v3426_v4 = vadd.f32 %v3378_v7, %v3101_v13  ;;  %v5988_v13 = vld [vmem:[%s14007_s12 + $0x28] sm:$0xff]  ;;  %v4320_v18 = vmul.f32 %v4232_v25, %v11610_v48  ;;  %v4757_v3 = vsel %vm1671_vm15, %v4755_v26, %v4756_v28 }
 0x3a2   : > { %v3687_v46 = vpop.f32.mrf.mxu2  ;;  %v3847_v22 = vrot.slane %v3846_v16, 2  ;;  %8507 = vmatmul.msk.f32.gmra.mxu3 %vm2287_vm13, %v11752_v29  ;;  %v4061_v39 = vadd.f32 %v4060_v50, %v4059_v9  ;;  %6097 = vmatpush.msra.mxu2 %v5988_v13  ;;  %vm4239_vm12 = vweird.f32 %v11747_v6 }
 0x3a3   : > { %v3381_v27 = vpop.f32.mrf.mxu1  ;;  %v11762_v47 = vadd.f32 %v3687_v46, %v3426_v4  ;;  %v4479_v43 = vadd.f32 %v4400_v0, %v4319_v38  ;;  %v4480_v53 = vadd.f32 %v4402_v62, %v4320_v18  ;;  %v4758_v46 = vrot.slane %v11665_v55, 7 }
 0x3a4   : > { %v3848_v61 = vadd.f32 %v3847_v22, %v3846_v16  ;;  %v3427_v8 = vadd.f32 %v3381_v27, %v3104_v49  ;;  %v4062_v15 = vrot.slane %v4061_v39, 2  ;;  %v5118_v38 = vsel %vm1979_vm3, %v5065_v31, 0.0 }
 0x3a5   : > { %v11776_v7 = vmax.f32 %v4479_v43, 0.0  ;;  %v3851_v2 = vsel %vm2287_vm13, %v11762_v47, 0.0  ;;  %v11812_v4 = vmax.f32 %v4480_v53, 0.0  ;;  %v5068_v31 = vrot.slane %v11699_v20, 1 }
 0x3a6   : > { %8565 = vmatmul.msk.f32.gmra.mxu1 %vm2287_vm13, %v5117_v32  ;;  %v3849_v5 = vrot.slane %v3848_v61, 1  ;;  %v11764_v34 = vpop.f32.mrf.mxu0  ;;  %v8894_v14 = vpop.eup %8893  ;;  %v4063_v17 = vadd.f32 %v4062_v15, %v4061_v39  ;;  %v4810_v39 = vsel %vm1671_vm15, 0.0, %v4758_v46 }
 0x3a7   : > { %v4234_v45 = vmul.f32 %v8894_v14, %v11747_v6  ;;  %vm4240_vm11 = vweird.f32 %v8894_v14  ;;  %v5067_v6 = vrot.slane %v11665_v55, 1  ;;  %v4404_v15 = vpop.permute.xlu0 %4403 }
 0x3a8   : > { %v3850_v19 = vadd.f32 %v3849_v5, %v3848_v61  ;;  %v4064_v36 = vrot.slane %v4063_v17, 1  ;;  %vm4241_vm2 = vmor %vm4239_vm12, %vm4240_vm11 }
 0x3a9   : > { %8534 = vmatmul.msk.f32.gmra.mxu0 %vm2287_vm13, %v4809_v63  ;;  %v4235_v37 = vmul.f32 %v8894_v14, %v4234_v45 }
 0x3aa   : > { %v3898_v51 = vmul.f32 %v3850_v19, %v9258_v54  ;;  %8508 = vmatmul.msk.f32.gmra.mxu3 %vm2287_vm13, %v11776_v7  ;;  %v4065_v1 = vadd.f32 %v4064_v36, %v4063_v17  ;;  %v4759_v19 = vrot.slane %v11699_v20, 7  ;;  %v5069_v17 = vsel %vm1979_vm3, %v5067_v6, %v5068_v31 }
 0x3ab   : > { %v3690_v30 = vpop.f32.mrf.mxu2  ;;  %v3384_v52 = vpop.f32.mrf.mxu1  ;;  %v4236_v59 = vmul.f32 0.5, %v4235_v37 }
 0x3ac   : > { %v11774_v41 = vadd.f32 %v3690_v30, %v3427_v8  ;;  %v11788_v12 = vsub.f32 %v11709_v42, %v3898_v51  ;;  %v11791_v44 = vsub.f32 %v11717_v33, %v3898_v51  ;;  %v11800_v42 = vpop.f32.mrf.mxu3  ;;  %v4121_v25 = vmul.f32 %v4065_v1, %v9258_v54 }
 0x3ad   : > { %7450 = vrot.lane.b32.xlu2 %v11800_v42, %s9037_s24  ;;  %v4237_v32 = vsub.f32 1.5, %v4236_v59  ;;  %v3428_v13 = vadd.f32 %v3384_v52, %v11764_v34 }
 0x3ae   : > { %8566 = vmatmul.msk.f32.gmra.mxu1 %vm2287_vm13, %v5066_v11  ;;  %v3852_v48 = vsel %vm2287_vm13, %v11774_v41, 0.0  ;;  %v3957_v26 = vmul.f32 %v11788_v12, %v11788_v12  ;;  %v3958_v49 = vmul.f32 %v11791_v44, %v11791_v44  ;;  %v3110_v16 = vpop.f32.mrf.mxu0  ;;  %v11810_v50 = vadd.f32 1e-05, %v4121_v25 }
 0x3af   : > { %v3853_v24 = vadd.f32 %v3852_v48, %v3851_v2  ;;  %v4238_v63 = vmul.f32 %v8894_v14, %v4237_v32 }
 0x3b0   : > { %v4066_v40 = vsel %vm2287_vm13, %v3957_v26, 0.0  ;;  %v4067_v35 = vsel %vm2287_vm13, %v3958_v49, 0.0  ;;  %8895 = vrsqrt.f32 %v11810_v50  ;;  %vm4249_vm0 = vweird.f32 %v11810_v50 }
 0x3b1   : > { %8535 = vmatmul.msk.f32.gmra.mxu0 %vm2287_vm13, %v4757_v3  ;;  %v3854_v33 = vrot.slane %v3853_v24, 4  ;;  %v4068_v22 = vadd.f32 %v4067_v35, %v4066_v40  ;;  %v4242_v5 = vsel %vm4241_vm2, %v8894_v14, %v4238_v63  ;;  %v6598_v14 = vld [vmem:[%s14008_s13 + $0x28] sm:$0xff]  ;;  %v4761_v40 = vrot.slane %v11723_v10, 7 }
 0x3b2   : > { %8509 = vmatmul.msk.f32.gmra.mxu3 %vm2287_vm13, %v11812_v4  ;;  %v4321_v8 = vmul.f32 %v4242_v5, %v11678_v58  ;;  %6691 = vmatpush.msrb.mxu0 %v6598_v14  ;;  %v4322_v3 = vmul.f32 %v4242_v5, %v11681_v57  ;;  %v4406_v57 = vpop.permute.xlu1 %4405  ;;  %v5119_v63 = vsel %vm1979_vm3, %v5068_v31, 0.0  ;;  %v5070_v14 = vrot.slane %v11723_v10, 1 }
 0x3b3   : > { %v3693_v9 = vpop.f32.mrf.mxu2  ;;  %v3855_v27 = vadd.f32 %v3854_v33, %v3853_v24  ;;  %v3387_v61 = vpop.f32.mrf.mxu1  ;;  %v4069_v23 = vrot.slane %v4068_v22, 4  ;;  %v4760_v24 = vsel %vm1671_vm15, %v4758_v46, %v4759_v19  ;;  %v4811_v31 = vsel %vm1671_vm15, 0.0, %v4761_v40 }
 0x3b4   : > { %v11825_v60 = vpop.f32.mrf.mxu3  ;;  %v3429_v55 = vadd.f32 %v3387_v61, %v3110_v16  ;;  %v4481_v11 = vadd.f32 %v4404_v15, %v4321_v8  ;;  %v11833_v45 = vadd.f32 %v3693_v9, %v3428_v13  ;;  %v4482_v46 = vadd.f32 %v4406_v57, %v4322_v3 }
 0x3b5   : > { %v3856_v0 = vrot.slane %v3855_v27, 2  ;;  %v4070_v43 = vadd.f32 %v4069_v23, %v4068_v22  ;;  %7452 = vrot.lane.b32.xlu0 %v11825_v60, %s9037_s24 }
 0x3b6   : > { %8567 = vmatmul.msk.f32.gmra.mxu1 %vm2287_vm13, %v5118_v38  ;;  %v3113_v58 = vpop.f32.mrf.mxu0  ;;  %v11838_v2 = vmax.f32 %v4481_v11, 0.0  ;;  %v8896_v48 = vpop.eup %8895  ;;  %v3860_v59 = vsel %vm2287_vm13, %v11833_v45, 0.0 }
 0x3b7   : > { %v3857_v28 = vadd.f32 %v3856_v0, %v3855_v27  ;;  %v4071_v30 = vrot.slane %v4070_v43, 2  ;;  %v4244_v37 = vmul.f32 %v8896_v48, %v11810_v50  ;;  %vm4250_vm14 = vweird.f32 %v8896_v48 }
 0x3b8   : > { %vm4251_vm1 = vmor %vm4249_vm0, %vm4250_vm14 }
 0x3b9   : > { %8536 = vmatmul.msk.f32.gmra.mxu0 %vm2287_vm13, %v4810_v39  ;;  %v3858_v18 = vrot.slane %v3857_v28, 1  ;;  %v4072_v51 = vadd.f32 %v4071_v30, %v4070_v43  ;;  %v4245_v26 = vmul.f32 %v8896_v48, %v4244_v37  ;;  %v11873_v43 = vmax.f32 %v4482_v46, 0.0 }
 0x3ba   : > { %8510 = vmatmul.msk.f32.gmra.mxu3 %vm2287_vm13, %v11838_v2 }
 0x3bb   : > { %v3696_v34 = vpop.f32.mrf.mxu2  ;;  %v3859_v20 = vadd.f32 %v3858_v18, %v3857_v28  ;;  %v3390_v62 = vpop.f32.mrf.mxu1  ;;  %v4073_v36 = vrot.slane %v4072_v51, 1  ;;  %v4246_v35 = vmul.f32 0.5, %v4245_v26  ;;  %v5071_v18 = vrot.slane %v11752_v29, 1 }
 0x3bc   : > { %v11836_v52 = vadd.f32 %v3696_v34, %v3429_v55  ;;  %v11858_v25 = vpop.f32.mrf.mxu3  ;;  %v3430_v30 = vadd.f32 %v3390_v62, %v3113_v58 }
 0x3bd   : > { %v3899_v53 = vmul.f32 %v3859_v20, %v9258_v54  ;;  %v4074_v49 = vadd.f32 %v4073_v36, %v4072_v51  ;;  %7454 = vrot.lane.b32.xlu1 %v11858_v25, %s9037_s24  ;;  %v4247_v61 = vsub.f32 1.5, %v4246_v35  ;;  %v4408_v51 = vpop.permute.xlu2 %4407 }
 0x3be   : > { %8568 = vmatmul.msk.f32.gmra.mxu1 %vm2287_vm13, %v5069_v17  ;;  %v3861_v1 = vsel %vm2287_vm13, %v11836_v52, 0.0  ;;  %v4762_v17 = vrot.slane %v11752_v29, 7 }
 0x3bf   : > { %v11853_v33 = vsub.f32 %v11762_v47, %v3899_v53  ;;  %v11856_v16 = vsub.f32 %v11774_v41, %v3899_v53  ;;  %v3862_v32 = vadd.f32 %v3861_v1, %v3860_v59  ;;  %v4122_v9 = vmul.f32 %v4074_v49, %v9258_v54  ;;  %v3116_v47 = vpop.f32.mrf.mxu0 }
 0x3c0   : > { %v4248_v28 = vmul.f32 %v8896_v48, %v4247_v61  ;;  %v4763_v49 = vsel %vm1671_vm15, %v4761_v40, %v4762_v17  ;;  %v4410_v40 = vpop.permute.xlu0 %4409 }
 0x3c1   : > { %8537 = vmatmul.msk.f32.gmra.mxu0 %vm2287_vm13, %v4760_v24  ;;  %v3959_v22 = vmul.f32 %v11853_v33, %v11853_v33  ;;  %v3960_v27 = vmul.f32 %v11856_v16, %v11856_v16  ;;  %v3863_v41 = vrot.slane %v3862_v32, 4  ;;  %v11869_v23 = vadd.f32 1e-05, %v4122_v9 }
 0x3c2   : > { %8511 = vmatmul.msk.f32.gmra.mxu3 %vm2287_vm13, %v11873_v43  ;;  %v4252_v19 = vsel %vm4251_vm1, %v8896_v48, %v4248_v28  ;;  %v6284_v48 = vld [vmem:[%s14006_s11 + $0x20] sm:$0xff]  ;;  %v5072_v24 = vsel %vm1979_vm3, %v5070_v14, %v5071_v18 }
 0x3c3   : > { %v3699_v38 = vpop.f32.mrf.mxu2  ;;  %v4075_v0 = vsel %vm2287_vm13, %v3959_v22, 0.0  ;;  %v4076_v39 = vsel %vm2287_vm13, %v3960_v27, 0.0  ;;  %v3864_v6 = vadd.f32 %v3863_v41, %v3862_v32  ;;  %v3393_v8 = vpop.f32.mrf.mxu1  ;;  %8897 = vrsqrt.f32 %v11869_v23  ;;  %6379 = vmatpush.msrb.mxu3 %v6284_v48 }
 0x3c4   : > { %v4077_v5 = vadd.f32 %v4076_v39, %v4075_v0  ;;  %v4323_v50 = vmul.f32 %v4252_v19, %v11733_v56  ;;  %v11886_v34 = vpop.f32.mrf.mxu3  ;;  %v11889_v20 = vadd.f32 %v3699_v38, %v3430_v30  ;;  %v3431_v3 = vadd.f32 %v3393_v8, %v3116_v47  ;;  %v5987_v56 = vld [vmem:[%s14007_s12 + $0x20] sm:$0xff] }
 0x3c5   : > { %v3865_v13 = vrot.slane %v3864_v6, 2  ;;  %7456 = vrot.lane.b32.xlu2 %v11886_v34, %s9037_s24  ;;  %6098 = vmatpush.msra.mxu2 %v5987_v56  ;;  %v4324_v46 = vmul.f32 %v4252_v19, %v11736_v21  ;;  %v4764_v8 = vrot.slane %v11776_v7, 7  ;;  %vm4259_vm5 = vweird.f32 %v11869_v23 }
 0x3c6   : > { %8569 = vmatmul.msk.f32.gmra.mxu1 %vm2287_vm13, %v5119_v63  ;;  %v4078_v15 = vrot.slane %v4077_v5, 4  ;;  %v4483_v37 = vadd.f32 %v4408_v51, %v4323_v50  ;;  %v3869_v32 = vsel %vm2287_vm13, %v11889_v20, 0.0  ;;  %v5120_v19 = vsel %vm1979_vm3, %v5071_v18, 0.0 }
 0x3c7   : > { %v3866_v11 = vadd.f32 %v3865_v13, %v3864_v6  ;;  %v11893_v58 = vpop.f32.mrf.mxu0  ;;  %v4484_v39 = vadd.f32 %v4410_v40, %v4324_v46  ;;  %v5073_v18 = vrot.slane %v11776_v7, 1  ;;  %v5074_v56 = vrot.slane %v11812_v4, 1 }
 0x3c8   : > { %v4079_v55 = vadd.f32 %v4078_v15, %v4077_v5  ;;  %v11912_v9 = vmax.f32 %v4483_v37, 0.0  ;;  %v4412_v37 = vpop.permute.xlu1 %4411 }
 0x3c9   : > { %8538 = vmatmul.msk.f32.gmra.mxu0 %vm2287_vm13, %v4811_v31  ;;  %v3867_v62 = vrot.slane %v3866_v11, 1  ;;  %v8898_v36 = vpop.eup %8897 }
 0x3ca   : > { %v4080_v10 = vrot.slane %v4079_v55, 2  ;;  %v4254_v59 = vmul.f32 %v8898_v36, %v11869_v23  ;;  %8512 = vmatmul.msk.f32.gmra.mxu3 %vm2287_vm13, %v11912_v9  ;;  %vm4260_vm4 = vweird.f32 %v8898_v36  ;;  %v4812_v23 = vsel %vm1671_vm15, 0.0, %v4764_v8 }
 0x3cb   : > { %v3702_v29 = vpop.f32.mrf.mxu2  ;;  %v3868_v57 = vadd.f32 %v3867_v62, %v3866_v11  ;;  %v3396_v26 = vpop.f32.mrf.mxu1  ;;  %vm4261_vm6 = vmor %vm4259_vm5, %vm4260_vm4 }
 0x3cc   : > { %v11901_v53 = vadd.f32 %v3702_v29, %v3431_v3  ;;  %v4081_v1 = vadd.f32 %v4080_v10, %v4079_v55  ;;  %v4255_v22 = vmul.f32 %v8898_v36, %v4254_v59  ;;  %v11924_v0 = vpop.f32.mrf.mxu3  ;;  %v11942_v3 = vmax.f32 %v4484_v39, 0.0 }
 0x3cd   : > { %v3900_v47 = vmul.f32 %v3868_v57, %v9258_v54  ;;  %7458 = vrot.lane.b32.xlu0 %v11924_v0, %s9037_s24 }
 0x3ce   : > { %8570 = vmatmul.msk.f32.gmra.mxu1 %vm2287_vm13, %v5072_v24  ;;  %v3870_v35 = vsel %vm2287_vm13, %v11901_v53, 0.0  ;;  %v4082_v27 = vrot.slane %v4081_v1, 1  ;;  %v4256_v21 = vmul.f32 0.5, %v4255_v22  ;;  %v3432_v24 = vadd.f32 %v3396_v26, %v11893_v58  ;;  %v6597_v58 = vld [vmem:[%s14008_s13 + $0x20] sm:$0xff] }
 0x3cf   : > { %v3871_v41 = vadd.f32 %v3870_v35, %v3869_v32  ;;  %v11919_v63 = vsub.f32 %v11833_v45, %v3900_v47  ;;  %v11922_v61 = vsub.f32 %v11836_v52, %v3900_v47  ;;  %v3122_v6 = vpop.f32.mrf.mxu0  ;;  %v5075_v35 = vsel %vm1979_vm3, %v5073_v18, %v5074_v56  ;;  %6692 = vmatpush.msrb.mxu0 %v6597_v58 }
 0x3d0   : > { %v4083_v38 = vadd.f32 %v4082_v27, %v4081_v1  ;;  %v4257_v28 = vsub.f32 1.5, %v4256_v21  ;;  %v4767_v21 = vrot.slane %v11838_v2, 7 }
 0x3d1   : > { %8539 = vmatmul.msk.f32.gmra.mxu0 %vm2287_vm13, %v4763_v49  ;;  %v3872_v5 = vrot.slane %v3871_v41, 4  ;;  %v3961_v45 = vmul.f32 %v11919_v63, %v11919_v63  ;;  %v3962_v52 = vmul.f32 %v11922_v61, %v11922_v61 }
 0x3d2   : > { %v4123_v31 = vmul.f32 %v4083_v38, %v9258_v54  ;;  %v4258_v30 = vmul.f32 %v8898_v36, %v4257_v28  ;;  %8513 = vmatmul.msk.f32.gmra.mxu3 %vm2287_vm13, %v11942_v3 }
 0x3d3   : > { %v3705_v15 = vpop.f32.mrf.mxu2  ;;  %v3873_v13 = vadd.f32 %v3872_v5, %v3871_v41  ;;  %v4084_v50 = vsel %vm2287_vm13, %v3961_v45, 0.0  ;;  %v4085_v55 = vsel %vm2287_vm13, %v3962_v52, 0.0  ;;  %v3399_v11 = vpop.f32.mrf.mxu1 }
 0x3d4   : > { %v11936_v14 = vadd.f32 1e-05, %v4123_v31  ;;  %v4086_v17 = vadd.f32 %v4085_v55, %v4084_v50  ;;  %v4262_v10 = vsel %vm4261_vm6, %v8898_v36, %v4258_v30  ;;  %v11953_v59 = vpop.f32.mrf.mxu3  ;;  %v4765_v36 = vrot.slane %v11812_v4, 7  ;;  %v4414_v45 = vpop.permute.xlu2 %4413 }
 0x3d5   : > { %v3874_v51 = vrot.slane %v3873_v13, 2  ;;  %v4325_v48 = vmul.f32 %v4262_v10, %v11788_v12  ;;  %v3433_v49 = vadd.f32 %v3399_v11, %v3122_v6  ;;  %7460 = vrot.lane.b32.xlu1 %v11953_v59, %s9037_s24  ;;  %v11958_v46 = vadd.f32 %v3705_v15, %v3432_v24 }
 0x3d6   : > { %8571 = vmatmul.msk.f32.gmra.mxu1 %vm2287_vm13, %v5120_v19  ;;  %8899 = vrsqrt.f32 %v11936_v14  ;;  %v4087_v62 = vrot.slane %v4086_v17, 4  ;;  %v4326_v41 = vmul.f32 %v4262_v10, %v11791_v44  ;;  %v4766_v6 = vsel %vm1671_vm15, %v4764_v8, %v4765_v36 }
 0x3d7   : > { %v3875_v29 = vadd.f32 %v3874_v51, %v3873_v13  ;;  %v4921_v7 = vpop.f32.mrf.mxu0  ;;  %v4485_v12 = vadd.f32 %v4412_v37, %v4325_v48  ;;  %v3878_v28 = vsel %vm2287_vm13, %v11958_v46, 0.0  ;;  %v5121_v44 = vsel %vm1979_vm3, %v5074_v56, 0.0 }
 0x3d8   : > { %v4088_v1 = vadd.f32 %v4087_v62, %v4086_v17  ;;  %v4486_v8 = vadd.f32 %v4414_v45, %v4326_v41  ;;  %v5017_v30 = vadd.f32 %v4921_v7, %v11800_v42  ;;  %v4813_v11 = vsel %vm1671_vm15, 0.0, %v4767_v21 }
 0x3d9   : > { %8540 = vmatmul.msk.f32.gmra.mxu0 %vm2287_vm13, %v4812_v23  ;;  %v3876_v57 = vrot.slane %v3875_v29, 1  ;;  %v11966_v27 = vmax.f32 %v4485_v12, 0.0  ;;  %vm4269_vm7 = vweird.f32 %v11936_v14 }
 0x3da   : > { %v4089_v22 = vrot.slane %v4088_v1, 2 }
 0x3db   : > { %v3708_v32 = vpop.f32.mrf.mxu2  ;;  %v3877_v26 = vadd.f32 %v3876_v57, %v3875_v29  ;;  %v5230_v40 = vpop.f32.mrf.mxu1  ;;  %8514 = vmatmul.msk.f32.gmra.mxu3 %vm2287_vm13, %v11966_v27 }
 0x3dc   : > { %v11964_v4 = vadd.f32 %v3708_v32, %v3433_v49  ;;  %v8900_v47 = vpop.eup %8899  ;;  %v4090_v39 = vadd.f32 %v4089_v22, %v4088_v1  ;;  %v12005_v24 = vadd.f32 %v5230_v40, %v5017_v30  ;;  %v12007_v1 = vmax.f32 %v4486_v8, 0.0 }
 0x3dd   : > { %v4264_v38 = vmul.f32 %v8900_v47, %v11936_v14  ;;  %v3901_v5 = vmul.f32 %v3877_v26, %v9258_v54  ;;  %v11989_v55 = vpop.f32.mrf.mxu3  ;;  %vm4270_vm8 = vweird.f32 %v8900_v47  ;;  %v5076_v32 = vrot.slane %v11838_v2, 1 }
 0x3de   : > { %8572 = vmatmul.msk.f32.gmra.mxu1 %vm2287_vm13, %v5075_v35  ;;  %v3879_v31 = vsel %vm2287_vm13, %v11964_v4, 0.0  ;;  %v4091_v15 = vrot.slane %v4090_v39, 1  ;;  %7462 = vrot.lane.b32.xlu2 %v11989_v55, %s9037_s24  ;;  %vm4271_vm10 = vmor %vm4269_vm7, %vm4270_vm8  ;;  %v5077_v35 = vrot.slane %v11873_v43, 1  ;;  %v4768_v14 = vrot.slane %v11873_v43, 7  ;;  %v5986_v43 = vld [vmem:[%s14007_s12 + $0x18] sm:$0xff] }
 0x3df   : > { %v4265_v52 = vmul.f32 %v8900_v47, %v4264_v38  ;;  %v11981_v13 = vsub.f32 %v11889_v20, %v3901_v5  ;;  %v11984_v19 = vsub.f32 %v11901_v53, %v3901_v5  ;;  %v3880_v50 = vadd.f32 %v3879_v31, %v3878_v28  ;;  %v4924_v23 = vpop.f32.mrf.mxu0  ;;  %6099 = vmatpush.msra.mxu2 %v5986_v43 }
 0x3e0   : > { %v4092_v51 = vadd.f32 %v4091_v15, %v4090_v39  ;;  %v5018_v10 = vadd.f32 %v4924_v23, %v11825_v60  ;;  %v5359_v38 = vsel %vm5358_vm9, %v12005_v24, 0.0 }
 0x3e1   : > { %8541 = vmatmul.msk.f32.gmra.mxu0 %vm2287_vm13, %v4766_v6  ;;  %v4266_v17 = vmul.f32 0.5, %v4265_v52  ;;  %v3963_v20 = vmul.f32 %v11981_v13, %v11981_v13  ;;  %v3964_v53 = vmul.f32 %v11984_v19, %v11984_v19  ;;  %v3881_v42 = vrot.slane %v3880_v50, 4  ;;  %v4416_v6 = vpop.permute.xlu0 %4415 }
 0x3e2   : > { %v4124_v56 = vmul.f32 %v4092_v51, %v9258_v54  ;;  %v5078_v52 = vsel %vm1979_vm3, %v5076_v32, %v5077_v35 }
 0x3e3   : > { %v4267_v18 = vsub.f32 1.5, %v4266_v17  ;;  %v4093_v48 = vsel %vm2287_vm13, %v3963_v20, 0.0  ;;  %v4094_v62 = vsel %vm2287_vm13, %v3964_v53, 0.0  ;;  %v3882_v37 = vadd.f32 %v3881_v42, %v3880_v50  ;;  %v5233_v36 = vpop.f32.mrf.mxu1  ;;  %8515 = vmatmul.msk.f32.gmra.mxu3 %vm2287_vm13, %v12007_v1 }
 0x3e4   : > { %v4095_v29 = vadd.f32 %v4094_v62, %v4093_v48  ;;  %v12010_v49 = vadd.f32 1e-05, %v4124_v56  ;;  %v12012_v60 = vadd.f32 %v5233_v36, %v5018_v10  ;;  %v4769_v50 = vsel %vm1671_vm15, %v4767_v21, %v4768_v14  ;;  %v4418_v21 = vpop.permute.xlu1 %4417 }
 0x3e5   : > { %v4268_v57 = vmul.f32 %v8900_v47, %v4267_v18  ;;  %v3883_v12 = vrot.slane %v3882_v37, 2  ;;  %v12029_v39 = vpop.f32.mrf.mxu3  ;;  %v4770_v53 = vrot.slane %v11912_v9, 7 }
 0x3e6   : > { %8573 = vmatmul.msk.f32.gmra.mxu1 %vm2287_vm13, %v5121_v44  ;;  %v4096_v7 = vrot.slane %v4095_v29, 4  ;;  %8901 = vrsqrt.f32 %v12010_v49  ;;  %v5360_v58 = vsel %vm5358_vm9, %v12012_v60, 0.0  ;;  %7464 = vrot.lane.b32.xlu0 %v12029_v39, %s9037_s24  ;;  %vm4279_vm12 = vweird.f32 %v12010_v49 }
 0x3e7   : > { %v4272_v22 = vsel %vm4271_vm10, %v8900_v47, %v4268_v57  ;;  %v3884_v40 = vadd.f32 %v3883_v12, %v3882_v37  ;;  %v5361_v47 = vadd.f32 %v5360_v58, %v5359_v38  ;;  %v4927_v5 = vpop.f32.mrf.mxu0  ;;  %v5079_v12 = vrot.slane %v11912_v9, 1 }
 0x3e8   : > { %v4327_v26 = vmul.f32 %v4272_v22, %v11853_v33  ;;  %v4097_v41 = vadd.f32 %v4096_v7, %v4095_v29  ;;  %v6283_v33 = vld [vmem:[%s14006_s11 + $0x18] sm:$0xff]  ;;  %v4328_v17 = vmul.f32 %v4272_v22, %v11856_v16  ;;  %v5019_v2 = vadd.f32 %v4927_v5, %v11858_v25 }
 0x3e9   : > { %8542 = vmatmul.msk.f32.gmra.mxu0 %vm2287_vm13, %v4813_v11  ;;  %v3885_v31 = vrot.slane %v3884_v40, 1  ;;  %6380 = vmatpush.msrb.mxu3 %v6283_v33  ;;  %v5362_v44 = vrot.slane %v5361_v47, 4  ;;  %v5122_v16 = vsel %vm1979_vm3, %v5077_v35, 0.0  ;;  %v4814_v7 = vsel %vm1671_vm15, 0.0, %v4770_v53 }
 0x3ea   : > { %v4098_v28 = vrot.slane %v4097_v41, 2  ;;  %v4487_v45 = vadd.f32 %v4416_v6, %v4327_v26  ;;  %v4488_v36 = vadd.f32 %v4418_v21, %v4328_v17 }
 0x3eb   : > { %v3886_v8 = vadd.f32 %v3885_v31, %v3884_v40  ;;  %v5236_v30 = vpop.f32.mrf.mxu1  ;;  %v5363_v51 = vadd.f32 %v5362_v44, %v5361_v47 }
 0x3ec   : > { %v4099_v15 = vadd.f32 %v4098_v28, %v4097_v41  ;;  %v8902_v11 = vpop.eup %8901  ;;  %v12045_v20 = vmax.f32 %v4487_v45, 0.0  ;;  %v12074_v58 = vadd.f32 %v5236_v30, %v5019_v2  ;;  %v12084_v43 = vmax.f32 %v4488_v36, 0.0 }
 0x3ed   : > { %v4274_v23 = vmul.f32 %v8902_v11, %v12010_v49  ;;  %v3902_v10 = vmul.f32 %v3886_v8, %v9258_v54  ;;  %v5364_v18 = vrot.slane %v5363_v51, 2  ;;  %v12061_v37 = vpop.f32.mrf.mxu3  ;;  %vm4280_vm11 = vweird.f32 %v8902_v11 }
 0x3ee   : > { %8574 = vmatmul.msk.f32.gmra.mxu1 %vm2287_vm13, %v5078_v52  ;;  %v4100_v42 = vrot.slane %v4099_v15, 1  ;;  %8516 = vmatmul.msk.f32.gmra.mxu3 %vm2287_vm13, %v12045_v20  ;;  %vm4281_vm2 = vmor %vm4279_vm12, %vm4280_vm11  ;;  %v5368_v45 = vsel %vm5358_vm9, %v12074_v58, 0.0 }
 0x3ef   : > { %v4275_v56 = vmul.f32 %v8902_v11, %v4274_v23  ;;  %v12056_v62 = vsub.f32 %v11958_v46, %v3902_v10  ;;  %v12059_v29 = vsub.f32 %v11964_v4, %v3902_v10  ;;  %v5365_v57 = vadd.f32 %v5364_v18, %v5363_v51  ;;  %7466 = vrot.lane.b32.xlu1 %v12061_v37, %s9037_s24  ;;  %v4930_v25 = vpop.f32.mrf.mxu0 }
 0x3f0   : > { %v4101_v48 = vadd.f32 %v4100_v42, %v4099_v15  ;;  %v5020_v14 = vadd.f32 %v4930_v25, %v11886_v34  ;;  %v5080_v34 = vrot.slane %v11942_v3, 1  ;;  %v4771_v23 = vrot.slane %v11942_v3, 7  ;;  %v4420_v42 = vpop.permute.xlu2 %4419 }
 0x3f1   : > { %8543 = vmatmul.msk.f32.gmra.mxu0 %vm2287_vm13, %v4769_v50  ;;  %v4276_v32 = vmul.f32 0.5, %v4275_v56  ;;  %v3965_v4 = vmul.f32 %v12056_v62, %v12056_v62  ;;  %v3966_v35 = vmul.f32 %v12059_v29, %v12059_v29  ;;  %v5366_v22 = vrot.slane %v5365_v57, 1 }
 0x3f2   : > { %v4125_v46 = vmul.f32 %v4101_v48, %v9258_v54  ;;  %v4772_v25 = vsel %vm1671_vm15, %v4770_v53, %v4771_v23  ;;  %v4422_v53 = vpop.permute.xlu0 %4421 }
 0x3f3   : > { %v4277_v26 = vsub.f32 1.5, %v4276_v32  ;;  %v4102_v40 = vsel %vm2287_vm13, %v3965_v4, 0.0  ;;  %v4103_v38 = vsel %vm2287_vm13, %v3966_v35, 0.0  ;;  %v5239_v47 = vpop.f32.mrf.mxu1  ;;  %v5367_v6 = vadd.f32 %v5366_v22, %v5365_v57 }
 0x3f4   : > { %v12077_v41 = vadd.f32 1e-05, %v4125_v46  ;;  %v4104_v5 = vadd.f32 %v4103_v38, %v4102_v40  ;;  %v12082_v28 = vadd.f32 %v5239_v47, %v5020_v14 }
 0x3f5   : > { %v4278_v33 = vmul.f32 %v8902_v11, %v4277_v26  ;;  %v5503_v44 = vmul.f32 %v5367_v6, %v9258_v54  ;;  %v12098_v8 = vpop.f32.mrf.mxu3 }
 0x3f6   : > { %8575 = vmatmul.msk.f32.gmra.mxu1 %vm2287_vm13, %v5122_v16  ;;  %8903 = vrsqrt.f32 %v12077_v41  ;;  %v4105_v31 = vrot.slane %v4104_v5, 4  ;;  %v5369_v52 = vsel %vm5358_vm9, %v12082_v28, 0.0  ;;  %8517 = vmatmul.msk.f32.gmra.mxu3 %vm2287_vm13, %v12084_v43  ;;  %v5081_v16 = vsel %vm1979_vm3, %v5079_v12, %v5080_v34 }
 0x3f7   : > { %v4282_v49 = vsel %vm4281_vm2, %v8902_v11, %v4278_v33  ;;  %v5370_v15 = vadd.f32 %v5369_v52, %v5368_v45  ;;  %v12102_v17 = vsub.f32 %v12005_v24, %v5503_v44  ;;  %7468 = vrot.lane.b32.xlu2 %v12098_v8, %s9037_s24  ;;  %v4933_v51 = vpop.f32.mrf.mxu0  ;;  %v12108_v10 = vsub.f32 %v12012_v60, %v5503_v44 }
 0x3f8   : > { %v4329_v30 = vmul.f32 %v4282_v49, %v11919_v63  ;;  %v4106_v50 = vadd.f32 %v4105_v31, %v4104_v5  ;;  %v6596_v63 = vld [vmem:[%s14008_s13 + $0x18] sm:$0xff]  ;;  %v5021_v26 = vadd.f32 %v4933_v51, %v11924_v0  ;;  %v5123_v0 = vsel %vm1979_vm3, %v5080_v34, 0.0 }
 0x3f9   : > { %8544 = vmatmul.msk.f32.gmra.mxu0 %vm2287_vm13, %v4814_v7  ;;  %v5371_v11 = vrot.slane %v5370_v15, 4  ;;  %v5551_v24 = vmul.f32 %v12102_v17, %v12102_v17  ;;  %v5552_v3 = vmul.f32 %v12108_v10, %v12108_v10  ;;  %v4330_v7 = vmul.f32 %v4282_v49, %v11922_v61 }
 0x3fa   : > { %v4107_v18 = vrot.slane %v4106_v50, 2  ;;  %v4489_v2 = vadd.f32 %v4420_v42, %v4329_v30  ;;  %6693 = vmatpush.msrb.mxu0 %v6596_v63  ;;  %v4773_v61 = vrot.slane %v11966_v27, 7  ;;  %vm4289_vm0 = vweird.f32 %v12077_v41 }
 0x3fb   : > { %v5372_v56 = vadd.f32 %v5371_v11, %v5370_v15  ;;  %v5242_v60 = vpop.f32.mrf.mxu1  ;;  %v5583_v57 = vsel %vm5358_vm9, %v5551_v24, 0.0  ;;  %v5584_v12 = vsel %vm5358_vm9, %v5552_v3, 0.0  ;;  %v4490_v6 = vadd.f32 %v4422_v53, %v4330_v7 }
 0x3fc   : > { %v8904_v21 = vpop.eup %8903  ;;  %v4108_v36 = vadd.f32 %v4107_v18, %v4106_v50  ;;  %v12126_v46 = vmax.f32 %v4489_v2, 0.0  ;;  %v5585_v22 = vadd.f32 %v5584_v12, %v5583_v57  ;;  %v12141_v15 = vadd.f32 %v5242_v60, %v5021_v26 }
 0x3fd   : > { %v4284_v48 = vmul.f32 %v8904_v21, %v12077_v41  ;;  %v5373_v32 = vrot.slane %v5372_v56, 2  ;;  %v12132_v9 = vpop.f32.mrf.mxu3  ;;  %vm4290_vm14 = vweird.f32 %v8904_v21  ;;  %v4815_v50 = vsel %vm1671_vm15, 0.0, %v4773_v61 }
 0x3fe   : > { %8576 = vmatmul.msk.f32.gmra.mxu1 %vm2287_vm13, %v5081_v16  ;;  %v4109_v35 = vrot.slane %v4108_v36, 1  ;;  %8518 = vmatmul.msk.f32.gmra.mxu3 %vm2287_vm13, %v12126_v46  ;;  %v5586_v47 = vrot.slane %v5585_v22, 4  ;;  %vm4291_vm1 = vmor %vm4289_vm0, %vm4290_vm14  ;;  %v12150_v11 = vmax.f32 %v4490_v6, 0.0  ;;  %v5082_v41 = vrot.slane %v11966_v27, 1 }
 0x3ff   : > { %v4285_v4 = vmul.f32 %v8904_v21, %v4284_v48  ;;  %v5374_v14 = vadd.f32 %v5373_v32, %v5372_v56  ;;  %7470 = vrot.lane.b32.xlu0 %v12132_v9, %s9037_s24  ;;  %v4936_v5 = vpop.f32.mrf.mxu0  ;;  %v5083_v24 = vrot.slane %v12007_v1, 1 }
 0x400   : > { %v4110_v38 = vadd.f32 %v4109_v35, %v4108_v36  ;;  %v5022_v31 = vadd.f32 %v4936_v5, %v11953_v59  ;;  %v5587_v52 = vadd.f32 %v5586_v47, %v5585_v22 }
 0x401   : > { %8545 = vmatmul.msk.f32.gmra.mxu0 %vm2287_vm13, %v4772_v25  ;;  %v4286_v40 = vmul.f32 0.5, %v4285_v4  ;;  %v5375_v33 = vrot.slane %v5374_v14, 1  ;;  %v5084_v12 = vsel %vm1979_vm3, %v5082_v41, %v5083_v24  ;;  %v6282_v41 = vld [vmem:[%s14006_s11 + $0x10] sm:$0xff] }
 0x402   : > { %v4126_v45 = vmul.f32 %v4110_v38, %v9258_v54  ;;  %v5588_v59 = vrot.slane %v5587_v52, 2  ;;  %6381 = vmatpush.msrb.mxu3 %v6282_v41 }
 0x403   : > { %v4287_v44 = vsub.f32 1.5, %v4286_v40  ;;  %v5376_v49 = vadd.f32 %v5375_v33, %v5374_v14  ;;  %v5245_v30 = vpop.f32.mrf.mxu1 }
 0x404   : > { %v12145_v23 = vadd.f32 1e-05, %v4126_v45  ;;  %v12147_v34 = vadd.f32 %v5245_v30, %v5022_v31  ;;  %v5589_v63 = vadd.f32 %v5588_v59, %v5587_v52 }
 0x405   : > { %v4288_v51 = vmul.f32 %v8904_v21, %v4287_v44  ;;  %v5504_v42 = vmul.f32 %v5376_v49, %v9258_v54  ;;  %v12165_v56 = vpop.f32.mrf.mxu3  ;;  %v4776_v49 = vrot.slane %v12045_v20, 7 }
 0x406   : > { %8577 = vmatmul.msk.f32.gmra.mxu1 %vm2287_vm13, %v5123_v0  ;;  %8905 = vrsqrt.f32 %v12145_v23  ;;  %8519 = vmatmul.msk.f32.gmra.mxu3 %vm2287_vm13, %v12150_v11  ;;  %v5590_v27 = vrot.slane %v5589_v63, 1  ;;  %v5378_v60 = vsel %vm5358_vm9, %v12147_v34, 0.0  ;;  %vm4299_vm5 = vweird.f32 %v12145_v23 }
 0x407   : > { %v4292_v18 = vsel %vm4291_vm1, %v8904_v21, %v4288_v51  ;;  %v12158_v16 = vsub.f32 %v12074_v58, %v5504_v42  ;;  %v12161_v3 = vsub.f32 %v12082_v28, %v5504_v42  ;;  %v5377_v21 = vsel %vm5358_vm9, %v12141_v15, 0.0  ;;  %7472 = vrot.lane.b32.xlu1 %v12165_v56, %s9037_s24  ;;  %v4424_v28 = vpop.permute.xlu1 %4423  ;;  %v5985_v42 = vld [vmem:[%s14007_s12 + $0x10] sm:$0xff] }
 0x408   : > { %v4331_v2 = vmul.f32 %v4292_v18, %v11981_v13  ;;  %v4939_v13 = vpop.f32.mrf.mxu0  ;;  %v4774_v58 = vrot.slane %v12007_v1, 7  ;;  %v5379_v57 = vadd.f32 %v5378_v60, %v5377_v21  ;;  %v5591_v25 = vadd.f32 %v5590_v27, %v5589_v63  ;;  %6100 = vmatpush.msra.mxu2 %v5985_v42 }
 0x409   : > { %8546 = vmatmul.msk.f32.gmra.mxu0 %vm2287_vm13, %v4815_v50  ;;  %v5553_v48 = vmul.f32 %v12158_v16, %v12158_v16  ;;  %v5554_v36 = vmul.f32 %v12161_v3, %v12161_v3  ;;  %v4332_v38 = vmul.f32 %v4292_v18, %v11984_v19  ;;  %v5023_v44 = vadd.f32 %v4939_v13, %v11989_v55  ;;  %v6595_v18 = vld [vmem:[%s14008_s13 + $0x10] sm:$0xff] }
 0x40a   : > { %v4491_v7 = vadd.f32 %v4424_v28, %v4331_v2  ;;  %v5380_v35 = vrot.slane %v5379_v57, 4  ;;  %v5727_v14 = vmul.f32 %v5591_v25, %v9258_v54  ;;  %v4775_v40 = vsel %vm1671_vm15, %v4773_v61, %v4774_v58  ;;  %v4426_v61 = vpop.permute.xlu2 %4425  ;;  %6694 = vmatpush.msrb.mxu0 %v6595_v18 }
 0x40b   : > { %v5592_v32 = vsel %vm5358_vm9, %v5553_v48, 0.0  ;;  %v5593_v4 = vsel %vm5358_vm9, %v5554_v36, 0.0  ;;  %v5248_v22 = vpop.f32.mrf.mxu1  ;;  %v4492_v30 = vadd.f32 %v4426_v61, %v4332_v38  ;;  %v5124_v63 = vsel %vm1979_vm3, %v5083_v24, 0.0  ;;  %v4428_v38 = vpop.permute.xlu0 %4427 }
 0x40c   : > { %v8906_v1 = vpop.eup %8905  ;;  %v5594_v26 = vadd.f32 %v5593_v4, %v5592_v32  ;;  %v12183_v53 = vmax.f32 %v4491_v7, 0.0  ;;  %v5381_v5 = vadd.f32 %v5380_v35, %v5379_v57  ;;  %v12189_v6 = vadd.f32 1e-05, %v5727_v14 }
 0x40d   : > { %v4294_v47 = vmul.f32 %v8906_v1, %v12145_v23  ;;  %v12194_v45 = vpop.f32.mrf.mxu3  ;;  %vm4300_vm4 = vweird.f32 %v8906_v1  ;;  %v12211_v27 = vadd.f32 %v5248_v22, %v5023_v44  ;;  %v4816_v58 = vsel %vm1671_vm15, 0.0, %v4776_v49 }
 0x40e   : > { %8578 = vmatmul.msk.f32.gmra.mxu1 %vm2287_vm13, %v5084_v12  ;;  %v5595_v33 = vrot.slane %v5594_v26, 4  ;;  %v5382_v0 = vrot.slane %v5381_v5, 2  ;;  %8520 = vmatmul.msk.f32.gmra.mxu3 %vm2287_vm13, %v12183_v53  ;;  %8907 = vrsqrt.f32 %v12189_v6  ;;  %v5085_v28 = vrot.slane %v12045_v20, 1  ;;  %vm4301_vm6 = vmor %vm4299_vm5, %vm4300_vm4 }
 0x40f   : > { %v4295_v31 = vmul.f32 %v8906_v1, %v4294_v47  ;;  %7474 = vrot.lane.b32.xlu2 %v12194_v45, %s9037_s24  ;;  %v12219_v36 = vmax.f32 %v4492_v30, 0.0  ;;  %v5086_v12 = vrot.slane %v12084_v43, 1  ;;  %v4777_v32 = vrot.slane %v12084_v43, 7 }
 0x410   : > { %v5596_v19 = vadd.f32 %v5595_v33, %v5594_v26  ;;  %v4942_v52 = vpop.f32.mrf.mxu0  ;;  %v5383_v51 = vadd.f32 %v5382_v0, %v5381_v5  ;;  %v5386_v35 = vsel %vm5358_vm9, %v12211_v27, 0.0  ;;  %vm5765_vm8 = vweird.f32 %v12189_v6 }
 0x411   : > { %8547 = vmatmul.msk.f32.gmra.mxu0 %vm2287_vm13, %v4775_v40  ;;  %v4296_v50 = vmul.f32 0.5, %v4295_v31  ;;  %v5024_v55 = vadd.f32 %v4942_v52, %v12029_v39  ;;  %v4778_v30 = vsel %vm1671_vm15, %v4776_v49, %v4777_v32  ;;  %v5089_v43 = vrot.slane %v12150_v11, 1 }
 0x412   : > { %v5597_v59 = vrot.slane %v5596_v19, 2  ;;  %v5384_v39 = vrot.slane %v5383_v51, 1 }
 0x413   : > { %v4297_v2 = vsub.f32 1.5, %v4296_v50  ;;  %v5251_v21 = vpop.f32.mrf.mxu1 }
 0x414   : > { %v5598_v60 = vadd.f32 %v5597_v59, %v5596_v19  ;;  %v12213_v13 = vadd.f32 %v5251_v21, %v5024_v55  ;;  %v5385_v24 = vadd.f32 %v5384_v39, %v5383_v51  ;;  %v8908_v57 = vpop.eup %8907 }
 0x415   : > { %v4298_v48 = vmul.f32 %v8906_v1, %v4297_v2  ;;  %v5760_v4 = vmul.f32 %v8908_v57, %v12189_v6  ;;  %v12233_v22 = vpop.f32.mrf.mxu3  ;;  %vm5766_vm7 = vweird.f32 %v8908_v57 }
 0x416   : > { %8579 = vmatmul.msk.f32.gmra.mxu1 %vm2287_vm13, %v5124_v63  ;;  %v5599_v25 = vrot.slane %v5598_v60, 1  ;;  %v5387_v7 = vsel %vm5358_vm9, %v12213_v13, 0.0  ;;  %v5505_v23 = vmul.f32 %v5385_v24, %v9258_v54  ;;  %8521 = vmatmul.msk.f32.gmra.mxu3 %vm2287_vm13, %v12219_v36  ;;  %v4430_v63 = vpop.permute.xlu1 %4429  ;;  %vm5767_vm10 = vmor %vm5765_vm8, %vm5766_vm7 }
 0x417   : > { %v4302_v20 = vsel %vm4301_vm6, %v8906_v1, %v4298_v48  ;;  %v5388_v40 = vadd.f32 %v5387_v7, %v5386_v35  ;;  %7476 = vrot.lane.b32.xlu0 %v12233_v22, %s9037_s24  ;;  %v5761_v47 = vmul.f32 %v8908_v57, %v5760_v4  ;;  %v4779_v48 = vrot.slane %v12126_v46, 7 }
 0x418   : > { %v4333_v14 = vmul.f32 %v4302_v20, %v12056_v62  ;;  %v5600_v26 = vadd.f32 %v5599_v25, %v5598_v60  ;;  %v4945_v1 = vpop.f32.mrf.mxu0  ;;  %v12239_v5 = vsub.f32 %v12141_v15, %v5505_v23  ;;  %v12242_v33 = vsub.f32 %v12147_v34, %v5505_v23  ;;  %v5984_v60 = vld [vmem:[%s14007_s12 + $0x8] sm:$0xff] }
 0x419   : > { %8548 = vmatmul.msk.f32.gmra.mxu0 %vm2287_vm13, %v4816_v58  ;;  %v5389_v0 = vrot.slane %v5388_v40, 4  ;;  %v5087_v62 = vsel %vm1979_vm3, %v5085_v28, %v5086_v12  ;;  %v5762_v61 = vmul.f32 0.5, %v5761_v47  ;;  %v4334_v55 = vmul.f32 %v4302_v20, %v12059_v29  ;;  %6101 = vmatpush.msra.mxu2 %v5984_v60  ;;  %v5983_v20 = vld [vmem:[%s14007_s12] sm:$0xff] }
 0x41a   : > { %v5728_v31 = vmul.f32 %v5600_v26, %v9258_v54  ;;  %v4493_v44 = vadd.f32 %v4428_v38, %v4333_v14  ;;  %v5555_v19 = vmul.f32 %v12239_v5, %v12239_v5  ;;  %v5556_v52 = vmul.f32 %v12242_v33, %v12242_v33 }
 0x41b   : > { %v5254_v15 = vpop.f32.mrf.mxu1  ;;  %v5390_v50 = vadd.f32 %v5389_v0, %v5388_v40  ;;  %v5763_v59 = vsub.f32 1.5, %v5762_v61  ;;  %v5025_v39 = vadd.f32 %v4945_v1, %v12061_v37  ;;  %v4494_v24 = vadd.f32 %v4430_v63, %v4334_v55  ;;  %6102 = vmatpush.msra.mxu2 %v5983_v20  ;;  %v6280_v63 = vld [vmem:[%s14006_s11] sm:$0xff] }
 0x41c   : > { %v12253_v34 = vadd.f32 1e-05, %v5728_v31  ;;  %v12255_v51 = vmax.f32 %v4493_v44, 0.0  ;;  %v5601_v42 = vsel %vm5358_vm9, %v5555_v19, 0.0  ;;  %v5602_v41 = vsel %vm5358_vm9, %v5556_v52, 0.0 }
 0x41d   : > { %v5603_v49 = vadd.f32 %v5602_v41, %v5601_v42  ;;  %v5391_v18 = vrot.slane %v5390_v50, 2  ;;  %v5764_v2 = vmul.f32 %v8908_v57, %v5763_v59  ;;  %v12271_v58 = vpop.f32.mrf.mxu3  ;;  %v12281_v4 = vadd.f32 %v5254_v15, %v5025_v39 }
 0x41e   : > { %8580 = vmatmul.msk.f32.gmra.mxu1 %vm2287_vm13, %v5087_v62  ;;  %8909 = vrsqrt.f32 %v12253_v34  ;;  %8522 = vmatmul.msk.f32.gmra.mxu3 %vm2287_vm13, %v12255_v51  ;;  %v5088_v35 = vrot.slane %v12126_v46, 1  ;;  %v4817_v40 = vsel %vm1671_vm15, 0.0, %v4779_v48  ;;  %v12294_v47 = vmax.f32 %v4494_v24, 0.0 }
 0x41f   : > { %v5604_v29 = vrot.slane %v5603_v49, 4  ;;  %v5392_v21 = vadd.f32 %v5391_v18, %v5390_v50  ;;  %v5768_v6 = vsel %vm5767_vm10, %v8908_v57, %v5764_v2  ;;  %7478 = vrot.lane.b32.xlu1 %v12271_v58, %s9037_s24  ;;  %v5125_v57 = vsel %vm1979_vm3, %v5086_v12, 0.0 }
 0x420   : > { %v4948_v28 = vpop.f32.mrf.mxu0  ;;  %v5919_v25 = vmul.f32 %v5768_v6, %v12102_v17  ;;  %v4780_v31 = vrot.slane %v12150_v11, 7  ;;  %v5920_v0 = vmul.f32 %v5768_v6, %v12108_v10  ;;  %v5395_v62 = vsel %vm5358_vm9, %v12281_v4, 0.0  ;;  %v6281_v10 = vld [vmem:[%s14006_s11 + $0x8] sm:$0xff] }
 0x421   : > { %8549 = vmatmul.msk.f32.gmra.mxu0 %vm2287_vm13, %v4778_v30  ;;  %v5026_v37 = vadd.f32 %v4948_v28, %v12098_v8  ;;  %v5605_v7 = vadd.f32 %v5604_v29, %v5603_v49  ;;  %v5393_v32 = vrot.slane %v5392_v21, 1  ;;  %6382 = vmatpush.msrb.mxu3 %v6281_v10  ;;  %vm5775_vm12 = vweird.f32 %v12253_v34 }
 0x422   : > { %v12287_v8 = vmax.f32 %v5919_v25, 0.0  ;;  %v12333_v2 = vmax.f32 %v5920_v0, 0.0 }
 0x423   : > { %v5257_v23 = vpop.f32.mrf.mxu1  ;;  %v5606_v17 = vrot.slane %v5605_v7, 2  ;;  %v5394_v26 = vadd.f32 %v5393_v32, %v5392_v21  ;;  %6383 = vmatpush.msrb.mxu3 %v6280_v63  ;;  %v4781_v21 = vsel %vm1671_vm15, %v4779_v48, %v4780_v31 }
 0x424   : > { %v8910_v14 = vpop.eup %8909  ;;  %v12292_v38 = vadd.f32 %v5257_v23, %v5026_v37  ;;  %8588 = vmatmul.msk.f32.vlgmr.msra.gmra.mxu2 %vm5358_vm9, %v12287_v8  ;;  %v6200_v42 = vrot.slane %v12287_v8, 7 }
 0x425   : > { %v5770_v1 = vmul.f32 %v8910_v14, %v12253_v34  ;;  %v5607_v46 = vadd.f32 %v5606_v17, %v5605_v7  ;;  %v5506_v12 = vmul.f32 %v5394_v26, %v9258_v54  ;;  %v12318_v50 = vpop.f32.mrf.mxu3  ;;  %vm5776_vm11 = vweird.f32 %v8910_v14 }
 0x426   : > { %8581 = vmatmul.msk.f32.gmra.mxu1 %vm2287_vm13, %v5125_v57  ;;  %v5396_v61 = vsel %vm5358_vm9, %v12292_v38, 0.0  ;;  %8523 = vmatmul.msk.f32.gmra.mxu3 %vm2287_vm13, %v12294_v47  ;;  %vm5777_vm2 = vmor %vm5775_vm12, %vm5776_vm11  ;;  %v6264_v48 = vsel %vm1671_vm15, 0.0, %v6200_v42  ;;  %v4782_v26 = vrot.slane %v12183_v53, 7 }
 0x427   : > { %v5771_v44 = vmul.f32 %v8910_v14, %v5770_v1  ;;  %v5608_v19 = vrot.slane %v5607_v46, 1  ;;  %v12310_v52 = vsub.f32 %v12211_v27, %v5506_v12  ;;  %v12313_v15 = vsub.f32 %v12213_v13, %v5506_v12  ;;  %7480 = vrot.lane.b32.xlu2 %v12318_v50, %s9037_s24 }
 0x428   : > { %v5397_v30 = vadd.f32 %v5396_v61, %v5395_v62  ;;  %v4951_v55 = vpop.f32.mrf.mxu0  ;;  %v5090_v27 = vsel %vm1979_vm3, %v5088_v35, %v5089_v43  ;;  %v5126_v62 = vsel %vm1979_vm3, %v5089_v43, 0.0  ;;  %v5091_v43 = vrot.slane %v12183_v53, 1 }
 0x429   : > { %8550 = vmatmul.msk.f32.gmra.mxu0 %vm2287_vm13, %v4817_v40  ;;  %v5772_v59 = vmul.f32 0.5, %v5771_v44  ;;  %v5609_v13 = vadd.f32 %v5608_v19, %v5607_v46  ;;  %v5557_v41 = vmul.f32 %v12310_v52, %v12310_v52  ;;  %v5558_v49 = vmul.f32 %v12313_v15, %v12313_v15 }
 0x42a   : > { %v5398_v18 = vrot.slane %v5397_v30, 4  ;;  %v5027_v57 = vadd.f32 %v4951_v55, %v12132_v9  ;;  %v6201_v9 = vrot.slane %v12333_v2, 7  ;;  %v4783_v53 = vrot.slane %v12219_v36, 7 }
 0x42b   : > { %v5773_v39 = vsub.f32 1.5, %v5772_v59  ;;  %v5260_v29 = vpop.f32.mrf.mxu1  ;;  %v5729_v60 = vmul.f32 %v5609_v13, %v9258_v54  ;;  %v5610_v28 = vsel %vm5358_vm9, %v5557_v41, 0.0  ;;  %v5611_v24 = vsel %vm5358_vm9, %v5558_v49, 0.0 }
 0x42c   : > { %v5399_v6 = vadd.f32 %v5398_v18, %v5397_v30  ;;  %v5612_v25 = vadd.f32 %v5611_v24, %v5610_v28  ;;  %8589 = vmatmul.msk.f32.gmra.mxu2 %vm5358_vm9, %v12333_v2  ;;  %v12363_v0 = vadd.f32 %v5260_v29, %v5027_v57  ;;  %v6202_v11 = vsel %vm1671_vm15, %v6200_v42, %v6201_v9 }
 0x42d   : > { %v5774_v37 = vmul.f32 %v8910_v14, %v5773_v39  ;;  %v12342_v7 = vadd.f32 1e-05, %v5729_v60  ;;  %v12351_v35 = vpop.f32.mrf.mxu3  ;;  %v5092_v59 = vrot.slane %v12219_v36, 1 }
 0x42e   : > { %8582 = vmatmul.msk.f32.gmra.mxu1 %vm2287_vm13, %v5090_v27  ;;  %v5400_v32 = vrot.slane %v5399_v6, 2  ;;  %v5613_v23 = vrot.slane %v5612_v25, 4  ;;  %8620 = vmatmul.msk.f32.vlgmr.msrb.gmra.mxu3 %vm5358_vm9, %v6264_v48  ;;  %v5404_v49 = vsel %vm5358_vm9, %v12363_v0, 0.0 }
 0x42f   : > { %v5778_v20 = vsel %vm5777_vm2, %v8910_v14, %v5774_v37  ;;  %8911 = vrsqrt.f32 %v12342_v7  ;;  %7482 = vrot.lane.b32.xlu0 %v12351_v35, %s9037_s24  ;;  %vm5785_vm0 = vweird.f32 %v12342_v7 }
 0x430   : > { %v5921_v34 = vmul.f32 %v5778_v20, %v12158_v16  ;;  %v4954_v17 = vpop.f32.mrf.mxu0  ;;  %v5614_v40 = vadd.f32 %v5613_v23, %v5612_v25  ;;  %v5401_v1 = vadd.f32 %v5400_v32, %v5399_v6  ;;  %v6594_v16 = vld [vmem:[%s14008_s13 + $0x8] sm:$0xff]  ;;  %v5922_v18 = vmul.f32 %v5778_v20, %v12161_v3 }
 0x431   : > { %8551 = vmatmul.msk.f32.gmra.mxu0 %vm2287_vm13, %v4781_v21  ;;  %v5028_v14 = vadd.f32 %v4954_v17, %v12165_v56  ;;  %v4818_v56 = vsel %vm1671_vm15, 0.0, %v4782_v26  ;;  %v5093_v6 = vsel %vm1979_vm3, %v5091_v43, %v5092_v59  ;;  %v4784_v20 = vsel %vm1671_vm15, %v4782_v26, %v4783_v53 }
 0x432   : > { %v12357_v46 = vmax.f32 %v5921_v34, 0.0  ;;  %v5615_v12 = vrot.slane %v5614_v40, 2  ;;  %v5402_v31 = vrot.slane %v5401_v1, 1  ;;  %6695 = vmatpush.msrb.mxu0 %v6594_v16 }
 0x433   : > { %v5263_v44 = vpop.f32.mrf.mxu1 }
 0x434   : > { %v12368_v61 = vadd.f32 %v5263_v44, %v5028_v14  ;;  %v5616_v19 = vadd.f32 %v5615_v12, %v5614_v40  ;;  %v5403_v10 = vadd.f32 %v5402_v31, %v5401_v1  ;;  %8590 = vmatmul.msk.f32.gmra.mxu2 %vm5358_vm9, %v12357_v46  ;;  %v6203_v3 = vrot.slane %v12357_v46, 7 }
 0x435   : > { %v8912_v30 = vpop.eup %8911  ;;  %v12386_v39 = vpop.f32.mrf.mxu3 }
 0x436   : > { %8583 = vmatmul.msk.f32.gmra.mxu1 %vm2287_vm13, %v5126_v62  ;;  %v5405_v55 = vsel %vm5358_vm9, %v12368_v61, 0.0  ;;  %v5780_v27 = vmul.f32 %v8912_v30, %v12342_v7  ;;  %v5617_v13 = vrot.slane %v5616_v19, 1  ;;  %v5507_v41 = vmul.f32 %v5403_v10, %v9258_v54  ;;  %8621 = vmatmul.msk.f32.gmra.mxu3 %vm5358_vm9, %v6202_v11 }
 0x437   : > { %v5406_v63 = vadd.f32 %v5405_v55, %v5404_v49  ;;  %7484 = vrot.lane.b32.xlu1 %v12386_v39, %s9037_s24  ;;  %vm5786_vm14 = vweird.f32 %v8912_v30  ;;  %v6265_v14 = vsel %vm1671_vm15, 0.0, %v6203_v3  ;;  %v4785_v62 = vrot.slane %v12255_v51, 7 }
 0x438   : > { %v4957_v42 = vpop.f32.mrf.mxu0  ;;  %v5781_v29 = vmul.f32 %v8912_v30, %v5780_v27  ;;  %v5618_v21 = vadd.f32 %v5617_v13, %v5616_v19  ;;  %v12390_v60 = vsub.f32 %v12281_v4, %v5507_v41  ;;  %v12393_v28 = vsub.f32 %v12292_v38, %v5507_v41  ;;  %vm5787_vm1 = vmor %vm5785_vm0, %vm5786_vm14 }
 0x439   : > { %8552 = vmatmul.msk.f32.gmra.mxu0 %vm2287_vm13, %v4818_v56  ;;  %v5407_v24 = vrot.slane %v5406_v63, 4  ;;  %v12404_v38 = vmax.f32 %v5922_v18, 0.0  ;;  %v5029_v26 = vadd.f32 %v4957_v42, %v12194_v45  ;;  %v5127_v27 = vsel %vm1979_vm3, %v5092_v59, 0.0 }
 0x43a   : > { %v5782_v37 = vmul.f32 0.5, %v5781_v29  ;;  %v5730_v25 = vmul.f32 %v5618_v21, %v9258_v54  ;;  %v5559_v36 = vmul.f32 %v12390_v60, %v12390_v60  ;;  %v5560_v4 = vmul.f32 %v12393_v28, %v12393_v28 }
 0x43b   : > { %v5266_v32 = vpop.f32.mrf.mxu1  ;;  %v5408_v48 = vadd.f32 %v5407_v24, %v5406_v63  ;;  %v6204_v55 = vrot.slane %v12404_v38, 7  ;;  %v5094_v59 = vrot.slane %v12255_v51, 1  ;;  %v5095_v51 = vrot.slane %v12294_v47, 1 }
 0x43c   : > { %v5783_v23 = vsub.f32 1.5, %v5782_v37  ;;  %v12408_v57 = vadd.f32 1e-05, %v5730_v25  ;;  %v5619_v34 = vsel %vm5358_vm9, %v5559_v36, 0.0  ;;  %v5620_v17 = vsel %vm5358_vm9, %v5560_v4, 0.0  ;;  %8591 = vmatmul.msk.f32.gmra.mxu2 %vm5358_vm9, %v12404_v38 }
 0x43d   : > { %v5621_v40 = vadd.f32 %v5620_v17, %v5619_v34  ;;  %v5409_v1 = vrot.slane %v5408_v48, 2  ;;  %v12421_v31 = vpop.f32.mrf.mxu3  ;;  %v12429_v11 = vadd.f32 %v5266_v32, %v5029_v26  ;;  %v6205_v29 = vsel %vm1671_vm15, %v6203_v3, %v6204_v55 }
 0x43e   : > { %8584 = vmatmul.msk.f32.gmra.mxu1 %vm2287_vm13, %v5093_v6  ;;  %v5784_v9 = vmul.f32 %v8912_v30, %v5783_v23  ;;  %8913 = vrsqrt.f32 %v12408_v57  ;;  %8622 = vmatmul.msk.f32.gmra.mxu3 %vm5358_vm9, %v6265_v14  ;;  %v4786_v6 = vrot.slane %v12294_v47, 7  ;;  %vm5795_vm5 = vweird.f32 %v12408_v57 }
 0x43f   : > { %v5622_v12 = vrot.slane %v5621_v40, 4  ;;  %v5410_v16 = vadd.f32 %v5409_v1, %v5408_v48  ;;  %7486 = vrot.lane.b32.xlu2 %v12421_v31, %s9037_s24  ;;  %v5413_v21 = vsel %vm5358_vm9, %v12429_v11, 0.0  ;;  %v5096_v1 = vsel %vm1979_vm3, %v5094_v59, %v5095_v51 }
 0x440   : > { %v4960_v44 = vpop.f32.mrf.mxu0  ;;  %v5788_v56 = vsel %vm5787_vm1, %v8912_v30, %v5784_v9  ;;  %v7617_v30 = vld [vmem:[%s14009_s14 + $0x38] sm:$0xff] }
 0x441   : > { %8553 = vmatmul.msk.f32.gmra.mxu0 %vm2287_vm13, %v4784_v20  ;;  %v5030_v7 = vadd.f32 %v4960_v44, %v12233_v22  ;;  %v5923_v19 = vmul.f32 %v5788_v56, %v12239_v5  ;;  %v5623_v45 = vadd.f32 %v5622_v12, %v5621_v40  ;;  %v5411_v10 = vrot.slane %v5410_v16, 1  ;;  %7722 = vmatpush.msrb.mxu1 %v7617_v30 }
 0x442   : > { %v4819_v22 = vsel %vm1671_vm15, 0.0, %v4785_v62  ;;  %v5924_v48 = vmul.f32 %v5788_v56, %v12242_v33  ;;  %v4787_v33 = vsel %vm1671_vm15, %v4785_v62, %v4786_v6 }
 0x443   : > { %v5269_v43 = vpop.f32.mrf.mxu1  ;;  %v5624_v13 = vrot.slane %v5623_v45, 2  ;;  %v5412_v41 = vadd.f32 %v5411_v10, %v5410_v16  ;;  %v12439_v18 = vmax.f32 %v5923_v19, 0.0 }
 0x444   : > { %v12435_v49 = vadd.f32 %v5269_v43, %v5030_v7  ;;  %v8914_v5 = vpop.eup %8913  ;;  %v12477_v16 = vmax.f32 %v5924_v48, 0.0  ;;  %v6513_v43 = vrot.slane %v12287_v8, 1  ;;  %v5128_v8 = vsel %vm1979_vm3, %v5095_v51, 0.0 }
 0x445   : > { %v5790_v63 = vmul.f32 %v8914_v5, %v12408_v57  ;;  %v5625_v42 = vadd.f32 %v5624_v13, %v5623_v45  ;;  %v5508_v53 = vmul.f32 %v5412_v41, %v9258_v54  ;;  %8592 = vmatmul.msk.f32.gmra.mxu2 %vm5358_vm9, %v12439_v18  ;;  %v12461_v4 = vpop.f32.mrf.mxu3  ;;  %v6206_v23 = vrot.slane %v12439_v18, 7 }
 0x446   : > { %8585 = vmatmul.msk.f32.gmra.mxu1 %vm2287_vm13, %v5127_v27  ;;  %v5414_v24 = vsel %vm5358_vm9, %v12435_v49, 0.0  ;;  %8623 = vmatmul.msk.f32.gmra.mxu3 %vm5358_vm9, %v6205_v29  ;;  %vm5796_vm4 = vweird.f32 %v8914_v5  ;;  %v6514_v27 = vrot.slane %v12333_v2, 1 }
 0x447   : > { %v5791_v37 = vmul.f32 %v8914_v5, %v5790_v63  ;;  %v5626_v25 = vrot.slane %v5625_v42, 1  ;;  %v12456_v36 = vsub.f32 %v12363_v0, %v5508_v53  ;;  %v12459_v3 = vsub.f32 %v12368_v61, %v5508_v53  ;;  %7488 = vrot.lane.b32.xlu0 %v12461_v4, %s9037_s24  ;;  %vm5797_vm6 = vmor %vm5795_vm5, %vm5796_vm4 }
 0x448   : > { %v4963_v32 = vpop.f32.mrf.mxu0  ;;  %v5415_v20 = vadd.f32 %v5414_v24, %v5413_v21  ;;  %v6266_v62 = vsel %vm1671_vm15, 0.0, %v6206_v23  ;;  %v6207_v63 = vrot.slane %v12477_v16, 7 }
 0x449   : > { %8554 = vmatmul.msk.f32.gmra.mxu0 %vm2287_vm13, %v4819_v22  ;;  %v5792_v47 = vmul.f32 0.5, %v5791_v37  ;;  %v5627_v34 = vadd.f32 %v5626_v25, %v5625_v42  ;;  %v5561_v0 = vmul.f32 %v12456_v36, %v12456_v36  ;;  %v5562_v61 = vmul.f32 %v12459_v3, %v12459_v3 }
 0x44a   : > { %v5416_v17 = vrot.slane %v5415_v20, 4  ;;  %v5031_v55 = vadd.f32 %v4963_v32, %v12271_v58  ;;  %v6208_v25 = vsel %vm1671_vm15, %v6206_v23, %v6207_v63  ;;  %v6516_v63 = vrot.slane %v12357_v46, 1 }
 0x44b   : > { %v5272_v40 = vpop.f32.mrf.mxu1  ;;  %v5793_v14 = vsub.f32 1.5, %v5792_v47  ;;  %v5731_v9 = vmul.f32 %v5627_v34, %v9258_v54  ;;  %v5628_v26 = vsel %vm5358_vm9, %v5561_v0, 0.0  ;;  %v5629_v12 = vsel %vm5358_vm9, %v5562_v61, 0.0 }
 0x44c   : > { %v5630_v44 = vadd.f32 %v5629_v12, %v5628_v26  ;;  %v5417_v56 = vadd.f32 %v5416_v17, %v5415_v20 }
 0x44d   : > { %v5794_v7 = vmul.f32 %v8914_v5, %v5793_v14  ;;  %v12481_v19 = vadd.f32 1e-05, %v5731_v9  ;;  %8593 = vmatmul.msk.f32.gmra.mxu2 %vm5358_vm9, %v12477_v16  ;;  %v12493_v59 = vpop.f32.mrf.mxu3 }
 0x44e   : > { %8586 = vmatmul.msk.f32.gmra.mxu1 %vm2287_vm13, %v5096_v1  ;;  %v5631_v45 = vrot.slane %v5630_v44, 4  ;;  %v5418_v10 = vrot.slane %v5417_v56, 2  ;;  %8624 = vmatmul.msk.f32.gmra.mxu3 %vm5358_vm9, %v6266_v62 }
 0x44f   : > { %v5798_v57 = vsel %vm5797_vm6, %v8914_v5, %v5794_v7  ;;  %8915 = vrsqrt.f32 %v12481_v19  ;;  %7490 = vrot.lane.b32.xlu1 %v12493_v59, %s9037_s24  ;;  %v6593_v5 = vld [vmem:[%s14008_s13] sm:$0xff]  ;;  %v6577_v7 = vsel %vm1979_vm3, %v6514_v27, 0.0  ;;  %vm5805_vm7 = vweird.f32 %v12481_v19 }
 0x450   : > { %v4966_v13 = vpop.f32.mrf.mxu0  ;;  %v5925_v30 = vmul.f32 %v5798_v57, %v12310_v52  ;;  %v5632_v41 = vadd.f32 %v5631_v45, %v5630_v44  ;;  %v5419_v22 = vadd.f32 %v5418_v10, %v5417_v56  ;;  %v12503_v52 = vadd.f32 %v5272_v40, %v5031_v55  ;;  %6696 = vmatpush.msrb.mxu0 %v6593_v5 }
 0x451   : > { %8555 = vmatmul.msk.f32.gmra.mxu0 %vm2287_vm13, %v4787_v33  ;;  %v5032_v58 = vadd.f32 %v4966_v13, %v12318_v50  ;;  %v6515_v50 = vsel %vm1979_vm3, %v6513_v43, %v6514_v27  ;;  %v5926_v34 = vmul.f32 %v5798_v57, %v12313_v15 }
 0x452   : > { %v5633_v2 = vrot.slane %v5632_v41, 2  ;;  %v5420_v42 = vrot.slane %v5419_v22, 1  ;;  %v12505_v29 = vmax.f32 %v5925_v30, 0.0  ;;  %v5422_v47 = vsel %vm5358_vm9, %v12503_v52, 0.0 }
 0x453   : > { %v5275_v53 = vpop.f32.mrf.mxu1 }
 0x454   : > { %v12507_v21 = vadd.f32 %v5275_v53, %v5032_v58  ;;  %v5634_v24 = vadd.f32 %v5633_v2, %v5632_v41  ;;  %v5421_v51 = vadd.f32 %v5420_v42, %v5419_v22  ;;  %v6209_v9 = vrot.slane %v12505_v29, 7 }
 0x455   : > { %v8916_v6 = vpop.eup %8915  ;;  %8594 = vmatmul.msk.f32.gmra.mxu2 %vm5358_vm9, %v12505_v29  ;;  %v12529_v33 = vpop.f32.mrf.mxu3 }
 0x456   : > { %8587 = vmatmul.msk.f32.gmra.mxu1 %vm2287_vm13, %v5128_v8  ;;  %v5423_v37 = vsel %vm5358_vm9, %v12507_v21, 0.0  ;;  %v5800_v32 = vmul.f32 %v8916_v6, %v12481_v19  ;;  %v5635_v48 = vrot.slane %v5634_v24, 1  ;;  %v5509_v20 = vmul.f32 %v5421_v51, %v9258_v54  ;;  %8625 = vmatmul.msk.f32.gmra.mxu3 %vm5358_vm9, %v6208_v25 }
 0x457   : > { %v5424_v0 = vadd.f32 %v5423_v37, %v5422_v47  ;;  %7492 = vrot.lane.b32.xlu2 %v12529_v33, %s9037_s24  ;;  %vm5806_vm13 = vweird.f32 %v8916_v6  ;;  %v6267_v13 = vsel %vm1671_vm15, 0.0, %v6209_v9  ;;  %v6517_v8 = vrot.slane %v12404_v38, 1  ;;  %v7616_v38 = vld [vmem:[%s14009_s14 + $0x30] sm:$0xff] }
 0x458   : > { %v4969_v61 = vpop.f32.mrf.mxu0  ;;  %v5801_v17 = vmul.f32 %v8916_v6, %v5800_v32  ;;  %v5636_v40 = vadd.f32 %v5635_v48, %v5634_v24  ;;  %v12524_v23 = vsub.f32 %v12429_v11, %v5509_v20  ;;  %v12527_v1 = vsub.f32 %v12435_v49, %v5509_v20  ;;  %vm5807_vm8 = vmor %vm5805_vm7, %vm5806_vm13  ;;  %7723 = vmatpush.msrb.mxu1 %v7616_v38 }
 0x459   : > { %8652 = vmatmul.msk.f32.vlgmr.msrb.gmra.mxu0 %vm5358_vm9, %v6515_v50  ;;  %v5425_v14 = vrot.slane %v5424_v0, 4  ;;  %v12539_v49 = vmax.f32 %v5926_v34, 0.0  ;;  %v5033_v27 = vadd.f32 %v4969_v61, %v12351_v35 }
 0x45a   : > { %v5802_v26 = vmul.f32 0.5, %v5801_v17  ;;  %v5732_v15 = vmul.f32 %v5636_v40, %v9258_v54  ;;  %v5563_v12 = vmul.f32 %v12524_v23, %v12524_v23  ;;  %v5564_v11 = vmul.f32 %v12527_v1, %v12527_v1 }
 0x45b   : > { %v5278_v44 = vpop.f32.mrf.mxu1  ;;  %v5426_v56 = vadd.f32 %v5425_v14, %v5424_v0  ;;  %v6210_v50 = vrot.slane %v12539_v49, 7 }
 0x45c   : > { %v5803_v62 = vsub.f32 1.5, %v5802_v26  ;;  %v12542_v45 = vadd.f32 1e-05, %v5732_v15  ;;  %v5637_v10 = vsel %vm5358_vm9, %v5563_v12, 0.0  ;;  %v5638_v55 = vsel %vm5358_vm9, %v5564_v11, 0.0 }
 0x45d   : > { %v5639_v43 = vadd.f32 %v5638_v55, %v5637_v10  ;;  %v5427_v57 = vrot.slane %v5426_v56, 2  ;;  %8595 = vmatmul.msk.f32.gmra.mxu2 %vm5358_vm9, %v12539_v49  ;;  %v12564_v24 = vadd.f32 %v5278_v44, %v5033_v27  ;;  %v6211_v47 = vsel %vm1671_vm15, %v6209_v9, %v6210_v50 }
 0x45e   : > { %v5804_v30 = vmul.f32 %v8916_v6, %v5803_v62  ;;  %8917 = vrsqrt.f32 %v12542_v45  ;;  %8626 = vmatmul.msk.f32.gmra.mxu3 %vm5358_vm9, %v6267_v13  ;;  %v12557_v19 = vpop.f32.mrf.mxu3  ;;  %vm5815_vm11 = vweird.f32 %v12542_v45 }
 0x45f   : > { %v5640_v41 = vrot.slane %v5639_v43, 4  ;;  %v5428_v22 = vadd.f32 %v5427_v57, %v5426_v56  ;;  %7494 = vrot.lane.b32.xlu0 %v12557_v19, %s9037_s24  ;;  %v5431_v34 = vsel %vm5358_vm9, %v12564_v24, 0.0 }
 0x460   : > { %v4972_v58 = vpop.f32.mrf.mxu0  ;;  %v5808_v2 = vsel %vm5807_vm8, %v8916_v6, %v5804_v30 }
 0x461   : > { %8653 = vmatmul.msk.f32.gmra.mxu0 %vm5358_vm9, %v6577_v7  ;;  %v5034_v5 = vadd.f32 %v4972_v58, %v12386_v39  ;;  %v5927_v35 = vmul.f32 %v5808_v2, %v12390_v60  ;;  %v5641_v42 = vadd.f32 %v5640_v41, %v5639_v43  ;;  %v5429_v53 = vrot.slane %v5428_v22, 1 }
 0x462   : > { %v6518_v39 = vsel %vm1979_vm3, %v6516_v63, %v6517_v8  ;;  %v5928_v26 = vmul.f32 %v5808_v2, %v12393_v28  ;;  %v6578_v28 = vsel %vm1979_vm3, %v6517_v8, 0.0 }
 0x463   : > { %v5281_v51 = vpop.f32.mrf.mxu1  ;;  %v5642_v46 = vrot.slane %v5641_v42, 2  ;;  %v5430_v6 = vadd.f32 %v5429_v53, %v5428_v22  ;;  %v12572_v25 = vmax.f32 %v5927_v35, 0.0 }
 0x464   : > { %v12569_v37 = vadd.f32 %v5281_v51, %v5034_v5  ;;  %v8918_v60 = vpop.eup %8917  ;;  %v12605_v13 = vmax.f32 %v5928_v26, 0.0 }
 0x465   : > { %v5810_v32 = vmul.f32 %v8918_v60, %v12542_v45  ;;  %v5643_v48 = vadd.f32 %v5642_v46, %v5641_v42  ;;  %v5510_v20 = vmul.f32 %v5430_v6, %v9258_v54  ;;  %8596 = vmatmul.msk.f32.gmra.mxu2 %vm5358_vm9, %v12572_v25  ;;  %v6212_v11 = vrot.slane %v12572_v25, 7 }
 0x466   : > { %v5432_v0 = vsel %vm5358_vm9, %v12569_v37, 0.0  ;;  %8627 = vmatmul.msk.f32.gmra.mxu3 %vm5358_vm9, %v6211_v47  ;;  %v12592_v12 = vpop.f32.mrf.mxu3  ;;  %vm5816_vm10 = vweird.f32 %v8918_v60  ;;  %v6519_v45 = vrot.slane %v12439_v18, 1  ;;  %v6520_v42 = vrot.slane %v12477_v16, 1 }
 0x467   : > { %v5811_v61 = vmul.f32 %v8918_v60, %v5810_v32  ;;  %v5644_v17 = vrot.slane %v5643_v48, 1  ;;  %v12586_v40 = vsub.f32 %v12503_v52, %v5510_v20  ;;  %v12589_v14 = vsub.f32 %v12507_v21, %v5510_v20  ;;  %7496 = vrot.lane.b32.xlu1 %v12592_v12, %s9037_s24  ;;  %vm5817_vm12 = vmor %vm5815_vm11, %vm5816_vm10 }
 0x468   : > { %v4975_v9 = vpop.f32.mrf.mxu0  ;;  %v5433_v15 = vadd.f32 %v5432_v0, %v5431_v34  ;;  %v6268_v58 = vsel %vm1671_vm15, 0.0, %v6212_v11  ;;  %v6213_v38 = vrot.slane %v12605_v13, 7 }
 0x469   : > { %8654 = vmatmul.msk.f32.gmra.mxu0 %vm5358_vm9, %v6518_v39  ;;  %v5812_v44 = vmul.f32 0.5, %v5811_v61  ;;  %v5645_v56 = vadd.f32 %v5644_v17, %v5643_v48  ;;  %v5565_v7 = vmul.f32 %v12586_v40, %v12586_v40  ;;  %v5566_v52 = vmul.f32 %v12589_v14, %v12589_v14 }
 0x46a   : > { %v5434_v21 = vrot.slane %v5433_v15, 4  ;;  %v5035_v2 = vadd.f32 %v4975_v9, %v12421_v31  ;;  %v6214_v34 = vsel %vm1671_vm15, %v6212_v11, %v6213_v38 }
 0x46b   : > { %v5284_v62 = vpop.f32.mrf.mxu1  ;;  %v5813_v10 = vsub.f32 1.5, %v5812_v44  ;;  %v5733_v55 = vmul.f32 %v5645_v56, %v9258_v54  ;;  %v5646_v43 = vsel %vm5358_vm9, %v5565_v7, 0.0  ;;  %v5647_v57 = vsel %vm5358_vm9, %v5566_v52, 0.0 }
 0x46c   : > { %v5648_v30 = vadd.f32 %v5647_v57, %v5646_v43  ;;  %v5435_v27 = vadd.f32 %v5434_v21, %v5433_v15 }
 0x46d   : > { %v5814_v41 = vmul.f32 %v8918_v60, %v5813_v10  ;;  %v12609_v22 = vadd.f32 1e-05, %v5733_v55  ;;  %8597 = vmatmul.msk.f32.gmra.mxu2 %vm5358_vm9, %v12605_v13 }
 0x46e   : > { %v5649_v63 = vrot.slane %v5648_v30, 4  ;;  %v5436_v8 = vrot.slane %v5435_v27, 2  ;;  %8628 = vmatmul.msk.f32.gmra.mxu3 %vm5358_vm9, %v6268_v58 }
 0x46f   : > { %v5818_v5 = vsel %vm5817_vm12, %v8918_v60, %v5814_v41  ;;  %8919 = vrsqrt.f32 %v12609_v22  ;;  %v12627_v60 = vadd.f32 %v5284_v62, %v5035_v2  ;;  %vm5825_vm14 = vweird.f32 %v12609_v22 }
 0x470   : > { %v4978_v35 = vpop.f32.mrf.mxu0  ;;  %v5929_v53 = vmul.f32 %v5818_v5, %v12456_v36  ;;  %v5650_v50 = vadd.f32 %v5649_v63, %v5648_v30  ;;  %v5437_v51 = vadd.f32 %v5436_v8, %v5435_v27  ;;  %v6521_v36 = vsel %vm1979_vm3, %v6519_v45, %v6520_v42 }
 0x471   : > { %8655 = vmatmul.msk.f32.gmra.mxu0 %vm5358_vm9, %v6578_v28  ;;  %v12621_v46 = vpop.f32.mrf.mxu3  ;;  %v5036_v31 = vadd.f32 %v4978_v35, %v12461_v4  ;;  %v5440_v9 = vsel %vm5358_vm9, %v12627_v60, 0.0  ;;  %v5930_v26 = vmul.f32 %v5818_v5, %v12459_v3  ;;  %v6579_v30 = vsel %vm1979_vm3, %v6520_v42, 0.0 }
 0x472   : > { %7498 = vrot.lane.b32.xlu2 %v12621_v46, %s9037_s24  ;;  %v5651_v6 = vrot.slane %v5650_v50, 2  ;;  %v5438_v39 = vrot.slane %v5437_v51, 1  ;;  %v12629_v32 = vmax.f32 %v5929_v53, 0.0 }
 0x473   : > { %v5287_v18 = vpop.f32.mrf.mxu1 }
 0x474   : > { %v12631_v16 = vadd.f32 %v5287_v18, %v5036_v31  ;;  %v5652_v48 = vadd.f32 %v5651_v6, %v5650_v50  ;;  %v5439_v20 = vadd.f32 %v5438_v39, %v5437_v51  ;;  %v6215_v28 = vrot.slane %v12629_v32, 7 }
 0x475   : > { %v8920_v47 = vpop.eup %8919  ;;  %8598 = vmatmul.msk.f32.gmra.mxu2 %vm5358_vm9, %v12629_v32  ;;  %v6522_v51 = vrot.slane %v12505_v29, 1  ;;  %v6523_v31 = vrot.slane %v12539_v49, 1  ;;  %v7615_v49 = vld [vmem:[%s14009_s14 + $0x28] sm:$0xff] }
 0x476   : > { %v5441_v4 = vsel %vm5358_vm9, %v12631_v16, 0.0  ;;  %v5820_v0 = vmul.f32 %v8920_v47, %v12609_v22  ;;  %v5653_v61 = vrot.slane %v5652_v48, 1  ;;  %v5511_v17 = vmul.f32 %v5439_v20, %v9258_v54  ;;  %8629 = vmatmul.msk.f32.gmra.mxu3 %vm5358_vm9, %v6214_v34  ;;  %7724 = vmatpush.msrb.mxu1 %v7615_v49 }
 0x477   : > { %v5442_v15 = vadd.f32 %v5441_v4, %v5440_v9  ;;  %vm5826_vm2 = vweird.f32 %v8920_v47  ;;  %v6269_v5 = vsel %vm1671_vm15, 0.0, %v6215_v28 }
 0x478   : > { %v4981_v44 = vpop.f32.mrf.mxu0  ;;  %v5821_v56 = vmul.f32 %v8920_v47, %v5820_v0  ;;  %v5654_v7 = vadd.f32 %v5653_v61, %v5652_v48  ;;  %v12647_v11 = vsub.f32 %v12564_v24, %v5511_v17  ;;  %v12650_v52 = vsub.f32 %v12569_v37, %v5511_v17  ;;  %vm5827_vm0 = vmor %vm5825_vm14, %vm5826_vm2 }
 0x479   : > { %8656 = vmatmul.msk.f32.gmra.mxu0 %vm5358_vm9, %v6521_v36  ;;  %v12652_v21 = vpop.f32.mrf.mxu3  ;;  %v5443_v62 = vrot.slane %v5442_v15, 4  ;;  %v12662_v37 = vmax.f32 %v5930_v26, 0.0  ;;  %v5037_v45 = vadd.f32 %v4981_v44, %v12493_v59 }
 0x47a   : > { %7500 = vrot.lane.b32.xlu0 %v12652_v21, %s9037_s24  ;;  %v5822_v10 = vmul.f32 0.5, %v5821_v56  ;;  %v5734_v3 = vmul.f32 %v5654_v7, %v9258_v54  ;;  %v5567_v55 = vmul.f32 %v12647_v11, %v12647_v11  ;;  %v5568_v24 = vmul.f32 %v12650_v52, %v12650_v52 }
 0x47b   : > { %v5290_v43 = vpop.f32.mrf.mxu1  ;;  %v5444_v57 = vadd.f32 %v5443_v62, %v5442_v15  ;;  %v6216_v36 = vrot.slane %v12662_v37, 7 }
 0x47c   : > { %v5823_v27 = vsub.f32 1.5, %v5822_v10  ;;  %v12665_v41 = vadd.f32 1e-05, %v5734_v3  ;;  %v5655_v58 = vsel %vm5358_vm9, %v5567_v55, 0.0  ;;  %v5656_v63 = vsel %vm5358_vm9, %v5568_v24, 0.0 }
 0x47d   : > { %v5657_v8 = vadd.f32 %v5656_v63, %v5655_v58  ;;  %v5445_v2 = vrot.slane %v5444_v57, 2  ;;  %8599 = vmatmul.msk.f32.gmra.mxu2 %vm5358_vm9, %v12662_v37  ;;  %v12685_v48 = vadd.f32 %v5290_v43, %v5037_v45  ;;  %v6217_v9 = vsel %vm1671_vm15, %v6215_v28, %v6216_v36 }
 0x47e   : > { %v5824_v35 = vmul.f32 %v8920_v47, %v5823_v27  ;;  %8921 = vrsqrt.f32 %v12665_v41  ;;  %8630 = vmatmul.msk.f32.gmra.mxu3 %vm5358_vm9, %v6269_v5  ;;  %vm5835_vm4 = vweird.f32 %v12665_v41 }
 0x47f   : > { %v5658_v42 = vrot.slane %v5657_v8, 4  ;;  %v5446_v53 = vadd.f32 %v5445_v2, %v5444_v57  ;;  %v5449_v26 = vsel %vm5358_vm9, %v12685_v48, 0.0 }
 0x480   : > { %v4984_v50 = vpop.f32.mrf.mxu0  ;;  %v5828_v38 = vsel %vm5827_vm0, %v8920_v47, %v5824_v35 }
 0x481   : > { %8657 = vmatmul.msk.f32.gmra.mxu0 %vm5358_vm9, %v6579_v30  ;;  %v5038_v22 = vadd.f32 %v4984_v50, %v12529_v33  ;;  %v5931_v6 = vmul.f32 %v5828_v38, %v12524_v23  ;;  %v5659_v59 = vadd.f32 %v5658_v42, %v5657_v8  ;;  %v5447_v39 = vrot.slane %v5446_v53, 1  ;;  %v12682_v18 = vpop.f32.mrf.mxu3 }
 0x482   : > { %7502 = vrot.lane.b32.xlu1 %v12682_v18, %s9037_s24  ;;  %v6524_v23 = vsel %vm1979_vm3, %v6522_v51, %v6523_v31  ;;  %v5932_v10 = vmul.f32 %v5828_v38, %v12527_v1  ;;  %v6580_v1 = vsel %vm1979_vm3, %v6523_v31, 0.0 }
 0x483   : > { %v5293_v20 = vpop.f32.mrf.mxu1  ;;  %v5660_v29 = vrot.slane %v5659_v59, 2  ;;  %v5448_v33 = vadd.f32 %v5447_v39, %v5446_v53  ;;  %v12695_v34 = vmax.f32 %v5931_v6, 0.0 }
 0x484   : > { %v12692_v47 = vadd.f32 %v5293_v20, %v5038_v22  ;;  %v8922_v4 = vpop.eup %8921  ;;  %v12728_v5 = vmax.f32 %v5932_v10, 0.0 }
 0x485   : > { %v5830_v0 = vmul.f32 %v8922_v4, %v12665_v41  ;;  %v5661_v61 = vadd.f32 %v5660_v29, %v5659_v59  ;;  %v5512_v17 = vmul.f32 %v5448_v33, %v9258_v54  ;;  %8600 = vmatmul.msk.f32.gmra.mxu2 %vm5358_vm9, %v12695_v34  ;;  %v6218_v55 = vrot.slane %v12695_v34, 7 }
 0x486   : > { %v5450_v15 = vsel %vm5358_vm9, %v12692_v47, 0.0  ;;  %8631 = vmatmul.msk.f32.gmra.mxu3 %vm5358_vm9, %v6217_v9  ;;  %vm5836_vm1 = vweird.f32 %v8922_v4  ;;  %v6525_v41 = vrot.slane %v12572_v25, 1  ;;  %v6526_v59 = vrot.slane %v12605_v13, 1 }
 0x487   : > { %v5831_v44 = vmul.f32 %v8922_v4, %v5830_v0  ;;  %v5662_v56 = vrot.slane %v5661_v61, 1  ;;  %v12709_v7 = vsub.f32 %v12627_v60, %v5512_v17  ;;  %v12712_v62 = vsub.f32 %v12631_v16, %v5512_v17  ;;  %vm5837_vm5 = vmor %vm5835_vm4, %vm5836_vm1 }
 0x488   : > { %v4987_v28 = vpop.f32.mrf.mxu0  ;;  %v5451_v3 = vadd.f32 %v5450_v15, %v5449_v26  ;;  %v6270_v50 = vsel %vm1671_vm15, 0.0, %v6218_v55  ;;  %v6219_v49 = vrot.slane %v12728_v5, 7 }
 0x489   : > { %8658 = vmatmul.msk.f32.gmra.mxu0 %vm5358_vm9, %v6524_v23  ;;  %v5832_v24 = vmul.f32 0.5, %v5831_v44  ;;  %v5663_v43 = vadd.f32 %v5662_v56, %v5661_v61  ;;  %v5569_v57 = vmul.f32 %v12709_v7, %v12709_v7  ;;  %v5570_v30 = vmul.f32 %v12712_v62, %v12712_v62  ;;  %v12720_v27 = vpop.f32.mrf.mxu3 }
 0x48a   : > { %v5452_v60 = vrot.slane %v5451_v3, 4  ;;  %7504 = vrot.lane.b32.xlu2 %v12720_v27, %s9037_s24  ;;  %v5039_v38 = vadd.f32 %v4987_v28, %v12557_v19  ;;  %v6220_v26 = vsel %vm1671_vm15, %v6218_v55, %v6219_v49 }
 0x48b   : > { %v5296_v16 = vpop.f32.mrf.mxu1  ;;  %v5833_v58 = vsub.f32 1.5, %v5832_v24  ;;  %v5735_v63 = vmul.f32 %v5663_v43, %v9258_v54  ;;  %v5664_v8 = vsel %vm5358_vm9, %v5569_v57, 0.0  ;;  %v5665_v2 = vsel %vm5358_vm9, %v5570_v30, 0.0 }
 0x48c   : > { %v5666_v35 = vadd.f32 %v5665_v2, %v5664_v8  ;;  %v5453_v45 = vadd.f32 %v5452_v60, %v5451_v3 }
 0x48d   : > { %v5834_v42 = vmul.f32 %v8922_v4, %v5833_v58  ;;  %v12732_v53 = vadd.f32 1e-05, %v5735_v63  ;;  %8601 = vmatmul.msk.f32.gmra.mxu2 %vm5358_vm9, %v12728_v5 }
 0x48e   : > { %v5667_v51 = vrot.slane %v5666_v35, 4  ;;  %v5454_v31 = vrot.slane %v5453_v45, 2  ;;  %8632 = vmatmul.msk.f32.gmra.mxu3 %vm5358_vm9, %v6270_v50 }
 0x48f   : > { %v5838_v22 = vsel %vm5837_vm5, %v8922_v4, %v5834_v42  ;;  %8923 = vrsqrt.f32 %v12732_v53  ;;  %v12748_v4 = vadd.f32 %v5296_v16, %v5039_v38  ;;  %vm5845_vm13 = vweird.f32 %v12732_v53 }
 0x490   : > { %v4990_v6 = vpop.f32.mrf.mxu0  ;;  %v5933_v39 = vmul.f32 %v5838_v22, %v12586_v40  ;;  %v5668_v36 = vadd.f32 %v5667_v51, %v5666_v35  ;;  %v5455_v20 = vadd.f32 %v5454_v31, %v5453_v45  ;;  %v6527_v40 = vsel %vm1979_vm3, %v6525_v41, %v6526_v59 }
 0x491   : > { %8659 = vmatmul.msk.f32.gmra.mxu0 %vm5358_vm9, %v6580_v1  ;;  %v12744_v29 = vpop.f32.mrf.mxu3  ;;  %v5040_v19 = vadd.f32 %v4990_v6, %v12592_v12  ;;  %v5458_v28 = vsel %vm5358_vm9, %v12748_v4, 0.0  ;;  %v5934_v10 = vmul.f32 %v5838_v22, %v12589_v14  ;;  %v6581_v35 = vsel %vm1979_vm3, %v6526_v59, 0.0 }
 0x492   : > { %v5669_v33 = vrot.slane %v5668_v36, 2  ;;  %v5456_v23 = vrot.slane %v5455_v20, 1  ;;  %7506 = vrot.lane.b32.xlu0 %v12744_v29, %s9037_s24  ;;  %v12752_v0 = vmax.f32 %v5933_v39, 0.0 }
 0x493   : > { %v5299_v25 = vpop.f32.mrf.mxu1 }
 0x494   : > { %v12754_v13 = vadd.f32 %v5299_v25, %v5040_v19  ;;  %v5670_v61 = vadd.f32 %v5669_v33, %v5668_v36  ;;  %v5457_v17 = vadd.f32 %v5456_v23, %v5455_v20  ;;  %v6221_v1 = vrot.slane %v12752_v0, 7 }
 0x495   : > { %v8924_v12 = vpop.eup %8923  ;;  %8602 = vmatmul.msk.f32.gmra.mxu2 %vm5358_vm9, %v12752_v0  ;;  %v6528_v20 = vrot.slane %v12629_v32, 1  ;;  %v6529_v19 = vrot.slane %v12662_v37, 1  ;;  %v7614_v37 = vld [vmem:[%s14009_s14 + $0x20] sm:$0xff] }
 0x496   : > { %v5459_v9 = vsel %vm5358_vm9, %v12754_v13, 0.0  ;;  %v5840_v15 = vmul.f32 %v8924_v12, %v12732_v53  ;;  %v5671_v44 = vrot.slane %v5670_v61, 1  ;;  %v5513_v56 = vmul.f32 %v5457_v17, %v9258_v54  ;;  %8633 = vmatmul.msk.f32.gmra.mxu3 %vm5358_vm9, %v6220_v26  ;;  %7725 = vmatpush.msrb.mxu1 %v7614_v37 }
 0x497   : > { %v5460_v3 = vadd.f32 %v5459_v9, %v5458_v28  ;;  %vm5846_vm6 = vweird.f32 %v8924_v12  ;;  %v6271_v22 = vsel %vm1671_vm15, 0.0, %v6221_v1 }
 0x498   : > { %v4993_v24 = vpop.f32.mrf.mxu0  ;;  %v5841_v43 = vmul.f32 %v8924_v12, %v5840_v15  ;;  %v5672_v57 = vadd.f32 %v5671_v44, %v5670_v61  ;;  %v12770_v55 = vsub.f32 %v12685_v48, %v5513_v56  ;;  %v12773_v30 = vsub.f32 %v12692_v47, %v5513_v56  ;;  %vm5847_vm7 = vmor %vm5845_vm13, %vm5846_vm6 }
 0x499   : > { %8660 = vmatmul.msk.f32.gmra.mxu0 %vm5358_vm9, %v6527_v40  ;;  %v5461_v60 = vrot.slane %v5460_v3, 4  ;;  %v12775_v16 = vpop.f32.mrf.mxu3  ;;  %v12785_v47 = vmax.f32 %v5934_v10, 0.0  ;;  %v5041_v41 = vadd.f32 %v4993_v24, %v12621_v46 }
 0x49a   : > { %v5842_v58 = vmul.f32 0.5, %v5841_v43  ;;  %v5736_v63 = vmul.f32 %v5672_v57, %v9258_v54  ;;  %v5571_v14 = vmul.f32 %v12770_v55, %v12770_v55  ;;  %v5572_v8 = vmul.f32 %v12773_v30, %v12773_v30  ;;  %7508 = vrot.lane.b32.xlu1 %v12775_v16, %s9037_s24 }
 0x49b   : > { %v5302_v48 = vpop.f32.mrf.mxu1  ;;  %v5462_v2 = vadd.f32 %v5461_v60, %v5460_v3  ;;  %v6222_v40 = vrot.slane %v12785_v47, 7 }
 0x49c   : > { %v5843_v45 = vsub.f32 1.5, %v5842_v58  ;;  %v12788_v42 = vadd.f32 1e-05, %v5736_v63  ;;  %v5673_v50 = vsel %vm5358_vm9, %v5571_v14, 0.0  ;;  %v5674_v51 = vsel %vm5358_vm9, %v5572_v8, 0.0 }
 0x49d   : > { %v5675_v31 = vadd.f32 %v5674_v51, %v5673_v50  ;;  %v5463_v38 = vrot.slane %v5462_v2, 2  ;;  %8603 = vmatmul.msk.f32.gmra.mxu2 %vm5358_vm9, %v12785_v47  ;;  %v12808_v61 = vadd.f32 %v5302_v48, %v5041_v41  ;;  %v6223_v28 = vsel %vm1671_vm15, %v6221_v1, %v6222_v40 }
 0x49e   : > { %v5844_v6 = vmul.f32 %v8924_v12, %v5843_v45  ;;  %8925 = vrsqrt.f32 %v12788_v42  ;;  %8634 = vmatmul.msk.f32.gmra.mxu3 %vm5358_vm9, %v6271_v22  ;;  %v6582_v50 = vsel %vm1979_vm3, %v6529_v19, 0.0  ;;  %vm5855_vm10 = vweird.f32 %v12788_v42 }
 0x49f   : > { %v5676_v59 = vrot.slane %v5675_v31, 4  ;;  %v5464_v39 = vadd.f32 %v5463_v38, %v5462_v2  ;;  %v5467_v10 = vsel %vm5358_vm9, %v12808_v61, 0.0 }
 0x4a0   : > { %v4996_v36 = vpop.f32.mrf.mxu0  ;;  %v5848_v49 = vsel %vm5847_vm7, %v8924_v12, %v5844_v6 }
 0x4a1   : > { %8661 = vmatmul.msk.f32.gmra.mxu0 %vm5358_vm9, %v6581_v35  ;;  %v5042_v53 = vadd.f32 %v4996_v36, %v12652_v21  ;;  %v5935_v33 = vmul.f32 %v5848_v49, %v12647_v11  ;;  %v5677_v46 = vadd.f32 %v5676_v59, %v5675_v31  ;;  %v5465_v23 = vrot.slane %v5464_v39, 1  ;;  %v12805_v25 = vpop.f32.mrf.mxu3 }
 0x4a2   : > { %7510 = vrot.lane.b32.xlu2 %v12805_v25, %s9037_s24  ;;  %v6530_v11 = vsel %vm1979_vm3, %v6528_v20, %v6529_v19  ;;  %v5936_v58 = vmul.f32 %v5848_v49, %v12650_v52 }
 0x4a3   : > { %v5305_v17 = vpop.f32.mrf.mxu1  ;;  %v5678_v32 = vrot.slane %v5677_v46, 2  ;;  %v5466_v21 = vadd.f32 %v5465_v23, %v5464_v39  ;;  %v12818_v26 = vmax.f32 %v5935_v33, 0.0  ;;  %v6532_v23 = vrot.slane %v12728_v5, 1 }
 0x4a4   : > { %v12815_v12 = vadd.f32 %v5305_v17, %v5042_v53  ;;  %v8926_v9 = vpop.eup %8925  ;;  %v12853_v6 = vmax.f32 %v5936_v58, 0.0 }
 0x4a5   : > { %v5850_v15 = vmul.f32 %v8926_v9, %v12788_v42  ;;  %v5679_v44 = vadd.f32 %v5678_v32, %v5677_v46  ;;  %v5514_v56 = vmul.f32 %v5466_v21, %v9258_v54  ;;  %8604 = vmatmul.msk.f32.gmra.mxu2 %vm5358_vm9, %v12818_v26  ;;  %v6224_v8 = vrot.slane %v12818_v26, 7 }
 0x4a6   : > { %v5468_v3 = vsel %vm5358_vm9, %v12815_v12, 0.0  ;;  %8635 = vmatmul.msk.f32.gmra.mxu3 %vm5358_vm9, %v6223_v28  ;;  %vm5856_vm8 = vweird.f32 %v8926_v9  ;;  %v6531_v42 = vrot.slane %v12695_v34, 1 }
 0x4a7   : > { %v5851_v24 = vmul.f32 %v8926_v9, %v5850_v15  ;;  %v5680_v43 = vrot.slane %v5679_v44, 1  ;;  %v12832_v57 = vsub.f32 %v12748_v4, %v5514_v56  ;;  %v12835_v60 = vsub.f32 %v12754_v13, %v5514_v56  ;;  %v12838_v14 = vpop.f32.mrf.mxu2  ;;  %vm5857_vm11 = vmor %vm5855_vm10, %vm5856_vm8 }
 0x4a8   : > { %v4999_v1 = vpop.f32.mrf.mxu0  ;;  %v5469_v63 = vadd.f32 %v5468_v3, %v5467_v10  ;;  %v6272_v20 = vsel %vm1671_vm15, 0.0, %v6224_v8 }
 0x4a9   : > { %8662 = vmatmul.msk.f32.gmra.mxu0 %vm5358_vm9, %v6530_v11  ;;  %v5852_v48 = vmul.f32 0.5, %v5851_v24  ;;  %v5681_v2 = vadd.f32 %v5680_v43, %v5679_v44  ;;  %v5573_v35 = vmul.f32 %v12832_v57, %v12832_v57  ;;  %v5574_v4 = vmul.f32 %v12835_v60, %v12835_v60  ;;  %v12845_v45 = vpop.f32.mrf.mxu3 }
 0x4aa   : > { %v5470_v13 = vrot.slane %v5469_v63, 4  ;;  %7512 = vrot.lane.b32.xlu0 %v12845_v45, %s9037_s24  ;;  %v5043_v53 = vadd.f32 %v4999_v1, %v12682_v18  ;;  %v6225_v11 = vrot.slane %v12853_v6, 7 }
 0x4ab   : > { %v5308_v52 = vpop.f32.mrf.mxu1  ;;  %v5853_v51 = vsub.f32 1.5, %v5852_v48  ;;  %v5737_v31 = vmul.f32 %v5681_v2, %v9258_v54  ;;  %v5682_v38 = vsel %vm5358_vm9, %v5573_v35, 0.0  ;;  %v5683_v22 = vsel %vm5358_vm9, %v5574_v4, 0.0 }
 0x4ac   : > { %v5684_v41 = vadd.f32 %v5683_v22, %v5682_v38  ;;  %v5471_v59 = vadd.f32 %v5470_v13, %v5469_v63  ;;  %v12875_v44 = vadd.f32 %v5308_v52, %v5043_v53  ;;  %v6226_v24 = vsel %vm1671_vm15, %v6224_v8, %v6225_v11 }
 0x4ad   : > { %v5854_v39 = vmul.f32 %v8926_v9, %v5853_v51  ;;  %v12857_v36 = vadd.f32 1e-05, %v5737_v31  ;;  %8605 = vmatmul.msk.f32.gmra.mxu2 %vm5358_vm9, %v12853_v6 }
 0x4ae   : > { %v5685_v19 = vrot.slane %v5684_v41, 4  ;;  %v5472_v49 = vrot.slane %v5471_v59, 2  ;;  %8636 = vmatmul.msk.f32.gmra.mxu3 %vm5358_vm9, %v6272_v20  ;;  %v5476_v63 = vsel %vm5358_vm9, %v12875_v44, 0.0  ;;  %v6583_v20 = vsel %vm1979_vm3, %v6532_v23, 0.0 }
 0x4af   : > { %v5858_v33 = vsel %vm5857_vm11, %v8926_v9, %v5854_v39  ;;  %8927 = vrsqrt.f32 %v12857_v36  ;;  %v12869_v37 = vpop.f32.mrf.mxu2  ;;  %vm5865_vm2 = vweird.f32 %v12857_v36 }
 0x4b0   : > { %v5002_v46 = vpop.f32.mrf.mxu0  ;;  %v5937_v40 = vmul.f32 %v5858_v33, %v12709_v7  ;;  %v5686_v17 = vadd.f32 %v5685_v19, %v5684_v41  ;;  %v5473_v32 = vadd.f32 %v5472_v49, %v5471_v59  ;;  %v6533_v7 = vsel %vm1979_vm3, %v6531_v42, %v6532_v23 }
 0x4b1   : > { %8663 = vmatmul.msk.f32.gmra.mxu0 %vm5358_vm9, %v6582_v50  ;;  %v12871_v18 = vpop.f32.mrf.mxu3  ;;  %v5044_v21 = vadd.f32 %v5002_v46, %v12720_v27  ;;  %v5938_v48 = vmul.f32 %v5858_v33, %v12712_v62 }
 0x4b2   : > { %v5687_v9 = vrot.slane %v5686_v17, 2  ;;  %v5474_v15 = vrot.slane %v5473_v32, 1  ;;  %v12879_v5 = vmax.f32 %v5937_v40, 0.0 }
 0x4b3   : > { %v5311_v56 = vpop.f32.mrf.mxu1  ;;  %v12910_v39 = vmax.f32 %v5938_v48, 0.0 }
 0x4b4   : > { %v12877_v34 = vadd.f32 %v5311_v56, %v5044_v21  ;;  %v5688_v28 = vadd.f32 %v5687_v9, %v5686_v17  ;;  %v5475_v10 = vadd.f32 %v5474_v15, %v5473_v32  ;;  %v6227_v38 = vrot.slane %v12879_v5, 7 }
 0x4b5   : > { %v8928_v3 = vpop.eup %8927  ;;  %8606 = vmatmul.msk.f32.gmra.mxu2 %vm5358_vm9, %v12879_v5 }
 0x4b6   : > { %v5477_v27 = vsel %vm5358_vm9, %v12877_v34, 0.0  ;;  %v5860_v43 = vmul.f32 %v8928_v3, %v12857_v36  ;;  %v5689_v1 = vrot.slane %v5688_v28, 1  ;;  %v5515_v58 = vmul.f32 %v5475_v10, %v9258_v54  ;;  %8637 = vmatmul.msk.f32.gmra.mxu3 %vm5358_vm9, %v6226_v24 }
 0x4b7   : > { %v5478_v2 = vadd.f32 %v5477_v27, %v5476_v63  ;;  %v12900_v50 = vpop.f32.mrf.mxu2  ;;  %vm5866_vm12 = vweird.f32 %v8928_v3  ;;  %v6273_v40 = vsel %vm1671_vm15, 0.0, %v6227_v38  ;;  %v6534_v36 = vrot.slane %v12752_v0, 1  ;;  %v7902_v0 = vld [vmem:[%s14011_s16 + $0x38] sm:$0xff] }
 0x4b8   : > { %v5005_v35 = vpop.f32.mrf.mxu0  ;;  %v5861_v4 = vmul.f32 %v8928_v3, %v5860_v43  ;;  %v5690_v13 = vadd.f32 %v5689_v1, %v5688_v28  ;;  %v12895_v8 = vsub.f32 %v12808_v61, %v5515_v58  ;;  %v12898_v52 = vsub.f32 %v12815_v12, %v5515_v58  ;;  %vm5867_vm14 = vmor %vm5865_vm2, %vm5866_vm12  ;;  %8007 = vmatpush.msrb.mxu2 %v7902_v0 }
 0x4b9   : > { %8664 = vmatmul.msk.f32.gmra.mxu0 %vm5358_vm9, %v6533_v7  ;;  %v5479_v51 = vrot.slane %v5478_v2, 4  ;;  %v12902_v31 = vpop.f32.mrf.mxu3  ;;  %v5045_v23 = vadd.f32 %v5005_v35, %v12744_v29  ;;  %v6535_v7 = vrot.slane %v12785_v47, 1  ;;  %v6228_v24 = vrot.slane %v12910_v39, 7 }
 0x4ba   : > { %v5862_v22 = vmul.f32 0.5, %v5861_v4  ;;  %v5738_v62 = vmul.f32 %v5690_v13, %v9258_v54  ;;  %v5575_v41 = vmul.f32 %v12895_v8, %v12895_v8  ;;  %v5576_v61 = vmul.f32 %v12898_v52, %v12898_v52 }
 0x4bb   : > { %v5314_v59 = vpop.f32.mrf.mxu1  ;;  %v5480_v12 = vadd.f32 %v5479_v51, %v5478_v2  ;;  %v6536_v48 = vsel %vm1979_vm3, %v6534_v36, %v6535_v7  ;;  %v6229_v13 = vsel %vm1671_vm15, %v6227_v38, %v6228_v24  ;;  %v6584_v36 = vsel %vm1979_vm3, %v6535_v7, 0.0 }
 0x4bc   : > { %v5863_v19 = vsub.f32 1.5, %v5862_v22  ;;  %v12913_v49 = vadd.f32 1e-05, %v5738_v62  ;;  %v5691_v53 = vsel %vm5358_vm9, %v5575_v41, 0.0  ;;  %v5692_v33 = vsel %vm5358_vm9, %v5576_v61, 0.0 }
 0x4bd   : > { %v5693_v46 = vadd.f32 %v5692_v33, %v5691_v53  ;;  %v5481_v42 = vrot.slane %v5480_v12, 2  ;;  %8607 = vmatmul.msk.f32.gmra.mxu2 %vm5358_vm9, %v12910_v39  ;;  %v12935_v43 = vadd.f32 %v5314_v59, %v5045_v23 }
 0x4be   : > { %v5864_v17 = vmul.f32 %v8928_v3, %v5863_v19  ;;  %8929 = vrsqrt.f32 %v12913_v49  ;;  %8638 = vmatmul.msk.f32.gmra.mxu3 %vm5358_vm9, %v6273_v40  ;;  %vm5875_vm1 = vweird.f32 %v12913_v49 }
 0x4bf   : > { %v5694_v32 = vrot.slane %v5693_v46, 4  ;;  %v5482_v21 = vadd.f32 %v5481_v42, %v5480_v12  ;;  %v12926_v15 = vpop.f32.mrf.mxu2  ;;  %v5485_v51 = vsel %vm5358_vm9, %v12935_v43, 0.0 }
 0x4c0   : > { %v5008_v11 = vpop.f32.mrf.mxu0  ;;  %v5868_v9 = vsel %vm5867_vm14, %v8928_v3, %v5864_v17 }
 0x4c1   : > { %8665 = vmatmul.msk.f32.gmra.mxu0 %vm5358_vm9, %v6583_v20  ;;  %v5046_v56 = vadd.f32 %v5008_v11, %v12775_v16  ;;  %v5939_v29 = vmul.f32 %v5868_v9, %v12770_v55  ;;  %v5695_v28 = vadd.f32 %v5694_v32, %v5693_v46  ;;  %v5483_v10 = vrot.slane %v5482_v21, 1  ;;  %v12932_v27 = vpop.f32.mrf.mxu3  ;;  %v7613_v16 = vld [vmem:[%s14009_s14 + $0x18] sm:$0xff] }
 0x4c2   : > { %7726 = vmatpush.msrb.mxu1 %v7613_v16  ;;  %v5940_v12 = vmul.f32 %v5868_v9, %v12773_v30  ;;  %v6537_v16 = vrot.slane %v12818_v26, 1 }
 0x4c3   : > { %v5317_v1 = vpop.f32.mrf.mxu1  ;;  %v5696_v3 = vrot.slane %v5695_v28, 2  ;;  %v5484_v47 = vadd.f32 %v5483_v10, %v5482_v21  ;;  %v12945_v63 = vmax.f32 %v5939_v29, 0.0 }
 0x4c4   : > { %v12943_v55 = vadd.f32 %v5317_v1, %v5046_v56  ;;  %v8930_v58 = vpop.eup %8929  ;;  %v12978_v11 = vmax.f32 %v5940_v12, 0.0 }
 0x4c5   : > { %v5870_v2 = vmul.f32 %v8930_v58, %v12913_v49  ;;  %v5697_v35 = vadd.f32 %v5696_v3, %v5695_v28  ;;  %v5516_v4 = vmul.f32 %v5484_v47, %v9258_v54  ;;  %8608 = vmatmul.msk.f32.gmra.mxu2 %vm5358_vm9, %v12945_v63  ;;  %v6230_v19 = vrot.slane %v12945_v63, 7 }
 0x4c6   : > { %v5486_v22 = vsel %vm5358_vm9, %v12943_v55, 0.0  ;;  %8639 = vmatmul.msk.f32.gmra.mxu3 %vm5358_vm9, %v6229_v13  ;;  %vm5876_vm0 = vweird.f32 %v8930_v58  ;;  %v6231_v13 = vrot.slane %v12978_v11, 7 }
 0x4c7   : > { %v5871_v62 = vmul.f32 %v8930_v58, %v5870_v2  ;;  %v5698_v41 = vrot.slane %v5697_v35, 1  ;;  %v12960_v61 = vsub.f32 %v12875_v44, %v5516_v4  ;;  %v12963_v38 = vsub.f32 %v12877_v34, %v5516_v4  ;;  %vm5877_vm4 = vmor %vm5875_vm1, %vm5876_vm0 }
 0x4c8   : > { %v5011_v59 = vpop.f32.mrf.mxu0  ;;  %v5487_v20 = vadd.f32 %v5486_v22, %v5485_v51  ;;  %v12971_v40 = vpop.f32.mrf.mxu2  ;;  %v6274_v10 = vsel %vm1671_vm15, 0.0, %v6230_v19  ;;  %v6538_v2 = vrot.slane %v12853_v6, 1 }
 0x4c9   : > { %8666 = vmatmul.msk.f32.gmra.mxu0 %vm5358_vm9, %v6536_v48  ;;  %v5872_v53 = vmul.f32 0.5, %v5871_v62  ;;  %v5699_v33 = vadd.f32 %v5698_v41, %v5697_v35  ;;  %v5577_v46 = vmul.f32 %v12960_v61, %v12960_v61  ;;  %v5578_v42 = vmul.f32 %v12963_v38, %v12963_v38  ;;  %v12973_v44 = vpop.f32.mrf.mxu3 }
 0x4ca   : > { %v5488_v34 = vrot.slane %v5487_v20, 4  ;;  %v5047_v3 = vadd.f32 %v5011_v59, %v12805_v25  ;;  %v6539_v6 = vsel %vm1979_vm3, %v6537_v16, %v6538_v2 }
 0x4cb   : > { %v5320_v17 = vpop.f32.mrf.mxu1  ;;  %v5873_v23 = vsub.f32 1.5, %v5872_v53  ;;  %v5739_v30 = vmul.f32 %v5699_v33, %v9258_v54  ;;  %v5700_v32 = vsel %vm5358_vm9, %v5577_v46, 0.0  ;;  %v5701_v21 = vsel %vm5358_vm9, %v5578_v42, 0.0 }
 0x4cc   : > { %v5702_v9 = vadd.f32 %v5701_v21, %v5700_v32  ;;  %v5489_v56 = vadd.f32 %v5488_v34, %v5487_v20  ;;  %v13001_v22 = vadd.f32 %v5320_v17, %v5047_v3  ;;  %v6481_v3 = vadd.f32 %v12871_v18, %v12838_v14 }
 0x4cd   : > { %v5874_v29 = vmul.f32 %v8930_v58, %v5873_v23  ;;  %v12982_v28 = vadd.f32 1e-05, %v5739_v30  ;;  %8609 = vmatmul.msk.f32.gmra.mxu2 %vm5358_vm9, %v12978_v11 }
 0x4ce   : > { %v5703_v24 = vrot.slane %v5702_v9, 4  ;;  %v5490_v1 = vrot.slane %v5489_v56, 2  ;;  %8640 = vmatmul.msk.f32.gmra.mxu3 %vm5358_vm9, %v6274_v10  ;;  %v5494_v42 = vsel %vm5358_vm9, %v13001_v22, 0.0  ;;  %v6585_v10 = vsel %vm1979_vm3, %v6538_v2, 0.0 }
 0x4cf   : > { %v5878_v7 = vsel %vm5877_vm4, %v8930_v58, %v5874_v29  ;;  %8931 = vrsqrt.f32 %v12982_v28  ;;  %vm5885_vm6 = vweird.f32 %v12982_v28 }
 0x4d0   : > { %v5014_v49 = vpop.f32.mrf.mxu0  ;;  %v5941_v0 = vmul.f32 %v5878_v7, %v12832_v57  ;;  %v5704_v47 = vadd.f32 %v5703_v24, %v5702_v9  ;;  %v5491_v48 = vadd.f32 %v5490_v1, %v5489_v56  ;;  %v12995_v35 = vpop.f32.mrf.mxu2  ;;  %v5942_v34 = vmul.f32 %v5878_v7, %v12835_v60 }
 0x4d1   : > { %8667 = vmatmul.msk.f32.gmra.mxu0 %vm5358_vm9, %v6584_v36  ;;  %v12997_v25 = vpop.f32.mrf.mxu3  ;;  %v5048_v4 = vadd.f32 %v5014_v49, %v12845_v45  ;;  %v6232_v45 = vsel %vm1671_vm15, %v6230_v19, %v6231_v13 }
 0x4d2   : > { %v5705_v58 = vrot.slane %v5704_v47, 2  ;;  %v5492_v51 = vrot.slane %v5491_v48, 1  ;;  %v13005_v57 = vmax.f32 %v5941_v0, 0.0 }
 0x4d3   : > { %v5323_v62 = vpop.f32.mrf.mxu1 }
 0x4d4   : > { %v13003_v26 = vadd.f32 %v5323_v62, %v5048_v4  ;;  %v5706_v41 = vadd.f32 %v5705_v58, %v5704_v47  ;;  %v5493_v59 = vadd.f32 %v5492_v51, %v5491_v48  ;;  %v6233_v29 = vrot.slane %v13005_v57, 7 }
 0x4d5   : > { %v8932_v12 = vpop.eup %8931  ;;  %8610 = vmatmul.msk.f32.gmra.mxu2 %vm5358_vm9, %v13005_v57  ;;  %v6482_v48 = vadd.f32 %v12902_v31, %v12869_v37 }
 0x4d6   : > { %v5495_v20 = vsel %vm5358_vm9, %v13003_v26, 0.0  ;;  %v5880_v53 = vmul.f32 %v8932_v12, %v12982_v28  ;;  %v5707_v33 = vrot.slane %v5706_v41, 1  ;;  %v5517_v46 = vmul.f32 %v5493_v59, %v9258_v54  ;;  %8641 = vmatmul.msk.f32.gmra.mxu3 %vm5358_vm9, %v6232_v45 }
 0x4d7   : > { %v5496_v17 = vadd.f32 %v5495_v20, %v5494_v42  ;;  %vm5886_vm5 = vweird.f32 %v8932_v12  ;;  %v6275_v13 = vsel %vm1671_vm15, 0.0, %v6233_v29  ;;  %v6541_v28 = vrot.slane %v12910_v39, 1 }
 0x4d8   : > { %v6698_v23 = vpop.f32.mrf.mxu0  ;;  %v5881_v19 = vmul.f32 %v8932_v12, %v5880_v53  ;;  %v5708_v30 = vadd.f32 %v5707_v33, %v5706_v41  ;;  %v13021_v32 = vsub.f32 %v12935_v43, %v5517_v46  ;;  %v13024_v21 = vsub.f32 %v12943_v55, %v5517_v46  ;;  %v13026_v56 = vpop.f32.mrf.mxu2  ;;  %vm5887_vm13 = vmor %vm5885_vm6, %vm5886_vm5 }
 0x4d9   : > { %8668 = vmatmul.msk.f32.gmra.mxu0 %vm5358_vm9, %v6539_v6  ;;  %v5497_v9 = vrot.slane %v5496_v17, 4  ;;  %v13028_v36 = vpop.f32.mrf.mxu3  ;;  %v13037_v55 = vmax.f32 %v5942_v34, 0.0  ;;  %v13051_v14 = vadd.f32 %v6698_v23, %v6481_v3  ;;  %v6540_v41 = vrot.slane %v12879_v5, 1  ;;  %v7612_v5 = vld [vmem:[%s14009_s14 + $0x10] sm:$0xff] }
 0x4da   : > { %v5882_v60 = vmul.f32 0.5, %v5881_v19  ;;  %v5740_v24 = vmul.f32 %v5708_v30, %v9258_v54  ;;  %v5579_v1 = vmul.f32 %v13021_v32, %v13021_v32  ;;  %v5580_v43 = vmul.f32 %v13024_v21, %v13024_v21  ;;  %7727 = vmatpush.msrb.mxu1 %v7612_v5 }
 0x4db   : > { %v5498_v7 = vadd.f32 %v5497_v9, %v5496_v17  ;;  %v6234_v33 = vrot.slane %v13037_v55, 7  ;;  %v6826_v46 = vsel %vm5358_vm9, %v13051_v14, 0.0  ;;  %v6542_v19 = vsel %vm1979_vm3, %v6540_v41, %v6541_v28 }
 0x4dc   : > { %v5883_v49 = vsub.f32 1.5, %v5882_v60  ;;  %v13041_v16 = vadd.f32 1e-05, %v5740_v24  ;;  %v5709_v0 = vsel %vm5358_vm9, %v5579_v1, 0.0  ;;  %v5710_v47 = vsel %vm5358_vm9, %v5580_v43, 0.0 }
 0x4dd   : > { %v5711_v2 = vadd.f32 %v5710_v47, %v5709_v0  ;;  %v5499_v4 = vrot.slane %v5498_v7, 2  ;;  %8611 = vmatmul.msk.f32.gmra.mxu2 %vm5358_vm9, %v13037_v55  ;;  %v6235_v60 = vsel %vm1671_vm15, %v6233_v29, %v6234_v33 }
 0x4de   : > { %v5884_v58 = vmul.f32 %v8932_v12, %v5883_v49  ;;  %8933 = vrsqrt.f32 %v13041_v16  ;;  %8642 = vmatmul.msk.f32.gmra.mxu3 %vm5358_vm9, %v6275_v13  ;;  %vm5895_vm8 = vweird.f32 %v13041_v16 }
 0x4df   : > { %v5712_v37 = vrot.slane %v5711_v2, 4  ;;  %v5500_v18 = vadd.f32 %v5499_v4, %v5498_v7 }
 0x4e0   : > { %v6701_v31 = vpop.f32.mrf.mxu0  ;;  %v5888_v51 = vsel %vm5887_vm13, %v8932_v12, %v5884_v58  ;;  %v13062_v45 = vpop.f32.mrf.mxu2 }
 0x4e1   : > { %8669 = vmatmul.msk.f32.gmra.mxu0 %vm5358_vm9, %v6585_v10  ;;  %v13057_v62 = vadd.f32 %v6701_v31, %v6482_v48  ;;  %v5943_v59 = vmul.f32 %v5888_v51, %v12895_v8  ;;  %v5713_v6 = vadd.f32 %v5712_v37, %v5711_v2  ;;  %v5501_v20 = vrot.slane %v5500_v18, 1  ;;  %v13064_v53 = vpop.f32.mrf.mxu3  ;;  %v7901_v8 = vld [vmem:[%s14011_s16 + $0x30] sm:$0xff] }
 0x4e2   : > { %8008 = vmatpush.msrb.mxu2 %v7901_v8  ;;  %v5944_v0 = vmul.f32 %v5888_v51, %v12898_v52  ;;  %v6586_v37 = vsel %vm1979_vm3, %v6541_v28, 0.0 }
 0x4e3   : > { %v6827_v12 = vsel %vm5358_vm9, %v13057_v62, 0.0  ;;  %v5714_v42 = vrot.slane %v5713_v6, 2  ;;  %v5502_v39 = vadd.f32 %v5501_v20, %v5500_v18  ;;  %v13077_v23 = vmax.f32 %v5943_v59, 0.0 }
 0x4e4   : > { %v6828_v34 = vadd.f32 %v6827_v12, %v6826_v46  ;;  %v8934_v17 = vpop.eup %8933  ;;  %v13107_v41 = vmax.f32 %v5944_v0, 0.0  ;;  %v6483_v59 = vadd.f32 %v12932_v27, %v12900_v50  ;;  %v6484_v12 = vadd.f32 %v12973_v44, %v12926_v15 }
 0x4e5   : > { %v5890_v30 = vmul.f32 %v8934_v17, %v13041_v16  ;;  %v5715_v9 = vadd.f32 %v5714_v42, %v5713_v6  ;;  %v5518_v10 = vmul.f32 %v5502_v39, %v9258_v54  ;;  %8612 = vmatmul.msk.f32.gmra.mxu2 %vm5358_vm9, %v13077_v23  ;;  %v6236_v47 = vrot.slane %v13077_v23, 7 }
 0x4e6   : > { %v6829_v24 = vrot.slane %v6828_v34, 4  ;;  %8643 = vmatmul.msk.f32.gmra.mxu3 %vm5358_vm9, %v6235_v60  ;;  %vm5896_vm7 = vweird.f32 %v8934_v17  ;;  %v6543_v50 = vrot.slane %v12945_v63, 1  ;;  %v6544_v39 = vrot.slane %v12978_v11, 1 }
 0x4e7   : > { %v5891_v1 = vmul.f32 %v8934_v17, %v5890_v30  ;;  %v5716_v43 = vrot.slane %v5715_v9, 1  ;;  %v13088_v3 = vsub.f32 %v13001_v22, %v5518_v10  ;;  %v13091_v7 = vsub.f32 %v13003_v26, %v5518_v10  ;;  %vm5897_vm10 = vmor %vm5895_vm8, %vm5896_vm7 }
 0x4e8   : > { %v6704_v49 = vpop.f32.mrf.mxu0  ;;  %v6830_v29 = vadd.f32 %v6829_v24, %v6828_v34  ;;  %v13099_v58 = vpop.f32.mrf.mxu2  ;;  %v6276_v28 = vsel %vm1671_vm15, 0.0, %v6236_v47  ;;  %v6237_v63 = vrot.slane %v13107_v41, 7  ;;  %v6545_v24 = vsel %vm1979_vm3, %v6543_v50, %v6544_v39 }
 0x4e9   : > { %8670 = vmatmul.msk.f32.gmra.mxu0 %vm5358_vm9, %v6542_v19  ;;  %v5892_v48 = vmul.f32 0.5, %v5891_v1  ;;  %v5717_v2 = vadd.f32 %v5716_v43, %v5715_v9  ;;  %v5581_v4 = vmul.f32 %v13088_v3, %v13088_v3  ;;  %v5582_v13 = vmul.f32 %v13091_v7, %v13091_v7  ;;  %v13101_v22 = vpop.f32.mrf.mxu3 }
 0x4ea   : > { %v6831_v26 = vrot.slane %v6830_v29, 2  ;;  %v13124_v16 = vadd.f32 %v6704_v49, %v6483_v59  ;;  %v6587_v50 = vsel %vm1979_vm3, %v6544_v39, 0.0 }
 0x4eb   : > { %v5893_v52 = vsub.f32 1.5, %v5892_v48  ;;  %v5741_v18 = vmul.f32 %v5717_v2, %v9258_v54  ;;  %v5718_v31 = vsel %vm5358_vm9, %v5581_v4, 0.0  ;;  %v5719_v51 = vsel %vm5358_vm9, %v5582_v13, 0.0 }
 0x4ec   : > { %v5720_v6 = vadd.f32 %v5719_v51, %v5718_v31  ;;  %v6832_v20 = vadd.f32 %v6831_v26, %v6830_v29  ;;  %v6835_v60 = vsel %vm5358_vm9, %v13124_v16, 0.0  ;;  %v6238_v48 = vsel %vm1671_vm15, %v6236_v47, %v6237_v63 }
 0x4ed   : > { %v5894_v33 = vmul.f32 %v8934_v17, %v5893_v52  ;;  %v13112_v46 = vadd.f32 1e-05, %v5741_v18  ;;  %8613 = vmatmul.msk.f32.gmra.mxu2 %vm5358_vm9, %v13107_v41 }
 0x4ee   : > { %v5721_v42 = vrot.slane %v5720_v6, 4  ;;  %v6833_v5 = vrot.slane %v6832_v20, 1  ;;  %8644 = vmatmul.msk.f32.gmra.mxu3 %vm5358_vm9, %v6276_v28 }
 0x4ef   : > { %v5898_v27 = vsel %vm5897_vm10, %v8934_v17, %v5894_v33  ;;  %8935 = vrsqrt.f32 %v13112_v46  ;;  %vm5905_vm12 = vweird.f32 %v13112_v46 }
 0x4f0   : > { %v6707_v8 = vpop.f32.mrf.mxu0  ;;  %v5945_v34 = vmul.f32 %v5898_v27, %v12960_v61  ;;  %v5722_v15 = vadd.f32 %v5721_v42, %v5720_v6  ;;  %v6834_v44 = vadd.f32 %v6833_v5, %v6832_v20  ;;  %v13128_v19 = vpop.f32.mrf.mxu2 }
 0x4f1   : > { %8671 = vmatmul.msk.f32.gmra.mxu0 %vm5358_vm9, %v6586_v37  ;;  %v13130_v30 = vpop.f32.mrf.mxu3  ;;  %v13132_v9 = vadd.f32 %v6707_v8, %v6484_v12  ;;  %v6485_v12 = vadd.f32 %v12997_v25, %v12971_v40 }
 0x4f2   : > { %v5723_v17 = vrot.slane %v5722_v15, 2  ;;  %v6970_v10 = vmul.f32 %v6834_v44, %v9258_v54  ;;  %v13140_v61 = vmax.f32 %v5945_v34, 0.0 }
 0x4f3   : > { %v6836_v11 = vsel %vm5358_vm9, %v13132_v9, 0.0 }
 0x4f4   : > { %v5724_v1 = vadd.f32 %v5723_v17, %v5722_v15  ;;  %v13144_v43 = vsub.f32 %v13051_v14, %v6970_v10  ;;  %v13147_v49 = vsub.f32 %v13057_v62, %v6970_v10  ;;  %v6837_v0 = vadd.f32 %v6836_v11, %v6835_v60 }
 0x4f5   : > { %v8936_v29 = vpop.eup %8935  ;;  %8614 = vmatmul.msk.f32.gmra.mxu2 %vm5358_vm9, %v13140_v61  ;;  %v5946_v14 = vmul.f32 %v5898_v27, %v12963_v38  ;;  %v6239_v6 = vrot.slane %v13140_v61, 7  ;;  %v6486_v15 = vadd.f32 %v13028_v36, %v12995_v35  ;;  %v6547_v35 = vrot.slane %v13037_v55, 1  ;;  %v7900_v55 = vld [vmem:[%s14011_s16 + $0x28] sm:$0xff] }
 0x4f6   : > { %v5900_v2 = vmul.f32 %v8936_v29, %v13112_v46  ;;  %v5725_v4 = vrot.slane %v5724_v1, 1  ;;  %v7018_v13 = vmul.f32 %v13144_v43, %v13144_v43  ;;  %8645 = vmatmul.msk.f32.gmra.mxu3 %vm5358_vm9, %v6238_v48  ;;  %v7019_v62 = vmul.f32 %v13147_v49, %v13147_v49  ;;  %8009 = vmatpush.msrb.mxu2 %v7900_v55 }
 0x4f7   : > { %v6838_v26 = vrot.slane %v6837_v0, 4  ;;  %v13166_v28 = vmax.f32 %v5946_v14, 0.0  ;;  %vm5906_vm11 = vweird.f32 %v8936_v29  ;;  %v6277_v63 = vsel %vm1671_vm15, 0.0, %v6239_v6 }
 0x4f8   : > { %v6710_v47 = vpop.f32.mrf.mxu0  ;;  %v5901_v37 = vmul.f32 %v8936_v29, %v5900_v2  ;;  %v5726_v52 = vadd.f32 %v5725_v4, %v5724_v1  ;;  %v7050_v18 = vsel %vm5358_vm9, %v7018_v13, 0.0  ;;  %v7051_v31 = vsel %vm5358_vm9, %v7019_v62, 0.0  ;;  %v13170_v5 = vpop.f32.mrf.mxu2  ;;  %vm5907_vm2 = vmor %vm5905_vm12, %vm5906_vm11  ;;  %v7611_v4 = vld [vmem:[%s14009_s14 + $0x8] sm:$0xff] }
 0x4f9   : > { %8672 = vmatmul.msk.f32.gmra.mxu0 %vm5358_vm9, %v6545_v24  ;;  %v6839_v51 = vadd.f32 %v6838_v26, %v6837_v0  ;;  %v13162_v59 = vpop.f32.mrf.mxu3  ;;  %v7052_v38 = vadd.f32 %v7051_v31, %v7050_v18  ;;  %v13181_v39 = vadd.f32 %v6710_v47, %v6485_v12  ;;  %v6546_v11 = vrot.slane %v13005_v57, 1  ;;  %7728 = vmatpush.msrb.mxu1 %v7611_v4 }
 0x4fa   : > { %v5902_v20 = vmul.f32 0.5, %v5901_v37  ;;  %v5742_v33 = vmul.f32 %v5726_v52, %v9258_v54  ;;  %v6240_v48 = vrot.slane %v13166_v28, 7  ;;  %v6550_v55 = vrot.slane %v13107_v41, 1 }
 0x4fb   : > { %v6840_v42 = vrot.slane %v6839_v51, 2  ;;  %v7053_v34 = vrot.slane %v7052_v38, 4  ;;  %v6548_v47 = vsel %vm1979_vm3, %v6546_v11, %v6547_v35 }
 0x4fc   : > { %v5903_v27 = vsub.f32 1.5, %v5902_v20  ;;  %v13173_v8 = vadd.f32 1e-05, %v5742_v33 }
 0x4fd   : > { %v6841_v44 = vadd.f32 %v6840_v42, %v6839_v51  ;;  %v7054_v25 = vadd.f32 %v7053_v34, %v7052_v38  ;;  %8615 = vmatmul.msk.f32.gmra.mxu2 %vm5358_vm9, %v13166_v28  ;;  %v6241_v51 = vsel %vm1671_vm15, %v6239_v6, %v6240_v48 }
 0x4fe   : > { %v5904_v40 = vmul.f32 %v8936_v29, %v5903_v27  ;;  %8937 = vrsqrt.f32 %v13173_v8  ;;  %8646 = vmatmul.msk.f32.gmra.mxu3 %vm5358_vm9, %v6277_v63  ;;  %vm5915_vm0 = vweird.f32 %v13173_v8 }
 0x4ff   : > { %v6842_v46 = vrot.slane %v6841_v44, 1  ;;  %v7055_v10 = vrot.slane %v7054_v25, 2 }
 0x500   : > { %v6713_v17 = vpop.f32.mrf.mxu0  ;;  %v5908_v36 = vsel %vm5907_vm2, %v8936_v29, %v5904_v40  ;;  %v6844_v29 = vsel %vm5358_vm9, %v13181_v39, 0.0  ;;  %v13215_v31 = vpop.f32.mrf.mxu2 }
 0x501   : > { %8673 = vmatmul.msk.f32.gmra.mxu0 %vm5358_vm9, %v6587_v50  ;;  %v13187_v60 = vadd.f32 %v6713_v17, %v6486_v15  ;;  %v5947_v24 = vmul.f32 %v5908_v36, %v13021_v32  ;;  %v6843_v1 = vadd.f32 %v6842_v46, %v6841_v44  ;;  %v13191_v0 = vpop.f32.mrf.mxu3  ;;  %v7056_v2 = vadd.f32 %v7055_v10, %v7054_v25 }
 0x502   : > { %v5948_v42 = vmul.f32 %v5908_v36, %v13024_v21  ;;  %v6588_v21 = vsel %vm1979_vm3, %v6547_v35, 0.0  ;;  %v6549_v35 = vrot.slane %v13077_v23, 1 }
 0x503   : > { %v6845_v57 = vsel %vm5358_vm9, %v13187_v60, 0.0  ;;  %v6971_v32 = vmul.f32 %v6843_v1, %v9258_v54  ;;  %v13205_v14 = vmax.f32 %v5947_v24, 0.0  ;;  %v7057_v26 = vrot.slane %v7056_v2, 1 }
 0x504   : > { %v6846_v13 = vadd.f32 %v6845_v57, %v6844_v29  ;;  %v8938_v62 = vpop.eup %8937  ;;  %v13236_v36 = vmax.f32 %v5948_v42, 0.0  ;;  %v6487_v1 = vadd.f32 %v13064_v53, %v13026_v56  ;;  %v6488_v56 = vadd.f32 %v13101_v22, %v13062_v45 }
 0x505   : > { %v5910_v37 = vmul.f32 %v8938_v62, %v13173_v8  ;;  %v13210_v52 = vsub.f32 %v13124_v16, %v6971_v32  ;;  %v13213_v18 = vsub.f32 %v13132_v9, %v6971_v32  ;;  %v7058_v20 = vadd.f32 %v7057_v26, %v7056_v2  ;;  %8616 = vmatmul.msk.f32.gmra.mxu2 %vm5358_vm9, %v13205_v14 }
 0x506   : > { %v6847_v33 = vrot.slane %v6846_v13, 4  ;;  %8647 = vmatmul.msk.f32.gmra.mxu3 %vm5358_vm9, %v6241_v51  ;;  %v6242_v63 = vrot.slane %v13205_v14, 7  ;;  %vm5916_vm14 = vweird.f32 %v8938_v62  ;;  %v6243_v23 = vrot.slane %v13236_v36, 7 }
 0x507   : > { %v5911_v38 = vmul.f32 %v8938_v62, %v5910_v37  ;;  %v7020_v16 = vmul.f32 %v13210_v52, %v13210_v52  ;;  %v7021_v9 = vmul.f32 %v13213_v18, %v13213_v18  ;;  %v7194_v6 = vmul.f32 %v7058_v20, %v9258_v54  ;;  %vm5917_vm1 = vmor %vm5915_vm0, %vm5916_vm14 }
 0x508   : > { %v6716_v12 = vpop.f32.mrf.mxu0  ;;  %v6848_v50 = vadd.f32 %v6847_v33, %v6846_v13  ;;  %v6278_v48 = vsel %vm1671_vm15, 0.0, %v6242_v63  ;;  %v13251_v53 = vpop.f32.mrf.mxu2  ;;  %v6551_v45 = vsel %vm1979_vm3, %v6549_v35, %v6550_v55 }
 0x509   : > { %8674 = vmatmul.msk.f32.gmra.mxu0 %vm5358_vm9, %v6548_v47  ;;  %v5912_v27 = vmul.f32 0.5, %v5911_v38  ;;  %v7059_v34 = vsel %vm5358_vm9, %v7020_v16, 0.0  ;;  %v7060_v15 = vsel %vm5358_vm9, %v7021_v9, 0.0  ;;  %v13230_v44 = vpop.f32.mrf.mxu3  ;;  %v13233_v40 = vadd.f32 1e-05, %v7194_v6 }
 0x50a   : > { %v7061_v25 = vadd.f32 %v7060_v15, %v7059_v34  ;;  %v6849_v46 = vrot.slane %v6848_v50, 2  ;;  %v13253_v29 = vadd.f32 %v6716_v12, %v6487_v1  ;;  %v6244_v6 = vsel %vm1671_vm15, %v6242_v63, %v6243_v23 }
 0x50b   : > { %v5913_v17 = vsub.f32 1.5, %v5912_v27  ;;  %8939 = vrsqrt.f32 %v13233_v40  ;;  %vm7232_vm5 = vweird.f32 %v13233_v40 }
 0x50c   : > { %v7062_v10 = vrot.slane %v7061_v25, 4  ;;  %v6850_v11 = vadd.f32 %v6849_v46, %v6848_v50  ;;  %v6853_v20 = vsel %vm5358_vm9, %v13253_v29, 0.0 }
 0x50d   : > { %v5914_v24 = vmul.f32 %v8938_v62, %v5913_v17  ;;  %8617 = vmatmul.msk.f32.gmra.mxu2 %vm5358_vm9, %v13236_v36 }
 0x50e   : > { %v7063_v2 = vadd.f32 %v7062_v10, %v7061_v25  ;;  %v6851_v4 = vrot.slane %v6850_v11, 1  ;;  %8648 = vmatmul.msk.f32.gmra.mxu3 %vm5358_vm9, %v6278_v48 }
 0x50f   : > { %v5918_v8 = vsel %vm5917_vm1, %v8938_v62, %v5914_v24 }
 0x510   : > { %v6719_v57 = vpop.f32.mrf.mxu0  ;;  %v5949_v32 = vmul.f32 %v5918_v8, %v13088_v3  ;;  %v7064_v13 = vrot.slane %v7063_v2, 2  ;;  %v6852_v26 = vadd.f32 %v6851_v4, %v6850_v11  ;;  %v13289_v24 = vpop.f32.mrf.mxu2 }
 0x511   : > { %8675 = vmatmul.msk.f32.gmra.mxu0 %vm5358_vm9, %v6588_v21  ;;  %v13256_v47 = vpop.f32.mrf.mxu3  ;;  %v13258_v37 = vadd.f32 %v6719_v57, %v6488_v56  ;;  %v8940_v41 = vpop.eup %8939  ;;  %v6589_v57 = vsel %vm1979_vm3, %v6550_v55, 0.0  ;;  %v6490_v55 = vadd.f32 %v13162_v59, %v13128_v19  ;;  %v6553_v19 = vrot.slane %v13166_v28, 1 }
 0x512   : > { %v7065_v62 = vadd.f32 %v7064_v13, %v7063_v2  ;;  %v6972_v51 = vmul.f32 %v6852_v26, %v9258_v54  ;;  %v7227_v22 = vmul.f32 %v8940_v41, %v13233_v40  ;;  %v13268_v33 = vmax.f32 %v5949_v32, 0.0 }
 0x513   : > { %v6854_v3 = vsel %vm5358_vm9, %v13258_v37, 0.0  ;;  %vm7233_vm4 = vweird.f32 %v8940_v41  ;;  %v6489_v13 = vadd.f32 %v13130_v30, %v13099_v58  ;;  %v7610_v58 = vld [vmem:[%s14009_s14] sm:$0xff] }
 0x514   : > { %v7066_v38 = vrot.slane %v7065_v62, 1  ;;  %v13271_v16 = vsub.f32 %v13181_v39, %v6972_v51  ;;  %v13274_v9 = vsub.f32 %v13187_v60, %v6972_v51  ;;  %v6855_v12 = vadd.f32 %v6854_v3, %v6853_v20  ;;  %vm7234_vm6 = vmor %vm7232_vm5, %vm7233_vm4  ;;  %v7451_v51 = vpop.permute.xlu2 %7450  ;;  %v7899_v30 = vld [vmem:[%s14011_s16 + $0x20] sm:$0xff]  ;;  %7729 = vmatpush.msrb.mxu1 %v7610_v58 }
 0x515   : > { %v7228_v42 = vmul.f32 %v8940_v41, %v7227_v22  ;;  %8618 = vmatmul.msk.f32.gmra.mxu2 %vm5358_vm9, %v13268_v33  ;;  %v5950_v39 = vmul.f32 %v5918_v8, %v13091_v7  ;;  %v6245_v48 = vrot.slane %v13268_v33, 7  ;;  %v6552_v3 = vrot.slane %v13140_v61, 1 }
 0x516   : > { %v7067_v50 = vadd.f32 %v7066_v38, %v7065_v62  ;;  %v7022_v27 = vmul.f32 %v13271_v16, %v13271_v16  ;;  %v7023_v34 = vmul.f32 %v13274_v9, %v13274_v9  ;;  %v6856_v15 = vrot.slane %v6855_v12, 4  ;;  %8649 = vmatmul.msk.f32.gmra.mxu3 %vm5358_vm9, %v6244_v6  ;;  %8010 = vmatpush.msrb.mxu2 %v7899_v30 }
 0x517   : > { %v7229_v60 = vmul.f32 0.5, %v7228_v42  ;;  %v13297_v8 = vmax.f32 %v5950_v39, 0.0  ;;  %v6279_v23 = vsel %vm1671_vm15, 0.0, %v6245_v48  ;;  %v6491_v30 = vadd.f32 %v13191_v0, %v13170_v5 }
 0x518   : > { %v6722_v25 = vpop.f32.mrf.mxu0  ;;  %v7195_v63 = vmul.f32 %v7067_v50, %v9258_v54  ;;  %v7068_v46 = vsel %vm5358_vm9, %v7022_v27, 0.0  ;;  %v7069_v17 = vsel %vm5358_vm9, %v7023_v34, 0.0  ;;  %v6857_v21 = vadd.f32 %v6856_v15, %v6855_v12 }
 0x519   : > { %8676 = vmatmul.msk.f32.gmra.mxu0 %vm5358_vm9, %v6551_v45  ;;  %v7230_v10 = vsub.f32 1.5, %v7229_v60  ;;  %v7070_v11 = vadd.f32 %v7069_v17, %v7068_v46  ;;  %v13291_v1 = vpop.f32.mrf.mxu3  ;;  %v6246_v42 = vrot.slane %v13297_v8, 7  ;;  %v13329_v60 = vpop.f32.mrf.mxu2  ;;  %v6554_v46 = vsel %vm1979_vm3, %v6552_v3, %v6553_v19 }
 0x51a   : > { %v13294_v2 = vadd.f32 1e-05, %v7195_v63  ;;  %v6858_v7 = vrot.slane %v6857_v21, 2  ;;  %v7453_v17 = vpop.permute.xlu0 %7452  ;;  %v6492_v3 = vadd.f32 %v13230_v44, %v13215_v31  ;;  %v6556_v0 = vrot.slane %v13236_v36, 1 }
 0x51b   : > { %v7231_v4 = vmul.f32 %v8940_v41, %v7230_v10  ;;  %v7071_v35 = vrot.slane %v7070_v11, 4 }
 0x51c   : > { %8941 = vrsqrt.f32 %v13294_v2  ;;  %v6859_v56 = vadd.f32 %v6858_v7, %v6857_v21  ;;  %vm7242_vm13 = vweird.f32 %v13294_v2 }
 0x51d   : > { %v7235_v32 = vsel %vm7234_vm6, %v8940_v41, %v7231_v4  ;;  %v7072_v26 = vadd.f32 %v7071_v35, %v7070_v11  ;;  %8619 = vmatmul.msk.f32.gmra.mxu2 %vm5358_vm9, %v13297_v8  ;;  %v6247_v11 = vsel %vm1671_vm15, %v6245_v48, %v6246_v42  ;;  %v6555_v42 = vrot.slane %v13205_v14, 1 }
 0x51e   : > { %v7386_v40 = vmul.f32 %v7235_v32, %v13144_v43  ;;  %v6860_v62 = vrot.slane %v6859_v56, 1  ;;  %8650 = vmatmul.msk.f32.gmra.mxu3 %vm5358_vm9, %v6279_v23  ;;  %v13317_v43 = vadd.f32 %v6722_v25, %v6489_v13  ;;  %v7387_v50 = vmul.f32 %v7235_v32, %v13147_v49 }
 0x51f   : > { %v7073_v41 = vrot.slane %v7072_v26, 2 }
 0x520   : > { %v6725_v45 = vpop.f32.mrf.mxu0  ;;  %v7546_v22 = vadd.f32 %v7451_v51, %v7386_v40  ;;  %v6861_v20 = vadd.f32 %v6860_v62, %v6859_v56  ;;  %v6862_v61 = vsel %vm5358_vm9, %v13317_v43, 0.0  ;;  %v7547_v7 = vadd.f32 %v7453_v17, %v7387_v50 }
 0x521   : > { %8677 = vmatmul.msk.f32.gmra.mxu0 %vm5358_vm9, %v6589_v57  ;;  %v7074_v59 = vadd.f32 %v7073_v41, %v7072_v26  ;;  %v13321_v38 = vpop.f32.mrf.mxu3  ;;  %v13323_v12 = vadd.f32 %v6725_v45, %v6490_v55 }
 0x522   : > { %v8942_v6 = vpop.eup %8941  ;;  %v7578_v27 = vmax.f32 %v7546_v22, 0.0  ;;  %v6973_v34 = vmul.f32 %v6861_v20, %v9258_v54  ;;  %v7579_v51 = vmax.f32 %v7547_v7, 0.0  ;;  %v6590_v22 = vsel %vm1979_vm3, %v6553_v19, 0.0 }
 0x523   : > { %v7237_v15 = vmul.f32 %v8942_v6, %v13294_v2  ;;  %v7075_v39 = vrot.slane %v7074_v59, 1  ;;  %v6863_v28 = vsel %vm5358_vm9, %v13323_v12, 0.0  ;;  %vm7243_vm15 = vweird.f32 %v8942_v6  ;;  %v13365_v2 = vpop.f32.mrf.mxu2 }
 0x524   : > { %v13336_v25 = vsub.f32 %v13253_v29, %v6973_v34  ;;  %v13339_v63 = vsub.f32 %v13258_v37, %v6973_v34  ;;  %v6864_v49 = vadd.f32 %v6863_v28, %v6862_v61  ;;  %8684 = vmatmul.msk.f32.vlgmr.msrb.gmra.mxu1 %vm5358_vm9, %v7578_v27  ;;  %vm7244_vm7 = vmor %vm7242_vm13, %vm7243_vm15  ;;  %v7455_v34 = vpop.permute.xlu1 %7454 }
 0x525   : > { %v7238_v21 = vmul.f32 %v8942_v6, %v7237_v15  ;;  %v7076_v10 = vadd.f32 %v7075_v39, %v7074_v59 }
 0x526   : > { %v7024_v29 = vmul.f32 %v13336_v25, %v13336_v25  ;;  %v7025_v37 = vmul.f32 %v13339_v63, %v13339_v63  ;;  %v6865_v4 = vrot.slane %v6864_v49, 4  ;;  %8651 = vmatmul.msk.f32.gmra.mxu3 %vm5358_vm9, %v6247_v11 }
 0x527   : > { %v7239_v35 = vmul.f32 0.5, %v7238_v21  ;;  %v7196_v56 = vmul.f32 %v7076_v10, %v9258_v54 }
 0x528   : > { %v6728_v57 = vpop.f32.mrf.mxu0  ;;  %v7077_v32 = vsel %vm5358_vm9, %v7024_v29, 0.0  ;;  %v7078_v48 = vsel %vm5358_vm9, %v7025_v37, 0.0  ;;  %v6866_v13 = vadd.f32 %v6865_v4, %v6864_v49  ;;  %v6557_v49 = vsel %vm1979_vm3, %v6555_v42, %v6556_v0 }
 0x529   : > { %8678 = vmatmul.msk.f32.gmra.mxu0 %vm5358_vm9, %v6554_v46  ;;  %v7240_v26 = vsub.f32 1.5, %v7239_v35  ;;  %v13353_v23 = vadd.f32 1e-05, %v7196_v56  ;;  %v7079_v40 = vadd.f32 %v7078_v48, %v7077_v32  ;;  %v13357_v58 = vpop.f32.mrf.mxu3  ;;  %v13370_v5 = vadd.f32 %v6728_v57, %v6491_v30 }
 0x52a   : > { %v6867_v62 = vrot.slane %v6866_v13, 2  ;;  %v6591_v42 = vsel %vm1979_vm3, %v6556_v0, 0.0 }
 0x52b   : > { %v7241_v55 = vmul.f32 %v8942_v6, %v7240_v26  ;;  %8943 = vrsqrt.f32 %v13353_v23  ;;  %v7080_v41 = vrot.slane %v7079_v40, 4  ;;  %v13398_v48 = vpop.f32.mrf.mxu2  ;;  %vm7252_vm10 = vweird.f32 %v13353_v23 }
 0x52c   : > { %v6868_v45 = vadd.f32 %v6867_v62, %v6866_v13  ;;  %8685 = vmatmul.msk.f32.gmra.mxu1 %vm5358_vm9, %v7579_v51 }
 0x52d   : > { %v7245_v20 = vsel %vm7244_vm7, %v8942_v6, %v7241_v55  ;;  %v7081_v59 = vadd.f32 %v7080_v41, %v7079_v40 }
 0x52e   : > { %v7388_v50 = vmul.f32 %v7245_v20, %v13210_v52  ;;  %v6869_v27 = vrot.slane %v6868_v45, 1  ;;  %v6871_v52 = vsel %vm5358_vm9, %v13370_v5, 0.0  ;;  %v7389_v36 = vmul.f32 %v7245_v20, %v13213_v18  ;;  %v7457_v18 = vpop.permute.xlu2 %7456 }
 0x52f   : > { %v7082_v19 = vrot.slane %v7081_v59, 2 }
 0x530   : > { %v6731_v6 = vpop.f32.mrf.mxu0  ;;  %v6870_v15 = vadd.f32 %v6869_v27, %v6868_v45  ;;  %v7548_v31 = vadd.f32 %v7455_v34, %v7388_v50  ;;  %v7549_v32 = vadd.f32 %v7457_v18, %v7389_v36  ;;  %v6493_v27 = vadd.f32 %v13256_v47, %v13251_v53 }
 0x531   : > { %8679 = vmatmul.msk.f32.gmra.mxu0 %vm5358_vm9, %v6590_v22  ;;  %v13373_v39 = vadd.f32 %v6731_v6, %v6492_v3  ;;  %v8944_v44 = vpop.eup %8943  ;;  %v7083_v61 = vadd.f32 %v7082_v19, %v7081_v59  ;;  %v13389_v4 = vpop.f32.mrf.mxu3  ;;  %v6494_v19 = vadd.f32 %v13291_v1, %v13289_v24  ;;  %v7898_v24 = vld [vmem:[%s14011_s16 + $0x18] sm:$0xff] }
 0x532   : > { %v7247_v28 = vmul.f32 %v8944_v44, %v13353_v23  ;;  %v6974_v14 = vmul.f32 %v6870_v15, %v9258_v54  ;;  %v7580_v21 = vmax.f32 %v7548_v31, 0.0  ;;  %vm7253_vm8 = vweird.f32 %v8944_v44  ;;  %v7459_v23 = vpop.permute.xlu0 %7458  ;;  %8011 = vmatpush.msrb.mxu2 %v7898_v24 }
 0x533   : > { %v7084_v46 = vrot.slane %v7083_v61, 1  ;;  %v6872_v17 = vsel %vm5358_vm9, %v13373_v39, 0.0  ;;  %vm7254_vm11 = vmor %vm7252_vm10, %vm7253_vm8  ;;  %v7581_v20 = vmax.f32 %v7549_v32, 0.0  ;;  %v6558_v15 = vrot.slane %v13268_v33, 1  ;;  %v13425_v1 = vpop.f32.mrf.mxu2 }
 0x534   : > { %v7248_v10 = vmul.f32 %v8944_v44, %v7247_v28  ;;  %v13384_v11 = vsub.f32 %v13317_v43, %v6974_v14  ;;  %v13387_v7 = vsub.f32 %v13323_v12, %v6974_v14  ;;  %v6873_v29 = vadd.f32 %v6872_v17, %v6871_v52  ;;  %8686 = vmatmul.msk.f32.gmra.mxu1 %vm5358_vm9, %v7580_v21 }
 0x535   : > { %v7085_v37 = vadd.f32 %v7084_v46, %v7083_v61  ;;  %v6559_v31 = vrot.slane %v13297_v8, 1 }
 0x536   : > { %v7249_v35 = vmul.f32 0.5, %v7248_v10  ;;  %v7026_v56 = vmul.f32 %v13384_v11, %v13384_v11  ;;  %v7027_v43 = vmul.f32 %v13387_v7, %v13387_v7  ;;  %v6874_v57 = vrot.slane %v6873_v29, 4 }
 0x537   : > { %v7197_v12 = vmul.f32 %v7085_v37, %v9258_v54  ;;  %v6560_v36 = vsel %vm1979_vm3, %v6558_v15, %v6559_v31  ;;  %v6496_v15 = vadd.f32 %v13357_v58, %v13365_v2 }
 0x538   : > { %v6734_v13 = vpop.f32.mrf.mxu0  ;;  %v7250_v26 = vsub.f32 1.5, %v7249_v35  ;;  %v7086_v40 = vsel %vm5358_vm9, %v7026_v56, 0.0  ;;  %v7087_v62 = vsel %vm5358_vm9, %v7027_v43, 0.0  ;;  %v6875_v51 = vadd.f32 %v6874_v57, %v6873_v29 }
 0x539   : > { %8680 = vmatmul.msk.f32.gmra.mxu0 %vm5358_vm9, %v6557_v49  ;;  %v13402_v55 = vadd.f32 1e-05, %v7197_v12  ;;  %v7088_v41 = vadd.f32 %v7087_v62, %v7086_v40 }
 0x53a   : > { %v7251_v30 = vmul.f32 %v8944_v44, %v7250_v26  ;;  %v6876_v45 = vrot.slane %v6875_v51, 2 }
 0x53b   : > { %8945 = vrsqrt.f32 %v13402_v55  ;;  %v7089_v22 = vrot.slane %v7088_v41, 4  ;;  %vm7262_vm2 = vweird.f32 %v13402_v55 }
 0x53c   : > { %v7255_v3 = vsel %vm7254_vm11, %v8944_v44, %v7251_v30  ;;  %v6877_v59 = vadd.f32 %v6876_v45, %v6875_v51  ;;  %8687 = vmatmul.msk.f32.gmra.mxu1 %vm5358_vm9, %v7581_v20  ;;  %v13416_v44 = vpop.f32.mrf.mxu3 }
 0x53d   : > { %v7390_v50 = vmul.f32 %v7255_v3, %v13271_v16  ;;  %v7090_v34 = vadd.f32 %v7089_v22, %v7088_v41  ;;  %v13418_v16 = vadd.f32 %v6734_v13, %v6493_v27  ;;  %v7391_v46 = vmul.f32 %v7255_v3, %v13274_v9  ;;  %v7461_v9 = vpop.permute.xlu1 %7460 }
 0x53e   : > { %v6878_v6 = vrot.slane %v6877_v59, 1 }
 0x53f   : > { %v7091_v0 = vrot.slane %v7090_v34, 2  ;;  %v7550_v47 = vadd.f32 %v7459_v23, %v7390_v50  ;;  %v6880_v21 = vsel %vm5358_vm9, %v13418_v16, 0.0 }
 0x540   : > { %v6737_v53 = vpop.f32.mrf.mxu0  ;;  %v6879_v61 = vadd.f32 %v6878_v6, %v6877_v59  ;;  %v13456_v59 = vpop.f32.mrf.mxu2 }
 0x541   : > { %8681 = vmatmul.msk.f32.gmra.mxu0 %vm5358_vm9, %v6591_v42  ;;  %v13420_v28 = vadd.f32 %v6737_v53, %v6494_v19  ;;  %v8946_v14 = vpop.eup %8945  ;;  %v7092_v52 = vadd.f32 %v7091_v0, %v7090_v34  ;;  %v7582_v33 = vmax.f32 %v7550_v47, 0.0  ;;  %v6592_v34 = vsel %vm1979_vm3, %v6559_v31, 0.0 }
 0x542   : > { %v7257_v8 = vmul.f32 %v8946_v14, %v13402_v55  ;;  %v6975_v49 = vmul.f32 %v6879_v61, %v9258_v54  ;;  %vm7263_vm12 = vweird.f32 %v8946_v14  ;;  %v6495_v19 = vadd.f32 %v13321_v38, %v13329_v60  ;;  %v7463_v55 = vpop.permute.xlu2 %7462 }
 0x543   : > { %v7093_v17 = vrot.slane %v7092_v52, 1  ;;  %v6881_v10 = vsel %vm5358_vm9, %v13420_v28, 0.0  ;;  %vm7264_vm14 = vmor %vm7262_vm2, %vm7263_vm12 }
 0x544   : > { %v7258_v29 = vmul.f32 %v8946_v14, %v7257_v8  ;;  %v13436_v37 = vsub.f32 %v13370_v5, %v6975_v49  ;;  %v13439_v18 = vsub.f32 %v13373_v39, %v6975_v49  ;;  %v6882_v35 = vadd.f32 %v6881_v10, %v6880_v21  ;;  %8688 = vmatmul.msk.f32.gmra.mxu1 %vm5358_vm9, %v7582_v33  ;;  %v13452_v45 = vpop.f32.mrf.mxu3 }
 0x545   : > { %v7094_v56 = vadd.f32 %v7093_v17, %v7092_v52  ;;  %v7551_v5 = vadd.f32 %v7461_v9, %v7391_v46 }
 0x546   : > { %v7259_v43 = vmul.f32 0.5, %v7258_v29  ;;  %v7028_v57 = vmul.f32 %v13436_v37, %v13436_v37  ;;  %v7029_v32 = vmul.f32 %v13439_v18, %v13439_v18  ;;  %v6883_v12 = vrot.slane %v6882_v35, 4 }
 0x547   : > { %v7198_v39 = vmul.f32 %v7094_v56, %v9258_v54  ;;  %v7583_v42 = vmax.f32 %v7551_v5, 0.0 }
 0x548   : > { %v6740_v13 = vpop.f32.mrf.mxu0  ;;  %v7260_v26 = vsub.f32 1.5, %v7259_v43  ;;  %v7095_v40 = vsel %vm5358_vm9, %v7028_v57, 0.0  ;;  %v7096_v62 = vsel %vm5358_vm9, %v7029_v32, 0.0  ;;  %v6884_v51 = vadd.f32 %v6883_v12, %v6882_v35  ;;  %v13485_v35 = vpop.f32.mrf.mxu2 }
 0x549   : > { %8682 = vmatmul.msk.f32.gmra.mxu0 %vm5358_vm9, %v6560_v36  ;;  %v13450_v41 = vadd.f32 1e-05, %v7198_v39  ;;  %v7097_v30 = vadd.f32 %v7096_v62, %v7095_v40  ;;  %v13466_v47 = vadd.f32 %v6740_v13, %v6495_v19 }
 0x54a   : > { %v7261_v22 = vmul.f32 %v8946_v14, %v7260_v26  ;;  %v6885_v20 = vrot.slane %v6884_v51, 2 }
 0x54b   : > { %8947 = vrsqrt.f32 %v13450_v41  ;;  %v7098_v3 = vrot.slane %v7097_v30, 4  ;;  %v6889_v2 = vsel %vm5358_vm9, %v13466_v47, 0.0  ;;  %vm7272_vm0 = vweird.f32 %v13450_v41 }
 0x54c   : > { %v7265_v50 = vsel %vm7264_vm14, %v8946_v14, %v7261_v22  ;;  %v6886_v27 = vadd.f32 %v6885_v20, %v6884_v51  ;;  %8689 = vmatmul.msk.f32.gmra.mxu1 %vm5358_vm9, %v7583_v42  ;;  %v13473_v58 = vpop.f32.mrf.mxu3 }
 0x54d   : > { %v7392_v23 = vmul.f32 %v7265_v50, %v13336_v25  ;;  %v7099_v6 = vadd.f32 %v7098_v3, %v7097_v30  ;;  %v7393_v8 = vmul.f32 %v7265_v50, %v13339_v63  ;;  %v7465_v63 = vpop.permute.xlu0 %7464  ;;  %v6497_v50 = vadd.f32 %v13389_v4, %v13398_v48 }
 0x54e   : > { %v6887_v0 = vrot.slane %v6886_v27, 1 }
 0x54f   : > { %v7100_v53 = vrot.slane %v7099_v6, 2  ;;  %v7552_v31 = vadd.f32 %v7463_v55, %v7392_v23  ;;  %v7467_v23 = vpop.permute.xlu1 %7466 }
 0x550   : > { %v6743_v61 = vpop.f32.mrf.mxu0  ;;  %v6888_v14 = vadd.f32 %v6887_v0, %v6886_v27  ;;  %v13507_v55 = vpop.f32.mrf.mxu2 }
 0x551   : > { %8683 = vmatmul.msk.f32.gmra.mxu0 %vm5358_vm9, %v6592_v34  ;;  %v13468_v25 = vadd.f32 %v6743_v61, %v6496_v15  ;;  %v8948_v52 = vpop.eup %8947  ;;  %v7101_v38 = vadd.f32 %v7100_v53, %v7099_v6  ;;  %v7584_v60 = vmax.f32 %v7552_v31, 0.0  ;;  %v7897_v31 = vld [vmem:[%s14011_s16 + $0x10] sm:$0xff] }
 0x552   : > { %v7267_v24 = vmul.f32 %v8948_v52, %v13450_v41  ;;  %v6976_v33 = vmul.f32 %v6888_v14, %v9258_v54  ;;  %vm7273_vm3 = vweird.f32 %v8948_v52  ;;  %v6498_v41 = vadd.f32 %v13416_v44, %v13425_v1  ;;  %8012 = vmatpush.msrb.mxu2 %v7897_v31 }
 0x553   : > { %v7102_v49 = vrot.slane %v7101_v38, 1  ;;  %v6890_v36 = vsel %vm5358_vm9, %v13468_v25, 0.0  ;;  %vm7274_vm1 = vmor %vm7272_vm0, %vm7273_vm3 }
 0x554   : > { %v7268_v46 = vmul.f32 %v8948_v52, %v7267_v24  ;;  %v13480_v17 = vsub.f32 %v13418_v16, %v6976_v33  ;;  %v13483_v21 = vsub.f32 %v13420_v28, %v6976_v33  ;;  %v6891_v10 = vadd.f32 %v6890_v36, %v6889_v2  ;;  %8690 = vmatmul.msk.f32.gmra.mxu1 %vm5358_vm9, %v7584_v60  ;;  %v13502_v34 = vpop.f32.mrf.mxu3 }
 0x555   : > { %v7103_v29 = vadd.f32 %v7102_v49, %v7101_v38  ;;  %v7553_v16 = vadd.f32 %v7465_v63, %v7393_v8 }
 0x556   : > { %v7269_v56 = vmul.f32 0.5, %v7268_v46  ;;  %v7030_v9 = vmul.f32 %v13480_v17, %v13480_v17  ;;  %v7031_v43 = vmul.f32 %v13483_v21, %v13483_v21  ;;  %v6892_v57 = vrot.slane %v6891_v10, 4  ;;  %v7469_v46 = vpop.permute.xlu2 %7468 }
 0x557   : > { %v7199_v28 = vmul.f32 %v7103_v29, %v9258_v54  ;;  %v7585_v22 = vmax.f32 %v7553_v16, 0.0 }
 0x558   : > { %v6746_v32 = vpop.f32.mrf.mxu0  ;;  %v7270_v12 = vsub.f32 1.5, %v7269_v56  ;;  %v7104_v5 = vsel %vm5358_vm9, %v7030_v9, 0.0  ;;  %v7105_v39 = vsel %vm5358_vm9, %v7031_v43, 0.0  ;;  %v6893_v13 = vadd.f32 %v6892_v57, %v6891_v10 }
 0x559   : > { %v13495_v26 = vadd.f32 1e-05, %v7199_v28  ;;  %v7106_v40 = vadd.f32 %v7105_v39, %v7104_v5  ;;  %v13509_v15 = vadd.f32 %v6746_v32, %v6497_v50 }
 0x55a   : > { %v7271_v62 = vmul.f32 %v8948_v52, %v7270_v12  ;;  %v6894_v51 = vrot.slane %v6893_v13, 2  ;;  %v13539_v12 = vpop.f32.mrf.mxu2 }
 0x55b   : > { %8949 = vrsqrt.f32 %v13495_v26  ;;  %v7107_v30 = vrot.slane %v7106_v40, 4  ;;  %v6898_v60 = vsel %vm5358_vm9, %v13509_v15, 0.0  ;;  %vm7282_vm5 = vweird.f32 %v13495_v26 }
 0x55c   : > { %v7275_v20 = vsel %vm7274_vm1, %v8948_v52, %v7271_v62  ;;  %v6895_v3 = vadd.f32 %v6894_v51, %v6893_v13  ;;  %8691 = vmatmul.msk.f32.gmra.mxu1 %vm5358_vm9, %v7585_v22  ;;  %v13535_v9 = vpop.f32.mrf.mxu3 }
 0x55d   : > { %v7394_v42 = vmul.f32 %v7275_v20, %v13384_v11  ;;  %v7108_v27 = vadd.f32 %v7107_v30, %v7106_v40  ;;  %v7395_v52 = vmul.f32 %v7275_v20, %v13387_v7  ;;  %v6499_v20 = vadd.f32 %v13452_v45, %v13456_v59 }
 0x55e   : > { %v6896_v19 = vrot.slane %v6895_v3, 1 }
 0x55f   : > { %v7109_v6 = vrot.slane %v7108_v27, 2  ;;  %v7554_v11 = vadd.f32 %v7467_v23, %v7394_v42  ;;  %v7555_v56 = vadd.f32 %v7469_v46, %v7395_v52  ;;  %v7471_v42 = vpop.permute.xlu0 %7470 }
 0x560   : > { %v6749_v0 = vpop.f32.mrf.mxu0  ;;  %v6897_v53 = vadd.f32 %v6896_v19, %v6895_v3 }
 0x561   : > { %v13511_v61 = vadd.f32 %v6749_v0, %v6498_v41  ;;  %v8950_v4 = vpop.eup %8949  ;;  %v7110_v48 = vadd.f32 %v7109_v6, %v7108_v27  ;;  %v7586_v14 = vmax.f32 %v7554_v11, 0.0  ;;  %v7587_v40 = vmax.f32 %v7555_v56, 0.0 }
 0x562   : > { %v7277_v44 = vmul.f32 %v8950_v4, %v13495_v26  ;;  %v6977_v1 = vmul.f32 %v6897_v53, %v9258_v54  ;;  %vm7283_vm4 = vweird.f32 %v8950_v4  ;;  %v6500_v26 = vadd.f32 %v13473_v58, %v13485_v35  ;;  %v13557_v35 = vpop.f32.mrf.mxu2 }
 0x563   : > { %v7111_v38 = vrot.slane %v7110_v48, 1  ;;  %v6899_v24 = vsel %vm5358_vm9, %v13511_v61, 0.0  ;;  %vm7284_vm6 = vmor %vm7282_vm5, %vm7283_vm4 }
 0x564   : > { %v7278_v33 = vmul.f32 %v8950_v4, %v7277_v44  ;;  %v13524_v8 = vsub.f32 %v13466_v47, %v6977_v1  ;;  %v13527_v49 = vsub.f32 %v13468_v25, %v6977_v1  ;;  %v6900_v2 = vadd.f32 %v6899_v24, %v6898_v60  ;;  %8692 = vmatmul.msk.f32.gmra.mxu1 %vm5358_vm9, %v7586_v14  ;;  %v13553_v53 = vpop.f32.mrf.mxu3 }
 0x565   : > { %v7112_v36 = vadd.f32 %v7111_v38, %v7110_v48 }
 0x566   : > { %v7279_v7 = vmul.f32 0.5, %v7278_v33  ;;  %v7032_v10 = vmul.f32 %v13524_v8, %v13524_v8  ;;  %v7033_v29 = vmul.f32 %v13527_v49, %v13527_v49  ;;  %v6901_v63 = vrot.slane %v6900_v2, 4 }
 0x567   : > { %v7200_v47 = vmul.f32 %v7112_v36, %v9258_v54 }
 0x568   : > { %v6752_v25 = vpop.f32.mrf.mxu0  ;;  %v7280_v43 = vsub.f32 1.5, %v7279_v7  ;;  %v7113_v57 = vsel %vm5358_vm9, %v7032_v10, 0.0  ;;  %v7114_v16 = vsel %vm5358_vm9, %v7033_v29, 0.0  ;;  %v6902_v28 = vadd.f32 %v6901_v63, %v6900_v2 }
 0x569   : > { %v7216_v32 = vadd.f32 1e-05, %v7200_v47  ;;  %v7115_v5 = vadd.f32 %v7114_v16, %v7113_v57  ;;  %v13549_v23 = vadd.f32 %v6752_v25, %v6499_v20 }
 0x56a   : > { %v7281_v39 = vmul.f32 %v8950_v4, %v7280_v43  ;;  %v6903_v13 = vrot.slane %v6902_v28, 2 }
 0x56b   : > { %8951 = vrsqrt.f32 %v7216_v32  ;;  %v7116_v62 = vrot.slane %v7115_v5, 4  ;;  %v6907_v31 = vsel %vm5358_vm9, %v13549_v23, 0.0  ;;  %vm7292_vm13 = vweird.f32 %v7216_v32 }
 0x56c   : > { %v7285_v51 = vsel %vm7284_vm6, %v8950_v4, %v7281_v39  ;;  %v6904_v30 = vadd.f32 %v6903_v13, %v6902_v28  ;;  %8693 = vmatmul.msk.f32.gmra.mxu1 %vm5358_vm9, %v7587_v40  ;;  %v13580_v28 = vpop.f32.mrf.mxu3  ;;  %v6501_v40 = vadd.f32 %v13502_v34, %v13507_v55  ;;  %v7896_v34 = vld [vmem:[%s14011_s16 + $0x8] sm:$0xff] }
 0x56d   : > { %v7396_v22 = vmul.f32 %v7285_v51, %v13436_v37  ;;  %v7117_v3 = vadd.f32 %v7116_v62, %v7115_v5  ;;  %v7397_v48 = vmul.f32 %v7285_v51, %v13439_v18  ;;  %v7473_v18 = vpop.permute.xlu1 %7472  ;;  %v6173_v62 = vpop.f32.mrf.mxu2  ;;  %8013 = vmatpush.msrb.mxu2 %v7896_v34 }
 0x56e   : > { %v6905_v50 = vrot.slane %v6904_v30, 1 }
 0x56f   : > { %v7118_v27 = vrot.slane %v7117_v3, 2  ;;  %v7556_v19 = vadd.f32 %v7471_v42, %v7396_v22  ;;  %v7557_v46 = vadd.f32 %v7473_v18, %v7397_v48 }
 0x570   : > { %v6755_v41 = vpop.f32.mrf.mxu0  ;;  %v6906_v6 = vadd.f32 %v6905_v50, %v6904_v30  ;;  %v6502_v30 = vadd.f32 %v13535_v9, %v13539_v12 }
 0x571   : > { %v13551_v0 = vadd.f32 %v6755_v41, %v6500_v26  ;;  %v8952_v37 = vpop.eup %8951  ;;  %v7119_v11 = vadd.f32 %v7118_v27, %v7117_v3  ;;  %v7588_v45 = vmax.f32 %v7556_v19, 0.0  ;;  %v7589_v57 = vmax.f32 %v7557_v46, 0.0 }
 0x572   : > { %v7287_v59 = vmul.f32 %v8952_v37, %v7216_v32  ;;  %v6978_v4 = vmul.f32 %v6906_v6, %v9258_v54  ;;  %vm7293_vm15 = vweird.f32 %v8952_v37  ;;  %v7475_v32 = vpop.permute.xlu2 %7474 }
 0x573   : > { %v7120_v58 = vrot.slane %v7119_v11, 1  ;;  %v6908_v14 = vsel %vm5358_vm9, %v13551_v0, 0.0  ;;  %vm7294_vm7 = vmor %vm7292_vm13, %vm7293_vm15 }
 0x574   : > { %v7288_v44 = vmul.f32 %v8952_v37, %v7287_v59  ;;  %v13564_v1 = vsub.f32 %v13509_v15, %v6978_v4  ;;  %v13567_v52 = vsub.f32 %v13511_v61, %v6978_v4  ;;  %v6909_v38 = vadd.f32 %v6908_v14, %v6907_v31  ;;  %8694 = vmatmul.msk.f32.gmra.mxu1 %vm5358_vm9, %v7588_v45  ;;  %v13608_v31 = vpop.f32.mrf.mxu3 }
 0x575   : > { %v7121_v60 = vadd.f32 %v7120_v58, %v7119_v11  ;;  %v13616_v18 = vpop.f32.mrf.mxu2 }
 0x576   : > { %v7289_v24 = vmul.f32 0.5, %v7288_v44  ;;  %v7034_v33 = vmul.f32 %v13564_v1, %v13564_v1  ;;  %v7035_v2 = vmul.f32 %v13567_v52, %v13567_v52  ;;  %v6910_v36 = vrot.slane %v6909_v38, 4 }
 0x577   : > { %v7201_v15 = vmul.f32 %v7121_v60, %v9258_v54 }
 0x578   : > { %v6758_v7 = vpop.f32.mrf.mxu0  ;;  %v7290_v61 = vsub.f32 1.5, %v7289_v24  ;;  %v7122_v10 = vsel %vm5358_vm9, %v7034_v33, 0.0  ;;  %v7123_v29 = vsel %vm5358_vm9, %v7035_v2, 0.0  ;;  %v6911_v63 = vadd.f32 %v6910_v36, %v6909_v38 }
 0x579   : > { %v13577_v56 = vadd.f32 1e-05, %v7201_v15  ;;  %v7124_v47 = vadd.f32 %v7123_v29, %v7122_v10  ;;  %v13588_v3 = vadd.f32 %v6758_v7, %v6501_v40 }
 0x57a   : > { %v7291_v25 = vmul.f32 %v8952_v37, %v7290_v61  ;;  %v6912_v43 = vrot.slane %v6911_v63, 2 }
 0x57b   : > { %8953 = vrsqrt.f32 %v13577_v56  ;;  %v7125_v16 = vrot.slane %v7124_v47, 4  ;;  %vm7302_vm10 = vweird.f32 %v13577_v56 }
 0x57c   : > { %v7295_v5 = vsel %vm7294_vm7, %v8952_v37, %v7291_v25  ;;  %v6913_v39 = vadd.f32 %v6912_v43, %v6911_v63  ;;  %8695 = vmatmul.msk.f32.gmra.mxu1 %vm5358_vm9, %v7589_v57  ;;  %v6916_v37 = vsel %vm5358_vm9, %v13588_v3, 0.0  ;;  %v6503_v57 = vadd.f32 %v13553_v53, %v13557_v35  ;;  %v6460_v40 = vpop.f32.mrf.mxu3 }
 0x57d   : > { %v7398_v13 = vmul.f32 %v7295_v5, %v13480_v17  ;;  %v7126_v51 = vadd.f32 %v7125_v16, %v7124_v47  ;;  %v7399_v12 = vmul.f32 %v7295_v5, %v13483_v21  ;;  %v7477_v21 = vpop.permute.xlu0 %7476  ;;  %v7479_v5 = vpop.permute.xlu1 %7478 }
 0x57e   : > { %v6914_v22 = vrot.slane %v6913_v39, 1 }
 0x57f   : > { %v7127_v20 = vrot.slane %v7126_v51, 2  ;;  %v7558_v26 = vadd.f32 %v7475_v32, %v7398_v13 }
 0x580   : > { %v6761_v42 = vpop.f32.mrf.mxu0  ;;  %v6915_v50 = vadd.f32 %v6914_v22, %v6913_v39  ;;  %v6504_v39 = vadd.f32 %v13580_v28, %v6173_v62 }
 0x581   : > { %v13590_v27 = vadd.f32 %v6761_v42, %v6502_v30  ;;  %v8954_v17 = vpop.eup %8953  ;;  %v7128_v41 = vadd.f32 %v7127_v20, %v7126_v51  ;;  %v7590_v55 = vmax.f32 %v7558_v26, 0.0  ;;  %v6179_v42 = vpop.f32.mrf.mxu2 }
 0x582   : > { %v7297_v19 = vmul.f32 %v8954_v17, %v13577_v56  ;;  %v6979_v9 = vmul.f32 %v6915_v50, %v9258_v54  ;;  %vm7303_vm8 = vweird.f32 %v8954_v17 }
 0x583   : > { %v7129_v6 = vrot.slane %v7128_v41, 1  ;;  %v6917_v11 = vsel %vm5358_vm9, %v13590_v27, 0.0  ;;  %vm7304_vm11 = vmor %vm7302_vm10, %vm7303_vm8 }
 0x584   : > { %v7298_v45 = vmul.f32 %v8954_v17, %v7297_v19  ;;  %v13603_v59 = vsub.f32 %v13549_v23, %v6979_v9  ;;  %v13606_v4 = vsub.f32 %v13551_v0, %v6979_v9  ;;  %v6918_v48 = vadd.f32 %v6917_v11, %v6916_v37  ;;  %8696 = vmatmul.msk.f32.gmra.mxu1 %vm5358_vm9, %v7590_v55 }
 0x585   : > { %v7130_v58 = vadd.f32 %v7129_v6, %v7128_v41  ;;  %v7559_v23 = vadd.f32 %v7477_v21, %v7399_v12  ;;  %v7481_v6 = vpop.permute.xlu2 %7480 }
 0x586   : > { %v7299_v14 = vmul.f32 0.5, %v7298_v45  ;;  %v7036_v44 = vmul.f32 %v13603_v59, %v13603_v59  ;;  %v7037_v38 = vmul.f32 %v13606_v4, %v13606_v4  ;;  %v6919_v60 = vrot.slane %v6918_v48, 4 }
 0x587   : > { %v7202_v0 = vmul.f32 %v7130_v58, %v9258_v54  ;;  %v7591_v29 = vmax.f32 %v7559_v23, 0.0 }
 0x588   : > { %v6764_v24 = vpop.f32.mrf.mxu0  ;;  %v7300_v33 = vsub.f32 1.5, %v7299_v14  ;;  %v7131_v2 = vsel %vm5358_vm9, %v7036_v44, 0.0  ;;  %v7132_v36 = vsel %vm5358_vm9, %v7037_v38, 0.0  ;;  %v6920_v46 = vadd.f32 %v6919_v60, %v6918_v48  ;;  %v13652_v60 = vpop.f32.mrf.mxu3 }
 0x589   : > { %v7218_v15 = vadd.f32 1e-05, %v7202_v0  ;;  %v7133_v7 = vadd.f32 %v7132_v36, %v7131_v2  ;;  %v13626_v51 = vadd.f32 %v6764_v24, %v6503_v57  ;;  %v13655_v2 = vpop.f32.mrf.mxu2 }
 0x58a   : > { %v7301_v61 = vmul.f32 %v8954_v17, %v7300_v33  ;;  %v6921_v10 = vrot.slane %v6920_v46, 2 }
 0x58b   : > { %8955 = vrsqrt.f32 %v7218_v15  ;;  %v7134_v63 = vrot.slane %v7133_v7, 4  ;;  %v6925_v62 = vsel %vm5358_vm9, %v13626_v51, 0.0  ;;  %vm7312_vm2 = vweird.f32 %v7218_v15 }
 0x58c   : > { %v7305_v47 = vsel %vm7304_vm11, %v8954_v17, %v7301_v61  ;;  %v6922_v25 = vadd.f32 %v6921_v10, %v6920_v46  ;;  %8697 = vmatmul.msk.f32.gmra.mxu1 %vm5358_vm9, %v7591_v29 }
 0x58d   : > { %v7400_v43 = vmul.f32 %v7305_v47, %v13524_v8  ;;  %v7135_v16 = vadd.f32 %v7134_v63, %v7133_v7  ;;  %v7401_v17 = vmul.f32 %v7305_v47, %v13527_v49  ;;  %v6505_v7 = vadd.f32 %v13608_v31, %v13616_v18  ;;  %v7483_v63 = vpop.permute.xlu0 %7482 }
 0x58e   : > { %v6923_v13 = vrot.slane %v6922_v25, 1 }
 0x58f   : > { %v7136_v56 = vrot.slane %v7135_v16, 2  ;;  %v7560_v30 = vadd.f32 %v7479_v5, %v7400_v43  ;;  %v7561_v48 = vadd.f32 %v7481_v6, %v7401_v17 }
 0x590   : > { %v6767_v32 = vpop.f32.mrf.mxu0  ;;  %v6924_v22 = vadd.f32 %v6923_v13, %v6922_v25  ;;  %v7895_v13 = vld [vmem:[%s14011_s16] sm:$0xff] }
 0x591   : > { %v13628_v20 = vadd.f32 %v6767_v32, %v6504_v39  ;;  %v8956_v8 = vpop.eup %8955  ;;  %v7137_v26 = vadd.f32 %v7136_v56, %v7135_v16  ;;  %v7592_v53 = vmax.f32 %v7560_v30, 0.0  ;;  %v7593_v33 = vmax.f32 %v7561_v48, 0.0  ;;  %v13666_v16 = vld [vmem:[%s14010_s15] ss:$0 sm:$0xff]  ;;  %8014 = vmatpush.msrb.mxu2 %v7895_v13 }
 0x592   : > { %v7307_v35 = vmul.f32 %v8956_v8, %v7218_v15  ;;  %v6980_v50 = vmul.f32 %v6924_v22, %v9258_v54  ;;  %vm7313_vm12 = vweird.f32 %v8956_v8  ;;  %v6506_v15 = vadd.f32 %v6460_v40, %v6179_v42 }
 0x593   : > { %v7138_v28 = vrot.slane %v7137_v26, 1  ;;  %v6926_v41 = vsel %vm5358_vm9, %v13628_v20, 0.0  ;;  %vm7314_vm14 = vmor %vm7312_vm2, %vm7313_vm12 }
 0x594   : > { %v7308_v34 = vmul.f32 %v8956_v8, %v7307_v35  ;;  %v13637_v55 = vsub.f32 %v13588_v3, %v6980_v50  ;;  %v13640_v19 = vsub.f32 %v13590_v27, %v6980_v50  ;;  %v6927_v9 = vadd.f32 %v6926_v41, %v6925_v62  ;;  %8698 = vmatmul.msk.f32.gmra.mxu1 %vm5358_vm9, %v7592_v53  ;;  %v6185_v41 = vpop.f32.mrf.mxu2 }
 0x595   : > { %v7139_v12 = vadd.f32 %v7138_v28, %v7137_v26  ;;  %v6466_v26 = vpop.f32.mrf.mxu3 }
 0x596   : > { %v7309_v49 = vmul.f32 0.5, %v7308_v34  ;;  %v7038_v37 = vmul.f32 %v13637_v55, %v13637_v55  ;;  %v7039_v11 = vmul.f32 %v13640_v19, %v13640_v19  ;;  %v6928_v45 = vrot.slane %v6927_v9, 4 }
 0x597   : > { %v7203_v3 = vmul.f32 %v7139_v12, %v9258_v54 }
 0x598   : > { %v6770_v58 = vpop.f32.mrf.mxu0  ;;  %v7310_v27 = vsub.f32 1.5, %v7309_v49  ;;  %v7140_v21 = vsel %vm5358_vm9, %v7038_v37, 0.0  ;;  %v7141_v14 = vsel %vm5358_vm9, %v7039_v11, 0.0  ;;  %v6929_v44 = vadd.f32 %v6928_v45, %v6927_v9 }
 0x599   : > { %v13650_v38 = vadd.f32 1e-05, %v7203_v3  ;;  %v7142_v23 = vadd.f32 %v7141_v14, %v7140_v21  ;;  %v13661_v25 = vadd.f32 %v6770_v58, %v6505_v7 }
 0x59a   : > { %v7311_v0 = vmul.f32 %v8956_v8, %v7310_v27  ;;  %v6930_v24 = vrot.slane %v6929_v44, 2 }
 0x59b   : > { %8957 = vrsqrt.f32 %v13650_v38  ;;  %v7143_v36 = vrot.slane %v7142_v23, 4  ;;  %v6934_v30 = vsel %vm5358_vm9, %v13661_v25, 0.0  ;;  %vm7322_vm0 = vweird.f32 %v13650_v38 }
 0x59c   : > { %v7315_v46 = vsel %vm7314_vm14, %v8956_v8, %v7311_v0  ;;  %v6931_v61 = vadd.f32 %v6930_v24, %v6929_v44  ;;  %8699 = vmatmul.msk.f32.gmra.mxu1 %vm5358_vm9, %v7593_v33 }
 0x59d   : > { %v7402_v10 = vmul.f32 %v7315_v46, %v13564_v1  ;;  %v7144_v29 = vadd.f32 %v7143_v36, %v7142_v23  ;;  %v7403_v8 = vmul.f32 %v7315_v46, %v13567_v52  ;;  %v7485_v52 = vpop.permute.xlu1 %7484  ;;  %v6507_v36 = vadd.f32 %v13652_v60, %v13655_v2 }
 0x59e   : > { %v6932_v47 = vrot.slane %v6931_v61, 1 }
 0x59f   : > { %v7145_v43 = vrot.slane %v7144_v29, 2  ;;  %v7562_v5 = vadd.f32 %v7483_v63, %v7402_v10  ;;  %v6469_v10 = vpop.f32.mrf.mxu3  ;;  %v6508_v63 = vadd.f32 %v6466_v26, %v6185_v41 }
 0x5a0   : > { %v6773_v57 = vpop.f32.mrf.mxu0  ;;  %v6933_v31 = vadd.f32 %v6932_v47, %v6931_v61 }
 0x5a1   : > { %v13668_v18 = vadd.f32 %v6773_v57, %v6506_v15  ;;  %v8958_v1 = vpop.eup %8957  ;;  %v7146_v39 = vadd.f32 %v7145_v43, %v7144_v29  ;;  %v7594_v56 = vmax.f32 %v7562_v5, 0.0  ;;  %v7731_v22 = vpop.f32.mrf.mxu1 }
 0x5a2   : > { %v7317_v40 = vmul.f32 %v8958_v1, %v13650_v38  ;;  %v6981_v32 = vmul.f32 %v6933_v31, %v9258_v54  ;;  %v7831_v35 = vadd.f32 %v13666_v16, %v7731_v22  ;;  %vm7323_vm3 = vweird.f32 %v8958_v1  ;;  %v7487_v38 = vpop.permute.xlu2 %7486  ;;  %v6188_v57 = vpop.f32.mrf.mxu2 }
 0x5a3   : > { %v7147_v42 = vrot.slane %v7146_v39, 1  ;;  %v6935_v53 = vsel %vm5358_vm9, %v13668_v18, 0.0  ;;  %vm7324_vm1 = vmor %vm7322_vm0, %vm7323_vm3 }
 0x5a4   : > { %v7318_v50 = vmul.f32 %v8958_v1, %v7317_v40  ;;  %v13682_v17 = vsub.f32 %v13626_v51, %v6981_v32  ;;  %v13685_v28 = vsub.f32 %v13628_v20, %v6981_v32  ;;  %v6936_v62 = vadd.f32 %v6935_v53, %v6934_v30  ;;  %8700 = vmatmul.msk.f32.gmra.mxu1 %vm5358_vm9, %v7594_v56 }
 0x5a5   : > { %v7148_v34 = vadd.f32 %v7147_v42, %v7146_v39  ;;  %v7863_v9 = vmax.f32 %v7831_v35, 0.0  ;;  %v7563_v51 = vadd.f32 %v7485_v52, %v7403_v8  ;;  %v7489_v52 = vpop.permute.xlu0 %7488 }
 0x5a6   : > { %v7319_v12 = vmul.f32 0.5, %v7318_v50  ;;  %v7040_v6 = vmul.f32 %v13682_v17, %v13682_v17  ;;  %v7041_v49 = vmul.f32 %v13685_v28, %v13685_v28  ;;  %v6937_v37 = vrot.slane %v6936_v62, 4 }
 0x5a7   : > { %v7204_v20 = vmul.f32 %v7148_v34, %v9258_v54  ;;  %8716 = vmatmul.msk.f32.vlgmr.msrb.gmra.mxu2 %vm5358_vm9, %v7863_v9  ;;  %v7595_v0 = vmax.f32 %v7563_v51, 0.0 }
 0x5a8   : > { %v6776_v11 = vpop.f32.mrf.mxu0  ;;  %v7320_v45 = vsub.f32 1.5, %v7319_v12  ;;  %v7149_v48 = vsel %vm5358_vm9, %v7040_v6, 0.0  ;;  %v7150_v3 = vsel %vm5358_vm9, %v7041_v49, 0.0  ;;  %v6938_v58 = vadd.f32 %v6937_v37, %v6936_v62  ;;  %v6472_v37 = vpop.f32.mrf.mxu3 }
 0x5a9   : > { %v13696_v27 = vadd.f32 1e-05, %v7204_v20  ;;  %v7151_v21 = vadd.f32 %v7150_v3, %v7149_v48  ;;  %v7734_v23 = vpop.f32.mrf.mxu1  ;;  %v13706_v47 = vadd.f32 %v6776_v11, %v6507_v36  ;;  %v6509_v36 = vadd.f32 %v6469_v10, %v6188_v57 }
 0x5aa   : > { %v7321_v14 = vmul.f32 %v8958_v1, %v7320_v45  ;;  %v6939_v44 = vrot.slane %v6938_v58, 2  ;;  %v7832_v7 = vadd.f32 %v13666_v16, %v7734_v23  ;;  %v6191_v48 = vpop.f32.mrf.mxu2 }
 0x5ab   : > { %8959 = vrsqrt.f32 %v13696_v27  ;;  %v7152_v24 = vrot.slane %v7151_v21, 4  ;;  %v6943_v32 = vsel %vm5358_vm9, %v13706_v47, 0.0  ;;  %vm7332_vm5 = vweird.f32 %v13696_v27 }
 0x5ac   : > { %v7325_v33 = vsel %vm7324_vm1, %v8958_v1, %v7321_v14  ;;  %v6940_v46 = vadd.f32 %v6939_v44, %v6938_v58  ;;  %8701 = vmatmul.msk.f32.gmra.mxu1 %vm5358_vm9, %v7595_v0  ;;  %v7864_v43 = vmax.f32 %v7832_v7, 0.0 }
 0x5ad   : > { %v7404_v61 = vmul.f32 %v7325_v33, %v13603_v59  ;;  %v7153_v29 = vadd.f32 %v7152_v24, %v7151_v21  ;;  %v7405_v8 = vmul.f32 %v7325_v33, %v13606_v4 }
 0x5ae   : > { %v6941_v15 = vrot.slane %v6940_v46, 1 }
 0x5af   : > { %v7154_v5 = vrot.slane %v7153_v29, 2  ;;  %v7564_v1 = vadd.f32 %v7487_v38, %v7404_v61  ;;  %8717 = vmatmul.msk.f32.gmra.mxu2 %vm5358_vm9, %v7864_v43  ;;  %v7565_v49 = vadd.f32 %v7489_v52, %v7405_v8  ;;  %v7491_v38 = vpop.permute.xlu1 %7490 }
 0x5b0   : > { %v6779_v31 = vpop.f32.mrf.mxu0  ;;  %v6942_v60 = vadd.f32 %v6941_v15, %v6940_v46 }
 0x5b1   : > { %v13709_v2 = vadd.f32 %v6779_v31, %v6508_v63  ;;  %v8960_v59 = vpop.eup %8959  ;;  %v7155_v39 = vadd.f32 %v7154_v5, %v7153_v29  ;;  %v7596_v13 = vmax.f32 %v7564_v1, 0.0  ;;  %v7737_v22 = vpop.f32.mrf.mxu1  ;;  %v7597_v23 = vmax.f32 %v7565_v49, 0.0 }
 0x5b2   : > { %v7327_v56 = vmul.f32 %v8960_v59, %v13696_v27  ;;  %v6982_v40 = vmul.f32 %v6942_v60, %v9258_v54  ;;  %v7833_v53 = vadd.f32 %v13666_v16, %v7737_v22  ;;  %vm7333_vm4 = vweird.f32 %v8960_v59  ;;  %v6475_v60 = vpop.f32.mrf.mxu3  ;;  %v6194_v22 = vpop.f32.mrf.mxu2 }
 0x5b3   : > { %v6944_v30 = vsel %vm5358_vm9, %v13709_v2, 0.0  ;;  %v7156_v42 = vrot.slane %v7155_v39, 1  ;;  %vm7334_vm6 = vmor %vm7332_vm5, %vm7333_vm4  ;;  %v6510_v63 = vadd.f32 %v6472_v37, %v6191_v48 }
 0x5b4   : > { %v6945_v26 = vadd.f32 %v6944_v30, %v6943_v32  ;;  %v7328_v35 = vmul.f32 %v8960_v59, %v7327_v56  ;;  %v13720_v50 = vsub.f32 %v13661_v25, %v6982_v40  ;;  %v13723_v62 = vsub.f32 %v13668_v18, %v6982_v40  ;;  %8702 = vmatmul.msk.f32.gmra.mxu1 %vm5358_vm9, %v7596_v13 }
 0x5b5   : > { %v7157_v41 = vadd.f32 %v7156_v42, %v7155_v39  ;;  %v7865_v9 = vmax.f32 %v7833_v53, 0.0 }
 0x5b6   : > { %v6946_v34 = vrot.slane %v6945_v26, 4  ;;  %v7329_v12 = vmul.f32 0.5, %v7328_v35  ;;  %v7042_v4 = vmul.f32 %v13720_v50, %v13720_v50  ;;  %v7043_v6 = vmul.f32 %v13723_v62, %v13723_v62 }
 0x5b7   : > { %v7205_v25 = vmul.f32 %v7157_v41, %v9258_v54  ;;  %8718 = vmatmul.msk.f32.gmra.mxu2 %vm5358_vm9, %v7865_v9  ;;  %v7493_v41 = vpop.permute.xlu2 %7492 }
 0x5b8   : > { %v6947_v51 = vadd.f32 %v6946_v34, %v6945_v26  ;;  %v6782_v18 = vpop.f32.mrf.mxu0  ;;  %v7330_v20 = vsub.f32 1.5, %v7329_v12  ;;  %v7158_v11 = vsel %vm5358_vm9, %v7042_v4, 0.0  ;;  %v7159_v45 = vsel %vm5358_vm9, %v7043_v6, 0.0 }
 0x5b9   : > { %v13734_v3 = vadd.f32 1e-05, %v7205_v25  ;;  %v7160_v58 = vadd.f32 %v7159_v45, %v7158_v11  ;;  %v7740_v44 = vpop.f32.mrf.mxu1  ;;  %v13741_v27 = vadd.f32 %v6782_v18, %v6509_v36 }
 0x5ba   : > { %v6948_v21 = vrot.slane %v6947_v51, 2  ;;  %v7331_v14 = vmul.f32 %v8960_v59, %v7330_v20  ;;  %v7834_v46 = vadd.f32 %v13666_v16, %v7740_v44 }
 0x5bb   : > { %8961 = vrsqrt.f32 %v13734_v3  ;;  %v7161_v0 = vrot.slane %v7160_v58, 4  ;;  %v6952_v40 = vsel %vm5358_vm9, %v13741_v27, 0.0  ;;  %vm7342_vm13 = vweird.f32 %v13734_v3 }
 0x5bc   : > { %v6949_v24 = vadd.f32 %v6948_v21, %v6947_v51  ;;  %v7335_v33 = vsel %vm7334_vm6, %v8960_v59, %v7331_v14  ;;  %8703 = vmatmul.msk.f32.gmra.mxu1 %vm5358_vm9, %v7597_v23  ;;  %v7866_v15 = vmax.f32 %v7834_v46, 0.0  ;;  %v6478_v23 = vpop.f32.mrf.mxu3 }
 0x5bd   : > { %v7406_v7 = vmul.f32 %v7335_v33, %v13637_v55  ;;  %v7162_v61 = vadd.f32 %v7161_v0, %v7160_v58  ;;  %v7407_v13 = vmul.f32 %v7335_v33, %v13640_v19  ;;  %v6511_v58 = vadd.f32 %v6475_v60, %v6194_v22 }
 0x5be   : > { %v6950_v29 = vrot.slane %v6949_v24, 1 }
 0x5bf   : > { %v7163_v43 = vrot.slane %v7162_v61, 2  ;;  %v7566_v1 = vadd.f32 %v7491_v38, %v7406_v7  ;;  %8719 = vmatmul.msk.f32.gmra.mxu2 %vm5358_vm9, %v7866_v15  ;;  %v6197_v7 = vpop.f32.mrf.mxu2  ;;  %v7495_v38 = vpop.permute.xlu0 %7494 }
 0x5c0   : > { %v6951_v5 = vadd.f32 %v6950_v29, %v6949_v24  ;;  %v6785_v31 = vpop.f32.mrf.mxu0 }
 0x5c1   : > { %v13744_v10 = vadd.f32 %v6785_v31, %v6510_v63  ;;  %v8962_v57 = vpop.eup %8961  ;;  %v7164_v55 = vadd.f32 %v7163_v43, %v7162_v61  ;;  %v7598_v39 = vmax.f32 %v7566_v1, 0.0  ;;  %v7743_v30 = vpop.f32.mrf.mxu1  ;;  %v6512_v63 = vadd.f32 %v6478_v23, %v6197_v7 }
 0x5c2   : > { %v6983_v59 = vmul.f32 %v6951_v5, %v9258_v54  ;;  %v7337_v56 = vmul.f32 %v8962_v57, %v13734_v3  ;;  %v7835_v19 = vadd.f32 %v13666_v16, %v7743_v30  ;;  %vm7343_vm15 = vweird.f32 %v8962_v57 }
 0x5c3   : > { %v6953_v32 = vsel %vm5358_vm9, %v13744_v10, 0.0  ;;  %v7165_v8 = vrot.slane %v7164_v55, 1  ;;  %vm7344_vm7 = vmor %vm7342_vm13, %vm7343_vm15 }
 0x5c4   : > { %v13754_v42 = vsub.f32 %v13706_v47, %v6983_v59  ;;  %v13757_v26 = vsub.f32 %v13709_v2, %v6983_v59  ;;  %v6954_v53 = vadd.f32 %v6953_v32, %v6952_v40  ;;  %v7338_v35 = vmul.f32 %v8962_v57, %v7337_v56  ;;  %8704 = vmatmul.msk.f32.gmra.mxu1 %vm5358_vm9, %v7598_v39 }
 0x5c5   : > { %v7166_v34 = vadd.f32 %v7165_v8, %v7164_v55  ;;  %v7567_v47 = vadd.f32 %v7493_v41, %v7407_v13  ;;  %v7867_v6 = vmax.f32 %v7835_v19, 0.0 }
 0x5c6   : > { %v7044_v9 = vmul.f32 %v13754_v42, %v13754_v42  ;;  %v7045_v52 = vmul.f32 %v13757_v26, %v13757_v26  ;;  %v6955_v12 = vrot.slane %v6954_v53, 4  ;;  %v7339_v4 = vmul.f32 0.5, %v7338_v35 }
 0x5c7   : > { %v7206_v2 = vmul.f32 %v7166_v34, %v9258_v54  ;;  %8720 = vmatmul.msk.f32.gmra.mxu2 %vm5358_vm9, %v7867_v6  ;;  %v7599_v44 = vmax.f32 %v7567_v47, 0.0 }
 0x5c8   : > { %v7167_v49 = vsel %vm5358_vm9, %v7044_v9, 0.0  ;;  %v7168_v25 = vsel %vm5358_vm9, %v7045_v52, 0.0  ;;  %v6956_v37 = vadd.f32 %v6955_v12, %v6954_v53  ;;  %v6788_v51 = vpop.f32.mrf.mxu0  ;;  %v7340_v18 = vsub.f32 1.5, %v7339_v4 }
 0x5c9   : > { %v7169_v20 = vadd.f32 %v7168_v25, %v7167_v49  ;;  %v13769_v11 = vadd.f32 1e-05, %v7206_v2  ;;  %v7746_v14 = vpop.f32.mrf.mxu1  ;;  %v13775_v29 = vadd.f32 %v6788_v51, %v6511_v58 }
 0x5ca   : > { %v6957_v45 = vrot.slane %v6956_v37, 2  ;;  %v7341_v48 = vmul.f32 %v8962_v57, %v7340_v18  ;;  %v7836_v24 = vadd.f32 %v13666_v16, %v7746_v14 }
 0x5cb   : > { %v7170_v21 = vrot.slane %v7169_v20, 4  ;;  %8963 = vrsqrt.f32 %v13769_v11  ;;  %v6961_v55 = vsel %vm5358_vm9, %v13775_v29, 0.0  ;;  %vm7352_vm10 = vweird.f32 %v13769_v11 }
 0x5cc   : > { %v6958_v0 = vadd.f32 %v6957_v45, %v6956_v37  ;;  %v7345_v33 = vsel %vm7344_vm7, %v8962_v57, %v7341_v48  ;;  %v7868_v3 = vmax.f32 %v7836_v24, 0.0  ;;  %8705 = vmatmul.msk.f32.gmra.mxu1 %vm5358_vm9, %v7599_v44  ;;  %v7499_v24 = vpop.permute.xlu2 %7498 }
 0x5cd   : > { %v7171_v36 = vadd.f32 %v7170_v21, %v7169_v20  ;;  %v7408_v46 = vmul.f32 %v7345_v33, %v13682_v17  ;;  %v7409_v39 = vmul.f32 %v7345_v33, %v13685_v28 }
 0x5ce   : > { %v6959_v61 = vrot.slane %v6958_v0, 1 }
 0x5cf   : > { %v7172_v15 = vrot.slane %v7171_v36, 2  ;;  %v7568_v31 = vadd.f32 %v7495_v38, %v7408_v46  ;;  %8721 = vmatmul.msk.f32.gmra.mxu2 %vm5358_vm9, %v7868_v3 }
 0x5d0   : > { %v6960_v43 = vadd.f32 %v6959_v61, %v6958_v0  ;;  %v6791_v5 = vpop.f32.mrf.mxu0 }
 0x5d1   : > { %v7173_v1 = vadd.f32 %v7172_v15, %v7171_v36  ;;  %v13779_v57 = vadd.f32 %v6791_v5, %v6512_v63  ;;  %v8964_v60 = vpop.eup %8963  ;;  %v7600_v59 = vmax.f32 %v7568_v31, 0.0  ;;  %v7749_v32 = vpop.f32.mrf.mxu1 }
 0x5d2   : > { %v6984_v17 = vmul.f32 %v6960_v43, %v9258_v54  ;;  %v7347_v13 = vmul.f32 %v8964_v60, %v13769_v11  ;;  %v7837_v53 = vadd.f32 %v13666_v16, %v7749_v32  ;;  %vm7353_vm8 = vweird.f32 %v8964_v60 }
 0x5d3   : > { %v7174_v56 = vrot.slane %v7173_v1, 1  ;;  %v6962_v40 = vsel %vm5358_vm9, %v13779_v57, 0.0  ;;  %vm7354_vm11 = vmor %vm7352_vm10, %vm7353_vm8 }
 0x5d4   : > { %v13789_v30 = vsub.f32 %v13741_v27, %v6984_v17  ;;  %v13792_v22 = vsub.f32 %v13744_v10, %v6984_v17  ;;  %v6963_v8 = vadd.f32 %v6962_v40, %v6961_v55  ;;  %v7348_v35 = vmul.f32 %v8964_v60, %v7347_v13  ;;  %8706 = vmatmul.msk.f32.gmra.mxu1 %vm5358_vm9, %v7600_v59  ;;  %v7497_v27 = vpop.permute.xlu1 %7496  ;;  %v7501_v17 = vpop.permute.xlu0 %7500 }
 0x5d5   : > { %v7175_v19 = vadd.f32 %v7174_v56, %v7173_v1  ;;  %v7869_v9 = vmax.f32 %v7837_v53, 0.0  ;;  %v7569_v12 = vadd.f32 %v7497_v27, %v7409_v39 }
 0x5d6   : > { %v7046_v28 = vmul.f32 %v13789_v30, %v13789_v30  ;;  %v7047_v41 = vmul.f32 %v13792_v22, %v13792_v22  ;;  %v6964_v34 = vrot.slane %v6963_v8, 4  ;;  %v7349_v52 = vmul.f32 0.5, %v7348_v35 }
 0x5d7   : > { %v7207_v10 = vmul.f32 %v7175_v19, %v9258_v54  ;;  %8722 = vmatmul.msk.f32.gmra.mxu2 %vm5358_vm9, %v7869_v9  ;;  %v7601_v45 = vmax.f32 %v7569_v12, 0.0 }
 0x5d8   : > { %v7176_v47 = vsel %vm5358_vm9, %v7046_v28, 0.0  ;;  %v7177_v4 = vsel %vm5358_vm9, %v7047_v41, 0.0  ;;  %v6965_v6 = vadd.f32 %v6964_v34, %v6963_v8  ;;  %v7350_v2 = vsub.f32 1.5, %v7349_v52 }
 0x5d9   : > { %v7223_v49 = vadd.f32 1e-05, %v7207_v10  ;;  %v7178_v25 = vadd.f32 %v7177_v4, %v7176_v47  ;;  %v7752_v20 = vpop.f32.mrf.mxu1 }
 0x5da   : > { %v6966_v37 = vrot.slane %v6965_v6, 2  ;;  %v7351_v51 = vmul.f32 %v8964_v60, %v7350_v2  ;;  %v7838_v58 = vadd.f32 %v13666_v16, %v7752_v20 }
 0x5db   : > { %8965 = vrsqrt.f32 %v7223_v49  ;;  %v7179_v18 = vrot.slane %v7178_v25, 4  ;;  %vm7362_vm2 = vweird.f32 %v7223_v49 }
 0x5dc   : > { %v6967_v48 = vadd.f32 %v6966_v37, %v6965_v6  ;;  %v7355_v21 = vsel %vm7354_vm11, %v8964_v60, %v7351_v51  ;;  %v7870_v0 = vmax.f32 %v7838_v58, 0.0  ;;  %8707 = vmatmul.msk.f32.gmra.mxu1 %vm5358_vm9, %v7601_v45  ;;  %v7503_v52 = vpop.permute.xlu1 %7502  ;;  %v7505_v58 = vpop.permute.xlu2 %7504 }
 0x5dd   : > { %v7180_v14 = vadd.f32 %v7179_v18, %v7178_v25  ;;  %v7410_v44 = vmul.f32 %v7355_v21, %v13720_v50  ;;  %v7411_v38 = vmul.f32 %v7355_v21, %v13723_v62 }
 0x5de   : > { %v6968_v23 = vrot.slane %v6967_v48, 1 }
 0x5df   : > { %v7181_v33 = vrot.slane %v7180_v14, 2  ;;  %v7570_v11 = vadd.f32 %v7499_v24, %v7410_v44  ;;  %8723 = vmatmul.msk.f32.gmra.mxu2 %vm5358_vm9, %v7870_v0  ;;  %v7571_v13 = vadd.f32 %v7501_v17, %v7411_v38 }
 0x5e0   : > { %v6969_v36 = vadd.f32 %v6968_v23, %v6967_v48 }
 0x5e1   : > { %v8966_v46 = vpop.eup %8965  ;;  %v7182_v7 = vadd.f32 %v7181_v33, %v7180_v14  ;;  %v7755_v15 = vpop.f32.mrf.mxu1  ;;  %v7602_v50 = vmax.f32 %v7570_v11, 0.0  ;;  %v7603_v28 = vmax.f32 %v7571_v13, 0.0 }
 0x5e2   : > { %v7357_v61 = vmul.f32 %v8966_v46, %v7223_v49  ;;  %v6985_v3 = vmul.f32 %v6969_v36, %v9258_v54  ;;  %v7839_v1 = vadd.f32 %v13666_v16, %v7755_v15  ;;  %vm7363_vm12 = vweird.f32 %v8966_v46 }
 0x5e3   : > { %v7183_v63 = vrot.slane %v7182_v7, 1  ;;  %vm7364_vm14 = vmor %vm7362_vm2, %vm7363_vm12 }
 0x5e4   : > { %v7358_v43 = vmul.f32 %v8966_v46, %v7357_v61  ;;  %v13812_v5 = vsub.f32 %v13775_v29, %v6985_v3  ;;  %v13815_v31 = vsub.f32 %v13779_v57, %v6985_v3  ;;  %v7871_v39 = vmax.f32 %v7839_v1, 0.0  ;;  %8708 = vmatmul.msk.f32.gmra.mxu1 %vm5358_vm9, %v7602_v50 }
 0x5e5   : > { %v7184_v60 = vadd.f32 %v7183_v63, %v7182_v7 }
 0x5e6   : > { %v7359_v55 = vmul.f32 0.5, %v7358_v43  ;;  %v7048_v59 = vmul.f32 %v13812_v5, %v13812_v5  ;;  %v7049_v62 = vmul.f32 %v13815_v31, %v13815_v31 }
 0x5e7   : > { %v7208_v29 = vmul.f32 %v7184_v60, %v9258_v54  ;;  %8724 = vmatmul.msk.f32.gmra.mxu2 %vm5358_vm9, %v7871_v39 }
 0x5e8   : > { %v7360_v56 = vsub.f32 1.5, %v7359_v55  ;;  %v7185_v57 = vsel %vm5358_vm9, %v7048_v59, 0.0  ;;  %v7186_v40 = vsel %vm5358_vm9, %v7049_v62, 0.0 }
 0x5e9   : > { %v7224_v32 = vadd.f32 1e-05, %v7208_v29  ;;  %v7187_v8 = vadd.f32 %v7186_v40, %v7185_v57  ;;  %v7758_v19 = vpop.f32.mrf.mxu1 }
 0x5ea   : > { %v7361_v53 = vmul.f32 %v8966_v46, %v7360_v56  ;;  %v7840_v34 = vadd.f32 %v13666_v16, %v7758_v19  ;;  %v7511_v56 = vpop.permute.xlu2 %7510 }
 0x5eb   : > { %8967 = vrsqrt.f32 %v7224_v32  ;;  %v7188_v35 = vrot.slane %v7187_v8, 4  ;;  %vm7372_vm0 = vweird.f32 %v7224_v32 }
 0x5ec   : > { %v7365_v41 = vsel %vm7364_vm14, %v8966_v46, %v7361_v53  ;;  %v7872_v10 = vmax.f32 %v7840_v34, 0.0  ;;  %8709 = vmatmul.msk.f32.gmra.mxu1 %vm5358_vm9, %v7603_v28  ;;  %v7507_v46 = vpop.permute.xlu0 %7506 }
 0x5ed   : > { %v7412_v9 = vmul.f32 %v7365_v41, %v13754_v42  ;;  %v7189_v27 = vadd.f32 %v7188_v35, %v7187_v8  ;;  %v7413_v51 = vmul.f32 %v7365_v41, %v13757_v26 }
 0x5ef   : > { %v7190_v12 = vrot.slane %v7189_v27, 2  ;;  %v7572_v47 = vadd.f32 %v7503_v52, %v7412_v9  ;;  %8725 = vmatmul.msk.f32.gmra.mxu2 %vm5358_vm9, %v7872_v10  ;;  %v7573_v14 = vadd.f32 %v7505_v58, %v7413_v51 }
 0x5f1   : > { %v8968_v4 = vpop.eup %8967  ;;  %v7191_v6 = vadd.f32 %v7190_v12, %v7189_v27  ;;  %v7604_v49 = vmax.f32 %v7572_v47, 0.0  ;;  %v7761_v37 = vpop.f32.mrf.mxu1  ;;  %v7605_v24 = vmax.f32 %v7573_v14, 0.0  ;;  %v13862_v12 = vld [vmem:[%s14012_s17] ss:$0 sm:$0xff] }
 0x5f2   : > { %v7367_v2 = vmul.f32 %v8968_v4, %v7224_v32  ;;  %v7841_v42 = vadd.f32 %v13666_v16, %v7761_v37  ;;  %vm7373_vm3 = vweird.f32 %v8968_v4 }
 0x5f3   : > { %v7192_v25 = vrot.slane %v7191_v6, 1  ;;  %vm7374_vm1 = vmor %vm7372_vm0, %vm7373_vm3 }
 0x5f4   : > { %v7368_v18 = vmul.f32 %v8968_v4, %v7367_v2  ;;  %v7873_v48 = vmax.f32 %v7841_v42, 0.0  ;;  %8710 = vmatmul.msk.f32.gmra.mxu1 %vm5358_vm9, %v7604_v49  ;;  %v7513_v28 = vpop.permute.xlu0 %7512 }
 0x5f5   : > { %v7193_v20 = vadd.f32 %v7192_v25, %v7191_v6 }
 0x5f6   : > { %v7369_v45 = vmul.f32 0.5, %v7368_v18 }
 0x5f7   : > { %v7209_v21 = vmul.f32 %v7193_v20, %v9258_v54  ;;  %8726 = vmatmul.msk.f32.gmra.mxu2 %vm5358_vm9, %v7873_v48 }
 0x5f8   : > { %v7370_v44 = vsub.f32 1.5, %v7369_v45 }
 0x5f9   : > { %v7225_v23 = vadd.f32 1e-05, %v7209_v21  ;;  %v7764_v26 = vpop.f32.mrf.mxu1 }
 0x5fa   : > { %v7371_v0 = vmul.f32 %v8968_v4, %v7370_v44  ;;  %v7842_v36 = vadd.f32 %v13666_v16, %v7764_v26 }
 0x5fb   : > { %8969 = vrsqrt.f32 %v7225_v23  ;;  %vm7382_vm5 = vweird.f32 %v7225_v23 }
 0x5fc   : > { %v7375_v33 = vsel %vm7374_vm1, %v8968_v4, %v7371_v0  ;;  %v7874_v7 = vmax.f32 %v7842_v36, 0.0  ;;  %8711 = vmatmul.msk.f32.gmra.mxu1 %vm5358_vm9, %v7605_v24 }
 0x5fd   : > { %v7414_v11 = vmul.f32 %v7375_v33, %v13789_v30  ;;  %v7415_v15 = vmul.f32 %v7375_v33, %v13792_v22  ;;  %v7509_v30 = vpop.permute.xlu1 %7508 }
 0x5ff   : > { %v7574_v54 = vadd.f32 %v7507_v46, %v7414_v11  ;;  %8727 = vmatmul.msk.f32.gmra.mxu2 %vm5358_vm9, %v7874_v7  ;;  %v7575_v17 = vadd.f32 %v7509_v30, %v7415_v15 }
 0x601   : > { %v8970_v61 = vpop.eup %8969  ;;  %v7606_v38 = vmax.f32 %v7574_v54, 0.0  ;;  %v7767_v63 = vpop.f32.mrf.mxu1  ;;  %v7607_v39 = vmax.f32 %v7575_v17, 0.0 }
 0x602   : > { %v7377_v3 = vmul.f32 %v8970_v61, %v7225_v23  ;;  %v7843_v43 = vadd.f32 %v13666_v16, %v7767_v63  ;;  %vm7383_vm4 = vweird.f32 %v8970_v61 }
 0x603   : > { %vm7384_vm6 = vmor %vm7382_vm5, %vm7383_vm4 }
 0x604   : > { %v7378_v50 = vmul.f32 %v8970_v61, %v7377_v3  ;;  %v7875_v60 = vmax.f32 %v7843_v43, 0.0  ;;  %8712 = vmatmul.msk.f32.gmra.mxu1 %vm5358_vm9, %v7606_v38 }
 0x606   : > { %v7379_v1 = vmul.f32 0.5, %v7378_v50 }
 0x607   : > { %8728 = vmatmul.msk.f32.gmra.mxu2 %vm5358_vm9, %v7875_v60 }
 0x608   : > { %v7380_v55 = vsub.f32 1.5, %v7379_v1 }
 0x609   : > { %v7770_v62 = vpop.f32.mrf.mxu1 }
 0x60a   : > { %v7381_v59 = vmul.f32 %v8970_v61, %v7380_v55  ;;  %v7844_v22 = vadd.f32 %v13666_v16, %v7770_v62 }
 0x60c   : > { %v7385_v13 = vsel %vm7384_vm6, %v8970_v61, %v7381_v59  ;;  %v7876_v57 = vmax.f32 %v7844_v22, 0.0  ;;  %8713 = vmatmul.msk.f32.gmra.mxu1 %vm5358_vm9, %v7607_v39 }
 0x60d   : > { %v7416_v29 = vmul.f32 %v7385_v13, %v13812_v5  ;;  %v7417_v53 = vmul.f32 %v7385_v13, %v13815_v31 }
 0x60f   : > { %v7576_v40 = vadd.f32 %v7511_v56, %v7416_v29  ;;  %8729 = vmatmul.msk.f32.gmra.mxu2 %vm5358_vm9, %v7876_v57  ;;  %v7577_v5 = vadd.f32 %v7513_v28, %v7417_v53 }
 0x611   : > { %v7608_v32 = vmax.f32 %v7576_v40, 0.0  ;;  %v7773_v8 = vpop.f32.mrf.mxu1  ;;  %v7609_v34 = vmax.f32 %v7577_v5, 0.0 }
 0x612   : > { %v7845_v35 = vadd.f32 %v13666_v16, %v7773_v8 }
 0x614   : > { %v7877_v19 = vmax.f32 %v7845_v35, 0.0  ;;  %8714 = vmatmul.msk.f32.gmra.mxu1 %vm5358_vm9, %v7608_v32 }
 0x617   : > { %8730 = vmatmul.msk.f32.gmra.mxu2 %vm5358_vm9, %v7877_v19 }
 0x619   : > { %v7776_v41 = vpop.f32.mrf.mxu1 }
 0x61a   : > { %v7846_v9 = vadd.f32 %v13666_v16, %v7776_v41 }
 0x61c   : > { %v7878_v27 = vmax.f32 %v7846_v9, 0.0  ;;  %8715 = vmatmul.msk.f32.gmra.mxu1 %vm5358_vm9, %v7609_v34 }
 0x61f   : > { %8731 = vmatmul.msk.f32.gmra.mxu2 %vm5358_vm9, %v7878_v27 }
 0x621   : > { %v7779_v31 = vpop.f32.mrf.mxu1 }
 0x622   : > { %v7847_v52 = vadd.f32 %v13666_v16, %v7779_v31 }
 0x624   : > { %v7879_v10 = vmax.f32 %v7847_v52, 0.0 }
 0x627   : > { %8732 = vmatmul.msk.f32.gmra.mxu2 %vm5358_vm9, %v7879_v10 }
 0x629   : > { %v7782_v47 = vpop.f32.mrf.mxu1 }
 0x62a   : > { %v8016_v4 = vpop.f32.mrf.mxu2  ;;  %v7848_v6 = vadd.f32 %v13666_v16, %v7782_v47 }
 0x62b   : > { %v8116_v2 = vadd.f32 %v13862_v12, %v8016_v4 }
 0x62c   : > { %v7880_v49 = vmax.f32 %v7848_v6, 0.0 }
 0x62d   : > { %8148 = vst [vmem:[%s13867_s23] sm:$0xff] %v8116_v2 }
 0x62f   : > { %8733 = vmatmul.msk.f32.gmra.mxu2 %vm5358_vm9, %v7880_v49 }
 0x631   : > { %v7785_v25 = vpop.f32.mrf.mxu1 }
 0x632   : > { %v7849_v37 = vadd.f32 %v13666_v16, %v7785_v25  ;;  %v8019_v51 = vpop.f32.mrf.mxu2 }
 0x633   : > { %v8117_v18 = vadd.f32 %v13862_v12, %v8019_v51 }
 0x634   : > { %v7881_v42 = vmax.f32 %v7849_v37, 0.0 }
 0x635   : > { %8149 = vst [vmem:[%s13867_s23 + $0x8] sm:$0xff] %v8117_v18 }
 0x637   : > { %8734 = vmatmul.msk.f32.gmra.mxu2 %vm5358_vm9, %v7881_v42 }
 0x639   : > { %v7788_v20 = vpop.f32.mrf.mxu1 }
 0x63a   : > { %v7850_v45 = vadd.f32 %v13666_v16, %v7788_v20  ;;  %v8022_v48 = vpop.f32.mrf.mxu2 }
 0x63b   : > { %v8118_v58 = vadd.f32 %v13862_v12, %v8022_v48 }
 0x63c   : > { %v7882_v21 = vmax.f32 %v7850_v45, 0.0 }
 0x63d   : > { %8150 = vst [vmem:[%s13867_s23 + $0x10] sm:$0xff] %v8118_v58 }
 0x63f   : > { %8735 = vmatmul.msk.f32.gmra.mxu2 %vm5358_vm9, %v7882_v21 }
 0x641   : > { %v7791_v14 = vpop.f32.mrf.mxu1 }
 0x642   : > { %v7851_v44 = vadd.f32 %v13666_v16, %v7791_v14  ;;  %v8025_v23 = vpop.f32.mrf.mxu2 }
 0x643   : > { %v8119_v0 = vadd.f32 %v13862_v12, %v8025_v23 }
 0x644   : > { %v7883_v26 = vmax.f32 %v7851_v44, 0.0 }
 0x645   : > { %8151 = vst [vmem:[%s13867_s23 + $0x18] sm:$0xff] %v8119_v0 }
 0x647   : > { %8736 = vmatmul.msk.f32.gmra.mxu2 %vm5358_vm9, %v7883_v26 }
 0x649   : > { %v7794_v24 = vpop.f32.mrf.mxu1 }
 0x64a   : > { %v7852_v33 = vadd.f32 %v13666_v16, %v7794_v24  ;;  %v8028_v36 = vpop.f32.mrf.mxu2 }
 0x64b   : > { %v8120_v11 = vadd.f32 %v13862_v12, %v8028_v36 }
 0x64c   : > { %v7884_v46 = vmax.f32 %v7852_v33, 0.0 }
 0x64d   : > { %8152 = vst [vmem:[%s13867_s23 + $0x20] sm:$0xff] %v8120_v11 }
 0x64f   : > { %8737 = vmatmul.msk.f32.gmra.mxu2 %vm5358_vm9, %v7884_v46 }
 0x651   : > { %v7797_v7 = vpop.f32.mrf.mxu1 }
 0x652   : > { %v7853_v54 = vadd.f32 %v13666_v16, %v7797_v7  ;;  %v8031_v61 = vpop.f32.mrf.mxu2 }
 0x653   : > { %v8121_v3 = vadd.f32 %v13862_v12, %v8031_v61 }
 0x654   : > { %v7885_v38 = vmax.f32 %v7853_v54, 0.0 }
 0x655   : > { %8153 = vst [vmem:[%s13867_s23 + $0x28] sm:$0xff] %v8121_v3 }
 0x657   : > { %8738 = vmatmul.msk.f32.gmra.mxu2 %vm5358_vm9, %v7885_v38 }
 0x659   : > { %v7800_v63 = vpop.f32.mrf.mxu1 }
 0x65a   : > { %v7854_v15 = vadd.f32 %v13666_v16, %v7800_v63  ;;  %v8034_v50 = vpop.f32.mrf.mxu2 }
 0x65b   : > { %v8122_v43 = vadd.f32 %v13862_v12, %v8034_v50 }
 0x65c   : > { %v7886_v1 = vmax.f32 %v7854_v15, 0.0 }
 0x65d   : > { %8154 = vst [vmem:[%s13867_s23 + $0x30] sm:$0xff] %v8122_v43 }
 0x65f   : > { %8739 = vmatmul.msk.f32.gmra.mxu2 %vm5358_vm9, %v7886_v1 }
 0x661   : > { %v7803_v60 = vpop.f32.mrf.mxu1 }
 0x662   : > { %v7855_v30 = vadd.f32 %v13666_v16, %v7803_v60  ;;  %v8037_v17 = vpop.f32.mrf.mxu2 }
 0x663   : > { %v8123_v55 = vadd.f32 %v13862_v12, %v8037_v17 }
 0x664   : > { %v7887_v59 = vmax.f32 %v7855_v30, 0.0 }
 0x665   : > { %8155 = vst [vmem:[%s13867_s23 + $0x38] sm:$0xff] %v8123_v55 }
 0x667   : > { %8740 = vmatmul.msk.f32.gmra.mxu2 %vm5358_vm9, %v7887_v59 }
 0x669   : > { %v7806_v62 = vpop.f32.mrf.mxu1 }
 0x66a   : > { %v7856_v39 = vadd.f32 %v13666_v16, %v7806_v62  ;;  %v8040_v13 = vpop.f32.mrf.mxu2 }
 0x66b   : > { %v8124_v22 = vadd.f32 %v13862_v12, %v8040_v13 }
 0x66c   : > { %v7888_v29 = vmax.f32 %v7856_v39, 0.0 }
 0x66d   : > { %8156 = vst [vmem:[%s13867_s23 + $0x40] sm:$0xff] %v8124_v22 }
 0x66f   : > { %8741 = vmatmul.msk.f32.gmra.mxu2 %vm5358_vm9, %v7888_v29 }
 0x671   : > { %v7809_v56 = vpop.f32.mrf.mxu1 }
 0x672   : > { %v7857_v57 = vadd.f32 %v13666_v16, %v7809_v56  ;;  %v8043_v40 = vpop.f32.mrf.mxu2 }
 0x673   : > { %v8125_v32 = vadd.f32 %v13862_v12, %v8043_v40 }
 0x674   : > { %v7889_v8 = vmax.f32 %v7857_v57, 0.0 }
 0x675   : > { %8157 = vst [vmem:[%s13867_s23 + $0x48] sm:$0xff] %v8125_v32 }
 0x677   : > { %8742 = vmatmul.msk.f32.gmra.mxu2 %vm5358_vm9, %v7889_v8 }
 0x679   : > { %v7812_v53 = vpop.f32.mrf.mxu1 }
 0x67a   : > { %v7858_v35 = vadd.f32 %v13666_v16, %v7812_v53  ;;  %v8046_v19 = vpop.f32.mrf.mxu2 }
 0x67b   : > { %v8126_v28 = vadd.f32 %v13862_v12, %v8046_v19 }
 0x67c   : > { %v7890_v5 = vmax.f32 %v7858_v35, 0.0 }
 0x67d   : > { %8158 = vst [vmem:[%s13867_s23 + $0x50] sm:$0xff] %v8126_v28 }
 0x67f   : > { %8743 = vmatmul.msk.f32.gmra.mxu2 %vm5358_vm9, %v7890_v5 }
 0x681   : > { %v7815_v41 = vpop.f32.mrf.mxu1 }
 0x682   : > { %v7859_v34 = vadd.f32 %v13666_v16, %v7815_v41  ;;  %v8049_v9 = vpop.f32.mrf.mxu2 }
 0x683   : > { %v8127_v27 = vadd.f32 %v13862_v12, %v8049_v9 }
 0x684   : > { %v7891_v31 = vmax.f32 %v7859_v34, 0.0 }
 0x685   : > { %8159 = vst [vmem:[%s13867_s23 + $0x58] sm:$0xff] %v8127_v27 }
 0x687   : > { %8744 = vmatmul.msk.f32.gmra.mxu2 %vm5358_vm9, %v7891_v31 }
 0x689   : > { %v7818_v52 = vpop.f32.mrf.mxu1 }
 0x68a   : > { %v7860_v10 = vadd.f32 %v13666_v16, %v7818_v52  ;;  %v8052_v47 = vpop.f32.mrf.mxu2 }
 0x68b   : > { %v8128_v4 = vadd.f32 %v13862_v12, %v8052_v47 }
 0x68c   : > { %v7892_v6 = vmax.f32 %v7860_v10, 0.0 }
 0x68d   : > { %8160 = vst [vmem:[%s13867_s23 + $0x60] sm:$0xff] %v8128_v4 }
 0x68f   : > { %8745 = vmatmul.msk.f32.gmra.mxu2 %vm5358_vm9, %v7892_v6 }
 0x691   : > { %v7821_v2 = vpop.f32.mrf.mxu1 }
 0x692   : > { %v7861_v49 = vadd.f32 %v13666_v16, %v7821_v2  ;;  %v8055_v25 = vpop.f32.mrf.mxu2 }
 0x693   : > { %v8129_v37 = vadd.f32 %v13862_v12, %v8055_v25 }
 0x694   : > { %v7893_v51 = vmax.f32 %v7861_v49, 0.0 }
 0x695   : > { %8161 = vst [vmem:[%s13867_s23 + $0x68] sm:$0xff] %v8129_v37 }
 0x697   : > { %8746 = vmatmul.msk.f32.gmra.mxu2 %vm5358_vm9, %v7893_v51 }
 0x699   : > { %v7824_v18 = vpop.f32.mrf.mxu1 }
 0x69a   : > { %v7862_v42 = vadd.f32 %v13666_v16, %v7824_v18  ;;  %v8058_v20 = vpop.f32.mrf.mxu2 }
 0x69b   : > { %v8130_v45 = vadd.f32 %v13862_v12, %v8058_v20 }
 0x69c   : > { %v7894_v48 = vmax.f32 %v7862_v42, 0.0 }
 0x69d   : > { %8162 = vst [vmem:[%s13867_s23 + $0x70] sm:$0xff] %v8130_v45 }
 0x69f   : > { %8747 = vmatmul.msk.f32.gmra.mxu2 %vm5358_vm9, %v7894_v48 }
 0x6a2   : > { %v8061_v58 = vpop.f32.mrf.mxu2 }
 0x6a3   : > { %v8131_v21 = vadd.f32 %v13862_v12, %v8061_v58 }
 0x6a5   : > { %8163 = vst [vmem:[%s13867_s23 + $0x78] sm:$0xff] %v8131_v21 }
 0x6aa   : > { %v8064_v14 = vpop.f32.mrf.mxu2 }
 0x6ab   : > { %v8132_v44 = vadd.f32 %v13862_v12, %v8064_v14 }
 0x6ad   : > { %8164 = vst [vmem:[%s13867_s23 + $0x80] sm:$0xff] %v8132_v44 }
 0x6b2   : > { %v8067_v16 = vpop.f32.mrf.mxu2 }
 0x6b3   : > { %v8133_v23 = vadd.f32 %v13862_v12, %v8067_v16 }
 0x6b5   : > { %8165 = vst [vmem:[%s13867_s23 + $0x88] sm:$0xff] %v8133_v23 }
 0x6ba   : > { %v8070_v0 = vpop.f32.mrf.mxu2 }
 0x6bb   : > { %v8134_v26 = vadd.f32 %v13862_v12, %v8070_v0 }
 0x6bd   : > { %8166 = vst [vmem:[%s13867_s23 + $0x90] sm:$0xff] %v8134_v26 }
 0x6c2   : > { %v8073_v24 = vpop.f32.mrf.mxu2 }
 0x6c3   : > { %v8135_v33 = vadd.f32 %v13862_v12, %v8073_v24 }
 0x6c5   : > { %8167 = vst [vmem:[%s13867_s23 + $0x98] sm:$0xff] %v8135_v33 }
 0x6ca   : > { %v8076_v36 = vpop.f32.mrf.mxu2 }
 0x6cb   : > { %v8136_v11 = vadd.f32 %v13862_v12, %v8076_v36 }
 0x6cd   : > { %8168 = vst [vmem:[%s13867_s23 + $0xa0] sm:$0xff] %v8136_v11 }
 0x6d2   : > { %v8079_v46 = vpop.f32.mrf.mxu2 }
 0x6d3   : > { %v8137_v7 = vadd.f32 %v13862_v12, %v8079_v46 }
 0x6d5   : > { %8169 = vst [vmem:[%s13867_s23 + $0xa8] sm:$0xff] %v8137_v7 }
 0x6da   : > { %v8082_v54 = vpop.f32.mrf.mxu2 }
 0x6db   : > { %v8138_v61 = vadd.f32 %v13862_v12, %v8082_v54 }
 0x6dd   : > { %8170 = vst [vmem:[%s13867_s23 + $0xb0] sm:$0xff] %v8138_v61 }
 0x6e2   : > { %v8085_v3 = vpop.f32.mrf.mxu2 }
 0x6e3   : > { %v8139_v38 = vadd.f32 %v13862_v12, %v8085_v3 }
 0x6e5   : > { %8171 = vst [vmem:[%s13867_s23 + $0xb8] sm:$0xff] %v8139_v38 }
 0x6ea   : > { %v8088_v63 = vpop.f32.mrf.mxu2 }
 0x6eb   : > { %v8140_v15 = vadd.f32 %v13862_v12, %v8088_v63 }
 0x6ed   : > { %8172 = vst [vmem:[%s13867_s23 + $0xc0] sm:$0xff] %v8140_v15 }
 0x6f2   : > { %v8091_v50 = vpop.f32.mrf.mxu2 }
 0x6f3   : > { %v8141_v43 = vadd.f32 %v13862_v12, %v8091_v50 }
 0x6f5   : > { %8173 = vst [vmem:[%s13867_s23 + $0xc8] sm:$0xff] %v8141_v43 }
 0x6fa   : > { %v8094_v1 = vpop.f32.mrf.mxu2 }
 0x6fb   : > { %v8142_v60 = vadd.f32 %v13862_v12, %v8094_v1 }
 0x6fd   : > { %8174 = vst [vmem:[%s13867_s23 + $0xd0] sm:$0xff] %v8142_v60 }
 0x702   : > { %v8097_v30 = vpop.f32.mrf.mxu2 }
 0x703   : > { %v8143_v17 = vadd.f32 %v13862_v12, %v8097_v30 }
 0x705   : > { %8175 = vst [vmem:[%s13867_s23 + $0xd8] sm:$0xff] %v8143_v17 }
 0x70a   : > { %v8100_v55 = vpop.f32.mrf.mxu2 }
 0x70b   : > { %v8144_v59 = vadd.f32 %v13862_v12, %v8100_v55 }
 0x70d   : > { %8176 = vst [vmem:[%s13867_s23 + $0xe0] sm:$0xff] %v8144_v59 }
 0x712   : > { %v8103_v62 = vpop.f32.mrf.mxu2 }
 0x713   : > { %v8145_v39 = vadd.f32 %v13862_v12, %v8103_v62 }
 0x715   : > { %8177 = vst [vmem:[%s13867_s23 + $0xe8] sm:$0xff] %v8145_v39 }
 0x71a   : > { %v8106_v13 = vpop.f32.mrf.mxu2 }
 0x71b   : > { %v8146_v22 = vadd.f32 %v13862_v12, %v8106_v13 }
 0x71d   : > { %8178 = vst [vmem:[%s13867_s23 + $0xf0] sm:$0xff] %v8146_v22 }
 0x722   : > { %v8109_v29 = vpop.f32.mrf.mxu2 }
 0x723   : > { %v8147_v56 = vadd.f32 %v13862_v12, %v8109_v29 }
 0x725   : > { %8179 = vst [vmem:[%s13867_s23 + $0xf8] sm:$0xff] %v8147_v56 }
 0x726   : > { %8998 = shalt.err (!%p8995_p3)
}
 0x727   : > { %s9038_s19 = smov 128   ;;  %s9039_s23 = smov 8  }
 0x728   : > { %8763 = dma.vmem_to_hbm [thread:$0]  (%p9173_p5), %s8195_s1, 4096, %s8197_s22, %s8181_s3, %s9038_s19, %s9038_s19, %s9039_s23  }
 0x729 PF: > { %p8769_p4 = scmp.ge.s32.totalorder %s9033_s30, 2  ;;  %s8211_s24 = sand.u32 1, %s9021_s27  }
 0x72a   : > { %s8212_s5 = scalar_lea.sflag [#allocation3], %s8211_s24 }
 0x72b   : > { %p8766_p7 = pnand %p8769_p4, %p9177_p6 }
 0x72d   : > { %p8767_p8 = pneg %p8766_p7 }
 0x72f   : > { %9016 = dma.done.wait (%p8767_p8), %s8212_s5, 4096  }
 0x730   : > { %9018 = vsyncadd (%p8767_p8), %s8212_s5, 4294963200  ;;  %s14071_s30 = sld [smem:[#allocation6_spill]]  ;;  %s14074_s27 = smov %s9025_s28 }
 0x731   : > { %s14072_s4 = sld [smem:[#allocation5_spill]] }
 0x732   : > { %s14073_s29 = sld [smem:[#allocation7_spill]] }
 0x736   : > { %p28_p9 = scmp.ge.s32.totalorder %s14071_s30, 6  }
 0x737   : > { %s14075_s28 = smov %s14072_s4 }
 0x738   :  { %30 = sbr.rel (!%p28_p9) target bundleno = 11 (0xb), region = 127 }
 0x73d   :  { %8218 = vsyncpa [#allocation3], 1 }
 0x73e   :  { %8220 = vsyncpa [#allocation3 + $0x1], 1 }

</bundles_post_ra>
